<compile_context>
chip_gen: v6e
topology: v6e:2x2x1
jax: 0.10.0
libtpu: 0.0.40
codegen_flags: <defaults>
</compile_context>

<pallas_src>
import functools
import math

import jax
import jax.numpy as jnp
from jax.experimental import pallas as pl
from jax.experimental.pallas import tpu as pltpu

_VMEM_LIMIT = 48 * 1024 * 1024  # < v7x 64 MiB physical; > v5e 16 MiB scoped default


def _round_up(x, m):
    return (x + m - 1) // m * m


def _split_even(total, max_tile, align=8):
    """Pick (tile, padded_total): tile <= ~max_tile, tile % align == 0, low pad waste."""
    blocks = -(-total // max_tile)          # cdiv
    tile = _round_up(-(-total // blocks), align)
    return tile, tile * blocks


# ----------------------- Pallas kernels -----------------------

def _mm_bias_act_kernel(a_ref, w_ref, b_ref, o_ref, acc_ref, *, relu):
    """Tiled (tm,tk)@(tk,tn) bf16 matmul, f32 accumulate; bias+ReLU on last K-step."""
    @pl.when(pl.program_id(2) == 0)
    def _():
        acc_ref[...] = jnp.zeros_like(acc_ref)

    acc_ref[...] += jnp.dot(a_ref[...], w_ref[...],
                            preferred_element_type=jnp.float32)

    @pl.when(pl.program_id(2) == pl.num_programs(2) - 1)
    def _():
        out = acc_ref[...] + b_ref[...]
        if relu:
            out = jnp.maximum(out, 0.0)
        o_ref[...] = out.astype(o_ref.dtype)


def _max_reduce_kernel(*refs):
    """Elementwise max over k*k window views (pairwise jnp.maximum, VPU-only)."""
    *in_refs, o_ref = refs
    acc = in_refs[0][...]
    for r in in_refs[1:]:
        acc = jnp.maximum(acc, r[...])
    o_ref[...] = acc


# ----------------------- matmul wrapper -----------------------

def matmul_bias_act(a, w, b, *, relu):
    """(M,K) @ (K,N) + b, optional ReLU. bf16 MXU operands, f32 accumulation."""
    M, K = a.shape
    _, N = w.shape

    # M tiles: up to 512 rows, balanced so small M is not padded to 512.
    tm, Mp = _split_even(M, 512)
    # N tiles: 256 fills the 2x256 MXU on v6e/v7x; 128 for narrow layers (v5e-native).
    tn = 256 if (N >= 256 and N % 256 == 0) else 128
    Np = _round_up(N, tn)
    # K tiles: full-K block (exempt from the 128 rule) for K<=1152 -> no pad copy
    # of the im2col matrix and no wasted MXU K-occupancy for conv1_1 (K=27).
    if K <= 1152:
        tk, Kp = K, K
    elif K % 512 == 0:
        tk, Kp = 512, K
    elif K % 256 == 0:
        tk, Kp = 256, K
    else:
        tk = 128
        Kp = _round_up(K, tk)

    a_bf = a.astype(jnp.bfloat16)
    w_bf = w.astype(jnp.bfloat16)
    if (Mp, Kp) != (M, K):
        a_bf = jnp.pad(a_bf, ((0, Mp - M), (0, Kp - K)))
    if (Kp, Np) != (K, N):
        w_bf = jnp.pad(w_bf, ((0, Kp - K), (0, Np - N)))
    b_p = jnp.pad(b.astype(jnp.float32), (0, Np - N)).reshape(1, Np)

    cost = pl.CostEstimate(
        flops=2 * Mp * Np * Kp,
        transcendentals=0,
        bytes_accessed=a_bf.size * 2 + w_bf.size * 2 + Np * 4 + Mp * Np * 2,
    )

    out = pl.pallas_call(
        functools.partial(_mm_bias_act_kernel, relu=relu),
        out_shape=jax.ShapeDtypeStruct((Mp, Np), jnp.bfloat16),
        grid_spec=pltpu.PrefetchScalarGridSpec(
            num_scalar_prefetch=0,
            grid=(Mp // tm, Np // tn, Kp // tk),
            in_specs=[
                pl.BlockSpec((tm, tk), lambda i, j, k: (i, k)),
                pl.BlockSpec((tk, tn), lambda i, j, k: (k, j)),
                pl.BlockSpec((1, tn), lambda i, j, k: (0, j)),
            ],
            out_specs=pl.BlockSpec((tm, tn), lambda i, j, k: (i, j)),
            scratch_shapes=[pltpu.VMEM((tm, tn), jnp.float32)],
        ),
        compiler_params=pltpu.CompilerParams(
            dimension_semantics=("parallel", "parallel", "arbitrary"),
            vmem_limit_bytes=_VMEM_LIMIT),
        cost_estimate=cost,
    )(a_bf, w_bf, b_p)

    if (Mp, Np) != (M, N):
        out = out[:M, :N]
    return out


# ----------------------- conv / pool wrappers -----------------------

def conv2d(x, w, b, *, pad, dilation=1, relu=True):
    """x: NHWC (bf16); w: PyTorch layout (Cout, Cin, kh, kw); b: (Cout,). stride=1."""
    N, H, W, _ = x.shape
    Cout, Cin, kh, kw = w.shape
    Hout = H + 2 * pad - dilation * (kh - 1)
    Wout = W + 2 * pad - dilation * (kw - 1)
    xp = jnp.pad(x, ((0, 0), (pad, pad), (pad, pad), (0, 0)))
    # TODO(synk): im2col is still materialized in HBM; fully fusing the tap loop
    # into the matmul kernel (K grid axis over taps reading shifted NHWC windows)
    # would remove the 9x activation write/read on the memory-bound backbone.
    cols = []
    for i in range(kh):
        for j in range(kw):
            hs, ws = i * dilation, j * dilation
            cols.append(xp[:, hs:hs + Hout, ws:ws + Wout, :])
    a = jnp.concatenate(cols, axis=-1).reshape(N * Hout * Wout, kh * kw * Cin)
    w2 = jnp.transpose(w, (2, 3, 1, 0)).reshape(kh * kw * Cin, Cout)
    out = matmul_bias_act(a, w2, b, relu=relu)
    return out.reshape(N, Hout, Wout, Cout)


def _pick_col_tile(S):
    if S <= 4096:
        return S                     # full-extent block (exempt from 128 rule)
    for t in (4096, 2048, 1024, 512, 256, 128):
        if S % t == 0:
            return t
    return S                         # fallback: full extent


def maxpool2d(x, k, stride, pad, ceil_mode=False):
    """x: NHWC. Matches nn.MaxPool2d semantics (pads with -inf)."""
    # TODO(synk): ceil_mode with pad>0 would need PyTorch's "window must not start
    # entirely in padding" rule; never hit by VGGBase (ceil_mode only with pad=0).
    N, H, W, C = x.shape

    def out_size(L):
        num = L + 2 * pad - k
        return (-(-num // stride) + 1) if ceil_mode else (num // stride + 1)

    Hout, Wout = out_size(H), out_size(W)
    Hneed = (Hout - 1) * stride + k
    Wneed = (Wout - 1) * stride + k
    xp = jnp.pad(x, ((0, 0), (pad, Hneed - H - pad), (pad, Wneed - W - pad), (0, 0)),
                 constant_values=-jnp.inf)

    # k*k shifted strided window views, reshaped lane-dense: (N*Hout, Wout*C).
    views = []
    for i in range(k):
        for j in range(k):
            v = xp[:, i:i + stride * Hout:stride, j:j + stride * Wout:stride, :]
            views.append(v.reshape(N * Hout, Wout * C))

    R, S = N * Hout, Wout * C
    tr, Rp = _split_even(R, 256)
    ts = _pick_col_tile(S)
    Sp = _round_up(S, ts)
    if (Rp, Sp) != (R, S):
        views = [jnp.pad(v, ((0, Rp - R), (0, Sp - S))) for v in views]

    kk = len(views)
    itemsize = jnp.dtype(x.dtype).itemsize
    cost = pl.CostEstimate(flops=kk * Rp * Sp, transcendentals=0,
                           bytes_accessed=(kk + 1) * Rp * Sp * itemsize)

    out = pl.pallas_call(
        _max_reduce_kernel,
        out_shape=jax.ShapeDtypeStruct((Rp, Sp), x.dtype),
        grid_spec=pltpu.PrefetchScalarGridSpec(
            num_scalar_prefetch=0,
            grid=(Rp // tr, Sp // ts),
            in_specs=[pl.BlockSpec((tr, ts), lambda i, j: (i, j))] * kk,
            out_specs=pl.BlockSpec((tr, ts), lambda i, j: (i, j)),
        ),
        compiler_params=pltpu.CompilerParams(
            dimension_semantics=("parallel", "parallel"),
            vmem_limit_bytes=_VMEM_LIMIT),
        cost_estimate=cost,
    )(*views)

    if (Rp, Sp) != (R, S):
        out = out[:R, :S]
    return out.reshape(N, Hout, Wout, C)


# ----------------------- parameters -----------------------

# TODO(synk): original module loads decimated pretrained VGG16 weights;
# here parameters are initialized deterministically in-script instead.
_CFG = [
    ("conv1_1", 3, 64, 3), ("conv1_2", 64, 64, 3),
    ("conv2_1", 64, 128, 3), ("conv2_2", 128, 128, 3),
    ("conv3_1", 128, 256, 3), ("conv3_2", 256, 256, 3), ("conv3_3", 256, 256, 3),
    ("conv4_1", 256, 512, 3), ("conv4_2", 512, 512, 3), ("conv4_3", 512, 512, 3),
    ("conv5_1", 512, 512, 3), ("conv5_2", 512, 512, 3), ("conv5_3", 512, 512, 3),
    ("conv6", 512, 1024, 3), ("conv7", 1024, 1024, 1),
]


def init_params(key):
    params = {}
    for idx, (name, cin, cout, k) in enumerate(_CFG):
        kw_key, kb_key = jax.random.split(jax.random.fold_in(key, idx))
        fan_in = cin * k * k
        w = jax.random.normal(kw_key, (cout, cin, k, k), jnp.float32) / math.sqrt(fan_in)
        b = 0.01 * jax.random.normal(kb_key, (cout,), jnp.float32)
        params[name] = (w, b)
    return params


# ----------------------- forward (VGGBase.forward) -----------------------

def vgg_base_forward(params, x_nchw):
    # NCHW -> NHWC, bf16 activations throughout (f32 accumulation inside kernels).
    x = jnp.transpose(x_nchw, (0, 2, 3, 1)).astype(jnp.bfloat16)
    x = conv2d(x, *params["conv1_1"], pad=1)
    x = conv2d(x, *params["conv1_2"], pad=1)
    x = maxpool2d(x, 2, 2, 0)
    x = conv2d(x, *params["conv2_1"], pad=1)
    x = conv2d(x, *params["conv2_2"], pad=1)
    x = maxpool2d(x, 2, 2, 0)
    x = conv2d(x, *params["conv3_1"], pad=1)
    x = conv2d(x, *params["conv3_2"], pad=1)
    x = conv2d(x, *params["conv3_3"], pad=1)
    x = maxpool2d(x, 2, 2, 0, ceil_mode=True)
    x = conv2d(x, *params["conv4_1"], pad=1)
    x = conv2d(x, *params["conv4_2"], pad=1)
    conv4_3 = conv2d(x, *params["conv4_3"], pad=1)
    x = maxpool2d(conv4_3, 2, 2, 0)
    x = conv2d(x, *params["conv5_1"], pad=1)
    x = conv2d(x, *params["conv5_2"], pad=1)
    x = conv2d(x, *params["conv5_3"], pad=1)
    x = maxpool2d(x, 3, 1, 1)
    x = conv2d(x, *params["conv6"], pad=6, dilation=6)
    conv7 = conv2d(x, *params["conv7"], pad=0)
    # return NCHW f32, matching PyTorch
    return (jnp.transpose(conv4_3, (0, 3, 1, 2)).astype(jnp.float32),
            jnp.transpose(conv7, (0, 3, 1, 2)).astype(jnp.float32))


if __name__ == "__main__":
    key = jax.random.PRNGKey(0)
    params = init_params(jax.random.fold_in(key, 1))
    x = jax.random.normal(jax.random.fold_in(key, 2), (2, 3, 16, 16), jnp.float32)

    fwd = jax.jit(vgg_base_forward)
    conv4_3_feats, conv7_feats = fwd(params, x)
    jax.block_until_ready((conv4_3_feats, conv7_feats))

    assert conv4_3_feats.shape == (2, 512, 2, 2), conv4_3_feats.shape
    assert conv7_feats.shape == (2, 1024, 1, 1), conv7_feats.shape
    assert bool(jnp.isfinite(conv4_3_feats).all()) and bool(jnp.isfinite(conv7_feats).all())
    print("KERNEL_OK")
</pallas_src>

<mosaic_0001>
module attributes {stable_mosaic.version = 11 : i64} {
  func.func @_mm_bias_act_kernel(%arg0: i32, %arg1: i32, %arg2: i32, %arg3: memref<512x27xbf16, #tpu.memory_space<vmem>>, %arg4: memref<27x128xbf16, #tpu.memory_space<vmem>>, %arg5: memref<1x128xf32, #tpu.memory_space<vmem>>, %arg6: memref<512x128xbf16, #tpu.memory_space<vmem>>, %arg7: memref<512x128xf32, #tpu.memory_space<vmem>>) attributes {dimension_semantics = [#tpu.dimension_semantics<parallel>, #tpu.dimension_semantics<parallel>, #tpu.dimension_semantics<arbitrary>], iteration_bounds = array<i64: 1, 1, 1>, scalar_prefetch = 0 : i64, scratch_operands = 1 : i64, tpu.core_type = #tpu.core_type<tc>, window_params = [{transform_indices = @transform_0, window_bounds = array<i64: 512, 27>}, {transform_indices = @transform_1, window_bounds = array<i64: 27, 128>}, {transform_indices = @transform_2, window_bounds = array<i64: 1, 128>}, {transform_indices = @transform_3, window_bounds = array<i64: 512, 128>}]} {
    %c0_i32 = arith.constant 0 : i32
    %0 = arith.cmpi eq, %arg2, %c0_i32 : i32
    %1 = arith.extui %0 : i1 to i32
    %c0_i32_0 = arith.constant 0 : i32
    %2 = arith.cmpi ne, %1, %c0_i32_0 : i32
    scf.if %2 {
      %cst_10 = arith.constant 0.000000e+00 : f32
      %12 = vector.broadcast %cst_10 : f32 to vector<512x128xf32>
      %c0_11 = arith.constant 0 : index
      %c0_12 = arith.constant 0 : index
      %13 = vector.load %arg7[%c0_11, %c0_12] : memref<512x128xf32, #tpu.memory_space<vmem>>, vector<512x128xf32>
      tpu.vector_store %arg7[%c0_11, %c0_12], %12 {strides = array<i32>} : memref<512x128xf32, #tpu.memory_space<vmem>>, vector<512x128xf32>,
    } else {
    }
    %c0 = arith.constant 0 : index
    %c0_1 = arith.constant 0 : index
    %3 = vector.load %arg7[%c0, %c0_1] : memref<512x128xf32, #tpu.memory_space<vmem>>, vector<512x128xf32>
    %c0_2 = arith.constant 0 : index
    %c0_3 = arith.constant 0 : index
    %4 = vector.load %arg3[%c0_2, %c0_3] : memref<512x27xbf16, #tpu.memory_space<vmem>>, vector<512x27xbf16>
    %c0_4 = arith.constant 0 : index
    %c0_5 = arith.constant 0 : index
    %5 = vector.load %arg4[%c0_4, %c0_5] : memref<27x128xbf16, #tpu.memory_space<vmem>>, vector<27x128xbf16>
    %cst = arith.constant dense<0.000000e+00> : vector<512x128xf32>
    %6 = tpu.matmul %4, %5, %cst {dimension_numbers = #tpu.dot_dimension_numbers<[1], [0], [0], [1], [0, 0, 1, 1], [], []>} : vector<512x27xbf16>, vector<27x128xbf16>, vector<512x128xf32> -> vector<512x128xf32>
    %7 = arith.addf %3, %6 : vector<512x128xf32>
    %c0_6 = arith.constant 0 : index
    %c0_7 = arith.constant 0 : index
    %8 = vector.load %arg7[%c0_6, %c0_7] : memref<512x128xf32, #tpu.memory_space<vmem>>, vector<512x128xf32>
    tpu.vector_store %arg7[%c0_6, %c0_7], %7 {strides = array<i32>} : memref<512x128xf32, #tpu.memory_space<vmem>>, vector<512x128xf32>,
    %c0_i32_8 = arith.constant 0 : i32
    %9 = arith.cmpi eq, %arg2, %c0_i32_8 : i32
    %10 = arith.extui %9 : i1 to i32
    %c0_i32_9 = arith.constant 0 : i32
    %11 = arith.cmpi ne, %10, %c0_i32_9 : i32
    scf.if %11 {
      %c0_10 = arith.constant 0 : index
      %c0_11 = arith.constant 0 : index
      %12 = vector.load %arg7[%c0_10, %c0_11] : memref<512x128xf32, #tpu.memory_space<vmem>>, vector<512x128xf32>
      %c0_12 = arith.constant 0 : index
      %c0_13 = arith.constant 0 : index
      %13 = vector.load %arg5[%c0_12, %c0_13] : memref<1x128xf32, #tpu.memory_space<vmem>>, vector<1x128xf32>
      %14 = vector.broadcast %13 : vector<1x128xf32> to vector<512x128xf32>
      %15 = arith.addf %12, %14 : vector<512x128xf32>
      %cst_14 = arith.constant 0.000000e+00 : f32
      %16 = vector.broadcast %cst_14 : f32 to vector<512x128xf32>
      %17 = arith.maximumf %15, %16 : vector<512x128xf32>
      %18 = arith.truncf %17 : vector<512x128xf32> to vector<512x128xbf16>
      %c0_15 = arith.constant 0 : index
      %c0_16 = arith.constant 0 : index
      %19 = vector.load %arg6[%c0_15, %c0_16] : memref<512x128xbf16, #tpu.memory_space<vmem>>, vector<512x128xbf16>
      tpu.vector_store %arg6[%c0_15, %c0_16], %18 {strides = array<i32>} : memref<512x128xbf16, #tpu.memory_space<vmem>>, vector<512x128xbf16>,
    } else {
    }
    return
  }
  func.func @transform_0(%arg0: i32, %arg1: i32, %arg2: i32) -> (i32, i32) {
    %c0_i32 = arith.constant 0 : i32
    return %arg0, %arg2 : i32, i32
  }
  func.func @transform_1(%arg0: i32, %arg1: i32, %arg2: i32) -> (i32, i32) {
    %c0_i32 = arith.constant 0 : i32
    return %arg2, %arg1 : i32, i32
  }
  func.func @transform_2(%arg0: i32, %arg1: i32, %arg2: i32) -> (i32, i32) {
    %c0_i32 = arith.constant 0 : i32
    %c0_i32_0 = arith.constant 0 : i32
    return %c0_i32, %arg1 : i32, i32
  }
  func.func @transform_3(%arg0: i32, %arg1: i32, %arg2: i32) -> (i32, i32) {
    %c0_i32 = arith.constant 0 : i32
    return %arg0, %arg1 : i32, i32
  }
}

module attributes {stable_mosaic.version = 11 : i64} {
  func.func @_mm_bias_act_kernel(%arg0: i32, %arg1: i32, %arg2: i32, %arg3: memref<512x576xbf16, #tpu.memory_space<vmem>>, %arg4: memref<576x128xbf16, #tpu.memory_space<vmem>>, %arg5: memref<1x128xf32, #tpu.memory_space<vmem>>, %arg6: memref<512x128xbf16, #tpu.memory_space<vmem>>, %arg7: memref<512x128xf32, #tpu.memory_space<vmem>>) attributes {dimension_semantics = [#tpu.dimension_semantics<parallel>, #tpu.dimension_semantics<parallel>, #tpu.dimension_semantics<arbitrary>], iteration_bounds = array<i64: 1, 1, 1>, scalar_prefetch = 0 : i64, scratch_operands = 1 : i64, tpu.core_type = #tpu.core_type<tc>, window_params = [{transform_indices = @transform_0, window_bounds = array<i64: 512, 576>}, {transform_indices = @transform_1, window_bounds = array<i64: 576, 128>}, {transform_indices = @transform_2, window_bounds = array<i64: 1, 128>}, {transform_indices = @transform_3, window_bounds = array<i64: 512, 128>}]} {
    %c0_i32 = arith.constant 0 : i32
    %0 = arith.cmpi eq, %arg2, %c0_i32 : i32
    %1 = arith.extui %0 : i1 to i32
    %c0_i32_0 = arith.constant 0 : i32
    %2 = arith.cmpi ne, %1, %c0_i32_0 : i32
    scf.if %2 {
      %cst_10 = arith.constant 0.000000e+00 : f32
      %12 = vector.broadcast %cst_10 : f32 to vector<512x128xf32>
      %c0_11 = arith.constant 0 : index
      %c0_12 = arith.constant 0 : index
      %13 = vector.load %arg7[%c0_11, %c0_12] : memref<512x128xf32, #tpu.memory_space<vmem>>, vector<512x128xf32>
      tpu.vector_store %arg7[%c0_11, %c0_12], %12 {strides = array<i32>} : memref<512x128xf32, #tpu.memory_space<vmem>>, vector<512x128xf32>,
    } else {
    }
    %c0 = arith.constant 0 : index
    %c0_1 = arith.constant 0 : index
    %3 = vector.load %arg7[%c0, %c0_1] : memref<512x128xf32, #tpu.memory_space<vmem>>, vector<512x128xf32>
    %c0_2 = arith.constant 0 : index
    %c0_3 = arith.constant 0 : index
    %4 = vector.load %arg3[%c0_2, %c0_3] : memref<512x576xbf16, #tpu.memory_space<vmem>>, vector<512x576xbf16>
    %c0_4 = arith.constant 0 : index
    %c0_5 = arith.constant 0 : index
    %5 = vector.load %arg4[%c0_4, %c0_5] : memref<576x128xbf16, #tpu.memory_space<vmem>>, vector<576x128xbf16>
    %cst = arith.constant dense<0.000000e+00> : vector<512x128xf32>
    %6 = tpu.matmul %4, %5, %cst {dimension_numbers = #tpu.dot_dimension_numbers<[1], [0], [0], [1], [0, 0, 1, 1], [], []>} : vector<512x576xbf16>, vector<576x128xbf16>, vector<512x128xf32> -> vector<512x128xf32>
    %7 = arith.addf %3, %6 : vector<512x128xf32>
    %c0_6 = arith.constant 0 : index
    %c0_7 = arith.constant 0 : index
    %8 = vector.load %arg7[%c0_6, %c0_7] : memref<512x128xf32, #tpu.memory_space<vmem>>, vector<512x128xf32>
    tpu.vector_store %arg7[%c0_6, %c0_7], %7 {strides = array<i32>} : memref<512x128xf32, #tpu.memory_space<vmem>>, vector<512x128xf32>,
    %c0_i32_8 = arith.constant 0 : i32
    %9 = arith.cmpi eq, %arg2, %c0_i32_8 : i32
    %10 = arith.extui %9 : i1 to i32
    %c0_i32_9 = arith.constant 0 : i32
    %11 = arith.cmpi ne, %10, %c0_i32_9 : i32
    scf.if %11 {
      %c0_10 = arith.constant 0 : index
      %c0_11 = arith.constant 0 : index
      %12 = vector.load %arg7[%c0_10, %c0_11] : memref<512x128xf32, #tpu.memory_space<vmem>>, vector<512x128xf32>
      %c0_12 = arith.constant 0 : index
      %c0_13 = arith.constant 0 : index
      %13 = vector.load %arg5[%c0_12, %c0_13] : memref<1x128xf32, #tpu.memory_space<vmem>>, vector<1x128xf32>
      %14 = vector.broadcast %13 : vector<1x128xf32> to vector<512x128xf32>
      %15 = arith.addf %12, %14 : vector<512x128xf32>
      %cst_14 = arith.constant 0.000000e+00 : f32
      %16 = vector.broadcast %cst_14 : f32 to vector<512x128xf32>
      %17 = arith.maximumf %15, %16 : vector<512x128xf32>
      %18 = arith.truncf %17 : vector<512x128xf32> to vector<512x128xbf16>
      %c0_15 = arith.constant 0 : index
      %c0_16 = arith.constant 0 : index
      %19 = vector.load %arg6[%c0_15, %c0_16] : memref<512x128xbf16, #tpu.memory_space<vmem>>, vector<512x128xbf16>
      tpu.vector_store %arg6[%c0_15, %c0_16], %18 {strides = array<i32>} : memref<512x128xbf16, #tpu.memory_space<vmem>>, vector<512x128xbf16>,
    } else {
    }
    return
  }
  func.func @transform_0(%arg0: i32, %arg1: i32, %arg2: i32) -> (i32, i32) {
    %c0_i32 = arith.constant 0 : i32
    return %arg0, %arg2 : i32, i32
  }
  func.func @transform_1(%arg0: i32, %arg1: i32, %arg2: i32) -> (i32, i32) {
    %c0_i32 = arith.constant 0 : i32
    return %arg2, %arg1 : i32, i32
  }
  func.func @transform_2(%arg0: i32, %arg1: i32, %arg2: i32) -> (i32, i32) {
    %c0_i32 = arith.constant 0 : i32
    %c0_i32_0 = arith.constant 0 : i32
    return %c0_i32, %arg1 : i32, i32
  }
  func.func @transform_3(%arg0: i32, %arg1: i32, %arg2: i32) -> (i32, i32) {
    %c0_i32 = arith.constant 0 : i32
    return %arg0, %arg1 : i32, i32
  }
}

module attributes {stable_mosaic.version = 11 : i64} {
  func.func @_max_reduce_kernel(%arg0: i32, %arg1: i32, %arg2: memref<16x512xbf16, #tpu.memory_space<vmem>>, %arg3: memref<16x512xbf16, #tpu.memory_space<vmem>>, %arg4: memref<16x512xbf16, #tpu.memory_space<vmem>>, %arg5: memref<16x512xbf16, #tpu.memory_space<vmem>>, %arg6: memref<16x512xbf16, #tpu.memory_space<vmem>>) attributes {dimension_semantics = [#tpu.dimension_semantics<parallel>, #tpu.dimension_semantics<parallel>], iteration_bounds = array<i64: 1, 1>, scalar_prefetch = 0 : i64, scratch_operands = 0 : i64, tpu.core_type = #tpu.core_type<tc>, window_params = [{transform_indices = @transform_0, window_bounds = array<i64: 16, 512>}, {transform_indices = @transform_1, window_bounds = array<i64: 16, 512>}, {transform_indices = @transform_2, window_bounds = array<i64: 16, 512>}, {transform_indices = @transform_3, window_bounds = array<i64: 16, 512>}, {transform_indices = @transform_4, window_bounds = array<i64: 16, 512>}]} {
    %c0 = arith.constant 0 : index
    %c0_0 = arith.constant 0 : index
    %0 = vector.load %arg2[%c0, %c0_0] : memref<16x512xbf16, #tpu.memory_space<vmem>>, vector<16x512xbf16>
    %c0_1 = arith.constant 0 : index
    %c0_2 = arith.constant 0 : index
    %1 = vector.load %arg3[%c0_1, %c0_2] : memref<16x512xbf16, #tpu.memory_space<vmem>>, vector<16x512xbf16>
    %2 = arith.maximumf %0, %1 : vector<16x512xbf16>
    %c0_3 = arith.constant 0 : index
    %c0_4 = arith.constant 0 : index
    %3 = vector.load %arg4[%c0_3, %c0_4] : memref<16x512xbf16, #tpu.memory_space<vmem>>, vector<16x512xbf16>
    %4 = arith.maximumf %2, %3 : vector<16x512xbf16>
    %c0_5 = arith.constant 0 : index
    %c0_6 = arith.constant 0 : index
    %5 = vector.load %arg5[%c0_5, %c0_6] : memref<16x512xbf16, #tpu.memory_space<vmem>>, vector<16x512xbf16>
    %6 = arith.maximumf %4, %5 : vector<16x512xbf16>
    %c0_7 = arith.constant 0 : index
    %c0_8 = arith.constant 0 : index
    %7 = vector.load %arg6[%c0_7, %c0_8] : memref<16x512xbf16, #tpu.memory_space<vmem>>, vector<16x512xbf16>
    tpu.vector_store %arg6[%c0_7, %c0_8], %6 {strides = array<i32>} : memref<16x512xbf16, #tpu.memory_space<vmem>>, vector<16x512xbf16>,
    return
  }
  func.func @transform_0(%arg0: i32, %arg1: i32) -> (i32, i32) {
    %c0_i32 = arith.constant 0 : i32
    return %arg0, %arg1 : i32, i32
  }
  func.func @transform_1(%arg0: i32, %arg1: i32) -> (i32, i32) {
    %c0_i32 = arith.constant 0 : i32
    return %arg0, %arg1 : i32, i32
  }
  func.func @transform_2(%arg0: i32, %arg1: i32) -> (i32, i32) {
    %c0_i32 = arith.constant 0 : i32
    return %arg0, %arg1 : i32, i32
  }
  func.func @transform_3(%arg0: i32, %arg1: i32) -> (i32, i32) {
    %c0_i32 = arith.constant 0 : i32
    return %arg0, %arg1 : i32, i32
  }
  func.func @transform_4(%arg0: i32, %arg1: i32) -> (i32, i32) {
    %c0_i32 = arith.constant 0 : i32
    return %arg0, %arg1 : i32, i32
  }
}

module attributes {stable_mosaic.version = 11 : i64} {
  func.func @_mm_bias_act_kernel(%arg0: i32, %arg1: i32, %arg2: i32, %arg3: memref<128x576xbf16, #tpu.memory_space<vmem>>, %arg4: memref<576x128xbf16, #tpu.memory_space<vmem>>, %arg5: memref<1x128xf32, #tpu.memory_space<vmem>>, %arg6: memref<128x128xbf16, #tpu.memory_space<vmem>>, %arg7: memref<128x128xf32, #tpu.memory_space<vmem>>) attributes {dimension_semantics = [#tpu.dimension_semantics<parallel>, #tpu.dimension_semantics<parallel>, #tpu.dimension_semantics<arbitrary>], iteration_bounds = array<i64: 1, 1, 1>, scalar_prefetch = 0 : i64, scratch_operands = 1 : i64, tpu.core_type = #tpu.core_type<tc>, window_params = [{transform_indices = @transform_0, window_bounds = array<i64: 128, 576>}, {transform_indices = @transform_1, window_bounds = array<i64: 576, 128>}, {transform_indices = @transform_2, window_bounds = array<i64: 1, 128>}, {transform_indices = @transform_3, window_bounds = array<i64: 128, 128>}]} {
    %c0_i32 = arith.constant 0 : i32
    %0 = arith.cmpi eq, %arg2, %c0_i32 : i32
    %1 = arith.extui %0 : i1 to i32
    %c0_i32_0 = arith.constant 0 : i32
    %2 = arith.cmpi ne, %1, %c0_i32_0 : i32
    scf.if %2 {
      %cst_10 = arith.constant 0.000000e+00 : f32
      %12 = vector.broadcast %cst_10 : f32 to vector<128x128xf32>
      %c0_11 = arith.constant 0 : index
      %c0_12 = arith.constant 0 : index
      %13 = vector.load %arg7[%c0_11, %c0_12] : memref<128x128xf32, #tpu.memory_space<vmem>>, vector<128x128xf32>
      tpu.vector_store %arg7[%c0_11, %c0_12], %12 {strides = array<i32>} : memref<128x128xf32, #tpu.memory_space<vmem>>, vector<128x128xf32>,
    } else {
    }
    %c0 = arith.constant 0 : index
    %c0_1 = arith.constant 0 : index
    %3 = vector.load %arg7[%c0, %c0_1] : memref<128x128xf32, #tpu.memory_space<vmem>>, vector<128x128xf32>
    %c0_2 = arith.constant 0 : index
    %c0_3 = arith.constant 0 : index
    %4 = vector.load %arg3[%c0_2, %c0_3] : memref<128x576xbf16, #tpu.memory_space<vmem>>, vector<128x576xbf16>
    %c0_4 = arith.constant 0 : index
    %c0_5 = arith.constant 0 : index
    %5 = vector.load %arg4[%c0_4, %c0_5] : memref<576x128xbf16, #tpu.memory_space<vmem>>, vector<576x128xbf16>
    %cst = arith.constant dense<0.000000e+00> : vector<128x128xf32>
    %6 = tpu.matmul %4, %5, %cst {dimension_numbers = #tpu.dot_dimension_numbers<[1], [0], [0], [1], [0, 0, 1, 1], [], []>} : vector<128x576xbf16>, vector<576x128xbf16>, vector<128x128xf32> -> vector<128x128xf32>
    %7 = arith.addf %3, %6 : vector<128x128xf32>
    %c0_6 = arith.constant 0 : index
    %c0_7 = arith.constant 0 : index
    %8 = vector.load %arg7[%c0_6, %c0_7] : memref<128x128xf32, #tpu.memory_space<vmem>>, vector<128x128xf32>
    tpu.vector_store %arg7[%c0_6, %c0_7], %7 {strides = array<i32>} : memref<128x128xf32, #tpu.memory_space<vmem>>, vector<128x128xf32>,
    %c0_i32_8 = arith.constant 0 : i32
    %9 = arith.cmpi eq, %arg2, %c0_i32_8 : i32
    %10 = arith.extui %9 : i1 to i32
    %c0_i32_9 = arith.constant 0 : i32
    %11 = arith.cmpi ne, %10, %c0_i32_9 : i32
    scf.if %11 {
      %c0_10 = arith.constant 0 : index
      %c0_11 = arith.constant 0 : index
      %12 = vector.load %arg7[%c0_10, %c0_11] : memref<128x128xf32, #tpu.memory_space<vmem>>, vector<128x128xf32>
      %c0_12 = arith.constant 0 : index
      %c0_13 = arith.constant 0 : index
      %13 = vector.load %arg5[%c0_12, %c0_13] : memref<1x128xf32, #tpu.memory_space<vmem>>, vector<1x128xf32>
      %14 = vector.broadcast %13 : vector<1x128xf32> to vector<128x128xf32>
      %15 = arith.addf %12, %14 : vector<128x128xf32>
      %cst_14 = arith.constant 0.000000e+00 : f32
      %16 = vector.broadcast %cst_14 : f32 to vector<128x128xf32>
      %17 = arith.maximumf %15, %16 : vector<128x128xf32>
      %18 = arith.truncf %17 : vector<128x128xf32> to vector<128x128xbf16>
      %c0_15 = arith.constant 0 : index
      %c0_16 = arith.constant 0 : index
      %19 = vector.load %arg6[%c0_15, %c0_16] : memref<128x128xbf16, #tpu.memory_space<vmem>>, vector<128x128xbf16>
      tpu.vector_store %arg6[%c0_15, %c0_16], %18 {strides = array<i32>} : memref<128x128xbf16, #tpu.memory_space<vmem>>, vector<128x128xbf16>,
    } else {
    }
    return
  }
  func.func @transform_0(%arg0: i32, %arg1: i32, %arg2: i32) -> (i32, i32) {
    %c0_i32 = arith.constant 0 : i32
    return %arg0, %arg2 : i32, i32
  }
  func.func @transform_1(%arg0: i32, %arg1: i32, %arg2: i32) -> (i32, i32) {
    %c0_i32 = arith.constant 0 : i32
    return %arg2, %arg1 : i32, i32
  }
  func.func @transform_2(%arg0: i32, %arg1: i32, %arg2: i32) -> (i32, i32) {
    %c0_i32 = arith.constant 0 : i32
    %c0_i32_0 = arith.constant 0 : i32
    return %c0_i32, %arg1 : i32, i32
  }
  func.func @transform_3(%arg0: i32, %arg1: i32, %arg2: i32) -> (i32, i32) {
    %c0_i32 = arith.constant 0 : i32
    return %arg0, %arg1 : i32, i32
  }
}

module attributes {stable_mosaic.version = 11 : i64} {
  func.func @_mm_bias_act_kernel(%arg0: i32, %arg1: i32, %arg2: i32, %arg3: memref<128x1152xbf16, #tpu.memory_space<vmem>>, %arg4: memref<1152x128xbf16, #tpu.memory_space<vmem>>, %arg5: memref<1x128xf32, #tpu.memory_space<vmem>>, %arg6: memref<128x128xbf16, #tpu.memory_space<vmem>>, %arg7: memref<128x128xf32, #tpu.memory_space<vmem>>) attributes {dimension_semantics = [#tpu.dimension_semantics<parallel>, #tpu.dimension_semantics<parallel>, #tpu.dimension_semantics<arbitrary>], iteration_bounds = array<i64: 1, 1, 1>, scalar_prefetch = 0 : i64, scratch_operands = 1 : i64, tpu.core_type = #tpu.core_type<tc>, window_params = [{transform_indices = @transform_0, window_bounds = array<i64: 128, 1152>}, {transform_indices = @transform_1, window_bounds = array<i64: 1152, 128>}, {transform_indices = @transform_2, window_bounds = array<i64: 1, 128>}, {transform_indices = @transform_3, window_bounds = array<i64: 128, 128>}]} {
    %c0_i32 = arith.constant 0 : i32
    %0 = arith.cmpi eq, %arg2, %c0_i32 : i32
    %1 = arith.extui %0 : i1 to i32
    %c0_i32_0 = arith.constant 0 : i32
    %2 = arith.cmpi ne, %1, %c0_i32_0 : i32
    scf.if %2 {
      %cst_10 = arith.constant 0.000000e+00 : f32
      %12 = vector.broadcast %cst_10 : f32 to vector<128x128xf32>
      %c0_11 = arith.constant 0 : index
      %c0_12 = arith.constant 0 : index
      %13 = vector.load %arg7[%c0_11, %c0_12] : memref<128x128xf32, #tpu.memory_space<vmem>>, vector<128x128xf32>
      tpu.vector_store %arg7[%c0_11, %c0_12], %12 {strides = array<i32>} : memref<128x128xf32, #tpu.memory_space<vmem>>, vector<128x128xf32>,
    } else {
    }
    %c0 = arith.constant 0 : index
    %c0_1 = arith.constant 0 : index
    %3 = vector.load %arg7[%c0, %c0_1] : memref<128x128xf32, #tpu.memory_space<vmem>>, vector<128x128xf32>
    %c0_2 = arith.constant 0 : index
    %c0_3 = arith.constant 0 : index
    %4 = vector.load %arg3[%c0_2, %c0_3] : memref<128x1152xbf16, #tpu.memory_space<vmem>>, vector<128x1152xbf16>
    %c0_4 = arith.constant 0 : index
    %c0_5 = arith.constant 0 : index
    %5 = vector.load %arg4[%c0_4, %c0_5] : memref<1152x128xbf16, #tpu.memory_space<vmem>>, vector<1152x128xbf16>
    %cst = arith.constant dense<0.000000e+00> : vector<128x128xf32>
    %6 = tpu.matmul %4, %5, %cst {dimension_numbers = #tpu.dot_dimension_numbers<[1], [0], [0], [1], [0, 0, 1, 1], [], []>} : vector<128x1152xbf16>, vector<1152x128xbf16>, vector<128x128xf32> -> vector<128x128xf32>
    %7 = arith.addf %3, %6 : vector<128x128xf32>
    %c0_6 = arith.constant 0 : index
    %c0_7 = arith.constant 0 : index
    %8 = vector.load %arg7[%c0_6, %c0_7] : memref<128x128xf32, #tpu.memory_space<vmem>>, vector<128x128xf32>
    tpu.vector_store %arg7[%c0_6, %c0_7], %7 {strides = array<i32>} : memref<128x128xf32, #tpu.memory_space<vmem>>, vector<128x128xf32>,
    %c0_i32_8 = arith.constant 0 : i32
    %9 = arith.cmpi eq, %arg2, %c0_i32_8 : i32
    %10 = arith.extui %9 : i1 to i32
    %c0_i32_9 = arith.constant 0 : i32
    %11 = arith.cmpi ne, %10, %c0_i32_9 : i32
    scf.if %11 {
      %c0_10 = arith.constant 0 : index
      %c0_11 = arith.constant 0 : index
      %12 = vector.load %arg7[%c0_10, %c0_11] : memref<128x128xf32, #tpu.memory_space<vmem>>, vector<128x128xf32>
      %c0_12 = arith.constant 0 : index
      %c0_13 = arith.constant 0 : index
      %13 = vector.load %arg5[%c0_12, %c0_13] : memref<1x128xf32, #tpu.memory_space<vmem>>, vector<1x128xf32>
      %14 = vector.broadcast %13 : vector<1x128xf32> to vector<128x128xf32>
      %15 = arith.addf %12, %14 : vector<128x128xf32>
      %cst_14 = arith.constant 0.000000e+00 : f32
      %16 = vector.broadcast %cst_14 : f32 to vector<128x128xf32>
      %17 = arith.maximumf %15, %16 : vector<128x128xf32>
      %18 = arith.truncf %17 : vector<128x128xf32> to vector<128x128xbf16>
      %c0_15 = arith.constant 0 : index
      %c0_16 = arith.constant 0 : index
      %19 = vector.load %arg6[%c0_15, %c0_16] : memref<128x128xbf16, #tpu.memory_space<vmem>>, vector<128x128xbf16>
      tpu.vector_store %arg6[%c0_15, %c0_16], %18 {strides = array<i32>} : memref<128x128xbf16, #tpu.memory_space<vmem>>, vector<128x128xbf16>,
    } else {
    }
    return
  }
  func.func @transform_0(%arg0: i32, %arg1: i32, %arg2: i32) -> (i32, i32) {
    %c0_i32 = arith.constant 0 : i32
    return %arg0, %arg2 : i32, i32
  }
  func.func @transform_1(%arg0: i32, %arg1: i32, %arg2: i32) -> (i32, i32) {
    %c0_i32 = arith.constant 0 : i32
    return %arg2, %arg1 : i32, i32
  }
  func.func @transform_2(%arg0: i32, %arg1: i32, %arg2: i32) -> (i32, i32) {
    %c0_i32 = arith.constant 0 : i32
    %c0_i32_0 = arith.constant 0 : i32
    return %c0_i32, %arg1 : i32, i32
  }
  func.func @transform_3(%arg0: i32, %arg1: i32, %arg2: i32) -> (i32, i32) {
    %c0_i32 = arith.constant 0 : i32
    return %arg0, %arg1 : i32, i32
  }
}

module attributes {stable_mosaic.version = 11 : i64} {
  func.func @_max_reduce_kernel(%arg0: i32, %arg1: i32, %arg2: memref<8x512xbf16, #tpu.memory_space<vmem>>, %arg3: memref<8x512xbf16, #tpu.memory_space<vmem>>, %arg4: memref<8x512xbf16, #tpu.memory_space<vmem>>, %arg5: memref<8x512xbf16, #tpu.memory_space<vmem>>, %arg6: memref<8x512xbf16, #tpu.memory_space<vmem>>) attributes {dimension_semantics = [#tpu.dimension_semantics<parallel>, #tpu.dimension_semantics<parallel>], iteration_bounds = array<i64: 1, 1>, scalar_prefetch = 0 : i64, scratch_operands = 0 : i64, tpu.core_type = #tpu.core_type<tc>, window_params = [{transform_indices = @transform_0, window_bounds = array<i64: 8, 512>}, {transform_indices = @transform_1, window_bounds = array<i64: 8, 512>}, {transform_indices = @transform_2, window_bounds = array<i64: 8, 512>}, {transform_indices = @transform_3, window_bounds = array<i64: 8, 512>}, {transform_indices = @transform_4, window_bounds = array<i64: 8, 512>}]} {
    %c0 = arith.constant 0 : index
    %c0_0 = arith.constant 0 : index
    %0 = vector.load %arg2[%c0, %c0_0] : memref<8x512xbf16, #tpu.memory_space<vmem>>, vector<8x512xbf16>
    %c0_1 = arith.constant 0 : index
    %c0_2 = arith.constant 0 : index
    %1 = vector.load %arg3[%c0_1, %c0_2] : memref<8x512xbf16, #tpu.memory_space<vmem>>, vector<8x512xbf16>
    %2 = arith.maximumf %0, %1 : vector<8x512xbf16>
    %c0_3 = arith.constant 0 : index
    %c0_4 = arith.constant 0 : index
    %3 = vector.load %arg4[%c0_3, %c0_4] : memref<8x512xbf16, #tpu.memory_space<vmem>>, vector<8x512xbf16>
    %4 = arith.maximumf %2, %3 : vector<8x512xbf16>
    %c0_5 = arith.constant 0 : index
    %c0_6 = arith.constant 0 : index
    %5 = vector.load %arg5[%c0_5, %c0_6] : memref<8x512xbf16, #tpu.memory_space<vmem>>, vector<8x512xbf16>
    %6 = arith.maximumf %4, %5 : vector<8x512xbf16>
    %c0_7 = arith.constant 0 : index
    %c0_8 = arith.constant 0 : index
    %7 = vector.load %arg6[%c0_7, %c0_8] : memref<8x512xbf16, #tpu.memory_space<vmem>>, vector<8x512xbf16>
    tpu.vector_store %arg6[%c0_7, %c0_8], %6 {strides = array<i32>} : memref<8x512xbf16, #tpu.memory_space<vmem>>, vector<8x512xbf16>,
    return
  }
  func.func @transform_0(%arg0: i32, %arg1: i32) -> (i32, i32) {
    %c0_i32 = arith.constant 0 : i32
    return %arg0, %arg1 : i32, i32
  }
  func.func @transform_1(%arg0: i32, %arg1: i32) -> (i32, i32) {
    %c0_i32 = arith.constant 0 : i32
    return %arg0, %arg1 : i32, i32
  }
  func.func @transform_2(%arg0: i32, %arg1: i32) -> (i32, i32) {
    %c0_i32 = arith.constant 0 : i32
    return %arg0, %arg1 : i32, i32
  }
  func.func @transform_3(%arg0: i32, %arg1: i32) -> (i32, i32) {
    %c0_i32 = arith.constant 0 : i32
    return %arg0, %arg1 : i32, i32
  }
  func.func @transform_4(%arg0: i32, %arg1: i32) -> (i32, i32) {
    %c0_i32 = arith.constant 0 : i32
    return %arg0, %arg1 : i32, i32
  }
}

module attributes {stable_mosaic.version = 11 : i64} {
  func.func @_mm_bias_act_kernel(%arg0: i32, %arg1: i32, %arg2: i32, %arg3: memref<32x1152xbf16, #tpu.memory_space<vmem>>, %arg4: memref<1152x256xbf16, #tpu.memory_space<vmem>>, %arg5: memref<1x256xf32, #tpu.memory_space<vmem>>, %arg6: memref<32x256xbf16, #tpu.memory_space<vmem>>, %arg7: memref<32x256xf32, #tpu.memory_space<vmem>>) attributes {dimension_semantics = [#tpu.dimension_semantics<parallel>, #tpu.dimension_semantics<parallel>, #tpu.dimension_semantics<arbitrary>], iteration_bounds = array<i64: 1, 1, 1>, scalar_prefetch = 0 : i64, scratch_operands = 1 : i64, tpu.core_type = #tpu.core_type<tc>, window_params = [{transform_indices = @transform_0, window_bounds = array<i64: 32, 1152>}, {transform_indices = @transform_1, window_bounds = array<i64: 1152, 256>}, {transform_indices = @transform_2, window_bounds = array<i64: 1, 256>}, {transform_indices = @transform_3, window_bounds = array<i64: 32, 256>}]} {
    %c0_i32 = arith.constant 0 : i32
    %0 = arith.cmpi eq, %arg2, %c0_i32 : i32
    %1 = arith.extui %0 : i1 to i32
    %c0_i32_0 = arith.constant 0 : i32
    %2 = arith.cmpi ne, %1, %c0_i32_0 : i32
    scf.if %2 {
      %cst_10 = arith.constant 0.000000e+00 : f32
      %12 = vector.broadcast %cst_10 : f32 to vector<32x256xf32>
      %c0_11 = arith.constant 0 : index
      %c0_12 = arith.constant 0 : index
      %13 = vector.load %arg7[%c0_11, %c0_12] : memref<32x256xf32, #tpu.memory_space<vmem>>, vector<32x256xf32>
      tpu.vector_store %arg7[%c0_11, %c0_12], %12 {strides = array<i32>} : memref<32x256xf32, #tpu.memory_space<vmem>>, vector<32x256xf32>,
    } else {
    }
    %c0 = arith.constant 0 : index
    %c0_1 = arith.constant 0 : index
    %3 = vector.load %arg7[%c0, %c0_1] : memref<32x256xf32, #tpu.memory_space<vmem>>, vector<32x256xf32>
    %c0_2 = arith.constant 0 : index
    %c0_3 = arith.constant 0 : index
    %4 = vector.load %arg3[%c0_2, %c0_3] : memref<32x1152xbf16, #tpu.memory_space<vmem>>, vector<32x1152xbf16>
    %c0_4 = arith.constant 0 : index
    %c0_5 = arith.constant 0 : index
    %5 = vector.load %arg4[%c0_4, %c0_5] : memref<1152x256xbf16, #tpu.memory_space<vmem>>, vector<1152x256xbf16>
    %cst = arith.constant dense<0.000000e+00> : vector<32x256xf32>
    %6 = tpu.matmul %4, %5, %cst {dimension_numbers = #tpu.dot_dimension_numbers<[1], [0], [0], [1], [0, 0, 1, 1], [], []>} : vector<32x1152xbf16>, vector<1152x256xbf16>, vector<32x256xf32> -> vector<32x256xf32>
    %7 = arith.addf %3, %6 : vector<32x256xf32>
    %c0_6 = arith.constant 0 : index
    %c0_7 = arith.constant 0 : index
    %8 = vector.load %arg7[%c0_6, %c0_7] : memref<32x256xf32, #tpu.memory_space<vmem>>, vector<32x256xf32>
    tpu.vector_store %arg7[%c0_6, %c0_7], %7 {strides = array<i32>} : memref<32x256xf32, #tpu.memory_space<vmem>>, vector<32x256xf32>,
    %c0_i32_8 = arith.constant 0 : i32
    %9 = arith.cmpi eq, %arg2, %c0_i32_8 : i32
    %10 = arith.extui %9 : i1 to i32
    %c0_i32_9 = arith.constant 0 : i32
    %11 = arith.cmpi ne, %10, %c0_i32_9 : i32
    scf.if %11 {
      %c0_10 = arith.constant 0 : index
      %c0_11 = arith.constant 0 : index
      %12 = vector.load %arg7[%c0_10, %c0_11] : memref<32x256xf32, #tpu.memory_space<vmem>>, vector<32x256xf32>
      %c0_12 = arith.constant 0 : index
      %c0_13 = arith.constant 0 : index
      %13 = vector.load %arg5[%c0_12, %c0_13] : memref<1x256xf32, #tpu.memory_space<vmem>>, vector<1x256xf32>
      %14 = vector.broadcast %13 : vector<1x256xf32> to vector<32x256xf32>
      %15 = arith.addf %12, %14 : vector<32x256xf32>
      %cst_14 = arith.constant 0.000000e+00 : f32
      %16 = vector.broadcast %cst_14 : f32 to vector<32x256xf32>
      %17 = arith.maximumf %15, %16 : vector<32x256xf32>
      %18 = arith.truncf %17 : vector<32x256xf32> to vector<32x256xbf16>
      %c0_15 = arith.constant 0 : index
      %c0_16 = arith.constant 0 : index
      %19 = vector.load %arg6[%c0_15, %c0_16] : memref<32x256xbf16, #tpu.memory_space<vmem>>, vector<32x256xbf16>
      tpu.vector_store %arg6[%c0_15, %c0_16], %18 {strides = array<i32>} : memref<32x256xbf16, #tpu.memory_space<vmem>>, vector<32x256xbf16>,
    } else {
    }
    return
  }
  func.func @transform_0(%arg0: i32, %arg1: i32, %arg2: i32) -> (i32, i32) {
    %c0_i32 = arith.constant 0 : i32
    return %arg0, %arg2 : i32, i32
  }
  func.func @transform_1(%arg0: i32, %arg1: i32, %arg2: i32) -> (i32, i32) {
    %c0_i32 = arith.constant 0 : i32
    return %arg2, %arg1 : i32, i32
  }
  func.func @transform_2(%arg0: i32, %arg1: i32, %arg2: i32) -> (i32, i32) {
    %c0_i32 = arith.constant 0 : i32
    %c0_i32_0 = arith.constant 0 : i32
    return %c0_i32, %arg1 : i32, i32
  }
  func.func @transform_3(%arg0: i32, %arg1: i32, %arg2: i32) -> (i32, i32) {
    %c0_i32 = arith.constant 0 : i32
    return %arg0, %arg1 : i32, i32
  }
}

module attributes {stable_mosaic.version = 11 : i64} {
  func.func @_mm_bias_act_kernel(%arg0: i32, %arg1: i32, %arg2: i32, %arg3: memref<32x256xbf16, #tpu.memory_space<vmem>>, %arg4: memref<256x256xbf16, #tpu.memory_space<vmem>>, %arg5: memref<1x256xf32, #tpu.memory_space<vmem>>, %arg6: memref<32x256xbf16, #tpu.memory_space<vmem>>, %arg7: memref<32x256xf32, #tpu.memory_space<vmem>>) attributes {dimension_semantics = [#tpu.dimension_semantics<parallel>, #tpu.dimension_semantics<parallel>, #tpu.dimension_semantics<arbitrary>], iteration_bounds = array<i64: 1, 1, 9>, scalar_prefetch = 0 : i64, scratch_operands = 1 : i64, tpu.core_type = #tpu.core_type<tc>, window_params = [{transform_indices = @transform_0, window_bounds = array<i64: 32, 256>}, {transform_indices = @transform_1, window_bounds = array<i64: 256, 256>}, {transform_indices = @transform_2, window_bounds = array<i64: 1, 256>}, {transform_indices = @transform_3, window_bounds = array<i64: 32, 256>}]} {
    %c0_i32 = arith.constant 0 : i32
    %0 = arith.cmpi eq, %arg2, %c0_i32 : i32
    %1 = arith.extui %0 : i1 to i32
    %c0_i32_0 = arith.constant 0 : i32
    %2 = arith.cmpi ne, %1, %c0_i32_0 : i32
    scf.if %2 {
      %cst_9 = arith.constant 0.000000e+00 : f32
      %12 = vector.broadcast %cst_9 : f32 to vector<32x256xf32>
      %c0_10 = arith.constant 0 : index
      %c0_11 = arith.constant 0 : index
      %13 = vector.load %arg7[%c0_10, %c0_11] : memref<32x256xf32, #tpu.memory_space<vmem>>, vector<32x256xf32>
      tpu.vector_store %arg7[%c0_10, %c0_11], %12 {strides = array<i32>} : memref<32x256xf32, #tpu.memory_space<vmem>>, vector<32x256xf32>,
    } else {
    }
    %c0 = arith.constant 0 : index
    %c0_1 = arith.constant 0 : index
    %3 = vector.load %arg7[%c0, %c0_1] : memref<32x256xf32, #tpu.memory_space<vmem>>, vector<32x256xf32>
    %c0_2 = arith.constant 0 : index
    %c0_3 = arith.constant 0 : index
    %4 = vector.load %arg3[%c0_2, %c0_3] : memref<32x256xbf16, #tpu.memory_space<vmem>>, vector<32x256xbf16>
    %c0_4 = arith.constant 0 : index
    %c0_5 = arith.constant 0 : index
    %5 = vector.load %arg4[%c0_4, %c0_5] : memref<256x256xbf16, #tpu.memory_space<vmem>>, vector<256x256xbf16>
    %cst = arith.constant dense<0.000000e+00> : vector<32x256xf32>
    %6 = tpu.matmul %4, %5, %cst {dimension_numbers = #tpu.dot_dimension_numbers<[1], [0], [0], [1], [0, 0, 1, 1], [], []>} : vector<32x256xbf16>, vector<256x256xbf16>, vector<32x256xf32> -> vector<32x256xf32>
    %7 = arith.addf %3, %6 : vector<32x256xf32>
    %c0_6 = arith.constant 0 : index
    %c0_7 = arith.constant 0 : index
    %8 = vector.load %arg7[%c0_6, %c0_7] : memref<32x256xf32, #tpu.memory_space<vmem>>, vector<32x256xf32>
    tpu.vector_store %arg7[%c0_6, %c0_7], %7 {strides = array<i32>} : memref<32x256xf32, #tpu.memory_space<vmem>>, vector<32x256xf32>,
    %c8_i32 = arith.constant 8 : i32
    %9 = arith.cmpi eq, %arg2, %c8_i32 : i32
    %10 = arith.extui %9 : i1 to i32
    %c0_i32_8 = arith.constant 0 : i32
    %11 = arith.cmpi ne, %10, %c0_i32_8 : i32
    scf.if %11 {
      %c0_9 = arith.constant 0 : index
      %c0_10 = arith.constant 0 : index
      %12 = vector.load %arg7[%c0_9, %c0_10] : memref<32x256xf32, #tpu.memory_space<vmem>>, vector<32x256xf32>
      %c0_11 = arith.constant 0 : index
      %c0_12 = arith.constant 0 : index
      %13 = vector.load %arg5[%c0_11, %c0_12] : memref<1x256xf32, #tpu.memory_space<vmem>>, vector<1x256xf32>
      %14 = vector.broadcast %13 : vector<1x256xf32> to vector<32x256xf32>
      %15 = arith.addf %12, %14 : vector<32x256xf32>
      %cst_13 = arith.constant 0.000000e+00 : f32
      %16 = vector.broadcast %cst_13 : f32 to vector<32x256xf32>
      %17 = arith.maximumf %15, %16 : vector<32x256xf32>
      %18 = arith.truncf %17 : vector<32x256xf32> to vector<32x256xbf16>
      %c0_14 = arith.constant 0 : index
      %c0_15 = arith.constant 0 : index
      %19 = vector.load %arg6[%c0_14, %c0_15] : memref<32x256xbf16, #tpu.memory_space<vmem>>, vector<32x256xbf16>
      tpu.vector_store %arg6[%c0_14, %c0_15], %18 {strides = array<i32>} : memref<32x256xbf16, #tpu.memory_space<vmem>>, vector<32x256xbf16>,
    } else {
    }
    return
  }
  func.func @transform_0(%arg0: i32, %arg1: i32, %arg2: i32) -> (i32, i32) {
    %c0_i32 = arith.constant 0 : i32
    return %arg0, %arg2 : i32, i32
  }
  func.func @transform_1(%arg0: i32, %arg1: i32, %arg2: i32) -> (i32, i32) {
    %c0_i32 = arith.constant 0 : i32
    return %arg2, %arg1 : i32, i32
  }
  func.func @transform_2(%arg0: i32, %arg1: i32, %arg2: i32) -> (i32, i32) {
    %c0_i32 = arith.constant 0 : i32
    %c0_i32_0 = arith.constant 0 : i32
    return %c0_i32, %arg1 : i32, i32
  }
  func.func @transform_3(%arg0: i32, %arg1: i32, %arg2: i32) -> (i32, i32) {
    %c0_i32 = arith.constant 0 : i32
    return %arg0, %arg1 : i32, i32
  }
}

module attributes {stable_mosaic.version = 11 : i64} {
  func.func @_mm_bias_act_kernel(%arg0: i32, %arg1: i32, %arg2: i32, %arg3: memref<8x256xbf16, #tpu.memory_space<vmem>>, %arg4: memref<256x256xbf16, #tpu.memory_space<vmem>>, %arg5: memref<1x256xf32, #tpu.memory_space<vmem>>, %arg6: memref<8x256xbf16, #tpu.memory_space<vmem>>, %arg7: memref<8x256xf32, #tpu.memory_space<vmem>>) attributes {dimension_semantics = [#tpu.dimension_semantics<parallel>, #tpu.dimension_semantics<parallel>, #tpu.dimension_semantics<arbitrary>], iteration_bounds = array<i64: 1, 2, 9>, scalar_prefetch = 0 : i64, scratch_operands = 1 : i64, tpu.core_type = #tpu.core_type<tc>, window_params = [{transform_indices = @transform_0, window_bounds = array<i64: 8, 256>}, {transform_indices = @transform_1, window_bounds = array<i64: 256, 256>}, {transform_indices = @transform_2, window_bounds = array<i64: 1, 256>}, {transform_indices = @transform_3, window_bounds = array<i64: 8, 256>}]} {
    %c0_i32 = arith.constant 0 : i32
    %0 = arith.cmpi eq, %arg2, %c0_i32 : i32
    %1 = arith.extui %0 : i1 to i32
    %c0_i32_0 = arith.constant 0 : i32
    %2 = arith.cmpi ne, %1, %c0_i32_0 : i32
    scf.if %2 {
      %cst_9 = arith.constant 0.000000e+00 : f32
      %12 = vector.broadcast %cst_9 : f32 to vector<8x256xf32>
      %c0_10 = arith.constant 0 : index
      %c0_11 = arith.constant 0 : index
      %13 = vector.load %arg7[%c0_10, %c0_11] : memref<8x256xf32, #tpu.memory_space<vmem>>, vector<8x256xf32>
      tpu.vector_store %arg7[%c0_10, %c0_11], %12 {strides = array<i32>} : memref<8x256xf32, #tpu.memory_space<vmem>>, vector<8x256xf32>,
    } else {
    }
    %c0 = arith.constant 0 : index
    %c0_1 = arith.constant 0 : index
    %3 = vector.load %arg7[%c0, %c0_1] : memref<8x256xf32, #tpu.memory_space<vmem>>, vector<8x256xf32>
    %c0_2 = arith.constant 0 : index
    %c0_3 = arith.constant 0 : index
    %4 = vector.load %arg3[%c0_2, %c0_3] : memref<8x256xbf16, #tpu.memory_space<vmem>>, vector<8x256xbf16>
    %c0_4 = arith.constant 0 : index
    %c0_5 = arith.constant 0 : index
    %5 = vector.load %arg4[%c0_4, %c0_5] : memref<256x256xbf16, #tpu.memory_space<vmem>>, vector<256x256xbf16>
    %cst = arith.constant dense<0.000000e+00> : vector<8x256xf32>
    %6 = tpu.matmul %4, %5, %cst {dimension_numbers = #tpu.dot_dimension_numbers<[1], [0], [0], [1], [0, 0, 1, 1], [], []>} : vector<8x256xbf16>, vector<256x256xbf16>, vector<8x256xf32> -> vector<8x256xf32>
    %7 = arith.addf %3, %6 : vector<8x256xf32>
    %c0_6 = arith.constant 0 : index
    %c0_7 = arith.constant 0 : index
    %8 = vector.load %arg7[%c0_6, %c0_7] : memref<8x256xf32, #tpu.memory_space<vmem>>, vector<8x256xf32>
    tpu.vector_store %arg7[%c0_6, %c0_7], %7 {strides = array<i32>} : memref<8x256xf32, #tpu.memory_space<vmem>>, vector<8x256xf32>,
    %c8_i32 = arith.constant 8 : i32
    %9 = arith.cmpi eq, %arg2, %c8_i32 : i32
    %10 = arith.extui %9 : i1 to i32
    %c0_i32_8 = arith.constant 0 : i32
    %11 = arith.cmpi ne, %10, %c0_i32_8 : i32
    scf.if %11 {
      %c0_9 = arith.constant 0 : index
      %c0_10 = arith.constant 0 : index
      %12 = vector.load %arg7[%c0_9, %c0_10] : memref<8x256xf32, #tpu.memory_space<vmem>>, vector<8x256xf32>
      %c0_11 = arith.constant 0 : index
      %c0_12 = arith.constant 0 : index
      %13 = vector.load %arg5[%c0_11, %c0_12] : memref<1x256xf32, #tpu.memory_space<vmem>>, vector<1x256xf32>
      %14 = vector.broadcast %13 : vector<1x256xf32> to vector<8x256xf32>
      %15 = arith.addf %12, %14 : vector<8x256xf32>
      %cst_13 = arith.constant 0.000000e+00 : f32
      %16 = vector.broadcast %cst_13 : f32 to vector<8x256xf32>
      %17 = arith.maximumf %15, %16 : vector<8x256xf32>
      %18 = arith.truncf %17 : vector<8x256xf32> to vector<8x256xbf16>
      %c0_14 = arith.constant 0 : index
      %c0_15 = arith.constant 0 : index
      %19 = vector.load %arg6[%c0_14, %c0_15] : memref<8x256xbf16, #tpu.memory_space<vmem>>, vector<8x256xbf16>
      tpu.vector_store %arg6[%c0_14, %c0_15], %18 {strides = array<i32>} : memref<8x256xbf16, #tpu.memory_space<vmem>>, vector<8x256xbf16>,
    } else {
    }
    return
  }
  func.func @transform_0(%arg0: i32, %arg1: i32, %arg2: i32) -> (i32, i32) {
    %c0_i32 = arith.constant 0 : i32
    return %arg0, %arg2 : i32, i32
  }
  func.func @transform_1(%arg0: i32, %arg1: i32, %arg2: i32) -> (i32, i32) {
    %c0_i32 = arith.constant 0 : i32
    return %arg2, %arg1 : i32, i32
  }
  func.func @transform_2(%arg0: i32, %arg1: i32, %arg2: i32) -> (i32, i32) {
    %c0_i32 = arith.constant 0 : i32
    %c0_i32_0 = arith.constant 0 : i32
    return %c0_i32, %arg1 : i32, i32
  }
  func.func @transform_3(%arg0: i32, %arg1: i32, %arg2: i32) -> (i32, i32) {
    %c0_i32 = arith.constant 0 : i32
    return %arg0, %arg1 : i32, i32
  }
}

module attributes {stable_mosaic.version = 11 : i64} {
  func.func @_mm_bias_act_kernel(%arg0: i32, %arg1: i32, %arg2: i32, %arg3: memref<8x512xbf16, #tpu.memory_space<vmem>>, %arg4: memref<512x256xbf16, #tpu.memory_space<vmem>>, %arg5: memref<1x256xf32, #tpu.memory_space<vmem>>, %arg6: memref<8x256xbf16, #tpu.memory_space<vmem>>, %arg7: memref<8x256xf32, #tpu.memory_space<vmem>>) attributes {dimension_semantics = [#tpu.dimension_semantics<parallel>, #tpu.dimension_semantics<parallel>, #tpu.dimension_semantics<arbitrary>], iteration_bounds = array<i64: 1, 2, 9>, scalar_prefetch = 0 : i64, scratch_operands = 1 : i64, tpu.core_type = #tpu.core_type<tc>, window_params = [{transform_indices = @transform_0, window_bounds = array<i64: 8, 512>}, {transform_indices = @transform_1, window_bounds = array<i64: 512, 256>}, {transform_indices = @transform_2, window_bounds = array<i64: 1, 256>}, {transform_indices = @transform_3, window_bounds = array<i64: 8, 256>}]} {
    %c0_i32 = arith.constant 0 : i32
    %0 = arith.cmpi eq, %arg2, %c0_i32 : i32
    %1 = arith.extui %0 : i1 to i32
    %c0_i32_0 = arith.constant 0 : i32
    %2 = arith.cmpi ne, %1, %c0_i32_0 : i32
    scf.if %2 {
      %cst_9 = arith.constant 0.000000e+00 : f32
      %12 = vector.broadcast %cst_9 : f32 to vector<8x256xf32>
      %c0_10 = arith.constant 0 : index
      %c0_11 = arith.constant 0 : index
      %13 = vector.load %arg7[%c0_10, %c0_11] : memref<8x256xf32, #tpu.memory_space<vmem>>, vector<8x256xf32>
      tpu.vector_store %arg7[%c0_10, %c0_11], %12 {strides = array<i32>} : memref<8x256xf32, #tpu.memory_space<vmem>>, vector<8x256xf32>,
    } else {
    }
    %c0 = arith.constant 0 : index
    %c0_1 = arith.constant 0 : index
    %3 = vector.load %arg7[%c0, %c0_1] : memref<8x256xf32, #tpu.memory_space<vmem>>, vector<8x256xf32>
    %c0_2 = arith.constant 0 : index
    %c0_3 = arith.constant 0 : index
    %4 = vector.load %arg3[%c0_2, %c0_3] : memref<8x512xbf16, #tpu.memory_space<vmem>>, vector<8x512xbf16>
    %c0_4 = arith.constant 0 : index
    %c0_5 = arith.constant 0 : index
    %5 = vector.load %arg4[%c0_4, %c0_5] : memref<512x256xbf16, #tpu.memory_space<vmem>>, vector<512x256xbf16>
    %cst = arith.constant dense<0.000000e+00> : vector<8x256xf32>
    %6 = tpu.matmul %4, %5, %cst {dimension_numbers = #tpu.dot_dimension_numbers<[1], [0], [0], [1], [0, 0, 1, 1], [], []>} : vector<8x512xbf16>, vector<512x256xbf16>, vector<8x256xf32> -> vector<8x256xf32>
    %7 = arith.addf %3, %6 : vector<8x256xf32>
    %c0_6 = arith.constant 0 : index
    %c0_7 = arith.constant 0 : index
    %8 = vector.load %arg7[%c0_6, %c0_7] : memref<8x256xf32, #tpu.memory_space<vmem>>, vector<8x256xf32>
    tpu.vector_store %arg7[%c0_6, %c0_7], %7 {strides = array<i32>} : memref<8x256xf32, #tpu.memory_space<vmem>>, vector<8x256xf32>,
    %c8_i32 = arith.constant 8 : i32
    %9 = arith.cmpi eq, %arg2, %c8_i32 : i32
    %10 = arith.extui %9 : i1 to i32
    %c0_i32_8 = arith.constant 0 : i32
    %11 = arith.cmpi ne, %10, %c0_i32_8 : i32
    scf.if %11 {
      %c0_9 = arith.constant 0 : index
      %c0_10 = arith.constant 0 : index
      %12 = vector.load %arg7[%c0_9, %c0_10] : memref<8x256xf32, #tpu.memory_space<vmem>>, vector<8x256xf32>
      %c0_11 = arith.constant 0 : index
      %c0_12 = arith.constant 0 : index
      %13 = vector.load %arg5[%c0_11, %c0_12] : memref<1x256xf32, #tpu.memory_space<vmem>>, vector<1x256xf32>
      %14 = vector.broadcast %13 : vector<1x256xf32> to vector<8x256xf32>
      %15 = arith.addf %12, %14 : vector<8x256xf32>
      %cst_13 = arith.constant 0.000000e+00 : f32
      %16 = vector.broadcast %cst_13 : f32 to vector<8x256xf32>
      %17 = arith.maximumf %15, %16 : vector<8x256xf32>
      %18 = arith.truncf %17 : vector<8x256xf32> to vector<8x256xbf16>
      %c0_14 = arith.constant 0 : index
      %c0_15 = arith.constant 0 : index
      %19 = vector.load %arg6[%c0_14, %c0_15] : memref<8x256xbf16, #tpu.memory_space<vmem>>, vector<8x256xbf16>
      tpu.vector_store %arg6[%c0_14, %c0_15], %18 {strides = array<i32>} : memref<8x256xbf16, #tpu.memory_space<vmem>>, vector<8x256xbf16>,
    } else {
    }
    return
  }
  func.func @transform_0(%arg0: i32, %arg1: i32, %arg2: i32) -> (i32, i32) {
    %c0_i32 = arith.constant 0 : i32
    return %arg0, %arg2 : i32, i32
  }
  func.func @transform_1(%arg0: i32, %arg1: i32, %arg2: i32) -> (i32, i32) {
    %c0_i32 = arith.constant 0 : i32
    return %arg2, %arg1 : i32, i32
  }
  func.func @transform_2(%arg0: i32, %arg1: i32, %arg2: i32) -> (i32, i32) {
    %c0_i32 = arith.constant 0 : i32
    %c0_i32_0 = arith.constant 0 : i32
    return %c0_i32, %arg1 : i32, i32
  }
  func.func @transform_3(%arg0: i32, %arg1: i32, %arg2: i32) -> (i32, i32) {
    %c0_i32 = arith.constant 0 : i32
    return %arg0, %arg1 : i32, i32
  }
}

module attributes {stable_mosaic.version = 11 : i64} {
  func.func @_max_reduce_kernel(%arg0: i32, %arg1: i32, %arg2: memref<8x512xbf16, #tpu.memory_space<vmem>>, %arg3: memref<8x512xbf16, #tpu.memory_space<vmem>>, %arg4: memref<8x512xbf16, #tpu.memory_space<vmem>>, %arg5: memref<8x512xbf16, #tpu.memory_space<vmem>>, %arg6: memref<8x512xbf16, #tpu.memory_space<vmem>>, %arg7: memref<8x512xbf16, #tpu.memory_space<vmem>>, %arg8: memref<8x512xbf16, #tpu.memory_space<vmem>>, %arg9: memref<8x512xbf16, #tpu.memory_space<vmem>>, %arg10: memref<8x512xbf16, #tpu.memory_space<vmem>>, %arg11: memref<8x512xbf16, #tpu.memory_space<vmem>>) attributes {dimension_semantics = [#tpu.dimension_semantics<parallel>, #tpu.dimension_semantics<parallel>], iteration_bounds = array<i64: 1, 1>, scalar_prefetch = 0 : i64, scratch_operands = 0 : i64, tpu.core_type = #tpu.core_type<tc>, window_params = [{transform_indices = @transform_0, window_bounds = array<i64: 8, 512>}, {transform_indices = @transform_1, window_bounds = array<i64: 8, 512>}, {transform_indices = @transform_2, window_bounds = array<i64: 8, 512>}, {transform_indices = @transform_3, window_bounds = array<i64: 8, 512>}, {transform_indices = @transform_4, window_bounds = array<i64: 8, 512>}, {transform_indices = @transform_5, window_bounds = array<i64: 8, 512>}, {transform_indices = @transform_6, window_bounds = array<i64: 8, 512>}, {transform_indices = @transform_7, window_bounds = array<i64: 8, 512>}, {transform_indices = @transform_8, window_bounds = array<i64: 8, 512>}, {transform_indices = @transform_9, window_bounds = array<i64: 8, 512>}]} {
    %c0 = arith.constant 0 : index
    %c0_0 = arith.constant 0 : index
    %0 = vector.load %arg2[%c0, %c0_0] : memref<8x512xbf16, #tpu.memory_space<vmem>>, vector<8x512xbf16>
    %c0_1 = arith.constant 0 : index
    %c0_2 = arith.constant 0 : index
    %1 = vector.load %arg3[%c0_1, %c0_2] : memref<8x512xbf16, #tpu.memory_space<vmem>>, vector<8x512xbf16>
    %2 = arith.maximumf %0, %1 : vector<8x512xbf16>
    %c0_3 = arith.constant 0 : index
    %c0_4 = arith.constant 0 : index
    %3 = vector.load %arg4[%c0_3, %c0_4] : memref<8x512xbf16, #tpu.memory_space<vmem>>, vector<8x512xbf16>
    %4 = arith.maximumf %2, %3 : vector<8x512xbf16>
    %c0_5 = arith.constant 0 : index
    %c0_6 = arith.constant 0 : index
    %5 = vector.load %arg5[%c0_5, %c0_6] : memref<8x512xbf16, #tpu.memory_space<vmem>>, vector<8x512xbf16>
    %6 = arith.maximumf %4, %5 : vector<8x512xbf16>
    %c0_7 = arith.constant 0 : index
    %c0_8 = arith.constant 0 : index
    %7 = vector.load %arg6[%c0_7, %c0_8] : memref<8x512xbf16, #tpu.memory_space<vmem>>, vector<8x512xbf16>
    %8 = arith.maximumf %6, %7 : vector<8x512xbf16>
    %c0_9 = arith.constant 0 : index
    %c0_10 = arith.constant 0 : index
    %9 = vector.load %arg7[%c0_9, %c0_10] : memref<8x512xbf16, #tpu.memory_space<vmem>>, vector<8x512xbf16>
    %10 = arith.maximumf %8, %9 : vector<8x512xbf16>
    %c0_11 = arith.constant 0 : index
    %c0_12 = arith.constant 0 : index
    %11 = vector.load %arg8[%c0_11, %c0_12] : memref<8x512xbf16, #tpu.memory_space<vmem>>, vector<8x512xbf16>
    %12 = arith.maximumf %10, %11 : vector<8x512xbf16>
    %c0_13 = arith.constant 0 : index
    %c0_14 = arith.constant 0 : index
    %13 = vector.load %arg9[%c0_13, %c0_14] : memref<8x512xbf16, #tpu.memory_space<vmem>>, vector<8x512xbf16>
    %14 = arith.maximumf %12, %13 : vector<8x512xbf16>
    %c0_15 = arith.constant 0 : index
    %c0_16 = arith.constant 0 : index
    %15 = vector.load %arg10[%c0_15, %c0_16] : memref<8x512xbf16, #tpu.memory_space<vmem>>, vector<8x512xbf16>
    %16 = arith.maximumf %14, %15 : vector<8x512xbf16>
    %c0_17 = arith.constant 0 : index
    %c0_18 = arith.constant 0 : index
    %17 = vector.load %arg11[%c0_17, %c0_18] : memref<8x512xbf16, #tpu.memory_space<vmem>>, vector<8x512xbf16>
    tpu.vector_store %arg11[%c0_17, %c0_18], %16 {strides = array<i32>} : memref<8x512xbf16, #tpu.memory_space<vmem>>, vector<8x512xbf16>,
    return
  }
  func.func @transform_0(%arg0: i32, %arg1: i32) -> (i32, i32) {
    %c0_i32 = arith.constant 0 : i32
    return %arg0, %arg1 : i32, i32
  }
  func.func @transform_1(%arg0: i32, %arg1: i32) -> (i32, i32) {
    %c0_i32 = arith.constant 0 : i32
    return %arg0, %arg1 : i32, i32
  }
  func.func @transform_2(%arg0: i32, %arg1: i32) -> (i32, i32) {
    %c0_i32 = arith.constant 0 : i32
    return %arg0, %arg1 : i32, i32
  }
  func.func @transform_3(%arg0: i32, %arg1: i32) -> (i32, i32) {
    %c0_i32 = arith.constant 0 : i32
    return %arg0, %arg1 : i32, i32
  }
  func.func @transform_4(%arg0: i32, %arg1: i32) -> (i32, i32) {
    %c0_i32 = arith.constant 0 : i32
    return %arg0, %arg1 : i32, i32
  }
  func.func @transform_5(%arg0: i32, %arg1: i32) -> (i32, i32) {
    %c0_i32 = arith.constant 0 : i32
    return %arg0, %arg1 : i32, i32
  }
  func.func @transform_6(%arg0: i32, %arg1: i32) -> (i32, i32) {
    %c0_i32 = arith.constant 0 : i32
    return %arg0, %arg1 : i32, i32
  }
  func.func @transform_7(%arg0: i32, %arg1: i32) -> (i32, i32) {
    %c0_i32 = arith.constant 0 : i32
    return %arg0, %arg1 : i32, i32
  }
  func.func @transform_8(%arg0: i32, %arg1: i32) -> (i32, i32) {
    %c0_i32 = arith.constant 0 : i32
    return %arg0, %arg1 : i32, i32
  }
  func.func @transform_9(%arg0: i32, %arg1: i32) -> (i32, i32) {
    %c0_i32 = arith.constant 0 : i32
    return %arg0, %arg1 : i32, i32
  }
}

module attributes {stable_mosaic.version = 11 : i64} {
  func.func @_mm_bias_act_kernel(%arg0: i32, %arg1: i32, %arg2: i32, %arg3: memref<8x512xbf16, #tpu.memory_space<vmem>>, %arg4: memref<512x256xbf16, #tpu.memory_space<vmem>>, %arg5: memref<1x256xf32, #tpu.memory_space<vmem>>, %arg6: memref<8x256xbf16, #tpu.memory_space<vmem>>, %arg7: memref<8x256xf32, #tpu.memory_space<vmem>>) attributes {dimension_semantics = [#tpu.dimension_semantics<parallel>, #tpu.dimension_semantics<parallel>, #tpu.dimension_semantics<arbitrary>], iteration_bounds = array<i64: 1, 4, 9>, scalar_prefetch = 0 : i64, scratch_operands = 1 : i64, tpu.core_type = #tpu.core_type<tc>, window_params = [{transform_indices = @transform_0, window_bounds = array<i64: 8, 512>}, {transform_indices = @transform_1, window_bounds = array<i64: 512, 256>}, {transform_indices = @transform_2, window_bounds = array<i64: 1, 256>}, {transform_indices = @transform_3, window_bounds = array<i64: 8, 256>}]} {
    %c0_i32 = arith.constant 0 : i32
    %0 = arith.cmpi eq, %arg2, %c0_i32 : i32
    %1 = arith.extui %0 : i1 to i32
    %c0_i32_0 = arith.constant 0 : i32
    %2 = arith.cmpi ne, %1, %c0_i32_0 : i32
    scf.if %2 {
      %cst_9 = arith.constant 0.000000e+00 : f32
      %12 = vector.broadcast %cst_9 : f32 to vector<8x256xf32>
      %c0_10 = arith.constant 0 : index
      %c0_11 = arith.constant 0 : index
      %13 = vector.load %arg7[%c0_10, %c0_11] : memref<8x256xf32, #tpu.memory_space<vmem>>, vector<8x256xf32>
      tpu.vector_store %arg7[%c0_10, %c0_11], %12 {strides = array<i32>} : memref<8x256xf32, #tpu.memory_space<vmem>>, vector<8x256xf32>,
    } else {
    }
    %c0 = arith.constant 0 : index
    %c0_1 = arith.constant 0 : index
    %3 = vector.load %arg7[%c0, %c0_1] : memref<8x256xf32, #tpu.memory_space<vmem>>, vector<8x256xf32>
    %c0_2 = arith.constant 0 : index
    %c0_3 = arith.constant 0 : index
    %4 = vector.load %arg3[%c0_2, %c0_3] : memref<8x512xbf16, #tpu.memory_space<vmem>>, vector<8x512xbf16>
    %c0_4 = arith.constant 0 : index
    %c0_5 = arith.constant 0 : index
    %5 = vector.load %arg4[%c0_4, %c0_5] : memref<512x256xbf16, #tpu.memory_space<vmem>>, vector<512x256xbf16>
    %cst = arith.constant dense<0.000000e+00> : vector<8x256xf32>
    %6 = tpu.matmul %4, %5, %cst {dimension_numbers = #tpu.dot_dimension_numbers<[1], [0], [0], [1], [0, 0, 1, 1], [], []>} : vector<8x512xbf16>, vector<512x256xbf16>, vector<8x256xf32> -> vector<8x256xf32>
    %7 = arith.addf %3, %6 : vector<8x256xf32>
    %c0_6 = arith.constant 0 : index
    %c0_7 = arith.constant 0 : index
    %8 = vector.load %arg7[%c0_6, %c0_7] : memref<8x256xf32, #tpu.memory_space<vmem>>, vector<8x256xf32>
    tpu.vector_store %arg7[%c0_6, %c0_7], %7 {strides = array<i32>} : memref<8x256xf32, #tpu.memory_space<vmem>>, vector<8x256xf32>,
    %c8_i32 = arith.constant 8 : i32
    %9 = arith.cmpi eq, %arg2, %c8_i32 : i32
    %10 = arith.extui %9 : i1 to i32
    %c0_i32_8 = arith.constant 0 : i32
    %11 = arith.cmpi ne, %10, %c0_i32_8 : i32
    scf.if %11 {
      %c0_9 = arith.constant 0 : index
      %c0_10 = arith.constant 0 : index
      %12 = vector.load %arg7[%c0_9, %c0_10] : memref<8x256xf32, #tpu.memory_space<vmem>>, vector<8x256xf32>
      %c0_11 = arith.constant 0 : index
      %c0_12 = arith.constant 0 : index
      %13 = vector.load %arg5[%c0_11, %c0_12] : memref<1x256xf32, #tpu.memory_space<vmem>>, vector<1x256xf32>
      %14 = vector.broadcast %13 : vector<1x256xf32> to vector<8x256xf32>
      %15 = arith.addf %12, %14 : vector<8x256xf32>
      %cst_13 = arith.constant 0.000000e+00 : f32
      %16 = vector.broadcast %cst_13 : f32 to vector<8x256xf32>
      %17 = arith.maximumf %15, %16 : vector<8x256xf32>
      %18 = arith.truncf %17 : vector<8x256xf32> to vector<8x256xbf16>
      %c0_14 = arith.constant 0 : index
      %c0_15 = arith.constant 0 : index
      %19 = vector.load %arg6[%c0_14, %c0_15] : memref<8x256xbf16, #tpu.memory_space<vmem>>, vector<8x256xbf16>
      tpu.vector_store %arg6[%c0_14, %c0_15], %18 {strides = array<i32>} : memref<8x256xbf16, #tpu.memory_space<vmem>>, vector<8x256xbf16>,
    } else {
    }
    return
  }
  func.func @transform_0(%arg0: i32, %arg1: i32, %arg2: i32) -> (i32, i32) {
    %c0_i32 = arith.constant 0 : i32
    return %arg0, %arg2 : i32, i32
  }
  func.func @transform_1(%arg0: i32, %arg1: i32, %arg2: i32) -> (i32, i32) {
    %c0_i32 = arith.constant 0 : i32
    return %arg2, %arg1 : i32, i32
  }
  func.func @transform_2(%arg0: i32, %arg1: i32, %arg2: i32) -> (i32, i32) {
    %c0_i32 = arith.constant 0 : i32
    %c0_i32_0 = arith.constant 0 : i32
    return %c0_i32, %arg1 : i32, i32
  }
  func.func @transform_3(%arg0: i32, %arg1: i32, %arg2: i32) -> (i32, i32) {
    %c0_i32 = arith.constant 0 : i32
    return %arg0, %arg1 : i32, i32
  }
}

module attributes {stable_mosaic.version = 11 : i64} {
  func.func @_mm_bias_act_kernel(%arg0: i32, %arg1: i32, %arg2: i32, %arg3: memref<8x1024xbf16, #tpu.memory_space<vmem>>, %arg4: memref<1024x256xbf16, #tpu.memory_space<vmem>>, %arg5: memref<1x256xf32, #tpu.memory_space<vmem>>, %arg6: memref<8x256xbf16, #tpu.memory_space<vmem>>, %arg7: memref<8x256xf32, #tpu.memory_space<vmem>>) attributes {dimension_semantics = [#tpu.dimension_semantics<parallel>, #tpu.dimension_semantics<parallel>, #tpu.dimension_semantics<arbitrary>], iteration_bounds = array<i64: 1, 4, 1>, scalar_prefetch = 0 : i64, scratch_operands = 1 : i64, tpu.core_type = #tpu.core_type<tc>, window_params = [{transform_indices = @transform_0, window_bounds = array<i64: 8, 1024>}, {transform_indices = @transform_1, window_bounds = array<i64: 1024, 256>}, {transform_indices = @transform_2, window_bounds = array<i64: 1, 256>}, {transform_indices = @transform_3, window_bounds = array<i64: 8, 256>}]} {
    %c0_i32 = arith.constant 0 : i32
    %0 = arith.cmpi eq, %arg2, %c0_i32 : i32
    %1 = arith.extui %0 : i1 to i32
    %c0_i32_0 = arith.constant 0 : i32
    %2 = arith.cmpi ne, %1, %c0_i32_0 : i32
    scf.if %2 {
      %cst_10 = arith.constant 0.000000e+00 : f32
      %12 = vector.broadcast %cst_10 : f32 to vector<8x256xf32>
      %c0_11 = arith.constant 0 : index
      %c0_12 = arith.constant 0 : index
      %13 = vector.load %arg7[%c0_11, %c0_12] : memref<8x256xf32, #tpu.memory_space<vmem>>, vector<8x256xf32>
      tpu.vector_store %arg7[%c0_11, %c0_12], %12 {strides = array<i32>} : memref<8x256xf32, #tpu.memory_space<vmem>>, vector<8x256xf32>,
    } else {
    }
    %c0 = arith.constant 0 : index
    %c0_1 = arith.constant 0 : index
    %3 = vector.load %arg7[%c0, %c0_1] : memref<8x256xf32, #tpu.memory_space<vmem>>, vector<8x256xf32>
    %c0_2 = arith.constant 0 : index
    %c0_3 = arith.constant 0 : index
    %4 = vector.load %arg3[%c0_2, %c0_3] : memref<8x1024xbf16, #tpu.memory_space<vmem>>, vector<8x1024xbf16>
    %c0_4 = arith.constant 0 : index
    %c0_5 = arith.constant 0 : index
    %5 = vector.load %arg4[%c0_4, %c0_5] : memref<1024x256xbf16, #tpu.memory_space<vmem>>, vector<1024x256xbf16>
    %cst = arith.constant dense<0.000000e+00> : vector<8x256xf32>
    %6 = tpu.matmul %4, %5, %cst {dimension_numbers = #tpu.dot_dimension_numbers<[1], [0], [0], [1], [0, 0, 1, 1], [], []>} : vector<8x1024xbf16>, vector<1024x256xbf16>, vector<8x256xf32> -> vector<8x256xf32>
    %7 = arith.addf %3, %6 : vector<8x256xf32>
    %c0_6 = arith.constant 0 : index
    %c0_7 = arith.constant 0 : index
    %8 = vector.load %arg7[%c0_6, %c0_7] : memref<8x256xf32, #tpu.memory_space<vmem>>, vector<8x256xf32>
    tpu.vector_store %arg7[%c0_6, %c0_7], %7 {strides = array<i32>} : memref<8x256xf32, #tpu.memory_space<vmem>>, vector<8x256xf32>,
    %c0_i32_8 = arith.constant 0 : i32
    %9 = arith.cmpi eq, %arg2, %c0_i32_8 : i32
    %10 = arith.extui %9 : i1 to i32
    %c0_i32_9 = arith.constant 0 : i32
    %11 = arith.cmpi ne, %10, %c0_i32_9 : i32
    scf.if %11 {
      %c0_10 = arith.constant 0 : index
      %c0_11 = arith.constant 0 : index
      %12 = vector.load %arg7[%c0_10, %c0_11] : memref<8x256xf32, #tpu.memory_space<vmem>>, vector<8x256xf32>
      %c0_12 = arith.constant 0 : index
      %c0_13 = arith.constant 0 : index
      %13 = vector.load %arg5[%c0_12, %c0_13] : memref<1x256xf32, #tpu.memory_space<vmem>>, vector<1x256xf32>
      %14 = vector.broadcast %13 : vector<1x256xf32> to vector<8x256xf32>
      %15 = arith.addf %12, %14 : vector<8x256xf32>
      %cst_14 = arith.constant 0.000000e+00 : f32
      %16 = vector.broadcast %cst_14 : f32 to vector<8x256xf32>
      %17 = arith.maximumf %15, %16 : vector<8x256xf32>
      %18 = arith.truncf %17 : vector<8x256xf32> to vector<8x256xbf16>
      %c0_15 = arith.constant 0 : index
      %c0_16 = arith.constant 0 : index
      %19 = vector.load %arg6[%c0_15, %c0_16] : memref<8x256xbf16, #tpu.memory_space<vmem>>, vector<8x256xbf16>
      tpu.vector_store %arg6[%c0_15, %c0_16], %18 {strides = array<i32>} : memref<8x256xbf16, #tpu.memory_space<vmem>>, vector<8x256xbf16>,
    } else {
    }
    return
  }
  func.func @transform_0(%arg0: i32, %arg1: i32, %arg2: i32) -> (i32, i32) {
    %c0_i32 = arith.constant 0 : i32
    return %arg0, %arg2 : i32, i32
  }
  func.func @transform_1(%arg0: i32, %arg1: i32, %arg2: i32) -> (i32, i32) {
    %c0_i32 = arith.constant 0 : i32
    return %arg2, %arg1 : i32, i32
  }
  func.func @transform_2(%arg0: i32, %arg1: i32, %arg2: i32) -> (i32, i32) {
    %c0_i32 = arith.constant 0 : i32
    %c0_i32_0 = arith.constant 0 : i32
    return %c0_i32, %arg1 : i32, i32
  }
  func.func @transform_3(%arg0: i32, %arg1: i32, %arg2: i32) -> (i32, i32) {
    %c0_i32 = arith.constant 0 : i32
    return %arg0, %arg1 : i32, i32
  }
}

</mosaic_0001>

<bundles_post_ra>
// kernel: vgg_base_forward.20
= control target key start
LH: loop header
LB: loop body
LE: loop exit
PB: predicated region body
PF: predicated region fallthrough
CT: control target
= control target key end

     0   :  { %vm483_vm0 = vcmask 1044480   ;;  %vm484_vm1 = vcmask 1045504   ;;  %v1960_v1 = vmov 65535   ;;  %vm386_vm2 = vcmask 220160   ;;  %s2280_s1 = inlined_call_operand.vmem [shape: bf16[27,128], index: 1, kind: input, shape index: {}]   ;;  %s2281_s0 = inlined_call_operand.vmem [shape: bf16[512,27], index: 0, kind: input, shape index: {}]   ;;  %s2282_s2 = inlined_call_operand.vmem [shape: f32[1,128], index: 2, kind: input, shape index: {}]   ;;  %s2283_s3 = inlined_call_operand.vmem [shape: bf16[512,128], index: 3, kind: output, shape index: {}]  }
   0x1   :  { %v1926_v0 = vld [vmem:[%s2280_s1 + $0x8] sm:$0x3f]   ;;  %v485_v2 = vsel %vm483_vm0, 4294967295, %v1960_v1  ;;  %v1928_v4 = vld [vmem:[%s2281_s0] sm:$0xff]   ;;  %v1932_v10 = vld [vmem:[%s2281_s0 + $0x10] sm:$0xff]  }
   0x2   :  { %v486_v3 = vsel %vm484_vm1, %v485_v2, 0  ;;  %v1927_v6 = vld [vmem:[%s2280_s1] sm:$0xff]   ;;  %1857 = vmatprep.mubr.msk.bf16.mxu0 %vm386_vm2, %v1928_v4  ;;  %v1930_v8 = vld [vmem:[%s2281_s0 + $0x8] sm:$0xff]   ;;  %v1933_v11 = vld [vmem:[%s2281_s0 + $0x90] sm:$0xff]  }
   0x3   :  { %v488_v5 = vand.u32 %v1926_v0, %v486_v3  ;;  %v1929_v7 = vld [vmem:[%s2281_s0 + $0x80] sm:$0xff]   ;;  %v1931_v9 = vld [vmem:[%s2281_s0 + $0x88] sm:$0xff]   ;;  %v1934_v12 = vld [vmem:[%s2281_s0 + $0x18] sm:$0xff]  }
   0x4   :  { %1889 = vmatprep.mubr.msk.bf16.mxu1 %vm386_vm2, %v1929_v7  ;;  %v1935_v13 = vld [vmem:[%s2281_s0 + $0x98] sm:$0xff]   ;;  %v1936_v14 = vld [vmem:[%s2281_s0 + $0x20] sm:$0xff]   ;;  %v1938_v16 = vld [vmem:[%s2281_s0 + $0x28] sm:$0xff]  }
   0x5   :  { %1853 = vmatprep.subr.bf16.mxu0 %v488_v5  ;;  %1921 = vmatprep.subr.bf16.mxu1 %v488_v5  ;;  %v1937_v15 = vld [vmem:[%s2281_s0 + $0xa0] sm:$0xff]   ;;  %v1939_v17 = vld [vmem:[%s2281_s0 + $0xa8] sm:$0xff]   ;;  %v1940_v18 = vld [vmem:[%s2281_s0 + $0x30] sm:$0xff]  }
   0x6   :  { %1854 = vmatpush3.bf16.msra.mxu0 %v488_v5  ;;  %1923 = vmatpush3.bf16.msra.mxu1 %v488_v5  ;;  %v1941_v19 = vld [vmem:[%s2281_s0 + $0xb0] sm:$0xff]   ;;  %v1942_v20 = vld [vmem:[%s2281_s0 + $0x38] sm:$0xff]   ;;  %v1944_v22 = vld [vmem:[%s2281_s0 + $0x40] sm:$0xff]  }
   0x7   :  { %1855 = vmatprep.subr.bf16.mxu0 %v1927_v6  ;;  %1922 = vmatprep.subr.bf16.mxu1 %v1927_v6  ;;  %v1943_v21 = vld [vmem:[%s2281_s0 + $0xb8] sm:$0xff]   ;;  %v1945_v23 = vld [vmem:[%s2281_s0 + $0xc0] sm:$0xff]   ;;  %v1946_v24 = vld [vmem:[%s2281_s0 + $0x48] sm:$0xff]  }
   0x8   :  { %v1947_v25 = vld [vmem:[%s2281_s0 + $0xc8] sm:$0xff]   ;;  %v1948_v26 = vld [vmem:[%s2281_s0 + $0x50] sm:$0xff]   ;;  %v1950_v28 = vld [vmem:[%s2281_s0 + $0x58] sm:$0xff]  }
   0x9   :  { %v1949_v27 = vld [vmem:[%s2281_s0 + $0xd0] sm:$0xff]   ;;  %v1951_v29 = vld [vmem:[%s2281_s0 + $0xd8] sm:$0xff]   ;;  %v1952_v30 = vld [vmem:[%s2281_s0 + $0x60] sm:$0xff]  }
   0xa   :  { %1856 = vmatpush3.bf16.msra.mxu0 %v1927_v6  ;;  %1924 = vmatpush3.bf16.msra.mxu1 %v1927_v6  ;;  %v1953_v31 = vld [vmem:[%s2281_s0 + $0xe0] sm:$0xff]   ;;  %v1954_v32 = vld [vmem:[%s2281_s0 + $0x68] sm:$0xff]   ;;  %v1956_v34 = vld [vmem:[%s2281_s0 + $0x70] sm:$0xff]  }
   0xb   :  { %v1955_v33 = vld [vmem:[%s2281_s0 + $0xe8] sm:$0xff]   ;;  %v1957_v35 = vld [vmem:[%s2281_s0 + $0xf0] sm:$0xff]   ;;  %v1958_v36 = vld [vmem:[%s2281_s0 + $0x78] sm:$0xff]  }
   0xc   :  { %v1959_v37 = vld [vmem:[%s2281_s0 + $0xf8] sm:$0xff]   ;;  %v2118_v38 = vld [vmem:[%s2282_s2] ss:$0 sm:$0xff] }
   0xd   :  { %1858 = vmatmul.mubr.msk.bf16.vlgmr.msra.gmra.mxu0 %vm386_vm2, %v1930_v8  ;;  %1890 = vmatmul.mubr.msk.bf16.vlgmr.msra.gmra.mxu1 %vm386_vm2, %v1931_v9 }
   0xe   :  { %1861 = vmatprep.mubr.msk.bf16.mxu0 %vm386_vm2, %v1932_v10  ;;  %1893 = vmatprep.mubr.msk.bf16.mxu1 %vm386_vm2, %v1933_v11 }
  0x15   :  { %1862 = vmatmul.mubr.msk.bf16.gmra.mxu0 %vm386_vm2, %v1934_v12  ;;  %1894 = vmatmul.mubr.msk.bf16.gmra.mxu1 %vm386_vm2, %v1935_v13 }
  0x16   :  { %1865 = vmatprep.mubr.msk.bf16.mxu0 %vm386_vm2, %v1936_v14  ;;  %1897 = vmatprep.mubr.msk.bf16.mxu1 %vm386_vm2, %v1937_v15 }
  0x1d   :  { %1866 = vmatmul.mubr.msk.bf16.gmra.mxu0 %vm386_vm2, %v1938_v16  ;;  %1898 = vmatmul.mubr.msk.bf16.gmra.mxu1 %vm386_vm2, %v1939_v17 }
  0x1e   :  { %1869 = vmatprep.mubr.msk.bf16.mxu0 %vm386_vm2, %v1940_v18  ;;  %1901 = vmatprep.mubr.msk.bf16.mxu1 %vm386_vm2, %v1941_v19 }
  0x25   :  { %1870 = vmatmul.mubr.msk.bf16.gmra.mxu0 %vm386_vm2, %v1942_v20  ;;  %1902 = vmatmul.mubr.msk.bf16.gmra.mxu1 %vm386_vm2, %v1943_v21 }
  0x26   :  { %1873 = vmatprep.mubr.msk.bf16.mxu0 %vm386_vm2, %v1944_v22  ;;  %1905 = vmatprep.mubr.msk.bf16.mxu1 %vm386_vm2, %v1945_v23 }
  0x2d   :  { %1874 = vmatmul.mubr.msk.bf16.gmra.mxu0 %vm386_vm2, %v1946_v24  ;;  %1906 = vmatmul.mubr.msk.bf16.gmra.mxu1 %vm386_vm2, %v1947_v25 }
  0x2e   :  { %1877 = vmatprep.mubr.msk.bf16.mxu0 %vm386_vm2, %v1948_v26  ;;  %1909 = vmatprep.mubr.msk.bf16.mxu1 %vm386_vm2, %v1949_v27 }
  0x35   :  { %1878 = vmatmul.mubr.msk.bf16.gmra.mxu0 %vm386_vm2, %v1950_v28  ;;  %1910 = vmatmul.mubr.msk.bf16.gmra.mxu1 %vm386_vm2, %v1951_v29 }
  0x36   :  { %1881 = vmatprep.mubr.msk.bf16.mxu0 %vm386_vm2, %v1952_v30  ;;  %1913 = vmatprep.mubr.msk.bf16.mxu1 %vm386_vm2, %v1953_v31 }
  0x3d   :  { %1882 = vmatmul.mubr.msk.bf16.gmra.mxu0 %vm386_vm2, %v1954_v32  ;;  %1914 = vmatmul.mubr.msk.bf16.gmra.mxu1 %vm386_vm2, %v1955_v33 }
  0x3e   :  { %1885 = vmatprep.mubr.msk.bf16.mxu0 %vm386_vm2, %v1956_v34  ;;  %1917 = vmatprep.mubr.msk.bf16.mxu1 %vm386_vm2, %v1957_v35 }
  0x45   :  { %1886 = vmatmul.mubr.msk.bf16.gmra.mxu0 %vm386_vm2, %v1958_v36  ;;  %1918 = vmatmul.mubr.msk.bf16.gmra.mxu1 %vm386_vm2, %v1959_v37 }
  0xcd   :  { %v1859_v39 = vpop.f32.mrf.mxu0  ;;  %v1891_v40 = vpop.f32.mrf.mxu1 }
  0xce   :  { %v983_v41 = vadd.f32 %v1859_v39, %v2118_v38  ;;  %v1015_v42 = vadd.f32 %v1891_v40, %v2118_v38 }
  0xcf   :  { %v524_v43 = vpop.f32.mrf.mxu0  ;;  %v652_v44 = vpop.f32.mrf.mxu1 }
  0xd0   :  { %v981_v45 = vadd.f32 %v2118_v38, %v524_v43  ;;  %v1013_v46 = vadd.f32 %v2118_v38, %v652_v44  ;;  %v1047_v51 = vmax.f32 %v983_v41, 0.0  ;;  %v1079_v52 = vmax.f32 %v1015_v42, 0.0 }
  0xd1   :  { %v1860_v47 = vpop.f32.mrf.mxu0  ;;  %v1892_v48 = vpop.f32.mrf.mxu1 }
  0xd2   :  { %v984_v49 = vadd.f32 %v1860_v47, %v2118_v38  ;;  %v1016_v50 = vadd.f32 %v1892_v48, %v2118_v38  ;;  %v1045_v59 = vmax.f32 %v981_v45, 0.0  ;;  %v1077_v60 = vmax.f32 %v1013_v46, 0.0 }
  0xd3   :  { %v527_v53 = vpop.f32.mrf.mxu0  ;;  %v655_v54 = vpop.f32.mrf.mxu1 }
  0xd4   :  { %v1048_v55 = vmax.f32 %v984_v49, 0.0  ;;  %v1080_v56 = vmax.f32 %v1016_v50, 0.0  ;;  %v982_v57 = vadd.f32 %v2118_v38, %v527_v53  ;;  %v1014_v58 = vadd.f32 %v2118_v38, %v655_v54 }
  0xd5   :  { %v1863_v61 = vpop.f32.mrf.mxu0  ;;  %v1895_v62 = vpop.f32.mrf.mxu1 }
  0xd6   :  { %v1636_v63 = vpack.c.bf16 %v1048_v55, %v1047_v51  ;;  %v1716_v0 = vpack.c.bf16 %v1080_v56, %v1079_v52  ;;  %v1046_v1 = vmax.f32 %v982_v57, 0.0  ;;  %v1078_v2 = vmax.f32 %v1014_v58, 0.0 }
  0xd7   :  { %v987_v3 = vadd.f32 %v1863_v61, %v2118_v38  ;;  %v1019_v4 = vadd.f32 %v1895_v62, %v2118_v38  ;;  %v540_v5 = vpop.f32.mrf.mxu0  ;;  %v668_v6 = vpop.f32.mrf.mxu1 }
  0xd8   :  { %1788 = vst [vmem:[%s2283_s3 + $0x8] sm:$0xff] %v1636_v63   ;;  %1804 = vst [vmem:[%s2283_s3 + $0x88] sm:$0xff] %v1716_v0   ;;  %v1631_v7 = vpack.c.bf16 %v1046_v1, %v1045_v59  ;;  %v1711_v8 = vpack.c.bf16 %v1078_v2, %v1077_v60  ;;  %v985_v9 = vadd.f32 %v2118_v38, %v540_v5 }
  0xd9   :  { %v1017_v10 = vadd.f32 %v2118_v38, %v668_v6  ;;  %v1864_v11 = vpop.f32.mrf.mxu0  ;;  %v1896_v12 = vpop.f32.mrf.mxu1  ;;  %v1051_v15 = vmax.f32 %v987_v3, 0.0  ;;  %v1083_v16 = vmax.f32 %v1019_v4, 0.0 }
  0xda   :  { %1632 = vst [vmem:[%s2283_s3] sm:$0xff] %v1631_v7   ;;  %1803 = vst [vmem:[%s2283_s3 + $0x80] sm:$0xff] %v1711_v8   ;;  %v988_v13 = vadd.f32 %v1864_v11, %v2118_v38  ;;  %v1020_v14 = vadd.f32 %v1896_v12, %v2118_v38  ;;  %v1049_v23 = vmax.f32 %v985_v9, 0.0 }
  0xdb   :  { %v543_v17 = vpop.f32.mrf.mxu0  ;;  %v671_v18 = vpop.f32.mrf.mxu1  ;;  %v1081_v24 = vmax.f32 %v1017_v10, 0.0 }
  0xdc   :  { %v1052_v19 = vmax.f32 %v988_v13, 0.0  ;;  %v1084_v20 = vmax.f32 %v1020_v14, 0.0  ;;  %v986_v21 = vadd.f32 %v2118_v38, %v543_v17  ;;  %v1018_v22 = vadd.f32 %v2118_v38, %v671_v18 }
  0xdd   :  { %v1867_v25 = vpop.f32.mrf.mxu0  ;;  %v1899_v26 = vpop.f32.mrf.mxu1 }
  0xde   :  { %v1646_v27 = vpack.c.bf16 %v1052_v19, %v1051_v15  ;;  %v1726_v28 = vpack.c.bf16 %v1084_v20, %v1083_v16  ;;  %v1050_v29 = vmax.f32 %v986_v21, 0.0  ;;  %v1082_v30 = vmax.f32 %v1018_v22, 0.0 }
  0xdf   :  { %v991_v31 = vadd.f32 %v1867_v25, %v2118_v38  ;;  %v1023_v32 = vadd.f32 %v1899_v26, %v2118_v38  ;;  %v556_v33 = vpop.f32.mrf.mxu0  ;;  %v684_v34 = vpop.f32.mrf.mxu1 }
  0xe0   :  { %1790 = vst [vmem:[%s2283_s3 + $0x18] sm:$0xff] %v1646_v27   ;;  %1806 = vst [vmem:[%s2283_s3 + $0x98] sm:$0xff] %v1726_v28   ;;  %v1641_v35 = vpack.c.bf16 %v1050_v29, %v1049_v23  ;;  %v1721_v36 = vpack.c.bf16 %v1082_v30, %v1081_v24  ;;  %v989_v37 = vadd.f32 %v2118_v38, %v556_v33 }
  0xe1   :  { %v1021_v39 = vadd.f32 %v2118_v38, %v684_v34  ;;  %v1868_v40 = vpop.f32.mrf.mxu0  ;;  %v1900_v41 = vpop.f32.mrf.mxu1  ;;  %v1055_v44 = vmax.f32 %v991_v31, 0.0  ;;  %v1087_v45 = vmax.f32 %v1023_v32, 0.0 }
  0xe2   :  { %1789 = vst [vmem:[%s2283_s3 + $0x10] sm:$0xff] %v1641_v35   ;;  %1805 = vst [vmem:[%s2283_s3 + $0x90] sm:$0xff] %v1721_v36   ;;  %v992_v42 = vadd.f32 %v1868_v40, %v2118_v38  ;;  %v1024_v43 = vadd.f32 %v1900_v41, %v2118_v38  ;;  %v1053_v52 = vmax.f32 %v989_v37, 0.0 }
  0xe3   :  { %v559_v46 = vpop.f32.mrf.mxu0  ;;  %v687_v47 = vpop.f32.mrf.mxu1  ;;  %v1085_v53 = vmax.f32 %v1021_v39, 0.0 }
  0xe4   :  { %v1056_v48 = vmax.f32 %v992_v42, 0.0  ;;  %v1088_v49 = vmax.f32 %v1024_v43, 0.0  ;;  %v990_v50 = vadd.f32 %v2118_v38, %v559_v46  ;;  %v1022_v51 = vadd.f32 %v2118_v38, %v687_v47 }
  0xe5   :  { %v1871_v54 = vpop.f32.mrf.mxu0  ;;  %v1903_v55 = vpop.f32.mrf.mxu1 }
  0xe6   :  { %v1656_v56 = vpack.c.bf16 %v1056_v48, %v1055_v44  ;;  %v1736_v57 = vpack.c.bf16 %v1088_v49, %v1087_v45  ;;  %v1054_v58 = vmax.f32 %v990_v50, 0.0  ;;  %v1086_v59 = vmax.f32 %v1022_v51, 0.0 }
  0xe7   :  { %v995_v60 = vadd.f32 %v1871_v54, %v2118_v38  ;;  %v1027_v61 = vadd.f32 %v1903_v55, %v2118_v38  ;;  %v572_v62 = vpop.f32.mrf.mxu0  ;;  %v700_v63 = vpop.f32.mrf.mxu1 }
  0xe8   :  { %1792 = vst [vmem:[%s2283_s3 + $0x28] sm:$0xff] %v1656_v56   ;;  %1808 = vst [vmem:[%s2283_s3 + $0xa8] sm:$0xff] %v1736_v57   ;;  %v1651_v0 = vpack.c.bf16 %v1054_v58, %v1053_v52  ;;  %v1731_v1 = vpack.c.bf16 %v1086_v59, %v1085_v53  ;;  %v993_v2 = vadd.f32 %v2118_v38, %v572_v62 }
  0xe9   :  { %v1025_v3 = vadd.f32 %v2118_v38, %v700_v63  ;;  %v1872_v4 = vpop.f32.mrf.mxu0  ;;  %v1904_v5 = vpop.f32.mrf.mxu1  ;;  %v1059_v8 = vmax.f32 %v995_v60, 0.0  ;;  %v1091_v9 = vmax.f32 %v1027_v61, 0.0 }
  0xea   :  { %1791 = vst [vmem:[%s2283_s3 + $0x20] sm:$0xff] %v1651_v0   ;;  %1807 = vst [vmem:[%s2283_s3 + $0xa0] sm:$0xff] %v1731_v1   ;;  %v996_v6 = vadd.f32 %v1872_v4, %v2118_v38  ;;  %v1028_v7 = vadd.f32 %v1904_v5, %v2118_v38  ;;  %v1057_v16 = vmax.f32 %v993_v2, 0.0 }
  0xeb   :  { %v575_v10 = vpop.f32.mrf.mxu0  ;;  %v703_v11 = vpop.f32.mrf.mxu1  ;;  %v1089_v17 = vmax.f32 %v1025_v3, 0.0 }
  0xec   :  { %v1060_v12 = vmax.f32 %v996_v6, 0.0  ;;  %v1092_v13 = vmax.f32 %v1028_v7, 0.0  ;;  %v994_v14 = vadd.f32 %v2118_v38, %v575_v10  ;;  %v1026_v15 = vadd.f32 %v2118_v38, %v703_v11 }
  0xed   :  { %v1875_v18 = vpop.f32.mrf.mxu0  ;;  %v1907_v19 = vpop.f32.mrf.mxu1 }
  0xee   :  { %v1666_v20 = vpack.c.bf16 %v1060_v12, %v1059_v8  ;;  %v1746_v21 = vpack.c.bf16 %v1092_v13, %v1091_v9  ;;  %v1058_v22 = vmax.f32 %v994_v14, 0.0  ;;  %v1090_v23 = vmax.f32 %v1026_v15, 0.0 }
  0xef   :  { %v999_v24 = vadd.f32 %v1875_v18, %v2118_v38  ;;  %v1031_v25 = vadd.f32 %v1907_v19, %v2118_v38  ;;  %v588_v26 = vpop.f32.mrf.mxu0  ;;  %v716_v27 = vpop.f32.mrf.mxu1 }
  0xf0   :  { %1794 = vst [vmem:[%s2283_s3 + $0x38] sm:$0xff] %v1666_v20   ;;  %1810 = vst [vmem:[%s2283_s3 + $0xb8] sm:$0xff] %v1746_v21   ;;  %v1661_v28 = vpack.c.bf16 %v1058_v22, %v1057_v16  ;;  %v1741_v29 = vpack.c.bf16 %v1090_v23, %v1089_v17  ;;  %v997_v30 = vadd.f32 %v2118_v38, %v588_v26 }
  0xf1   :  { %v1029_v31 = vadd.f32 %v2118_v38, %v716_v27  ;;  %v1876_v32 = vpop.f32.mrf.mxu0  ;;  %v1908_v33 = vpop.f32.mrf.mxu1  ;;  %v1063_v36 = vmax.f32 %v999_v24, 0.0  ;;  %v1095_v37 = vmax.f32 %v1031_v25, 0.0 }
  0xf2   :  { %1793 = vst [vmem:[%s2283_s3 + $0x30] sm:$0xff] %v1661_v28   ;;  %1809 = vst [vmem:[%s2283_s3 + $0xb0] sm:$0xff] %v1741_v29   ;;  %v1000_v34 = vadd.f32 %v1876_v32, %v2118_v38  ;;  %v1032_v35 = vadd.f32 %v1908_v33, %v2118_v38  ;;  %v1061_v45 = vmax.f32 %v997_v30, 0.0 }
  0xf3   :  { %v591_v39 = vpop.f32.mrf.mxu0  ;;  %v719_v40 = vpop.f32.mrf.mxu1  ;;  %v1093_v46 = vmax.f32 %v1029_v31, 0.0 }
  0xf4   :  { %v1064_v41 = vmax.f32 %v1000_v34, 0.0  ;;  %v1096_v42 = vmax.f32 %v1032_v35, 0.0  ;;  %v998_v43 = vadd.f32 %v2118_v38, %v591_v39  ;;  %v1030_v44 = vadd.f32 %v2118_v38, %v719_v40 }
  0xf5   :  { %v1879_v47 = vpop.f32.mrf.mxu0  ;;  %v1911_v48 = vpop.f32.mrf.mxu1 }
  0xf6   :  { %v1676_v49 = vpack.c.bf16 %v1064_v41, %v1063_v36  ;;  %v1756_v50 = vpack.c.bf16 %v1096_v42, %v1095_v37  ;;  %v1062_v51 = vmax.f32 %v998_v43, 0.0  ;;  %v1094_v52 = vmax.f32 %v1030_v44, 0.0 }
  0xf7   :  { %v1003_v53 = vadd.f32 %v1879_v47, %v2118_v38  ;;  %v1035_v54 = vadd.f32 %v1911_v48, %v2118_v38  ;;  %v604_v55 = vpop.f32.mrf.mxu0  ;;  %v732_v56 = vpop.f32.mrf.mxu1 }
  0xf8   :  { %1796 = vst [vmem:[%s2283_s3 + $0x48] sm:$0xff] %v1676_v49   ;;  %1812 = vst [vmem:[%s2283_s3 + $0xc8] sm:$0xff] %v1756_v50   ;;  %v1671_v57 = vpack.c.bf16 %v1062_v51, %v1061_v45  ;;  %v1751_v58 = vpack.c.bf16 %v1094_v52, %v1093_v46  ;;  %v1001_v59 = vadd.f32 %v2118_v38, %v604_v55 }
  0xf9   :  { %v1033_v60 = vadd.f32 %v2118_v38, %v732_v56  ;;  %v1880_v61 = vpop.f32.mrf.mxu0  ;;  %v1912_v62 = vpop.f32.mrf.mxu1  ;;  %v1067_v1 = vmax.f32 %v1003_v53, 0.0  ;;  %v1099_v2 = vmax.f32 %v1035_v54, 0.0 }
  0xfa   :  { %1795 = vst [vmem:[%s2283_s3 + $0x40] sm:$0xff] %v1671_v57   ;;  %1811 = vst [vmem:[%s2283_s3 + $0xc0] sm:$0xff] %v1751_v58   ;;  %v1004_v63 = vadd.f32 %v1880_v61, %v2118_v38  ;;  %v1036_v0 = vadd.f32 %v1912_v62, %v2118_v38  ;;  %v1065_v9 = vmax.f32 %v1001_v59, 0.0 }
  0xfb   :  { %v607_v3 = vpop.f32.mrf.mxu0  ;;  %v735_v4 = vpop.f32.mrf.mxu1  ;;  %v1097_v10 = vmax.f32 %v1033_v60, 0.0 }
  0xfc   :  { %v1068_v5 = vmax.f32 %v1004_v63, 0.0  ;;  %v1100_v6 = vmax.f32 %v1036_v0, 0.0  ;;  %v1002_v7 = vadd.f32 %v2118_v38, %v607_v3  ;;  %v1034_v8 = vadd.f32 %v2118_v38, %v735_v4 }
  0xfd   :  { %v1883_v11 = vpop.f32.mrf.mxu0  ;;  %v1915_v12 = vpop.f32.mrf.mxu1 }
  0xfe   :  { %v1686_v13 = vpack.c.bf16 %v1068_v5, %v1067_v1  ;;  %v1766_v14 = vpack.c.bf16 %v1100_v6, %v1099_v2  ;;  %v1066_v15 = vmax.f32 %v1002_v7, 0.0  ;;  %v1098_v16 = vmax.f32 %v1034_v8, 0.0 }
  0xff   :  { %v1007_v17 = vadd.f32 %v1883_v11, %v2118_v38  ;;  %v1039_v18 = vadd.f32 %v1915_v12, %v2118_v38  ;;  %v620_v19 = vpop.f32.mrf.mxu0  ;;  %v748_v20 = vpop.f32.mrf.mxu1 }
 0x100   :  { %1798 = vst [vmem:[%s2283_s3 + $0x58] sm:$0xff] %v1686_v13   ;;  %1814 = vst [vmem:[%s2283_s3 + $0xd8] sm:$0xff] %v1766_v14   ;;  %v1681_v21 = vpack.c.bf16 %v1066_v15, %v1065_v9  ;;  %v1761_v22 = vpack.c.bf16 %v1098_v16, %v1097_v10  ;;  %v1005_v23 = vadd.f32 %v2118_v38, %v620_v19 }
 0x101   :  { %v1037_v24 = vadd.f32 %v2118_v38, %v748_v20  ;;  %v1884_v25 = vpop.f32.mrf.mxu0  ;;  %v1916_v26 = vpop.f32.mrf.mxu1  ;;  %v1071_v29 = vmax.f32 %v1007_v17, 0.0  ;;  %v1103_v30 = vmax.f32 %v1039_v18, 0.0 }
 0x102   :  { %1797 = vst [vmem:[%s2283_s3 + $0x50] sm:$0xff] %v1681_v21   ;;  %1813 = vst [vmem:[%s2283_s3 + $0xd0] sm:$0xff] %v1761_v22   ;;  %v1008_v27 = vadd.f32 %v1884_v25, %v2118_v38  ;;  %v1040_v28 = vadd.f32 %v1916_v26, %v2118_v38  ;;  %v1069_v37 = vmax.f32 %v1005_v23, 0.0 }
 0x103   :  { %v623_v31 = vpop.f32.mrf.mxu0  ;;  %v751_v32 = vpop.f32.mrf.mxu1  ;;  %v1101_v39 = vmax.f32 %v1037_v24, 0.0 }
 0x104   :  { %v1072_v33 = vmax.f32 %v1008_v27, 0.0  ;;  %v1104_v34 = vmax.f32 %v1040_v28, 0.0  ;;  %v1006_v35 = vadd.f32 %v2118_v38, %v623_v31  ;;  %v1038_v36 = vadd.f32 %v2118_v38, %v751_v32 }
 0x105   :  { %v1887_v40 = vpop.f32.mrf.mxu0  ;;  %v1919_v41 = vpop.f32.mrf.mxu1 }
 0x106   :  { %v1696_v42 = vpack.c.bf16 %v1072_v33, %v1071_v29  ;;  %v1776_v43 = vpack.c.bf16 %v1104_v34, %v1103_v30  ;;  %v1070_v44 = vmax.f32 %v1006_v35, 0.0  ;;  %v1102_v45 = vmax.f32 %v1038_v36, 0.0 }
 0x107   :  { %v1011_v46 = vadd.f32 %v1887_v40, %v2118_v38  ;;  %v1043_v47 = vadd.f32 %v1919_v41, %v2118_v38  ;;  %v636_v48 = vpop.f32.mrf.mxu0  ;;  %v764_v49 = vpop.f32.mrf.mxu1 }
 0x108   :  { %1800 = vst [vmem:[%s2283_s3 + $0x68] sm:$0xff] %v1696_v42   ;;  %1816 = vst [vmem:[%s2283_s3 + $0xe8] sm:$0xff] %v1776_v43   ;;  %v1691_v50 = vpack.c.bf16 %v1070_v44, %v1069_v37  ;;  %v1771_v51 = vpack.c.bf16 %v1102_v45, %v1101_v39  ;;  %v1009_v52 = vadd.f32 %v2118_v38, %v636_v48 }
 0x109   :  { %v1041_v53 = vadd.f32 %v2118_v38, %v764_v49  ;;  %v1888_v54 = vpop.f32.mrf.mxu0  ;;  %v1920_v55 = vpop.f32.mrf.mxu1  ;;  %v1075_v58 = vmax.f32 %v1011_v46, 0.0  ;;  %v1107_v59 = vmax.f32 %v1043_v47, 0.0 }
 0x10a   :  { %1799 = vst [vmem:[%s2283_s3 + $0x60] sm:$0xff] %v1691_v50   ;;  %1815 = vst [vmem:[%s2283_s3 + $0xe0] sm:$0xff] %v1771_v51   ;;  %v1012_v56 = vadd.f32 %v1888_v54, %v2118_v38  ;;  %v1044_v57 = vadd.f32 %v1920_v55, %v2118_v38  ;;  %v1073_v2 = vmax.f32 %v1009_v52, 0.0 }
 0x10b   :  { %v639_v60 = vpop.f32.mrf.mxu0  ;;  %v767_v61 = vpop.f32.mrf.mxu1  ;;  %v1105_v3 = vmax.f32 %v1041_v53, 0.0 }
 0x10c   :  { %v1076_v62 = vmax.f32 %v1012_v56, 0.0  ;;  %v1108_v63 = vmax.f32 %v1044_v57, 0.0  ;;  %v1010_v0 = vadd.f32 %v2118_v38, %v639_v60  ;;  %v1042_v1 = vadd.f32 %v2118_v38, %v767_v61 }
 0x10e   :  { %v1706_v4 = vpack.c.bf16 %v1076_v62, %v1075_v58  ;;  %v1786_v5 = vpack.c.bf16 %v1108_v63, %v1107_v59  ;;  %v1074_v6 = vmax.f32 %v1010_v0, 0.0  ;;  %v1106_v7 = vmax.f32 %v1042_v1, 0.0 }
 0x110   :  { %1802 = vst [vmem:[%s2283_s3 + $0x78] sm:$0xff] %v1706_v4   ;;  %1818 = vst [vmem:[%s2283_s3 + $0xf8] sm:$0xff] %v1786_v5   ;;  %v1701_v8 = vpack.c.bf16 %v1074_v6, %v1073_v2  ;;  %v1781_v9 = vpack.c.bf16 %v1106_v7, %v1105_v3 }
 0x112   :  { %1801 = vst [vmem:[%s2283_s3 + $0x70] sm:$0xff] %v1701_v8   ;;  %1817 = vst [vmem:[%s2283_s3 + $0xf0] sm:$0xff] %v1781_v9  }

// kernel: vgg_base_forward.22
= control target key start
LH: loop header
LB: loop body
LE: loop exit
PB: predicated region body
PF: predicated region fallthrough
CT: control target
= control target key end

     0   :  { %s138_s0 = inlined_call_operand.vmem [shape: bf16[16,512], index: 0, kind: input, shape index: {}]   ;;  %s139_s1 = inlined_call_operand.vmem [shape: bf16[16,512], index: 1, kind: input, shape index: {}]   ;;  %s140_s2 = inlined_call_operand.vmem [shape: bf16[16,512], index: 2, kind: input, shape index: {}]   ;;  %s141_s3 = inlined_call_operand.vmem [shape: bf16[16,512], index: 3, kind: input, shape index: {}]   ;;  %s142_s4 = inlined_call_operand.vmem [shape: bf16[16,512], index: 4, kind: output, shape index: {}]  }
   0x1   :  { %v17_v0 = vld [vmem:[%s138_s0] sm:$0xff]  ;;  %v18_v4 = vld [vmem:[%s138_s0 + $0x8] sm:$0xff]  ;;  %v19_v9 = vld [vmem:[%s138_s0 + $0x10] sm:$0xff] }
   0x2   :  { %v21_v1 = vld [vmem:[%s139_s1] sm:$0xff]  ;;  %v22_v5 = vld [vmem:[%s139_s1 + $0x8] sm:$0xff]  ;;  %v23_v12 = vld [vmem:[%s139_s1 + $0x10] sm:$0xff] }
   0x3   :  { %v29_v2 = vld [vmem:[%s140_s2] sm:$0xff]  ;;  %v25_v3 = vmax.bf16 %v21_v1, %v17_v0  ;;  %v26_v7 = vmax.bf16 %v22_v5, %v18_v4  ;;  %v30_v8 = vld [vmem:[%s140_s2 + $0x8] sm:$0xff]  ;;  %v31_v13 = vld [vmem:[%s140_s2 + $0x10] sm:$0xff]  ;;  %v27_v15 = vmax.bf16 %v23_v12, %v19_v9 }
   0x4   :  { %v37_v6 = vld [vmem:[%s141_s3] sm:$0xff]  ;;  %v38_v11 = vld [vmem:[%s141_s3 + $0x8] sm:$0xff]  ;;  %v20_v16 = vld [vmem:[%s138_s0 + $0x18] sm:$0xff] }
   0x5   :  { %v33_v10 = vmax.bf16 %v29_v2, %v25_v3  ;;  %v34_v14 = vmax.bf16 %v30_v8, %v26_v7  ;;  %v24_v17 = vld [vmem:[%s139_s1 + $0x18] sm:$0xff]  ;;  %v39_v20 = vld [vmem:[%s141_s3 + $0x10] sm:$0xff]  ;;  %v35_v23 = vmax.bf16 %v31_v13, %v27_v15 }
   0x6   :  { %v32_v18 = vld [vmem:[%s140_s2 + $0x18] sm:$0xff]  ;;  %v28_v21 = vmax.bf16 %v24_v17, %v20_v16 }
   0x7   :  { %v41_v19 = vmax.bf16 %v37_v6, %v33_v10  ;;  %v42_v22 = vmax.bf16 %v38_v11, %v34_v14  ;;  %v40_v24 = vld [vmem:[%s141_s3 + $0x18] sm:$0xff]  ;;  %v43_v26 = vmax.bf16 %v39_v20, %v35_v23 }
   0x8   :  { %v36_v25 = vmax.bf16 %v32_v18, %v28_v21 }
   0x9   :  { %45 = vst [vmem:[%s142_s4] sm:$0xff] %v41_v19  ;;  %46 = vst [vmem:[%s142_s4 + $0x8] sm:$0xff] %v42_v22 }
   0xa   :  { %v44_v27 = vmax.bf16 %v40_v24, %v36_v25  ;;  %47 = vst [vmem:[%s142_s4 + $0x10] sm:$0xff] %v43_v26 }
   0xc   :  { %48 = vst [vmem:[%s142_s4 + $0x18] sm:$0xff] %v44_v27 }

// kernel: vgg_base_forward.21
= control target key start
LH: loop header
LB: loop body
LE: loop exit
PB: predicated region body
PF: predicated region fallthrough
CT: control target
= control target key end

     0   :  { %v3994_v0 = vmov 0   ;;  %vm1427_vm0 = vcmask 523264   ;;  %s5202_s1 = inlined_call_operand.vmem [shape: bf16[576,128], index: 1, kind: input, shape index: {}]   ;;  %s5203_s0 = inlined_call_operand.vmem [shape: bf16[512,576], index: 0, kind: input, shape index: {}]   ;;  %s5204_s2 = inlined_call_operand.vmem [shape: f32[1,128], index: 2, kind: input, shape index: {}]   ;;  %s5205_s3 = inlined_call_operand.vmem [shape: bf16[512,128], index: 3, kind: output, shape index: {}]  }
   0x1   :  { %1524 = vmatprep.subr.bf16.mxu0 %v3994_v0  ;;  %3701 = vmatprep.subr.bf16.mxu1 %v3994_v0  ;;  %v3734_v1 = vld [vmem:[%s5202_s1 + $0x38] sm:$0xff]   ;;  %v3735_v2 = vld [vmem:[%s5202_s1 + $0x30] sm:$0xff]   ;;  %v3736_v3 = vld [vmem:[%s5202_s1 + $0x28] sm:$0xff]  }
   0x2   :  { %1525 = vmatpush1.bf16.msra.mxu0 %v3734_v1  ;;  %3717 = vmatpush1.bf16.msra.mxu1 %v3734_v1  ;;  %v3737_v4 = vld [vmem:[%s5202_s1 + $0x20] sm:$0xff]   ;;  %v3738_v5 = vld [vmem:[%s5202_s1 + $0x18] sm:$0xff]   ;;  %v3739_v7 = vld [vmem:[%s5202_s1 + $0x10] sm:$0xff]  }
   0x3   :  { %1526 = vmatprep.subr.bf16.mxu0 %v3994_v0  ;;  %3702 = vmatprep.subr.bf16.mxu1 %v3994_v0  ;;  %v3752_v6 = vld [vmem:[%s5203_s0 + $0x4] ss:$20 sps:$4 sm:$0xff]   ;;  %v3740_v9 = vld [vmem:[%s5202_s1 + $0x8] sm:$0xff]   ;;  %v3743_v12 = vld [vmem:[%s5202_s1 + $0x70] sm:$0xff]  }
   0x4   :  { %v3755_v8 = vld [vmem:[%s5203_s0 + $0x3c4] ss:$20 sps:$4 sm:$0xff]   ;;  %1556 = vmatprep.mubr.bf16.mxu0 %v3752_v6  ;;  %v3744_v13 = vld [vmem:[%s5202_s1 + $0x68] sm:$0xff]   ;;  %v3747_v16 = vld [vmem:[%s5202_s1 + $0x50] sm:$0xff]  }
   0x5   :  { %1748 = vmatprep.mubr.bf16.mxu1 %v3755_v8  ;;  %v3741_v10 = vld [vmem:[%s5202_s1] sm:$0xff]   ;;  %v3742_v11 = vld [vmem:[%s5202_s1 + $0x78] sm:$0xff]   ;;  %v3748_v17 = vld [vmem:[%s5202_s1 + $0x48] sm:$0xff]  }
   0x6   :  { %1527 = vmatpush1.bf16.msra.mxu0 %v3735_v2  ;;  %3718 = vmatpush1.bf16.msra.mxu1 %v3735_v2  ;;  %v3745_v14 = vld [vmem:[%s5202_s1 + $0x60] sm:$0xff]   ;;  %v3746_v15 = vld [vmem:[%s5202_s1 + $0x58] sm:$0xff]   ;;  %v3805_v25 = vld [vmem:[%s5202_s1 + $0x110] sm:$0xff]  }
   0x7   :  { %1528 = vmatprep.subr.bf16.mxu0 %v3994_v0  ;;  %3703 = vmatprep.subr.bf16.mxu1 %v3994_v0  ;;  %v3749_v18 = vld [vmem:[%s5202_s1 + $0x40] sm:$0xff]   ;;  %v3756_v19 = vld [vmem:[%s5202_s1 + $0x118] sm:$0xff]   ;;  %v3758_v26 = vld [vmem:[%s5202_s1 + $0xb0] sm:$0xff]  }
   0x8   :  { %v3750_v20 = vld [vmem:[%s5203_s0] ss:$20 sps:$4 sm:$0xff]   ;;  %v3757_v22 = vld [vmem:[%s5202_s1 + $0xb8] sm:$0xff]   ;;  %v3765_v29 = vld [vmem:[%s5202_s1 + $0xa8] sm:$0xff]  }
   0x9   :  { %v3753_v21 = vld [vmem:[%s5203_s0 + $0x3c0] ss:$20 sps:$4 sm:$0xff]   ;;  %v3763_v27 = vld [vmem:[%s5203_s0 + $0x28] ss:$20 sps:$4 sm:$0xff]   ;;  %v3771_v34 = vld [vmem:[%s5203_s0 + $0x50] ss:$20 sps:$4 sm:$0xff]  }
   0xa   :  { %1529 = vmatpush1.bf16.msra.mxu0 %v3736_v3  ;;  %3719 = vmatpush1.bf16.msra.mxu1 %v3736_v3  ;;  %v3759_v23 = vld [vmem:[%s5203_s0 + $0x2c] ss:$20 sps:$4 sm:$0xff]   ;;  %v3764_v28 = vld [vmem:[%s5203_s0 + $0x3e8] ss:$20 sps:$4 sm:$0xff]   ;;  %v3772_v35 = vld [vmem:[%s5203_s0 + $0x410] ss:$20 sps:$4 sm:$0xff]  }
   0xb   :  { %1530 = vmatprep.subr.bf16.mxu0 %v3994_v0  ;;  %3704 = vmatprep.subr.bf16.mxu1 %v3994_v0  ;;  %v3761_v24 = vld [vmem:[%s5203_s0 + $0x3ec] ss:$20 sps:$4 sm:$0xff]   ;;  %v3767_v31 = vld [vmem:[%s5203_s0 + $0x54] ss:$20 sps:$4 sm:$0xff]   ;;  %v3773_v36 = vld [vmem:[%s5202_s1 + $0x98] sm:$0xff]  }
   0xc   :  { %v3846_v30 = vld [vmem:[%s5202_s1 + $0x108] sm:$0xff]   ;;  %v3766_v33 = vld [vmem:[%s5202_s1 + $0xa0] sm:$0xff]   ;;  %v3775_v37 = vld [vmem:[%s5203_s0 + $0x7c] ss:$20 sps:$4 sm:$0xff]  }
   0xd   :  { %v3769_v32 = vld [vmem:[%s5203_s0 + $0x414] ss:$20 sps:$4 sm:$0xff]   ;;  %v3777_v38 = vld [vmem:[%s5203_s0 + $0x43c] ss:$20 sps:$4 sm:$0xff]   ;;  %v3779_v40 = vld [vmem:[%s5203_s0 + $0x78] ss:$20 sps:$4 sm:$0xff]  }
   0xe   :  { %1531 = vmatpush1.bf16.msra.mxu0 %v3737_v4  ;;  %3720 = vmatpush1.bf16.msra.mxu1 %v3737_v4  ;;  %v3774_v39 = vld [vmem:[%s5202_s1 + $0x90] sm:$0xff]   ;;  %v3780_v41 = vld [vmem:[%s5203_s0 + $0x438] ss:$20 sps:$4 sm:$0xff]   ;;  %v3883_v44 = vld [vmem:[%s5202_s1 + $0x100] sm:$0xff]  }
   0xf   :  { %1532 = vmatprep.subr.bf16.mxu0 %v3994_v0  ;;  %3705 = vmatprep.subr.bf16.mxu1 %v3994_v0  ;;  %v3781_v42 = vld [vmem:[%s5202_s1 + $0x88] sm:$0xff]   ;;  %v3783_v43 = vld [vmem:[%s5203_s0 + $0xa4] ss:$20 sps:$4 sm:$0xff]   ;;  %v3787_v47 = vld [vmem:[%s5203_s0 + $0xa0] ss:$20 sps:$4 sm:$0xff]  }
  0x10   :  { %v3785_v45 = vld [vmem:[%s5203_s0 + $0x464] ss:$20 sps:$4 sm:$0xff]   ;;  %v3788_v48 = vld [vmem:[%s5203_s0 + $0x460] ss:$20 sps:$4 sm:$0xff]   ;;  %v3795_v53 = vld [vmem:[%s5203_s0 + $0xc8] ss:$20 sps:$4 sm:$0xff]  }
  0x11   :  { %v3782_v46 = vld [vmem:[%s5202_s1 + $0x80] sm:$0xff]   ;;  %v3789_v49 = vld [vmem:[%s5202_s1 + $0xf8] sm:$0xff]   ;;  %v3790_v52 = vld [vmem:[%s5202_s1 + $0xf0] sm:$0xff]  }
  0x12   :  { %1533 = vmatpush1.bf16.msra.mxu0 %v3738_v5  ;;  %3721 = vmatpush1.bf16.msra.mxu1 %v3738_v5  ;;  %v3791_v50 = vld [vmem:[%s5203_s0 + $0xcc] ss:$20 sps:$4 sm:$0xff]   ;;  %v3796_v54 = vld [vmem:[%s5203_s0 + $0x488] ss:$20 sps:$4 sm:$0xff]   ;;  %v3803_v59 = vld [vmem:[%s5203_s0 + $0xf0] ss:$20 sps:$4 sm:$0xff]  }
  0x13   :  { %1534 = vmatprep.subr.bf16.mxu0 %v3994_v0  ;;  %3706 = vmatprep.subr.bf16.mxu1 %v3994_v0  ;;  %v3793_v51 = vld [vmem:[%s5203_s0 + $0x48c] ss:$20 sps:$4 sm:$0xff]   ;;  %v3799_v56 = vld [vmem:[%s5203_s0 + $0xf4] ss:$20 sps:$4 sm:$0xff]   ;;  %v3804_v60 = vld [vmem:[%s5203_s0 + $0x4b0] ss:$20 sps:$4 sm:$0xff]  }
  0x14   :  { %v3797_v55 = vld [vmem:[%s5202_s1 + $0xe8] sm:$0xff]   ;;  %v3798_v58 = vld [vmem:[%s5202_s1 + $0xe0] sm:$0xff]   ;;  %v3806_v61 = vld [vmem:[%s5202_s1 + $0xd8] sm:$0xff]  }
  0x15   :  { %v3801_v57 = vld [vmem:[%s5203_s0 + $0x4b4] ss:$20 sps:$4 sm:$0xff]   ;;  %v3808_v62 = vld [vmem:[%s5203_s0 + $0x11c] ss:$20 sps:$4 sm:$0xff]   ;;  %v3812_v2 = vld [vmem:[%s5203_s0 + $0x118] ss:$20 sps:$4 sm:$0xff]  }
  0x16   :  { %1535 = vmatpush1.bf16.msra.mxu0 %v3739_v7  ;;  %3722 = vmatpush1.bf16.msra.mxu1 %v3739_v7  ;;  %v3810_v63 = vld [vmem:[%s5203_s0 + $0x4dc] ss:$20 sps:$4 sm:$0xff]   ;;  %v3813_v3 = vld [vmem:[%s5203_s0 + $0x4d8] ss:$20 sps:$4 sm:$0xff]   ;;  %v3815_v7 = vld [vmem:[%s5202_s1 + $0xc0] sm:$0xff]  }
  0x17   :  { %1536 = vmatprep.subr.bf16.mxu0 %v3994_v0  ;;  %3707 = vmatprep.subr.bf16.mxu1 %v3994_v0  ;;  %v3807_v1 = vld [vmem:[%s5202_s1 + $0xd0] sm:$0xff]   ;;  %v3814_v4 = vld [vmem:[%s5202_s1 + $0xc8] sm:$0xff]   ;;  %v3816_v5 = vld [vmem:[%s5203_s0 + $0x144] ss:$20 sps:$4 sm:$0xff]  }
  0x18   :  { %v3820_v6 = vld [vmem:[%s5203_s0 + $0xc] ss:$20 sps:$4 sm:$0xff]   ;;  %v3818_v8 = vld [vmem:[%s5203_s0 + $0x8] ss:$20 sps:$4 sm:$0xff]  }
  0x1a   :  { %1537 = vmatpush1.bf16.msra.mxu0 %v3740_v9  ;;  %3723 = vmatpush1.bf16.msra.mxu1 %v3740_v9  ;;  %v3821_v9 = vld [vmem:[%s5203_s0 + $0x140] ss:$20 sps:$4 sm:$0xff]  }
  0x1b   :  { %1538 = vmatprep.subr.bf16.mxu0 %v3994_v0  ;;  %3708 = vmatprep.subr.bf16.mxu1 %v3994_v0 }
  0x1e   :  { %1539 = vmatpush1.bf16.msra.mxu0 %v3741_v10  ;;  %3724 = vmatpush1.bf16.msra.mxu1 %v3741_v10  ;;  %v3822_v10 = vld [vmem:[%s5203_s0 + $0x16c] ss:$20 sps:$4 sm:$0xff]  }
  0x1f   :  { %1540 = vmatprep.subr.bf16.mxu0 %v3994_v0  ;;  %3709 = vmatprep.subr.bf16.mxu1 %v3994_v0 }
  0x22   :  { %1541 = vmatpush2.bf16.msra.mxu0 %v3742_v11  ;;  %3725 = vmatpush2.bf16.msra.mxu1 %v3742_v11  ;;  %v3824_v11 = vld [vmem:[%s5203_s0 + $0x34] ss:$20 sps:$4 sm:$0xff]  }
  0x23   :  { %1542 = vmatprep.subr.bf16.mxu0 %v3994_v0  ;;  %3710 = vmatprep.subr.bf16.mxu1 %v3994_v0 }
  0x26   :  { %1543 = vmatpush2.bf16.msra.mxu0 %v3743_v12  ;;  %3726 = vmatpush2.bf16.msra.mxu1 %v3743_v12  ;;  %v3827_v12 = vld [vmem:[%s5203_s0 + $0x30] ss:$20 sps:$4 sm:$0xff]  }
  0x27   :  { %1544 = vmatprep.subr.bf16.mxu0 %v3994_v0  ;;  %3711 = vmatprep.subr.bf16.mxu1 %v3994_v0 }
  0x2a   :  { %1545 = vmatpush2.bf16.msra.mxu0 %v3744_v13  ;;  %3727 = vmatpush2.bf16.msra.mxu1 %v3744_v13  ;;  %v3828_v13 = vld [vmem:[%s5203_s0 + $0x194] ss:$20 sps:$4 sm:$0xff]  }
  0x2b   :  { %1546 = vmatprep.subr.bf16.mxu0 %v3994_v0  ;;  %3712 = vmatprep.subr.bf16.mxu1 %v3994_v0 }
  0x2e   :  { %1547 = vmatpush2.bf16.msra.mxu0 %v3745_v14  ;;  %3728 = vmatpush2.bf16.msra.mxu1 %v3745_v14  ;;  %v3830_v14 = vld [vmem:[%s5203_s0 + $0x5c] ss:$20 sps:$4 sm:$0xff]  }
  0x2f   :  { %1548 = vmatprep.subr.bf16.mxu0 %v3994_v0  ;;  %3713 = vmatprep.subr.bf16.mxu1 %v3994_v0 }
  0x32   :  { %1549 = vmatpush2.bf16.msra.mxu0 %v3746_v15  ;;  %3729 = vmatpush2.bf16.msra.mxu1 %v3746_v15  ;;  %v3832_v15 = vld [vmem:[%s5203_s0 + $0x190] ss:$20 sps:$4 sm:$0xff]  }
  0x33   :  { %1550 = vmatprep.subr.bf16.mxu0 %v3994_v0  ;;  %3714 = vmatprep.subr.bf16.mxu1 %v3994_v0 }
  0x36   :  { %1551 = vmatpush2.bf16.msra.mxu0 %v3747_v16  ;;  %3730 = vmatpush2.bf16.msra.mxu1 %v3747_v16  ;;  %v3833_v16 = vld [vmem:[%s5203_s0 + $0x58] ss:$20 sps:$4 sm:$0xff]  }
  0x37   :  { %1552 = vmatprep.subr.bf16.mxu0 %v3994_v0  ;;  %3715 = vmatprep.subr.bf16.mxu1 %v3994_v0 }
  0x3a   :  { %1553 = vmatpush2.bf16.msra.mxu0 %v3748_v17  ;;  %3731 = vmatpush2.bf16.msra.mxu1 %v3748_v17  ;;  %v3834_v17 = vld [vmem:[%s5203_s0 + $0x1bc] ss:$20 sps:$4 sm:$0xff]  }
  0x3b   :  { %1554 = vmatprep.subr.bf16.mxu0 %v3994_v0  ;;  %3716 = vmatprep.subr.bf16.mxu1 %v3994_v0 }
  0x3e   :  { %1555 = vmatpush2.bf16.msra.mxu0 %v3749_v18  ;;  %3732 = vmatpush2.bf16.msra.mxu1 %v3749_v18  ;;  %v3836_v18 = vld [vmem:[%s5203_s0 + $0x84] ss:$20 sps:$4 sm:$0xff]  }
  0x3f   :  { %1813 = vmatprep.subr.bf16.mxu1 %v3994_v0  ;;  %3629 = vmatprep.subr.bf16.mxu0 %v3756_v19 }
  0x41   :  { %1557 = vmatmul.mubr.bf16.vlgmr.msra.gmra.mxu0 %v3750_v20  ;;  %1749 = vmatmul.mubr.bf16.vlgmr.msra.gmra.mxu1 %v3753_v21  ;;  %v3839_v20 = vld [vmem:[%s5203_s0 + $0x80] ss:$20 sps:$4 sm:$0xff]   ;;  %v3840_v21 = vld [vmem:[%s5203_s0 + $0x1e4] ss:$20 sps:$4 sm:$0xff]  }
  0x42   :  { %1814 = vmatpush1.bf16.msra.mxu1 %v3757_v22  ;;  %3630 = vmatpush3.bf16.msra.mxu0 %v3756_v19  ;;  %v3838_v19 = vld [vmem:[%s5203_s0 + $0x1b8] ss:$20 sps:$4 sm:$0xff]  }
  0x43   :  { %1815 = vmatprep.subr.bf16.mxu1 %v3994_v0  ;;  %1564 = vmatprep.mubr.bf16.mxu0 %v3759_v23  ;;  %v3842_v22 = vld [vmem:[%s5203_s0 + $0xac] ss:$20 sps:$4 sm:$0xff]  }
  0x44   :  { %1756 = vmatprep.mubr.bf16.mxu1 %v3761_v24  ;;  %3631 = vmatprep.subr.bf16.mxu0 %v3805_v25  ;;  %v3844_v23 = vld [vmem:[%s5203_s0 + $0x1e0] ss:$20 sps:$4 sm:$0xff]   ;;  %v3845_v24 = vld [vmem:[%s5203_s0 + $0xa8] ss:$20 sps:$4 sm:$0xff]  }
  0x46   :  { %1816 = vmatpush1.bf16.msra.mxu1 %v3758_v26  ;;  %3632 = vmatpush3.bf16.msra.mxu0 %v3805_v25  ;;  %v3847_v25 = vld [vmem:[%s5203_s0 + $0x20c] ss:$20 sps:$4 sm:$0xff]   ;;  %v3849_v26 = vld [vmem:[%s5203_s0 + $0xd4] ss:$20 sps:$4 sm:$0xff]  }
  0x47   :  { %1817 = vmatprep.subr.bf16.mxu1 %v3994_v0  ;;  %3633 = vmatprep.subr.bf16.mxu0 %v3846_v30 }
  0x49   :  { %1565 = vmatmul.mubr.bf16.gmra.mxu0 %v3763_v27  ;;  %1757 = vmatmul.mubr.bf16.gmra.mxu1 %v3764_v28  ;;  %v3851_v27 = vld [vmem:[%s5203_s0 + $0x208] ss:$20 sps:$4 sm:$0xff]   ;;  %v3852_v28 = vld [vmem:[%s5203_s0 + $0xd0] ss:$20 sps:$4 sm:$0xff]  }
  0x4a   :  { %1818 = vmatpush1.bf16.msra.mxu1 %v3765_v29  ;;  %1572 = vmatprep.mubr.bf16.mxu0 %v3767_v31  ;;  %v3853_v29 = vld [vmem:[%s5203_s0 + $0x234] ss:$20 sps:$4 sm:$0xff]   ;;  %v3857_v31 = vld [vmem:[%s5203_s0 + $0x230] ss:$20 sps:$4 sm:$0xff]  }
  0x4b   :  { %1819 = vmatprep.subr.bf16.mxu1 %v3994_v0  ;;  %1764 = vmatprep.mubr.bf16.mxu1 %v3769_v32  ;;  %v3858_v32 = vld [vmem:[%s5203_s0 + $0xf8] ss:$20 sps:$4 sm:$0xff]  }
  0x4c   :  { %3634 = vmatpush3.bf16.msra.mxu0 %v3846_v30  ;;  %v3855_v30 = vld [vmem:[%s5203_s0 + $0xfc] ss:$20 sps:$4 sm:$0xff]  }
  0x4d   :  { %3635 = vmatprep.subr.bf16.mxu0 %v3883_v44 }
  0x4e   :  { %1820 = vmatpush1.bf16.msra.mxu1 %v3766_v33  ;;  %v3859_v33 = vld [vmem:[%s5203_s0 + $0x25c] ss:$20 sps:$4 sm:$0xff]  }
  0x4f   :  { %1821 = vmatprep.subr.bf16.mxu1 %v3994_v0 }
  0x50   :  { %3636 = vmatpush3.bf16.msra.mxu0 %v3883_v44  ;;  %v3876_v44 = vld [vmem:[%s5203_s0 + $0x170] ss:$20 sps:$4 sm:$0xff]  }
  0x51   :  { %1573 = vmatmul.mubr.bf16.gmra.mxu0 %v3771_v34  ;;  %1765 = vmatmul.mubr.bf16.gmra.mxu1 %v3772_v35  ;;  %v3861_v34 = vld [vmem:[%s5203_s0 + $0x124] ss:$20 sps:$4 sm:$0xff]  }
  0x52   :  { %1822 = vmatpush1.bf16.msra.mxu1 %v3773_v36  ;;  %1580 = vmatprep.mubr.bf16.mxu0 %v3775_v37  ;;  %v3863_v35 = vld [vmem:[%s5203_s0 + $0x258] ss:$20 sps:$4 sm:$0xff]   ;;  %v3864_v36 = vld [vmem:[%s5203_s0 + $0x120] ss:$20 sps:$4 sm:$0xff]  }
  0x53   :  { %1823 = vmatprep.subr.bf16.mxu1 %v3994_v0  ;;  %1772 = vmatprep.mubr.bf16.mxu1 %v3777_v38  ;;  %v3865_v37 = vld [vmem:[%s5203_s0 + $0x284] ss:$20 sps:$4 sm:$0xff]   ;;  %v3867_v38 = vld [vmem:[%s5203_s0 + $0x14c] ss:$20 sps:$4 sm:$0xff]  }
  0x56   :  { %1824 = vmatpush1.bf16.msra.mxu1 %v3774_v39  ;;  %v3869_v39 = vld [vmem:[%s5203_s0 + $0x280] ss:$20 sps:$4 sm:$0xff]  }
  0x57   :  { %1825 = vmatprep.subr.bf16.mxu1 %v3994_v0 }
  0x59   :  { %1581 = vmatmul.mubr.bf16.gmra.mxu0 %v3779_v40  ;;  %1773 = vmatmul.mubr.bf16.gmra.mxu1 %v3780_v41  ;;  %v3870_v40 = vld [vmem:[%s5203_s0 + $0x148] ss:$20 sps:$4 sm:$0xff]   ;;  %v3871_v41 = vld [vmem:[%s5203_s0 + $0x2ac] ss:$20 sps:$4 sm:$0xff]  }
  0x5a   :  { %1826 = vmatpush1.bf16.msra.mxu1 %v3781_v42  ;;  %1588 = vmatprep.mubr.bf16.mxu0 %v3783_v43  ;;  %v3873_v42 = vld [vmem:[%s5203_s0 + $0x174] ss:$20 sps:$4 sm:$0xff]  }
  0x5b   :  { %1827 = vmatprep.subr.bf16.mxu1 %v3994_v0  ;;  %1780 = vmatprep.mubr.bf16.mxu1 %v3785_v45  ;;  %v3875_v43 = vld [vmem:[%s5203_s0 + $0x2a8] ss:$20 sps:$4 sm:$0xff]  }
  0x5c   :  { %v3877_v45 = vld [vmem:[%s5203_s0 + $0x2d4] ss:$20 sps:$4 sm:$0xff]  }
  0x5e   :  { %1828 = vmatpush1.bf16.msra.mxu1 %v3782_v46  ;;  %v3879_v46 = vld [vmem:[%s5203_s0 + $0x19c] ss:$20 sps:$4 sm:$0xff]  }
  0x5f   :  { %1829 = vmatprep.subr.bf16.mxu1 %v3994_v0 }
  0x61   :  { %1589 = vmatmul.mubr.bf16.gmra.mxu0 %v3787_v47  ;;  %1781 = vmatmul.mubr.bf16.gmra.mxu1 %v3788_v48  ;;  %v3881_v47 = vld [vmem:[%s5203_s0 + $0x2d0] ss:$20 sps:$4 sm:$0xff]   ;;  %v3882_v48 = vld [vmem:[%s5203_s0 + $0x198] ss:$20 sps:$4 sm:$0xff]  }
  0x62   :  { %1830 = vmatpush2.bf16.msra.mxu1 %v3789_v49  ;;  %1596 = vmatprep.mubr.bf16.mxu0 %v3791_v50  ;;  %v3884_v49 = vld [vmem:[%s5203_s0 + $0x2fc] ss:$20 sps:$4 sm:$0xff]   ;;  %v3886_v50 = vld [vmem:[%s5203_s0 + $0x1c4] ss:$20 sps:$4 sm:$0xff]  }
  0x63   :  { %1831 = vmatprep.subr.bf16.mxu1 %v3994_v0  ;;  %1788 = vmatprep.mubr.bf16.mxu1 %v3793_v51  ;;  %v3888_v51 = vld [vmem:[%s5203_s0 + $0x2f8] ss:$20 sps:$4 sm:$0xff]  }
  0x66   :  { %1832 = vmatpush2.bf16.msra.mxu1 %v3790_v52  ;;  %v3889_v52 = vld [vmem:[%s5203_s0 + $0x1c0] ss:$20 sps:$4 sm:$0xff]  }
  0x67   :  { %1833 = vmatprep.subr.bf16.mxu1 %v3994_v0 }
  0x69   :  { %1597 = vmatmul.mubr.bf16.gmra.mxu0 %v3795_v53  ;;  %1789 = vmatmul.mubr.bf16.gmra.mxu1 %v3796_v54  ;;  %v3890_v53 = vld [vmem:[%s5203_s0 + $0x324] ss:$20 sps:$4 sm:$0xff]   ;;  %v3892_v54 = vld [vmem:[%s5203_s0 + $0x1ec] ss:$20 sps:$4 sm:$0xff]  }
  0x6a   :  { %1834 = vmatpush2.bf16.msra.mxu1 %v3797_v55  ;;  %1604 = vmatprep.mubr.bf16.mxu0 %v3799_v56  ;;  %v3894_v55 = vld [vmem:[%s5203_s0 + $0x320] ss:$20 sps:$4 sm:$0xff]   ;;  %v3895_v56 = vld [vmem:[%s5203_s0 + $0x1e8] ss:$20 sps:$4 sm:$0xff]  }
  0x6b   :  { %1835 = vmatprep.subr.bf16.mxu1 %v3994_v0  ;;  %1796 = vmatprep.mubr.bf16.mxu1 %v3801_v57  ;;  %v3896_v57 = vld [vmem:[%s5203_s0 + $0x34c] ss:$20 sps:$4 sm:$0xff]  }
  0x6e   :  { %1836 = vmatpush2.bf16.msra.mxu1 %v3798_v58  ;;  %v3898_v58 = vld [vmem:[%s5203_s0 + $0x214] ss:$20 sps:$4 sm:$0xff]  }
  0x6f   :  { %1837 = vmatprep.subr.bf16.mxu1 %v3994_v0 }
  0x71   :  { %1605 = vmatmul.mubr.bf16.gmra.mxu0 %v3803_v59  ;;  %1797 = vmatmul.mubr.bf16.gmra.mxu1 %v3804_v60  ;;  %v3900_v59 = vld [vmem:[%s5203_s0 + $0x348] ss:$20 sps:$4 sm:$0xff]   ;;  %v3901_v60 = vld [vmem:[%s5203_s0 + $0x210] ss:$20 sps:$4 sm:$0xff]  }
  0x72   :  { %1838 = vmatpush2.bf16.msra.mxu1 %v3806_v61  ;;  %1612 = vmatprep.mubr.bf16.mxu0 %v3808_v62  ;;  %v3902_v61 = vld [vmem:[%s5203_s0 + $0x374] ss:$20 sps:$4 sm:$0xff]   ;;  %v3904_v62 = vld [vmem:[%s5203_s0 + $0x23c] ss:$20 sps:$4 sm:$0xff]  }
  0x73   :  { %1839 = vmatprep.subr.bf16.mxu1 %v3994_v0  ;;  %1804 = vmatprep.mubr.bf16.mxu1 %v3810_v63  ;;  %v3906_v63 = vld [vmem:[%s5203_s0 + $0x370] ss:$20 sps:$4 sm:$0xff]  }
  0x76   :  { %1840 = vmatpush2.bf16.msra.mxu1 %v3807_v1  ;;  %v3907_v1 = vld [vmem:[%s5203_s0 + $0x238] ss:$20 sps:$4 sm:$0xff]  }
  0x77   :  { %1841 = vmatprep.subr.bf16.mxu1 %v3994_v0 }
  0x79   :  { %1613 = vmatmul.mubr.bf16.gmra.mxu0 %v3812_v2  ;;  %1805 = vmatmul.mubr.bf16.gmra.mxu1 %v3813_v3  ;;  %v3908_v2 = vld [vmem:[%s5203_s0 + $0x39c] ss:$20 sps:$4 sm:$0xff]   ;;  %v3910_v3 = vld [vmem:[%s5203_s0 + $0x264] ss:$20 sps:$4 sm:$0xff]  }
  0x7a   :  { %1842 = vmatpush2.bf16.msra.mxu1 %v3814_v4  ;;  %1620 = vmatprep.mubr.bf16.mxu0 %v3816_v5  ;;  %v3912_v4 = vld [vmem:[%s5203_s0 + $0x398] ss:$20 sps:$4 sm:$0xff]   ;;  %v3913_v5 = vld [vmem:[%s5203_s0 + $0x260] ss:$20 sps:$4 sm:$0xff]  }
  0x7b   :  { %1843 = vmatprep.subr.bf16.mxu1 %v3994_v0  ;;  %1845 = vmatprep.mubr.bf16.mxu1 %v3820_v6  ;;  %v3826_v0 = vld [vmem:[%s5203_s0 + $0x168] ss:$20 sps:$4 sm:$0xff]   ;;  %v3914_v6 = vld [vmem:[%s5203_s0 + $0x28c] ss:$20 sps:$4 sm:$0xff]  }
  0x7e   :  { %1844 = vmatpush2.bf16.msra.mxu1 %v3815_v7  ;;  %v3916_v7 = vld [vmem:[%s5203_s0 + $0x10] ss:$20 sps:$4 sm:$0xff]  }
  0x81   :  { %1621 = vmatmul.mubr.bf16.gmra.mxu0 %v3821_v9  ;;  %1846 = vmatmul.mubr.bf16.vlgmr.msra.gmra.mxu1 %v3818_v8  ;;  %v3917_v8 = vld [vmem:[%s5203_s0 + $0x288] ss:$20 sps:$4 sm:$0xff]   ;;  %v3918_v9 = vld [vmem:[%s5203_s0 + $0x38] ss:$20 sps:$4 sm:$0xff]  }
  0x82   :  { %1628 = vmatprep.mubr.bf16.mxu0 %v3822_v10  ;;  %1853 = vmatprep.mubr.bf16.mxu1 %v3824_v11  ;;  %v3919_v10 = vld [vmem:[%s5203_s0 + $0x2b4] ss:$20 sps:$4 sm:$0xff]  }
  0x83   :  { %v3921_v11 = vld [vmem:[%s5203_s0 + $0x60] ss:$20 sps:$4 sm:$0xff]  }
  0x89   :  { %1629 = vmatmul.mubr.bf16.gmra.mxu0 %v3826_v0  ;;  %1854 = vmatmul.mubr.bf16.gmra.mxu1 %v3827_v12 }
  0x8a   :  { %1636 = vmatprep.mubr.bf16.mxu0 %v3828_v13  ;;  %1861 = vmatprep.mubr.bf16.mxu1 %v3830_v14 }
  0x91   :  { %1637 = vmatmul.mubr.bf16.gmra.mxu0 %v3832_v15  ;;  %1862 = vmatmul.mubr.bf16.gmra.mxu1 %v3833_v16 }
  0x92   :  { %1644 = vmatprep.mubr.bf16.mxu0 %v3834_v17  ;;  %1869 = vmatprep.mubr.bf16.mxu1 %v3836_v18  ;;  %v3922_v17 = vld [vmem:[%s5203_s0 + $0x2b0] ss:$20 sps:$4 sm:$0xff]   ;;  %v3923_v18 = vld [vmem:[%s5203_s0 + $0x88] ss:$20 sps:$4 sm:$0xff]  }
  0x99   :  { %1645 = vmatmul.mubr.bf16.gmra.mxu0 %v3838_v19  ;;  %1870 = vmatmul.mubr.bf16.gmra.mxu1 %v3839_v20  ;;  %v3924_v19 = vld [vmem:[%s5203_s0 + $0x2dc] ss:$20 sps:$4 sm:$0xff]  }
  0x9a   :  { %1652 = vmatprep.mubr.bf16.mxu0 %v3840_v21  ;;  %1877 = vmatprep.mubr.bf16.mxu1 %v3842_v22  ;;  %v3926_v20 = vld [vmem:[%s5203_s0 + $0xb0] ss:$20 sps:$4 sm:$0xff]  }
  0xa1   :  { %1653 = vmatmul.mubr.bf16.gmra.mxu0 %v3844_v23  ;;  %1878 = vmatmul.mubr.bf16.gmra.mxu1 %v3845_v24 }
  0xa2   :  { %1660 = vmatprep.mubr.bf16.mxu0 %v3847_v25  ;;  %1885 = vmatprep.mubr.bf16.mxu1 %v3849_v26 }
  0xa9   :  { %1661 = vmatmul.mubr.bf16.gmra.mxu0 %v3851_v27  ;;  %1886 = vmatmul.mubr.bf16.gmra.mxu1 %v3852_v28 }
  0xaa   :  { %1668 = vmatprep.mubr.bf16.mxu0 %v3853_v29  ;;  %1893 = vmatprep.mubr.bf16.mxu1 %v3855_v30  ;;  %v3927_v29 = vld [vmem:[%s5203_s0 + $0x2d8] ss:$20 sps:$4 sm:$0xff]  }
  0xab   :  { %v3928_v30 = vld [vmem:[%s5203_s0 + $0xd8] ss:$20 sps:$4 sm:$0xff]  }
  0xb1   :  { %1669 = vmatmul.mubr.bf16.gmra.mxu0 %v3857_v31  ;;  %1894 = vmatmul.mubr.bf16.gmra.mxu1 %v3858_v32  ;;  %v3929_v31 = vld [vmem:[%s5203_s0 + $0x304] ss:$20 sps:$4 sm:$0xff]   ;;  %v3931_v32 = vld [vmem:[%s5203_s0 + $0x100] ss:$20 sps:$4 sm:$0xff]  }
  0xb2   :  { %1676 = vmatprep.mubr.bf16.mxu0 %v3859_v33  ;;  %1901 = vmatprep.mubr.bf16.mxu1 %v3861_v34 }
  0xb9   :  { %1677 = vmatmul.mubr.bf16.gmra.mxu0 %v3863_v35  ;;  %1902 = vmatmul.mubr.bf16.gmra.mxu1 %v3864_v36 }
  0xba   :  { %1684 = vmatprep.mubr.bf16.mxu0 %v3865_v37  ;;  %1909 = vmatprep.mubr.bf16.mxu1 %v3867_v38 }
  0xc1   :  { %1685 = vmatmul.mubr.bf16.gmra.mxu0 %v3869_v39  ;;  %1910 = vmatmul.mubr.bf16.gmra.mxu1 %v3870_v40 }
  0xc2   :  { %1692 = vmatprep.mubr.bf16.mxu0 %v3871_v41  ;;  %1917 = vmatprep.mubr.bf16.mxu1 %v3873_v42  ;;  %v3932_v41 = vld [vmem:[%s5203_s0 + $0x300] ss:$20 sps:$4 sm:$0xff]   ;;  %v3933_v42 = vld [vmem:[%s5203_s0 + $0x128] ss:$20 sps:$4 sm:$0xff]  }
  0xc9   :  { %1693 = vmatmul.mubr.bf16.gmra.mxu0 %v3875_v43  ;;  %1918 = vmatmul.mubr.bf16.gmra.mxu1 %v3876_v44  ;;  %v3936_v43 = vld [vmem:[%s5203_s0 + $0x32c] ss:$20 sps:$4 sm:$0xff]   ;;  %v3937_v44 = vld [vmem:[%s5203_s0 + $0x150] ss:$20 sps:$4 sm:$0xff]  }
  0xca   :  { %1700 = vmatprep.mubr.bf16.mxu0 %v3877_v45  ;;  %1925 = vmatprep.mubr.bf16.mxu1 %v3879_v46 }
  0xd1   :  { %1701 = vmatmul.mubr.bf16.gmra.mxu0 %v3881_v47  ;;  %1926 = vmatmul.mubr.bf16.gmra.mxu1 %v3882_v48 }
  0xd2   :  { %1708 = vmatprep.mubr.bf16.mxu0 %v3884_v49  ;;  %1933 = vmatprep.mubr.bf16.mxu1 %v3886_v50 }
  0xd9   :  { %1709 = vmatmul.mubr.bf16.gmra.mxu0 %v3888_v51  ;;  %1934 = vmatmul.mubr.bf16.gmra.mxu1 %v3889_v52 }
  0xda   :  { %1716 = vmatprep.mubr.bf16.mxu0 %v3890_v53  ;;  %1941 = vmatprep.mubr.bf16.mxu1 %v3892_v54  ;;  %v3934_v53 = vld [vmem:[%s5203_s0 + $0x328] ss:$20 sps:$4 sm:$0xff]   ;;  %v3938_v54 = vld [vmem:[%s5203_s0 + $0x178] ss:$20 sps:$4 sm:$0xff]  }
  0xe1   :  { %1717 = vmatmul.mubr.bf16.gmra.mxu0 %v3894_v55  ;;  %1942 = vmatmul.mubr.bf16.gmra.mxu1 %v3895_v56  ;;  %v3941_v55 = vld [vmem:[%s5203_s0 + $0x354] ss:$20 sps:$4 sm:$0xff]  }
  0xe2   :  { %1724 = vmatprep.mubr.bf16.mxu0 %v3896_v57  ;;  %1949 = vmatprep.mubr.bf16.mxu1 %v3898_v58  ;;  %v3942_v56 = vld [vmem:[%s5203_s0 + $0x1a0] ss:$20 sps:$4 sm:$0xff]  }
  0xe9   :  { %1725 = vmatmul.mubr.bf16.gmra.mxu0 %v3900_v59  ;;  %1950 = vmatmul.mubr.bf16.gmra.mxu1 %v3901_v60 }
  0xea   :  { %1732 = vmatprep.mubr.bf16.mxu0 %v3902_v61  ;;  %1957 = vmatprep.mubr.bf16.mxu1 %v3904_v62 }
  0xf1   :  { %1733 = vmatmul.mubr.bf16.gmra.mxu0 %v3906_v63  ;;  %1958 = vmatmul.mubr.bf16.gmra.mxu1 %v3907_v1 }
  0xf2   :  { %1740 = vmatprep.mubr.bf16.mxu0 %v3908_v2  ;;  %1965 = vmatprep.mubr.bf16.mxu1 %v3910_v3  ;;  %v3939_v2 = vld [vmem:[%s5203_s0 + $0x350] ss:$20 sps:$4 sm:$0xff]   ;;  %v3943_v3 = vld [vmem:[%s5203_s0 + $0x1c8] ss:$20 sps:$4 sm:$0xff]  }
  0xf9   :  { %1741 = vmatmul.mubr.bf16.gmra.mxu0 %v3912_v4  ;;  %1966 = vmatmul.mubr.bf16.gmra.mxu1 %v3913_v5  ;;  %v3946_v4 = vld [vmem:[%s5203_s0 + $0x37c] ss:$20 sps:$4 sm:$0xff]  }
  0xfa   :  { %1973 = vmatprep.mubr.bf16.mxu1 %v3914_v6  ;;  %3637 = vmatprep.mubr.msk.bf16.mxu0 %vm1427_vm0, %v3916_v7  ;;  %v3947_v5 = vld [vmem:[%s5203_s0 + $0x1f0] ss:$20 sps:$4 sm:$0xff]  }
 0x101   :  { %v4478_v0 = vpop.f32.mrf.mxu0  ;;  %v4480_v12 = vpop.f32.mrf.mxu1  ;;  %1974 = vmatmul.mubr.bf16.gmra.mxu1 %v3917_v8  ;;  %3638 = vmatmul.mubr.msk.bf16.vlgmr.msra.gmra.mxu0 %vm1427_vm0, %v3918_v9 }
 0x102   :  { %5206 = vst [vmem:[#allocation3_spill] sm:$0xff] %v4480_v12  ;;  %1981 = vmatprep.mubr.bf16.mxu1 %v3919_v10  ;;  %3641 = vmatprep.mubr.msk.bf16.mxu0 %vm1427_vm0, %v3921_v11 }
 0x103   :  { %v1560_v13 = vpop.f32.mrf.mxu0  ;;  %v1752_v14 = vpop.f32.mrf.mxu1 }
 0x105   :  { %v4484_v15 = vpop.f32.mrf.mxu0  ;;  %v4486_v16 = vpop.f32.mrf.mxu1 }
 0x106   :  { %5207 = vst [vmem:[#allocation4_spill] sm:$0xff] %v4486_v16 }
 0x107   :  { %v1563_v21 = vpop.f32.mrf.mxu0  ;;  %v1755_v22 = vpop.f32.mrf.mxu1 }
 0x109   :  { %v4500_v23 = vpop.f32.mrf.mxu0  ;;  %v4502_v24 = vpop.f32.mrf.mxu1  ;;  %1982 = vmatmul.mubr.bf16.gmra.mxu1 %v3922_v17  ;;  %3642 = vmatmul.mubr.msk.bf16.gmra.mxu0 %vm1427_vm0, %v3923_v18  ;;  %v3944_v17 = vld [vmem:[%s5203_s0 + $0x378] ss:$20 sps:$4 sm:$0xff]  }
 0x10a   :  { %5208 = vst [vmem:[#allocation5_spill] sm:$0xff] %v4502_v24  ;;  %1989 = vmatprep.mubr.bf16.mxu1 %v3924_v19  ;;  %3645 = vmatprep.mubr.msk.bf16.mxu0 %vm1427_vm0, %v3926_v20  ;;  %v3948_v18 = vld [vmem:[%s5203_s0 + $0x218] ss:$20 sps:$4 sm:$0xff]   ;;  %v3952_v20 = vld [vmem:[%s5203_s0 + $0x240] ss:$20 sps:$4 sm:$0xff]  }
 0x10b   :  { %v1568_v25 = vpop.f32.mrf.mxu0  ;;  %v1760_v26 = vpop.f32.mrf.mxu1  ;;  %v3951_v19 = vld [vmem:[%s5203_s0 + $0x3a4] ss:$20 sps:$4 sm:$0xff]  }
 0x10d   :  { %v4506_v27 = vpop.f32.mrf.mxu0  ;;  %v4508_v28 = vpop.f32.mrf.mxu1 }
 0x10e   :  { %5209 = vst [vmem:[#allocation6_spill] sm:$0xff] %v4508_v28 }
 0x10f   :  { %v1571_v33 = vpop.f32.mrf.mxu0  ;;  %v1763_v34 = vpop.f32.mrf.mxu1 }
 0x110   :  { %v3949_v33 = vld [vmem:[%s5203_s0 + $0x3a0] ss:$20 sps:$4 sm:$0xff]   ;;  %v3953_v34 = vld [vmem:[%s5203_s0 + $0x268] ss:$20 sps:$4 sm:$0xff]  }
 0x111   :  { %v4522_v35 = vpop.f32.mrf.mxu0  ;;  %v4524_v36 = vpop.f32.mrf.mxu1  ;;  %1990 = vmatmul.mubr.bf16.gmra.mxu1 %v3927_v29  ;;  %3646 = vmatmul.mubr.msk.bf16.gmra.mxu0 %vm1427_vm0, %v3928_v30 }
 0x112   :  { %5210 = vst [vmem:[#allocation7_spill] sm:$0xff] %v4524_v36  ;;  %1997 = vmatprep.mubr.bf16.mxu1 %v3929_v31  ;;  %3649 = vmatprep.mubr.msk.bf16.mxu0 %vm1427_vm0, %v3931_v32 }
 0x113   :  { %v1576_v37 = vpop.f32.mrf.mxu0  ;;  %v1768_v38 = vpop.f32.mrf.mxu1 }
 0x114   :  { %v3956_v37 = vld [vmem:[%s5203_s0 + $0x3cc] ss:$20 sps:$4 sm:$0xff]   ;;  %v3957_v38 = vld [vmem:[%s5203_s0 + $0x290] ss:$20 sps:$4 sm:$0xff]  }
 0x115   :  { %v4528_v39 = vpop.f32.mrf.mxu0  ;;  %v4530_v40 = vpop.f32.mrf.mxu1 }
 0x116   :  { %5211 = vst [vmem:[#allocation8_spill] sm:$0xff] %v4530_v40 }
 0x117   :  { %v1579_v45 = vpop.f32.mrf.mxu0  ;;  %v1771_v46 = vpop.f32.mrf.mxu1 }
 0x119   :  { %v4544_v47 = vpop.f32.mrf.mxu0  ;;  %v4546_v48 = vpop.f32.mrf.mxu1  ;;  %1998 = vmatmul.mubr.bf16.gmra.mxu1 %v3932_v41  ;;  %3650 = vmatmul.mubr.msk.bf16.gmra.mxu0 %vm1427_vm0, %v3933_v42 }
 0x11a   :  { %5212 = vst [vmem:[#allocation9_spill] sm:$0xff] %v4546_v48  ;;  %2005 = vmatprep.mubr.bf16.mxu1 %v3936_v43  ;;  %3653 = vmatprep.mubr.msk.bf16.mxu0 %vm1427_vm0, %v3937_v44 }
 0x11b   :  { %v1584_v49 = vpop.f32.mrf.mxu0  ;;  %v1776_v50 = vpop.f32.mrf.mxu1 }
 0x11d   :  { %v4550_v51 = vpop.f32.mrf.mxu0  ;;  %v4552_v52 = vpop.f32.mrf.mxu1 }
 0x11e   :  { %5213 = vst [vmem:[#allocation10_spill] sm:$0xff] %v4552_v52 }
 0x11f   :  { %v1587_v57 = vpop.f32.mrf.mxu0  ;;  %v1779_v58 = vpop.f32.mrf.mxu1 }
 0x121   :  { %v4566_v59 = vpop.f32.mrf.mxu0  ;;  %v4568_v60 = vpop.f32.mrf.mxu1  ;;  %2006 = vmatmul.mubr.bf16.gmra.mxu1 %v3934_v53  ;;  %3654 = vmatmul.mubr.msk.bf16.gmra.mxu0 %vm1427_vm0, %v3938_v54  ;;  %v3954_v53 = vld [vmem:[%s5203_s0 + $0x3c8] ss:$20 sps:$4 sm:$0xff]   ;;  %v3958_v54 = vld [vmem:[%s5203_s0 + $0x2b8] ss:$20 sps:$4 sm:$0xff]  }
 0x122   :  { %5214 = vst [vmem:[#allocation11_spill] sm:$0xff] %v4568_v60  ;;  %2013 = vmatprep.mubr.bf16.mxu1 %v3941_v55  ;;  %3657 = vmatprep.mubr.msk.bf16.mxu0 %vm1427_vm0, %v3942_v56  ;;  %v3961_v55 = vld [vmem:[%s5203_s0 + $0x3f4] ss:$20 sps:$4 sm:$0xff]  }
 0x123   :  { %v1592_v61 = vpop.f32.mrf.mxu0  ;;  %v1784_v62 = vpop.f32.mrf.mxu1  ;;  %v3962_v56 = vld [vmem:[%s5203_s0 + $0x2e0] ss:$20 sps:$4 sm:$0xff]  }
 0x125   :  { %v4572_v63 = vpop.f32.mrf.mxu0  ;;  %v4574_v1 = vpop.f32.mrf.mxu1 }
 0x126   :  { %5215 = vst [vmem:[#allocation12_spill] sm:$0xff] %v4574_v1 }
 0x127   :  { %v1595_v6 = vpop.f32.mrf.mxu0  ;;  %v1787_v7 = vpop.f32.mrf.mxu1 }
 0x128   :  { %v3959_v7 = vld [vmem:[%s5203_s0 + $0x3f0] ss:$20 sps:$4 sm:$0xff]  }
 0x129   :  { %v4588_v8 = vpop.f32.mrf.mxu0  ;;  %v4590_v9 = vpop.f32.mrf.mxu1  ;;  %2014 = vmatmul.mubr.bf16.gmra.mxu1 %v3939_v2  ;;  %3658 = vmatmul.mubr.msk.bf16.gmra.mxu0 %vm1427_vm0, %v3943_v3 }
 0x12a   :  { %5216 = vst [vmem:[#allocation13_spill] sm:$0xff] %v4590_v9  ;;  %2021 = vmatprep.mubr.bf16.mxu1 %v3946_v4  ;;  %3661 = vmatprep.mubr.msk.bf16.mxu0 %vm1427_vm0, %v3947_v5 }
 0x12b   :  { %v1600_v10 = vpop.f32.mrf.mxu0  ;;  %v1792_v11 = vpop.f32.mrf.mxu1 }
 0x12c   :  { %v3963_v10 = vld [vmem:[%s5203_s0 + $0x308] ss:$20 sps:$4 sm:$0xff]  }
 0x12d   :  { %v4594_v13 = vpop.f32.mrf.mxu0  ;;  %v4596_v14 = vpop.f32.mrf.mxu1 }
 0x12e   :  { %5217 = vst [vmem:[#allocation14_spill] sm:$0xff] %v4596_v14 }
 0x12f   :  { %v1603_v21 = vpop.f32.mrf.mxu0  ;;  %v1795_v22 = vpop.f32.mrf.mxu1 }
 0x131   :  { %v4610_v25 = vpop.f32.mrf.mxu0  ;;  %v4612_v26 = vpop.f32.mrf.mxu1  ;;  %2022 = vmatmul.mubr.bf16.gmra.mxu1 %v3944_v17  ;;  %3662 = vmatmul.mubr.msk.bf16.gmra.mxu0 %vm1427_vm0, %v3948_v18  ;;  %v3967_v17 = vld [vmem:[%s5203_s0 + $0x330] ss:$20 sps:$4 sm:$0xff]  }
 0x132   :  { %5218 = vst [vmem:[#allocation15_spill] sm:$0xff] %v4612_v26  ;;  %2029 = vmatprep.mubr.bf16.mxu1 %v3951_v19  ;;  %3665 = vmatprep.mubr.msk.bf16.mxu0 %vm1427_vm0, %v3952_v20 }
 0x133   :  { %v1608_v29 = vpop.f32.mrf.mxu0  ;;  %v1800_v30 = vpop.f32.mrf.mxu1 }
 0x135   :  { %v4616_v31 = vpop.f32.mrf.mxu0  ;;  %v4618_v32 = vpop.f32.mrf.mxu1 }
 0x136   :  { %5219 = vst [vmem:[#allocation16_spill] sm:$0xff] %v4618_v32 }
 0x137   :  { %v1611_v41 = vpop.f32.mrf.mxu0  ;;  %v1803_v42 = vpop.f32.mrf.mxu1 }
 0x138   :  { %v3972_v41 = vld [vmem:[%s5203_s0 + $0x380] ss:$20 sps:$4 sm:$0xff]  }
 0x139   :  { %v4632_v43 = vpop.f32.mrf.mxu0  ;;  %v4634_v44 = vpop.f32.mrf.mxu1  ;;  %2030 = vmatmul.mubr.bf16.gmra.mxu1 %v3949_v33  ;;  %3666 = vmatmul.mubr.msk.bf16.gmra.mxu0 %vm1427_vm0, %v3953_v34  ;;  %v3964_v34 = vld [vmem:[%s5203_s0 + $0x418] ss:$20 sps:$4 sm:$0xff]  }
 0x13a   :  { %5220 = vst [vmem:[#allocation17_spill] sm:$0xff] %v4634_v44  ;;  %2037 = vmatprep.mubr.bf16.mxu1 %v3956_v37  ;;  %3669 = vmatprep.mubr.msk.bf16.mxu0 %vm1427_vm0, %v3957_v38  ;;  %v3968_v37 = vld [vmem:[%s5203_s0 + $0x358] ss:$20 sps:$4 sm:$0xff]  }
 0x13b   :  { %v1616_v45 = vpop.f32.mrf.mxu0  ;;  %v1808_v46 = vpop.f32.mrf.mxu1 }
 0x13d   :  { %v4638_v49 = vpop.f32.mrf.mxu0  ;;  %v4640_v50 = vpop.f32.mrf.mxu1 }
 0x13e   :  { %5221 = vst [vmem:[#allocation18_spill] sm:$0xff] %v4640_v50 }
 0x13f   :  { %v1619_v57 = vpop.f32.mrf.mxu0  ;;  %v1811_v58 = vpop.f32.mrf.mxu1 }
 0x140   :  { %v3969_v58 = vld [vmem:[%s5203_s0 + $0x440] ss:$20 sps:$4 sm:$0xff]  }
 0x141   :  { %v4654_v61 = vpop.f32.mrf.mxu0  ;;  %v1847_v62 = vpop.f32.mrf.mxu1  ;;  %2038 = vmatmul.mubr.bf16.gmra.mxu1 %v3954_v53  ;;  %3670 = vmatmul.mubr.msk.bf16.gmra.mxu0 %vm1427_vm0, %v3958_v54 }
 0x142   :  { %v4658_v2 = vadd.f32 %v1847_v62, %v4478_v0  ;;  %2045 = vmatprep.mubr.bf16.mxu1 %v3961_v55  ;;  %3673 = vmatprep.mubr.msk.bf16.mxu0 %vm1427_vm0, %v3962_v56  ;;  %v3966_v0 = vld [vmem:[%s5203_s0 + $0x41c] ss:$20 sps:$4 sm:$0xff]  }
 0x143   :  { %v1624_v3 = vpop.f32.mrf.mxu0  ;;  %v1849_v4 = vpop.f32.mrf.mxu1  ;;  %v3973_v62 = vld [vmem:[%s5203_s0 + $0x3a8] ss:$20 sps:$4 sm:$0xff]  }
 0x144   :  { %v3977_v4 = vld [vmem:[%s5203_s0 + $0x3d0] ss:$20 sps:$4 sm:$0xff]  }
 0x145   :  { %v4661_v5 = vpop.f32.mrf.mxu0  ;;  %v1850_v6 = vpop.f32.mrf.mxu1 }
 0x146   :  { %v4670_v11 = vadd.f32 %v1850_v6, %v4484_v15 }
 0x147   :  { %v1627_v18 = vpop.f32.mrf.mxu0  ;;  %v1852_v19 = vpop.f32.mrf.mxu1 }
 0x149   :  { %v4678_v20 = vpop.f32.mrf.mxu0  ;;  %v1855_v21 = vpop.f32.mrf.mxu1  ;;  %2046 = vmatmul.mubr.bf16.gmra.mxu1 %v3959_v7  ;;  %3674 = vmatmul.mubr.msk.bf16.gmra.mxu0 %vm1427_vm0, %v3963_v10 }
 0x14a   :  { %v4682_v22 = vadd.f32 %v1855_v21, %v4500_v23  ;;  %2053 = vmatprep.mubr.bf16.mxu1 %v3966_v0  ;;  %3677 = vmatprep.mubr.msk.bf16.mxu0 %vm1427_vm0, %v3967_v17  ;;  %v3971_v23 = vld [vmem:[%s5203_s0 + $0x444] ss:$20 sps:$4 sm:$0xff]  }
 0x14b   :  { %v1632_v15 = vpop.f32.mrf.mxu0  ;;  %v1857_v29 = vpop.f32.mrf.mxu1 }
 0x14c   :  { %v3974_v15 = vld [vmem:[%s5203_s0 + $0x468] ss:$20 sps:$4 sm:$0xff]   ;;  %v3978_v29 = vld [vmem:[%s5203_s0 + $0x3f8] ss:$20 sps:$4 sm:$0xff]  }
 0x14d   :  { %v4685_v30 = vpop.f32.mrf.mxu0  ;;  %v1858_v33 = vpop.f32.mrf.mxu1 }
 0x14e   :  { %v4694_v38 = vadd.f32 %v1858_v33, %v4506_v27 }
 0x14f   :  { %v1635_v42 = vpop.f32.mrf.mxu0  ;;  %v1860_v45 = vpop.f32.mrf.mxu1 }
 0x151   :  { %v4702_v46 = vpop.f32.mrf.mxu0  ;;  %v1863_v53 = vpop.f32.mrf.mxu1  ;;  %2054 = vmatmul.mubr.bf16.gmra.mxu1 %v3964_v34  ;;  %3678 = vmatmul.mubr.msk.bf16.gmra.mxu0 %vm1427_vm0, %v3968_v37  ;;  %v3982_v34 = vld [vmem:[%s5203_s0 + $0x420] ss:$20 sps:$4 sm:$0xff]  }
 0x152   :  { %v4706_v54 = vadd.f32 %v1863_v53, %v4522_v35  ;;  %2061 = vmatprep.mubr.bf16.mxu1 %v3971_v23  ;;  %3681 = vmatprep.mubr.msk.bf16.mxu0 %vm1427_vm0, %v3972_v41  ;;  %v3976_v35 = vld [vmem:[%s5203_s0 + $0x46c] ss:$20 sps:$4 sm:$0xff]  }
 0x153   :  { %v1640_v27 = vpop.f32.mrf.mxu0  ;;  %v1865_v55 = vpop.f32.mrf.mxu1 }
 0x155   :  { %v4709_v56 = vpop.f32.mrf.mxu0  ;;  %v1866_v57 = vpop.f32.mrf.mxu1 }
 0x156   :  { %v4718_v3 = vadd.f32 %v1866_v57, %v4528_v39  ;;  %v3979_v57 = vld [vmem:[%s5203_s0 + $0x490] ss:$20 sps:$4 sm:$0xff]  }
 0x157   :  { %v1643_v6 = vpop.f32.mrf.mxu0  ;;  %v1868_v7 = vpop.f32.mrf.mxu1 }
 0x159   :  { %v4726_v10 = vpop.f32.mrf.mxu0  ;;  %v1871_v0 = vpop.f32.mrf.mxu1  ;;  %2062 = vmatmul.mubr.bf16.gmra.mxu1 %v3969_v58  ;;  %3682 = vmatmul.mubr.msk.bf16.gmra.mxu0 %vm1427_vm0, %v3973_v62  ;;  %v3983_v58 = vld [vmem:[%s5203_s0 + $0x448] ss:$20 sps:$4 sm:$0xff]  }
 0x15a   :  { %v4730_v17 = vadd.f32 %v1871_v0, %v4544_v47  ;;  %2069 = vmatprep.mubr.bf16.mxu1 %v3976_v35  ;;  %3685 = vmatprep.mubr.msk.bf16.mxu0 %vm1427_vm0, %v3977_v4  ;;  %v3981_v47 = vld [vmem:[%s5203_s0 + $0x494] ss:$20 sps:$4 sm:$0xff]   ;;  %v3987_v35 = vld [vmem:[%s5203_s0 + $0x470] ss:$20 sps:$4 sm:$0xff]  }
 0x15b   :  { %v1648_v39 = vpop.f32.mrf.mxu0  ;;  %v1873_v18 = vpop.f32.mrf.mxu1 }
 0x15d   :  { %v4733_v19 = vpop.f32.mrf.mxu0  ;;  %v1874_v21 = vpop.f32.mrf.mxu1 }
 0x15e   :  { %v4742_v33 = vadd.f32 %v1874_v21, %v4550_v51 }
 0x15f   :  { %v1651_v37 = vpop.f32.mrf.mxu0  ;;  %v1876_v23 = vpop.f32.mrf.mxu1 }
 0x160   :  { %v3992_v37 = vld [vmem:[%s5203_s0 + $0x4c0] ss:$20 sps:$4 sm:$0xff]  }
 0x161   :  { %v4750_v41 = vpop.f32.mrf.mxu0  ;;  %v1879_v42 = vpop.f32.mrf.mxu1  ;;  %2070 = vmatmul.mubr.bf16.gmra.mxu1 %v3974_v15  ;;  %3686 = vmatmul.mubr.msk.bf16.gmra.mxu0 %vm1427_vm0, %v3978_v29  ;;  %v3984_v29 = vld [vmem:[%s5203_s0 + $0x4b8] ss:$20 sps:$4 sm:$0xff]  }
 0x162   :  { %v4754_v45 = vadd.f32 %v1879_v42, %v4566_v59  ;;  %2077 = vmatprep.mubr.bf16.mxu1 %v3981_v47  ;;  %3689 = vmatprep.mubr.msk.bf16.mxu0 %vm1427_vm0, %v3982_v34  ;;  %v3986_v59 = vld [vmem:[%s5203_s0 + $0x4bc] ss:$20 sps:$4 sm:$0xff]   ;;  %v3988_v47 = vld [vmem:[%s5203_s0 + $0x498] ss:$20 sps:$4 sm:$0xff]  }
 0x163   :  { %v1656_v51 = vpop.f32.mrf.mxu0  ;;  %v1881_v53 = vpop.f32.mrf.mxu1 }
 0x165   :  { %v4757_v27 = vpop.f32.mrf.mxu0  ;;  %v1882_v55 = vpop.f32.mrf.mxu1 }
 0x166   :  { %v4766_v62 = vadd.f32 %v1882_v55, %v4572_v63 }
 0x167   :  { %v1659_v4 = vpop.f32.mrf.mxu0  ;;  %v1884_v6 = vpop.f32.mrf.mxu1 }
 0x168   :  { %v3993_v4 = vld [vmem:[%s5203_s0 + $0x4e8] ss:$20 sps:$4 sm:$0xff]  }
 0x169   :  { %v4774_v7 = vpop.f32.mrf.mxu0  ;;  %v1887_v0 = vpop.f32.mrf.mxu1  ;;  %2078 = vmatmul.mubr.bf16.gmra.mxu1 %v3979_v57  ;;  %3690 = vmatmul.mubr.msk.bf16.gmra.mxu0 %vm1427_vm0, %v3983_v58 }
 0x16a   :  { %v4778_v39 = vadd.f32 %v1887_v0, %v4588_v8  ;;  %2085 = vmatprep.mubr.bf16.mxu1 %v3986_v59  ;;  %3693 = vmatprep.mubr.msk.bf16.mxu0 %vm1427_vm0, %v3987_v35  ;;  %v3991_v8 = vld [vmem:[%s5203_s0 + $0x4e4] ss:$20 sps:$4 sm:$0xff]   ;;  %v3989_v35 = vld [vmem:[%s5203_s0 + $0x4e0] ss:$20 sps:$4 sm:$0xff]  }
 0x16b   :  { %v1664_v63 = vpop.f32.mrf.mxu0  ;;  %v1889_v18 = vpop.f32.mrf.mxu1 }
 0x16d   :  { %v4781_v21 = vpop.f32.mrf.mxu0  ;;  %v1890_v15 = vpop.f32.mrf.mxu1 }
 0x16e   :  { %v4790_v34 = vadd.f32 %v1890_v15, %v4594_v13 }
 0x16f   :  { %v1667_v23 = vpop.f32.mrf.mxu0  ;;  %v1892_v42 = vpop.f32.mrf.mxu1 }
 0x171   :  { %v4798_v51 = vpop.f32.mrf.mxu0  ;;  %v1895_v53 = vpop.f32.mrf.mxu1  ;;  %2086 = vmatmul.mubr.bf16.gmra.mxu1 %v3984_v29  ;;  %3694 = vmatmul.mubr.msk.bf16.gmra.mxu0 %vm1427_vm0, %v3988_v47 }
 0x172   :  { %v4802_v55 = vadd.f32 %v1895_v53, %v4610_v25  ;;  %2093 = vmatprep.mubr.bf16.mxu1 %v3991_v8  ;;  %3697 = vmatprep.mubr.msk.bf16.mxu0 %vm1427_vm0, %v3992_v37 }
 0x173   :  { %v1672_v13 = vpop.f32.mrf.mxu0  ;;  %v1897_v57 = vpop.f32.mrf.mxu1 }
 0x175   :  { %v4805_v58 = vpop.f32.mrf.mxu0  ;;  %v1898_v59 = vpop.f32.mrf.mxu1 }
 0x176   :  { %v4814_v6 = vadd.f32 %v1898_v59, %v4616_v31 }
 0x177   :  { %v1675_v25 = vpop.f32.mrf.mxu0  ;;  %v1900_v0 = vpop.f32.mrf.mxu1 }
 0x179   :  { %v4816_v63 = vpop.f32.mrf.mxu0  ;;  %v1903_v18 = vpop.f32.mrf.mxu1  ;;  %2094 = vmatmul.mubr.bf16.gmra.mxu1 %v3989_v35  ;;  %3698 = vmatmul.mubr.msk.bf16.gmra.mxu0 %vm1427_vm0, %v3993_v4 }
 0x17a   :  { %v4820_v15 = vadd.f32 %v1903_v18, %v4632_v43 }
 0x17b   :  { %v1680_v29 = vpop.f32.mrf.mxu0  ;;  %v1905_v47 = vpop.f32.mrf.mxu1 }
 0x17d   :  { %v4822_v8 = vpop.f32.mrf.mxu0  ;;  %v1906_v37 = vpop.f32.mrf.mxu1 }
 0x17e   :  { %v4825_v23 = vadd.f32 %v1906_v37, %v4638_v49 }
 0x17f   :  { %v1683_v31 = vpop.f32.mrf.mxu0  ;;  %v1908_v42 = vpop.f32.mrf.mxu1 }
 0x181   :  { %v4827_v53 = vpop.f32.mrf.mxu0  ;;  %v1911_v13 = vpop.f32.mrf.mxu1 }
 0x182   :  { %v4830_v57 = vadd.f32 %v1911_v13, %v4654_v61 }
 0x183   :  { %v1688_v59 = vpop.f32.mrf.mxu0  ;;  %v1913_v35 = vpop.f32.mrf.mxu1 }
 0x185   :  { %v4832_v43 = vpop.f32.mrf.mxu0  ;;  %v1914_v4 = vpop.f32.mrf.mxu1 }
 0x186   :  { %v4835_v25 = vadd.f32 %v1914_v4, %v4661_v5 }
 0x187   :  { %v1691_v0 = vpop.f32.mrf.mxu0  ;;  %v1916_v18 = vpop.f32.mrf.mxu1 }
 0x189   :  { %v4837_v49 = vpop.f32.mrf.mxu0  ;;  %v1919_v29 = vpop.f32.mrf.mxu1 }
 0x18a   :  { %v4840_v47 = vadd.f32 %v1919_v29, %v4678_v20 }
 0x18b   :  { %v1696_v37 = vpop.f32.mrf.mxu0  ;;  %v1921_v31 = vpop.f32.mrf.mxu1 }
 0x18d   :  { %v4842_v61 = vpop.f32.mrf.mxu0  ;;  %v1922_v42 = vpop.f32.mrf.mxu1 }
 0x18e   :  { %v4845_v13 = vadd.f32 %v1922_v42, %v4685_v30 }
 0x18f   :  { %v1699_v59 = vpop.f32.mrf.mxu0  ;;  %v1924_v35 = vpop.f32.mrf.mxu1 }
 0x191   :  { %v4847_v5 = vpop.f32.mrf.mxu0  ;;  %v1927_v4 = vpop.f32.mrf.mxu1 }
 0x192   :  { %v4850_v0 = vadd.f32 %v1927_v4, %v4702_v46 }
 0x193   :  { %v1704_v18 = vpop.f32.mrf.mxu0  ;;  %v1929_v50 = vpop.f32.mrf.mxu1 }
 0x195   :  { %v4852_v20 = vpop.f32.mrf.mxu0  ;;  %v1930_v29 = vpop.f32.mrf.mxu1 }
 0x196   :  { %v4855_v37 = vadd.f32 %v1930_v29, %v4709_v56 }
 0x197   :  { %v1707_v31 = vpop.f32.mrf.mxu0  ;;  %v1932_v32 = vpop.f32.mrf.mxu1 }
 0x199   :  { %v4857_v30 = vpop.f32.mrf.mxu0  ;;  %v1935_v42 = vpop.f32.mrf.mxu1 }
 0x19a   :  { %v4860_v59 = vadd.f32 %v1935_v42, %v4726_v10 }
 0x19b   :  { %v1712_v35 = vpop.f32.mrf.mxu0  ;;  %v1937_v44 = vpop.f32.mrf.mxu1 }
 0x19d   :  { %v4862_v46 = vpop.f32.mrf.mxu0  ;;  %v1938_v4 = vpop.f32.mrf.mxu1 }
 0x19e   :  { %v4865_v50 = vadd.f32 %v1938_v4, %v4733_v19 }
 0x19f   :  { %v1715_v18 = vpop.f32.mrf.mxu0  ;;  %v1940_v26 = vpop.f32.mrf.mxu1 }
 0x1a1   :  { %v4867_v56 = vpop.f32.mrf.mxu0  ;;  %v1943_v29 = vpop.f32.mrf.mxu1 }
 0x1a2   :  { %v4870_v32 = vadd.f32 %v1943_v29, %v4750_v41 }
 0x1a3   :  { %v1720_v31 = vpop.f32.mrf.mxu0  ;;  %v1945_v1 = vpop.f32.mrf.mxu1 }
 0x1a5   :  { %v4872_v10 = vpop.f32.mrf.mxu0  ;;  %v1946_v42 = vpop.f32.mrf.mxu1 }
 0x1a6   :  { %v4875_v44 = vadd.f32 %v1946_v42, %v4757_v27 }
 0x1a7   :  { %v1723_v35 = vpop.f32.mrf.mxu0  ;;  %v1948_v14 = vpop.f32.mrf.mxu1 }
 0x1a9   :  { %v4877_v19 = vpop.f32.mrf.mxu0  ;;  %v1951_v4 = vpop.f32.mrf.mxu1 }
 0x1aa   :  { %v4880_v26 = vadd.f32 %v1951_v4, %v4774_v7 }
 0x1ab   :  { %v1728_v18 = vpop.f32.mrf.mxu0  ;;  %v1953_v60 = vpop.f32.mrf.mxu1 }
 0x1ad   :  { %v4882_v41 = vpop.f32.mrf.mxu0  ;;  %v1954_v29 = vpop.f32.mrf.mxu1 }
 0x1ae   :  { %v4885_v1 = vadd.f32 %v1954_v29, %v4781_v21 }
 0x1af   :  { %v1731_v31 = vpop.f32.mrf.mxu0  ;;  %v1956_v9 = vpop.f32.mrf.mxu1 }
 0x1b1   :  { %v4887_v27 = vpop.f32.mrf.mxu0  ;;  %v1959_v42 = vpop.f32.mrf.mxu1 }
 0x1b2   :  { %v4890_v14 = vadd.f32 %v1959_v42, %v4798_v51 }
 0x1b3   :  { %v1736_v35 = vpop.f32.mrf.mxu0  ;;  %v1961_v40 = vpop.f32.mrf.mxu1 }
 0x1b5   :  { %v4892_v7 = vpop.f32.mrf.mxu0  ;;  %v1962_v4 = vpop.f32.mrf.mxu1 }
 0x1b6   :  { %5222 = vst [vmem:[#allocation19_spill] sm:$0xff] %v4892_v7  ;;  %v4895_v60 = vadd.f32 %v1962_v4, %v4805_v58 }
 0x1b7   :  { %v1739_v18 = vpop.f32.mrf.mxu0  ;;  %v1964_v52 = vpop.f32.mrf.mxu1 }
 0x1b9   :  { %v4897_v21 = vpop.f32.mrf.mxu0  ;;  %v1967_v29 = vpop.f32.mrf.mxu1 }
 0x1ba   :  { %v4900_v9 = vadd.f32 %v1967_v29, %v4816_v63  ;;  %v4913_v63 = vld [vmem:[%s5204_s2] ss:$0 sm:$0xff] }
 0x1bb   :  { %v1744_v31 = vpop.f32.mrf.mxu0  ;;  %v1969_v36 = vpop.f32.mrf.mxu1 }
 0x1bd   :  { %v4902_v51 = vpop.f32.mrf.mxu0  ;;  %v4904_v42 = vpop.f32.mrf.mxu1 }
 0x1be   :  { %5223 = vst [vmem:[#allocation20_spill] sm:$0xff] %v4902_v51 }
 0x1bf   :  { %v1747_v40 = vpop.f32.mrf.mxu0  ;;  %v1972_v35 = vpop.f32.mrf.mxu1 }
 0x1c1   :  { %v1975_v48 = vpop.f32.mrf.mxu1  ;;  %v3639_v16 = vpop.f32.mrf.mxu0 }
 0x1c2   :  { %v4907_v58 = vadd.f32 %v1975_v48, %v4827_v53  ;;  %v2145_v52 = vadd.f32 %v3639_v16, %v4682_v22 }
 0x1c3   :  { %v1977_v4 = vpop.f32.mrf.mxu1  ;;  %v2136_v36 = vpop.f32.mrf.mxu0 }
 0x1c4   :  { %v2137_v18 = vadd.f32 %v2136_v36, %v4658_v2  ;;  %v2595_v40 = vadd.f32 %v4913_v63, %v2145_v52 }
 0x1c5   :  { %v1978_v29 = vpop.f32.mrf.mxu1  ;;  %v3640_v31 = vpop.f32.mrf.mxu0 }
 0x1c6   :  { %v4918_v35 = vadd.f32 %v1978_v29, %v4832_v43  ;;  %v2148_v48 = vadd.f32 %v3640_v31, %v4694_v38  ;;  %v2593_v22 = vadd.f32 %v4913_v63, %v2137_v18  ;;  %v2659_v36 = vmax.f32 %v2595_v40, 0.0 }
 0x1c7   :  { %v1980_v53 = vpop.f32.mrf.mxu1  ;;  %v2139_v16 = vpop.f32.mrf.mxu0 }
 0x1c8   :  { %v2596_v28 = vadd.f32 %v4913_v63, %v2148_v48  ;;  %v2140_v4 = vadd.f32 %v2139_v16, %v4670_v11  ;;  %v2657_v38 = vmax.f32 %v2593_v22, 0.0 }
 0x1c9   :  { %v4924_v12 = vpop.f32.mrf.mxu1  ;;  %v3643_v2 = vpop.f32.mrf.mxu0 }
 0x1ca   :  { %v2660_v24 = vmax.f32 %v2596_v28, 0.0  ;;  %v2594_v52 = vadd.f32 %v4913_v63, %v2140_v4  ;;  %v2161_v43 = vadd.f32 %v3643_v2, %v4730_v17 }
 0x1cb   :  { %v1985_v29 = vpop.f32.mrf.mxu1  ;;  %v2152_v7 = vpop.f32.mrf.mxu0 }
 0x1cc   :  { %v3410_v31 = vpack.c.bf16 %v2660_v24, %v2659_v36  ;;  %v2658_v53 = vmax.f32 %v2594_v52, 0.0  ;;  %v2153_v18 = vadd.f32 %v2152_v7, %v4706_v54  ;;  %v2599_v28 = vadd.f32 %v4913_v63, %v2161_v43 }
 0x1cd   :  { %v4929_v51 = vpop.f32.mrf.mxu1  ;;  %v3644_v48 = vpop.f32.mrf.mxu0 }
 0x1ce   :  { %3562 = vst [vmem:[%s5205_s3 + $0x8] sm:$0xff] %v3410_v31   ;;  %v3405_v11 = vpack.c.bf16 %v2658_v53, %v2657_v38  ;;  %v2164_v40 = vadd.f32 %v3644_v48, %v4742_v33  ;;  %v2597_v24 = vadd.f32 %v4913_v63, %v2153_v18  ;;  %v2663_v36 = vmax.f32 %v2599_v28, 0.0 }
 0x1cf   :  { %v1988_v17 = vpop.f32.mrf.mxu1  ;;  %v2155_v16 = vpop.f32.mrf.mxu0 }
 0x1d0   :  { %3406 = vst [vmem:[%s5205_s3] sm:$0xff] %v3405_v11   ;;  %v2156_v54 = vadd.f32 %v2155_v16, %v4718_v3  ;;  %v2600_v7 = vadd.f32 %v4913_v63, %v2164_v40  ;;  %v2661_v38 = vmax.f32 %v2597_v24, 0.0 }
 0x1d1   :  { %v4942_v22 = vpop.f32.mrf.mxu1  ;;  %v3647_v4 = vpop.f32.mrf.mxu0 }
 0x1d2   :  { %v2598_v2 = vadd.f32 %v4913_v63, %v2156_v54  ;;  %v2664_v52 = vmax.f32 %v2600_v7, 0.0  ;;  %v2177_v33 = vadd.f32 %v3647_v4, %v4778_v39 }
 0x1d3   :  { %v1993_v43 = vpop.f32.mrf.mxu1  ;;  %v2168_v29 = vpop.f32.mrf.mxu0 }
 0x1d4   :  { %v2662_v31 = vmax.f32 %v2598_v2, 0.0  ;;  %v2169_v53 = vadd.f32 %v2168_v29, %v4754_v45  ;;  %v3420_v18 = vpack.c.bf16 %v2664_v52, %v2663_v36  ;;  %v2603_v28 = vadd.f32 %v4913_v63, %v2177_v33 }
 0x1d5   :  { %v4947_v48 = vpop.f32.mrf.mxu1  ;;  %v3648_v3 = vpop.f32.mrf.mxu0 }
 0x1d6   :  { %v3415_v11 = vpack.c.bf16 %v2662_v31, %v2661_v38  ;;  %3564 = vst [vmem:[%s5205_s3 + $0x18] sm:$0xff] %v3420_v18   ;;  %v2180_v40 = vadd.f32 %v3648_v3, %v4790_v34  ;;  %v2601_v45 = vadd.f32 %v4913_v63, %v2169_v53  ;;  %v2667_v2 = vmax.f32 %v2603_v28, 0.0 }
 0x1d7   :  { %v1996_v39 = vpop.f32.mrf.mxu1  ;;  %v2171_v17 = vpop.f32.mrf.mxu0 }
 0x1d8   :  { %3563 = vst [vmem:[%s5205_s3 + $0x10] sm:$0xff] %v3415_v11   ;;  %v2172_v16 = vadd.f32 %v2171_v17, %v4766_v62  ;;  %v2604_v24 = vadd.f32 %v4913_v63, %v2180_v40  ;;  %v2665_v43 = vmax.f32 %v2601_v45, 0.0 }
 0x1d9   :  { %v4960_v54 = vpop.f32.mrf.mxu1  ;;  %v3651_v7 = vpop.f32.mrf.mxu0 }
 0x1da   :  { %v2602_v4 = vadd.f32 %v4913_v63, %v2172_v16  ;;  %v2668_v36 = vmax.f32 %v2604_v24, 0.0  ;;  %v2193_v34 = vadd.f32 %v3651_v7, %v4820_v15 }
 0x1db   :  { %v2001_v52 = vpop.f32.mrf.mxu1  ;;  %v2184_v33 = vpop.f32.mrf.mxu0 }
 0x1dc   :  { %v2666_v29 = vmax.f32 %v2602_v4, 0.0  ;;  %v2185_v38 = vadd.f32 %v2184_v33, %v4802_v55  ;;  %v3430_v31 = vpack.c.bf16 %v2668_v36, %v2667_v2  ;;  %v2607_v3 = vadd.f32 %v4913_v63, %v2193_v34 }
 0x1dd   :  { %v4965_v53 = vpop.f32.mrf.mxu1  ;;  %v3652_v62 = vpop.f32.mrf.mxu0 }
 0x1de   :  { %v3425_v18 = vpack.c.bf16 %v2666_v29, %v2665_v43  ;;  %3566 = vst [vmem:[%s5205_s3 + $0x28] sm:$0xff] %v3430_v31   ;;  %v2196_v11 = vadd.f32 %v3652_v62, %v4825_v23  ;;  %v2605_v55 = vadd.f32 %v4913_v63, %v2185_v38  ;;  %v2671_v24 = vmax.f32 %v2607_v3, 0.0 }
 0x1df   :  { %v2004_v15 = vpop.f32.mrf.mxu1  ;;  %v2187_v28 = vpop.f32.mrf.mxu0 }
 0x1e0   :  { %3565 = vst [vmem:[%s5205_s3 + $0x20] sm:$0xff] %v3425_v18   ;;  %v2188_v40 = vadd.f32 %v2187_v28, %v4814_v6  ;;  %v2608_v39 = vadd.f32 %v4913_v63, %v2196_v11  ;;  %v2669_v36 = vmax.f32 %v2605_v55, 0.0 }
 0x1e1   :  { %v4978_v17 = vpop.f32.mrf.mxu1  ;;  %v3655_v45 = vpop.f32.mrf.mxu0 }
 0x1e2   :  { %v2606_v16 = vadd.f32 %v4913_v63, %v2188_v40  ;;  %v2672_v7 = vmax.f32 %v2608_v39, 0.0  ;;  %v2209_v23 = vadd.f32 %v3655_v45, %v4840_v47 }
 0x1e3   :  { %v2009_v4 = vpop.f32.mrf.mxu1  ;;  %v2200_v2 = vpop.f32.mrf.mxu0 }
 0x1e4   :  { %v2670_v34 = vmax.f32 %v2606_v16, 0.0  ;;  %v2201_v52 = vadd.f32 %v2200_v2, %v4830_v57  ;;  %v3440_v33 = vpack.c.bf16 %v2672_v7, %v2671_v24  ;;  %v2611_v38 = vadd.f32 %v4913_v63, %v2209_v23 }
 0x1e5   :  { %v4983_v43 = vpop.f32.mrf.mxu1  ;;  %v3656_v6 = vpop.f32.mrf.mxu0 }
 0x1e6   :  { %v3435_v29 = vpack.c.bf16 %v2670_v34, %v2669_v36  ;;  %3568 = vst [vmem:[%s5205_s3 + $0x38] sm:$0xff] %v3440_v33   ;;  %v2212_v31 = vadd.f32 %v3656_v6, %v4845_v13  ;;  %v2609_v57 = vadd.f32 %v4913_v63, %v2201_v52  ;;  %v2675_v55 = vmax.f32 %v2611_v38, 0.0 }
 0x1e7   :  { %v2012_v47 = vpop.f32.mrf.mxu1  ;;  %v2203_v62 = vpop.f32.mrf.mxu0 }
 0x1e8   :  { %3567 = vst [vmem:[%s5205_s3 + $0x30] sm:$0xff] %v3435_v29   ;;  %v2204_v18 = vadd.f32 %v2203_v62, %v4835_v25  ;;  %v2612_v3 = vadd.f32 %v4913_v63, %v2212_v31  ;;  %v2673_v16 = vmax.f32 %v2609_v57, 0.0 }
 0x1e9   :  { %v4996_v11 = vpop.f32.mrf.mxu1  ;;  %v3659_v15 = vpop.f32.mrf.mxu0 }
 0x1ea   :  { %v2610_v28 = vadd.f32 %v4913_v63, %v2204_v18  ;;  %v2676_v40 = vmax.f32 %v2612_v3, 0.0  ;;  %v2225_v13 = vadd.f32 %v3659_v15, %v4860_v59 }
 0x1eb   :  { %v2017_v39 = vpop.f32.mrf.mxu1  ;;  %v2216_v45 = vpop.f32.mrf.mxu0 }
 0x1ec   :  { %v2674_v24 = vmax.f32 %v2610_v28, 0.0  ;;  %v2217_v7 = vadd.f32 %v2216_v45, %v4850_v0  ;;  %v3450_v23 = vpack.c.bf16 %v2676_v40, %v2675_v55  ;;  %v2615_v36 = vadd.f32 %v4913_v63, %v2225_v13 }
 0x1ed   :  { %v5001_v4 = vpop.f32.mrf.mxu1  ;;  %v3660_v25 = vpop.f32.mrf.mxu0 }
 0x1ee   :  { %v3445_v2 = vpack.c.bf16 %v2674_v24, %v2673_v16  ;;  %3570 = vst [vmem:[%s5205_s3 + $0x48] sm:$0xff] %v3450_v23   ;;  %v2228_v34 = vadd.f32 %v3660_v25, %v4865_v50  ;;  %v2613_v0 = vadd.f32 %v4913_v63, %v2217_v7  ;;  %v2679_v47 = vmax.f32 %v2615_v36, 0.0 }
 0x1ef   :  { %v2020_v59 = vpop.f32.mrf.mxu1  ;;  %v2219_v52 = vpop.f32.mrf.mxu0 }
 0x1f0   :  { %3569 = vst [vmem:[%s5205_s3 + $0x40] sm:$0xff] %v3445_v2   ;;  %v2220_v33 = vadd.f32 %v2219_v52, %v4855_v37  ;;  %v2616_v6 = vadd.f32 %v4913_v63, %v2228_v34  ;;  %v2677_v3 = vmax.f32 %v2613_v0, 0.0 }
 0x1f1   :  { %v5014_v29 = vpop.f32.mrf.mxu1  ;;  %v3663_v38 = vpop.f32.mrf.mxu0 }
 0x1f2   :  { %v2614_v31 = vadd.f32 %v4913_v63, %v2220_v33  ;;  %v2680_v62 = vmax.f32 %v2616_v6, 0.0  ;;  %v2241_v50 = vadd.f32 %v3663_v38, %v4880_v26 }
 0x1f3   :  { %v2025_v57 = vpop.f32.mrf.mxu1  ;;  %v2232_v18 = vpop.f32.mrf.mxu0 }
 0x1f4   :  { %v2678_v15 = vmax.f32 %v2614_v31, 0.0  ;;  %v2233_v28 = vadd.f32 %v2232_v18, %v4870_v32  ;;  %v3460_v55 = vpack.c.bf16 %v2680_v62, %v2679_v47  ;;  %v2619_v39 = vadd.f32 %v4913_v63, %v2241_v50 }
 0x1f5   :  { %v5019_v40 = vpop.f32.mrf.mxu1  ;;  %v3664_v37 = vpop.f32.mrf.mxu0 }
 0x1f6   :  { %v3455_v13 = vpack.c.bf16 %v2678_v15, %v2677_v3  ;;  %3572 = vst [vmem:[%s5205_s3 + $0x58] sm:$0xff] %v3460_v55   ;;  %v2244_v45 = vadd.f32 %v3664_v37, %v4885_v1  ;;  %v2617_v32 = vadd.f32 %v4913_v63, %v2233_v28  ;;  %v2683_v36 = vmax.f32 %v2619_v39, 0.0 }
 0x1f7   :  { %v2028_v26 = vpop.f32.mrf.mxu1  ;;  %v2235_v16 = vpop.f32.mrf.mxu0 }
 0x1f8   :  { %3571 = vst [vmem:[%s5205_s3 + $0x50] sm:$0xff] %v3455_v13   ;;  %v2236_v24 = vadd.f32 %v2235_v16, %v4875_v44  ;;  %v2620_v7 = vadd.f32 %v4913_v63, %v2244_v45  ;;  %v2681_v0 = vmax.f32 %v2617_v32, 0.0  ;;  %v1971_v44 = vadd.f32 %v4904_v42, %v4822_v8 }
 0x1f9   :  { %v5032_v23 = vpop.f32.mrf.mxu1  ;;  %v3667_v25 = vpop.f32.mrf.mxu0  ;;  %v1984_v42 = vadd.f32 %v4924_v12, %v4837_v49 }
 0x1fa   :  { %v2618_v2 = vadd.f32 %v4913_v63, %v2236_v24  ;;  %v2684_v34 = vmax.f32 %v2620_v7, 0.0  ;;  %v2257_v1 = vadd.f32 %v3667_v25, %v4900_v9 }
 0x1fb   :  { %v2033_v59 = vpop.f32.mrf.mxu1  ;;  %v2248_v52 = vpop.f32.mrf.mxu0 }
 0x1fc   :  { %v2682_v33 = vmax.f32 %v2618_v2, 0.0  ;;  %v2249_v6 = vadd.f32 %v2248_v52, %v4890_v14  ;;  %v3470_v38 = vpack.c.bf16 %v2684_v34, %v2683_v36  ;;  %v2623_v9 = vadd.f32 %v4913_v63, %v2257_v1 }
 0x1fd   :  { %v5039_v31 = vpop.f32.mrf.mxu1  ;;  %v3668_v47 = vpop.f32.mrf.mxu0 }
 0x1fe   :  { %v3465_v62 = vpack.c.bf16 %v2682_v33, %v2681_v0  ;;  %3574 = vst [vmem:[%s5205_s3 + $0x68] sm:$0xff] %v3470_v38   ;;  %v2260_v50 = vadd.f32 %v3668_v47, %v1971_v44  ;;  %v2621_v8 = vadd.f32 %v4913_v63, %v2249_v6  ;;  %v2687_v37 = vmax.f32 %v2623_v9, 0.0 }
 0x1ff   :  { %v2036_v57 = vpop.f32.mrf.mxu1  ;;  %v2251_v18 = vpop.f32.mrf.mxu0  ;;  %v1992_v33 = vadd.f32 %v4942_v22, %v4847_v5  ;;  %v1995_v5 = vadd.f32 %v4947_v48, %v4852_v20  ;;  %v2016_v20 = vadd.f32 %v4996_v11, %v4877_v19  ;;  %v2019_v19 = vadd.f32 %v5001_v4, %v4882_v41 }
 0x200   :  { %3573 = vst [vmem:[%s5205_s3 + $0x60] sm:$0xff] %v3465_v62   ;;  %v2252_v14 = vadd.f32 %v2251_v18, %v4895_v60  ;;  %v2624_v3 = vadd.f32 %v4913_v63, %v2260_v50  ;;  %v2685_v16 = vmax.f32 %v2621_v8, 0.0  ;;  %v1987_v60 = vadd.f32 %v4929_v51, %v4842_v61 }
 0x201   :  { %v5053_v15 = vpop.f32.mrf.mxu1  ;;  %v3671_v28 = vpop.f32.mrf.mxu0 }
 0x202   :  { %v2622_v55 = vadd.f32 %v4913_v63, %v2252_v14  ;;  %v2688_v13 = vmax.f32 %v2624_v3, 0.0  ;;  %v2273_v39 = vadd.f32 %v3671_v28, %v1984_v42 }
 0x203   :  { %v2041_v45 = vpop.f32.mrf.mxu1  ;;  %v2264_v26 = vpop.f32.mrf.mxu0 }
 0x204   :  { %v2686_v32 = vmax.f32 %v2622_v55, 0.0  ;;  %v2265_v24 = vadd.f32 %v2264_v26, %v4907_v58  ;;  %v3480_v12 = vpack.c.bf16 %v2688_v13, %v2687_v37  ;;  %v2627_v2 = vadd.f32 %v4913_v63, %v2273_v39 }
 0x205   :  { %v5059_v49 = vpop.f32.mrf.mxu1  ;;  %v3672_v7 = vpop.f32.mrf.mxu0  ;;  %v2000_v58 = vadd.f32 %v4960_v54, %v4857_v30  ;;  %v2003_v30 = vadd.f32 %v4965_v53, %v4862_v46  ;;  %v2008_v13 = vadd.f32 %v4978_v17, %v4867_v56  ;;  %v2011_v56 = vadd.f32 %v4983_v43, %v4872_v10 }
 0x206   :  { %v3475_v25 = vpack.c.bf16 %v2686_v32, %v2685_v16  ;;  %3576 = vst [vmem:[%s5205_s3 + $0x78] sm:$0xff] %v3480_v12   ;;  %v2276_v36 = vadd.f32 %v3672_v7, %v1987_v60  ;;  %v2625_v61 = vadd.f32 %v4913_v63, %v2265_v24  ;;  %v2691_v44 = vmax.f32 %v2627_v2, 0.0 }
 0x207   :  { %v2044_v34 = vpop.f32.mrf.mxu1  ;;  %v2267_v1 = vpop.f32.mrf.mxu0  ;;  %v2032_v10 = vadd.f32 %v5032_v23, %v4897_v21 }
 0x208   :  { %3575 = vst [vmem:[%s5205_s3 + $0x70] sm:$0xff] %v3475_v25   ;;  %v2268_v51 = vadd.f32 %v2267_v1, %v4918_v35  ;;  %v2628_v59 = vadd.f32 %v4913_v63, %v2276_v36  ;;  %v2689_v50 = vmax.f32 %v2625_v61, 0.0 }
 0x209   :  { %v5073_v52 = vpop.f32.mrf.mxu1  ;;  %v3675_v0 = vpop.f32.mrf.mxu0 }
 0x20a   :  { %v2626_v6 = vadd.f32 %v4913_v63, %v2268_v51  ;;  %v2692_v38 = vmax.f32 %v2628_v59, 0.0  ;;  %v2289_v47 = vadd.f32 %v3675_v0, %v2000_v58  ;;  %v2024_v59 = vadd.f32 %v5014_v29, %v4887_v27 }
 0x20b   :  { %v2049_v62 = vpop.f32.mrf.mxu1  ;;  %v2280_v9 = vpop.f32.mrf.mxu0 }
 0x20c   :  { %v2690_v35 = vmax.f32 %v2626_v6, 0.0  ;;  %v2281_v57 = vadd.f32 %v2280_v9, %v1992_v33  ;;  %v3490_v54 = vpack.c.bf16 %v2692_v38, %v2691_v44  ;;  %v2631_v14 = vadd.f32 %v4913_v63, %v2289_v47 }
 0x20d   :  { %v5080_v18 = vpop.f32.mrf.mxu1  ;;  %v3676_v8 = vpop.f32.mrf.mxu0 }
 0x20e   :  { %v3485_v22 = vpack.c.bf16 %v2690_v35, %v2689_v50  ;;  %3578 = vst [vmem:[%s5205_s3 + $0x88] sm:$0xff] %v3490_v54   ;;  %v2292_v42 = vadd.f32 %v3676_v8, %v2003_v30  ;;  %v2629_v46 = vadd.f32 %v4913_v63, %v2281_v57  ;;  %v2695_v45 = vmax.f32 %v2631_v14, 0.0  ;;  %v5224_v35 = vld [vmem:[#allocation20_spill] sm:$0xff]  ;;  %v5225_v54 = vld [vmem:[#allocation19_spill] sm:$0xff] }
 0x20f   :  { %v2052_v3 = vpop.f32.mrf.mxu1  ;;  %v2283_v28 = vpop.f32.mrf.mxu0  ;;  %v2035_v21 = vadd.f32 %v5039_v31, %v5224_v35  ;;  %v2027_v8 = vadd.f32 %v5019_v40, %v5225_v54  ;;  %v5232_v35 = vld [vmem:[#allocation10_spill] sm:$0xff]  ;;  %v5233_v54 = vld [vmem:[#allocation8_spill] sm:$0xff] }
 0x210   :  { %3577 = vst [vmem:[%s5205_s3 + $0x80] sm:$0xff] %v3485_v22   ;;  %v2284_v53 = vadd.f32 %v2283_v28, %v1995_v5  ;;  %v2632_v48 = vadd.f32 %v4913_v63, %v2292_v42  ;;  %v2693_v60 = vmax.f32 %v2629_v46, 0.0  ;;  %v5226_v3 = vld [vmem:[#allocation5_spill] sm:$0xff] }
 0x211   :  { %v5095_v55 = vpop.f32.mrf.mxu1  ;;  %v3679_v37 = vpop.f32.mrf.mxu0  ;;  %v2048_v40 = vadd.f32 %v5073_v52, %v5226_v3 }
 0x212   :  { %v2630_v39 = vadd.f32 %v4913_v63, %v2284_v53  ;;  %v2696_v26 = vmax.f32 %v2632_v48, 0.0  ;;  %v2305_v16 = vadd.f32 %v3679_v37, %v2016_v20  ;;  %v5227_v20 = vld [vmem:[#allocation3_spill] sm:$0xff] }
 0x213   :  { %v2057_v32 = vpop.f32.mrf.mxu1  ;;  %v2296_v24 = vpop.f32.mrf.mxu0  ;;  %v2040_v48 = vadd.f32 %v5053_v15, %v5227_v20 }
 0x214   :  { %v2694_v12 = vmax.f32 %v2630_v39, 0.0  ;;  %v2297_v7 = vadd.f32 %v2296_v24, %v2008_v13  ;;  %v3500_v11 = vpack.c.bf16 %v2696_v26, %v2695_v45  ;;  %v2635_v36 = vadd.f32 %v4913_v63, %v2305_v16 }
 0x215   :  { %v5102_v25 = vpop.f32.mrf.mxu1  ;;  %v3680_v2 = vpop.f32.mrf.mxu0 }
 0x216   :  { %v3495_v17 = vpack.c.bf16 %v2694_v12, %v2693_v60  ;;  %3580 = vst [vmem:[%s5205_s3 + $0x98] sm:$0xff] %v3500_v11   ;;  %v2308_v34 = vadd.f32 %v3680_v2, %v2019_v19  ;;  %v2633_v41 = vadd.f32 %v4913_v63, %v2297_v7  ;;  %v2699_v33 = vmax.f32 %v2635_v36, 0.0  ;;  %v5228_v12 = vld [vmem:[#allocation6_spill] sm:$0xff]  ;;  %v5229_v2 = vld [vmem:[#allocation4_spill] sm:$0xff] }
 0x217   :  { %v2060_v1 = vpop.f32.mrf.mxu1  ;;  %v2299_v61 = vpop.f32.mrf.mxu0  ;;  %v2051_v52 = vadd.f32 %v5080_v18, %v5228_v12 }
 0x218   :  { %3579 = vst [vmem:[%s5205_s3 + $0x90] sm:$0xff] %v3495_v17   ;;  %v2300_v4 = vadd.f32 %v2299_v61, %v2011_v56  ;;  %v2636_v43 = vadd.f32 %v4913_v63, %v2308_v34  ;;  %v2697_v62 = vmax.f32 %v2633_v41, 0.0  ;;  %v2043_v56 = vadd.f32 %v5059_v49, %v5229_v2  ;;  %v5230_v41 = vld [vmem:[#allocation9_spill] sm:$0xff] }
 0x219   :  { %v2063_v51 = vpop.f32.mrf.mxu1  ;;  %v3683_v58 = vpop.f32.mrf.mxu0 }
 0x21a   :  { %v2634_v0 = vadd.f32 %v4913_v63, %v2300_v4  ;;  %v2700_v6 = vmax.f32 %v2636_v43, 0.0  ;;  %v2321_v44 = vadd.f32 %v3683_v58, %v2032_v10  ;;  %v2064_v4 = vadd.f32 %v2063_v51, %v5230_v41  ;;  %v5231_v58 = vld [vmem:[#allocation7_spill] sm:$0xff] }
 0x21b   :  { %v2065_v38 = vpop.f32.mrf.mxu1  ;;  %v2312_v47 = vpop.f32.mrf.mxu0  ;;  %v5238_v41 = vld [vmem:[#allocation15_spill] sm:$0xff] }
 0x21c   :  { %v2698_v9 = vmax.f32 %v2634_v0, 0.0  ;;  %v2313_v50 = vadd.f32 %v2312_v47, %v2024_v59  ;;  %v3510_v23 = vpack.c.bf16 %v2700_v6, %v2699_v33  ;;  %v2639_v29 = vadd.f32 %v4913_v63, %v2321_v44 }
 0x21d   :  { %v2066_v57 = vpop.f32.mrf.mxu1  ;;  %v3684_v30 = vpop.f32.mrf.mxu0  ;;  %v2056_v59 = vadd.f32 %v5095_v55, %v5231_v58 }
 0x21e   :  { %v3505_v27 = vpack.c.bf16 %v2698_v9, %v2697_v62  ;;  %3582 = vst [vmem:[%s5205_s3 + $0xa8] sm:$0xff] %v3510_v23   ;;  %v2324_v5 = vadd.f32 %v3684_v30, %v2035_v21  ;;  %v2637_v31 = vadd.f32 %v4913_v63, %v2313_v50  ;;  %v2703_v13 = vmax.f32 %v2639_v29, 0.0 }
 0x21f   :  { %v2068_v22 = vpop.f32.mrf.mxu1  ;;  %v2315_v14 = vpop.f32.mrf.mxu0  ;;  %v2067_v21 = vadd.f32 %v2066_v57, %v5232_v35  ;;  %v5240_v35 = vld [vmem:[#allocation16_spill] sm:$0xff] }
 0x220   :  { %3581 = vst [vmem:[%s5205_s3 + $0xa0] sm:$0xff] %v3505_v27   ;;  %v2316_v42 = vadd.f32 %v2315_v14, %v2027_v8  ;;  %v2640_v28 = vadd.f32 %v4913_v63, %v2324_v5  ;;  %v2701_v32 = vmax.f32 %v2637_v31, 0.0  ;;  %v2059_v8 = vadd.f32 %v5102_v25, %v5233_v54  ;;  %v5234_v31 = vld [vmem:[#allocation13_spill] sm:$0xff] }
 0x221   :  { %v2071_v46 = vpop.f32.mrf.mxu1  ;;  %v3687_v53 = vpop.f32.mrf.mxu0 }
 0x222   :  { %v2638_v37 = vadd.f32 %v4913_v63, %v2316_v42  ;;  %v2704_v39 = vmax.f32 %v2640_v28, 0.0  ;;  %v2337_v45 = vadd.f32 %v3687_v53, %v2048_v40  ;;  %v5235_v28 = vld [vmem:[#allocation11_spill] sm:$0xff] }
 0x223   :  { %v2073_v26 = vpop.f32.mrf.mxu1  ;;  %v2328_v16 = vpop.f32.mrf.mxu0  ;;  %v2072_v53 = vadd.f32 %v2071_v46, %v5235_v28 }
 0x224   :  { %v2702_v24 = vmax.f32 %v2638_v37, 0.0  ;;  %v2329_v60 = vadd.f32 %v2328_v16, %v2040_v48  ;;  %v3520_v7 = vpack.c.bf16 %v2704_v39, %v2703_v13  ;;  %v2643_v17 = vadd.f32 %v4913_v63, %v2337_v45 }
 0x225   :  { %v2074_v19 = vpop.f32.mrf.mxu1  ;;  %v3688_v11 = vpop.f32.mrf.mxu0 }
 0x226   :  { %v3515_v15 = vpack.c.bf16 %v2702_v24, %v2701_v32  ;;  %3584 = vst [vmem:[%s5205_s3 + $0xb8] sm:$0xff] %v3520_v7   ;;  %v2340_v36 = vadd.f32 %v3688_v11, %v2051_v52  ;;  %v2641_v18 = vadd.f32 %v4913_v63, %v2329_v60  ;;  %v2707_v33 = vmax.f32 %v2643_v17, 0.0  ;;  %v5236_v24 = vld [vmem:[#allocation14_spill] sm:$0xff]  ;;  %v5237_v11 = vld [vmem:[#allocation12_spill] sm:$0xff] }
 0x227   :  { %v2076_v34 = vpop.f32.mrf.mxu1  ;;  %v2331_v1 = vpop.f32.mrf.mxu0  ;;  %v2075_v2 = vadd.f32 %v2074_v19, %v5237_v11 }
 0x228   :  { %3583 = vst [vmem:[%s5205_s3 + $0xb0] sm:$0xff] %v3515_v15   ;;  %v2332_v61 = vadd.f32 %v2331_v1, %v2043_v56  ;;  %v2644_v49 = vadd.f32 %v4913_v63, %v2340_v36  ;;  %v2705_v62 = vmax.f32 %v2641_v18, 0.0 }
 0x229   :  { %v2079_v10 = vpop.f32.mrf.mxu1  ;;  %v3691_v43 = vpop.f32.mrf.mxu0 }
 0x22a   :  { %v2642_v0 = vadd.f32 %v4913_v63, %v2332_v61  ;;  %v2708_v6 = vmax.f32 %v2644_v49, 0.0  ;;  %v2353_v44 = vadd.f32 %v3691_v43, %v2064_v4  ;;  %v2080_v42 = vadd.f32 %v2079_v10, %v5234_v31  ;;  %v5239_v10 = vld [vmem:[#allocation17_spill] sm:$0xff] }
 0x22b   :  { %v2081_v38 = vpop.f32.mrf.mxu1  ;;  %v2344_v47 = vpop.f32.mrf.mxu0 }
 0x22c   :  { %v2706_v9 = vmax.f32 %v2642_v0, 0.0  ;;  %v2345_v50 = vadd.f32 %v2344_v47, %v2056_v59  ;;  %v3530_v51 = vpack.c.bf16 %v2708_v6, %v2707_v33  ;;  %v2647_v55 = vadd.f32 %v4913_v63, %v2353_v44 }
 0x22d   :  { %v2082_v23 = vpop.f32.mrf.mxu1  ;;  %v3692_v30 = vpop.f32.mrf.mxu0 }
 0x22e   :  { %v3525_v27 = vpack.c.bf16 %v2706_v9, %v2705_v62  ;;  %3586 = vst [vmem:[%s5205_s3 + $0xc8] sm:$0xff] %v3530_v51   ;;  %v2356_v29 = vadd.f32 %v3692_v30, %v2067_v21  ;;  %v2645_v57 = vadd.f32 %v4913_v63, %v2345_v50  ;;  %v2711_v48 = vmax.f32 %v2647_v55, 0.0 }
 0x22f   :  { %v2084_v5 = vpop.f32.mrf.mxu1  ;;  %v2347_v22 = vpop.f32.mrf.mxu0  ;;  %v2083_v60 = vadd.f32 %v2082_v23, %v5236_v24  ;;  %v5241_v23 = vld [vmem:[#allocation18_spill] sm:$0xff] }
 0x230   :  { %3585 = vst [vmem:[%s5205_s3 + $0xc0] sm:$0xff] %v3525_v27   ;;  %v2348_v14 = vadd.f32 %v2347_v22, %v2059_v8  ;;  %v2648_v25 = vadd.f32 %v4913_v63, %v2356_v29  ;;  %v2709_v26 = vmax.f32 %v2645_v57, 0.0 }
 0x231   :  { %v2087_v3 = vpop.f32.mrf.mxu1  ;;  %v3695_v40 = vpop.f32.mrf.mxu0 }
 0x232   :  { %v2646_v20 = vadd.f32 %v4913_v63, %v2348_v14  ;;  %v2712_v37 = vmax.f32 %v2648_v25, 0.0  ;;  %v2369_v13 = vadd.f32 %v3695_v40, %v2080_v42  ;;  %v2088_v4 = vadd.f32 %v2087_v3, %v5238_v41 }
 0x233   :  { %v2089_v39 = vpop.f32.mrf.mxu1  ;;  %v2360_v45 = vpop.f32.mrf.mxu0 }
 0x234   :  { %v2710_v16 = vmax.f32 %v2646_v20, 0.0  ;;  %v2361_v32 = vadd.f32 %v2360_v45, %v2072_v53  ;;  %v3540_v12 = vpack.c.bf16 %v2712_v37, %v2711_v48  ;;  %v2651_v46 = vadd.f32 %v4913_v63, %v2369_v13 }
 0x235   :  { %v2090_v52 = vpop.f32.mrf.mxu1  ;;  %v3696_v7 = vpop.f32.mrf.mxu0 }
 0x236   :  { %v3535_v56 = vpack.c.bf16 %v2710_v16, %v2709_v26  ;;  %3588 = vst [vmem:[%s5205_s3 + $0xd8] sm:$0xff] %v3540_v12   ;;  %v2372_v15 = vadd.f32 %v3696_v7, %v2083_v60  ;;  %v2649_v34 = vadd.f32 %v4913_v63, %v2361_v32  ;;  %v2715_v58 = vmax.f32 %v2651_v46, 0.0 }
 0x237   :  { %v2092_v17 = vpop.f32.mrf.mxu1  ;;  %v2363_v36 = vpop.f32.mrf.mxu0  ;;  %v2091_v21 = vadd.f32 %v2090_v52, %v5240_v35 }
 0x238   :  { %3587 = vst [vmem:[%s5205_s3 + $0xd0] sm:$0xff] %v3535_v56   ;;  %v2364_v1 = vadd.f32 %v2363_v36, %v2075_v2  ;;  %v2652_v18 = vadd.f32 %v4913_v63, %v2372_v15  ;;  %v2713_v6 = vmax.f32 %v2649_v34, 0.0 }
 0x239   :  { %v2095_v19 = vpop.f32.mrf.mxu1  ;;  %v3699_v61 = vpop.f32.mrf.mxu0 }
 0x23a   :  { %v2650_v49 = vadd.f32 %v4913_v63, %v2364_v1  ;;  %v2096_v43 = vadd.f32 %v2095_v19, %v5239_v10  ;;  %v2716_v59 = vmax.f32 %v2652_v18, 0.0 }
 0x23b   :  { %v2097_v0 = vpop.f32.mrf.mxu1  ;;  %v2376_v33 = vpop.f32.mrf.mxu0 }
 0x23c   :  { %v2714_v44 = vmax.f32 %v2650_v49, 0.0  ;;  %v2385_v38 = vadd.f32 %v3699_v61, %v2096_v43  ;;  %v2377_v47 = vadd.f32 %v2376_v33, %v2088_v4  ;;  %v3550_v62 = vpack.c.bf16 %v2716_v59, %v2715_v58 }
 0x23d   :  { %v2098_v9 = vpop.f32.mrf.mxu1  ;;  %v3700_v50 = vpop.f32.mrf.mxu0 }
 0x23e   :  { %v3545_v51 = vpack.c.bf16 %v2714_v44, %v2713_v6  ;;  %v2099_v30 = vadd.f32 %v2098_v9, %v5241_v23  ;;  %3590 = vst [vmem:[%s5205_s3 + $0xe8] sm:$0xff] %v3550_v62   ;;  %v2655_v27 = vadd.f32 %v4913_v63, %v2385_v38  ;;  %v2653_v55 = vadd.f32 %v4913_v63, %v2377_v47 }
 0x23f   :  { %v2100_v54 = vpop.f32.mrf.mxu1  ;;  %v2379_v8 = vpop.f32.mrf.mxu0 }
 0x240   :  { %3589 = vst [vmem:[%s5205_s3 + $0xe0] sm:$0xff] %v3545_v51   ;;  %v2388_v29 = vadd.f32 %v3700_v50, %v2099_v30  ;;  %v2380_v5 = vadd.f32 %v2379_v8, %v2091_v21  ;;  %v2719_v14 = vmax.f32 %v2655_v27, 0.0  ;;  %v2717_v31 = vmax.f32 %v2653_v55, 0.0 }
 0x242   :  { %v2656_v22 = vadd.f32 %v4913_v63, %v2388_v29  ;;  %v2654_v57 = vadd.f32 %v4913_v63, %v2380_v5 }
 0x244   :  { %v2720_v42 = vmax.f32 %v2656_v22, 0.0  ;;  %v2718_v25 = vmax.f32 %v2654_v57, 0.0 }
 0x246   :  { %v3560_v3 = vpack.c.bf16 %v2720_v42, %v2719_v14  ;;  %v3555_v40 = vpack.c.bf16 %v2718_v25, %v2717_v31 }
 0x248   :  { %3592 = vst [vmem:[%s5205_s3 + $0xf8] sm:$0xff] %v3560_v3   ;;  %3591 = vst [vmem:[%s5205_s3 + $0xf0] sm:$0xff] %v3555_v40  }

// kernel: vgg_base_forward.23
= control target key start
LH: loop header
LB: loop body
LE: loop exit
PB: predicated region body
PF: predicated region fallthrough
CT: control target
= control target key end

     0   :  { %vm587_vm0 = vcmask 523264   ;;  %s1830_s1 = inlined_call_operand.vmem [shape: bf16[576,128], index: 1, kind: input, shape index: {}]   ;;  %s1831_s0 = inlined_call_operand.vmem [shape: bf16[128,576], index: 0, kind: input, shape index: {}]   ;;  %s1832_s2 = inlined_call_operand.vmem [shape: f32[1,128], index: 2, kind: input, shape index: {}]   ;;  %s1833_s3 = inlined_call_operand.vmem [shape: bf16[128,128], index: 3, kind: output, shape index: {}]  }
   0x1   :  { %v1413_v0 = vld [vmem:[%s1830_s1 + $0x78] sm:$0xff]   ;;  %v1417_v4 = vld [vmem:[%s1830_s1 + $0x70] sm:$0xff]   ;;  %v1421_v8 = vld [vmem:[%s1830_s1 + $0x68] sm:$0xff]  }
   0x2   :  { %v1414_v1 = vld [vmem:[%s1830_s1 + $0xf8] sm:$0xff]   ;;  %1241 = vmatprep.subr.bf16.mxu0 %v1413_v0  ;;  %v1418_v5 = vld [vmem:[%s1830_s1 + $0xf0] sm:$0xff]   ;;  %v1422_v9 = vld [vmem:[%s1830_s1 + $0xe8] sm:$0xff]  }
   0x3   :  { %v1415_v2 = vld [vmem:[%s1830_s1 + $0x38] sm:$0xff]   ;;  %1305 = vmatprep.subr.bf16.mxu1 %v1414_v1  ;;  %v1419_v6 = vld [vmem:[%s1830_s1 + $0x30] sm:$0xff]   ;;  %v1423_v10 = vld [vmem:[%s1830_s1 + $0x28] sm:$0xff]  }
   0x4   :  { %v1416_v3 = vld [vmem:[%s1830_s1 + $0xb8] sm:$0xff]   ;;  %1242 = vmatpush3.bf16.msra.mxu0 %v1415_v2  ;;  %v1420_v7 = vld [vmem:[%s1830_s1 + $0xb0] sm:$0xff]   ;;  %v1424_v11 = vld [vmem:[%s1830_s1 + $0xa8] sm:$0xff]  }
   0x5   :  { %1306 = vmatpush3.bf16.msra.mxu1 %v1416_v3  ;;  %1243 = vmatprep.subr.bf16.mxu0 %v1417_v4  ;;  %v1425_v12 = vld [vmem:[%s1830_s1 + $0x60] sm:$0xff]   ;;  %v1429_v16 = vld [vmem:[%s1830_s1 + $0x58] sm:$0xff]   ;;  %v1433_v20 = vld [vmem:[%s1830_s1 + $0x50] sm:$0xff]  }
   0x6   :  { %1307 = vmatprep.subr.bf16.mxu1 %v1418_v5  ;;  %v1426_v13 = vld [vmem:[%s1830_s1 + $0xe0] sm:$0xff]   ;;  %v1430_v17 = vld [vmem:[%s1830_s1 + $0xd8] sm:$0xff]   ;;  %v1434_v21 = vld [vmem:[%s1830_s1 + $0xd0] sm:$0xff]  }
   0x7   :  { %v1427_v14 = vld [vmem:[%s1830_s1 + $0x20] sm:$0xff]   ;;  %v1431_v18 = vld [vmem:[%s1830_s1 + $0x18] sm:$0xff]   ;;  %v1435_v22 = vld [vmem:[%s1830_s1 + $0x10] sm:$0xff]  }
   0x8   :  { %1244 = vmatpush3.bf16.msra.mxu0 %v1419_v6  ;;  %v1428_v15 = vld [vmem:[%s1830_s1 + $0xa0] sm:$0xff]   ;;  %v1432_v19 = vld [vmem:[%s1830_s1 + $0x98] sm:$0xff]   ;;  %v1436_v23 = vld [vmem:[%s1830_s1 + $0x90] sm:$0xff]  }
   0x9   :  { %1308 = vmatpush3.bf16.msra.mxu1 %v1420_v7  ;;  %1245 = vmatprep.subr.bf16.mxu0 %v1421_v8  ;;  %v1437_v24 = vld [vmem:[%s1830_s1 + $0x48] sm:$0xff]   ;;  %v1441_v28 = vld [vmem:[%s1830_s1 + $0x40] sm:$0xff]   ;;  %v1451_v36 = vld [vmem:[%s1830_s1 + $0x118] sm:$0xff]  }
   0xa   :  { %1309 = vmatprep.subr.bf16.mxu1 %v1422_v9  ;;  %v1438_v25 = vld [vmem:[%s1830_s1 + $0xc8] sm:$0xff]   ;;  %v1442_v29 = vld [vmem:[%s1830_s1 + $0xc0] sm:$0xff]   ;;  %v1464_v42 = vld [vmem:[%s1830_s1 + $0x110] sm:$0xff]  }
   0xb   :  { %v1439_v26 = vld [vmem:[%s1830_s1 + $0x8] sm:$0xff]   ;;  %v1443_v30 = vld [vmem:[%s1830_s1] sm:$0xff]   ;;  %v1460_v43 = vld [vmem:[%s1831_s0 + $0x5c] ss:$20 sps:$4 sm:$0xff]  }
   0xc   :  { %1246 = vmatpush3.bf16.msra.mxu0 %v1423_v10  ;;  %v1440_v27 = vld [vmem:[%s1830_s1 + $0x88] sm:$0xff]   ;;  %v1444_v31 = vld [vmem:[%s1830_s1 + $0x80] sm:$0xff]   ;;  %v1465_v47 = vld [vmem:[%s1831_s0 + $0x7c] ss:$20 sps:$4 sm:$0xff]  }
   0xd   :  { %1310 = vmatpush3.bf16.msra.mxu1 %v1424_v11  ;;  %1247 = vmatprep.subr.bf16.mxu0 %v1425_v12  ;;  %v1445_v32 = vld [vmem:[%s1831_s0] ss:$20 sps:$4 sm:$0xff]   ;;  %v1447_v33 = vld [vmem:[%s1831_s0 + $0x4] ss:$20 sps:$4 sm:$0xff]   ;;  %v1448_v34 = vld [vmem:[%s1831_s0 + $0x8] ss:$20 sps:$4 sm:$0xff]  }
   0xe   :  { %1311 = vmatprep.subr.bf16.mxu1 %v1426_v13  ;;  %v1450_v35 = vld [vmem:[%s1831_s0 + $0xc] ss:$20 sps:$4 sm:$0xff]   ;;  %644 = vmatprep.mubr.bf16.mxu0 %v1447_v33  ;;  %v1454_v38 = vld [vmem:[%s1831_s0 + $0x34] ss:$20 sps:$4 sm:$0xff]   ;;  %v1457_v40 = vld [vmem:[%s1831_s0 + $0x30] ss:$20 sps:$4 sm:$0xff]  }
   0xf   :  { %741 = vmatprep.mubr.bf16.mxu1 %v1450_v35  ;;  %v1452_v37 = vld [vmem:[%s1831_s0 + $0x2c] ss:$20 sps:$4 sm:$0xff]   ;;  %v1456_v39 = vld [vmem:[%s1831_s0 + $0x28] ss:$20 sps:$4 sm:$0xff]   ;;  %v1462_v44 = vld [vmem:[%s1831_s0 + $0x50] ss:$20 sps:$4 sm:$0xff]  }
  0x10   :  { %1248 = vmatpush3.bf16.msra.mxu0 %v1427_v14  ;;  %v1458_v41 = vld [vmem:[%s1831_s0 + $0x54] ss:$20 sps:$4 sm:$0xff]   ;;  %v1463_v45 = vld [vmem:[%s1831_s0 + $0x58] ss:$20 sps:$4 sm:$0xff]   ;;  %v1490_v49 = vld [vmem:[%s1830_s1 + $0x100] sm:$0xff]  }
  0x11   :  { %1312 = vmatpush3.bf16.msra.mxu1 %v1428_v15  ;;  %1249 = vmatprep.subr.bf16.mxu0 %v1429_v16  ;;  %v1477_v46 = vld [vmem:[%s1830_s1 + $0x108] sm:$0xff]   ;;  %v1467_v48 = vld [vmem:[%s1831_s0 + $0x84] ss:$20 sps:$4 sm:$0xff]   ;;  %v1470_v51 = vld [vmem:[%s1831_s0 + $0x80] ss:$20 sps:$4 sm:$0xff]  }
  0x12   :  { %1313 = vmatprep.subr.bf16.mxu1 %v1430_v17  ;;  %v1469_v50 = vld [vmem:[%s1831_s0 + $0x78] ss:$20 sps:$4 sm:$0xff]   ;;  %v1475_v54 = vld [vmem:[%s1831_s0 + $0xa0] ss:$20 sps:$4 sm:$0xff]   ;;  %v1476_v55 = vld [vmem:[%s1831_s0 + $0xa8] ss:$20 sps:$4 sm:$0xff]  }
  0x13   :  { %v1471_v52 = vld [vmem:[%s1831_s0 + $0xa4] ss:$20 sps:$4 sm:$0xff]   ;;  %v1473_v53 = vld [vmem:[%s1831_s0 + $0xac] ss:$20 sps:$4 sm:$0xff]   ;;  %v1480_v57 = vld [vmem:[%s1831_s0 + $0xd4] ss:$20 sps:$4 sm:$0xff]  }
  0x14   :  { %1250 = vmatpush3.bf16.msra.mxu0 %v1431_v18  ;;  %v1478_v56 = vld [vmem:[%s1831_s0 + $0xcc] ss:$20 sps:$4 sm:$0xff]   ;;  %v1482_v58 = vld [vmem:[%s1831_s0 + $0xc8] ss:$20 sps:$4 sm:$0xff]   ;;  %v1483_v59 = vld [vmem:[%s1831_s0 + $0xd0] ss:$20 sps:$4 sm:$0xff]  }
  0x15   :  { %1314 = vmatpush3.bf16.msra.mxu1 %v1432_v19  ;;  %1251 = vmatprep.subr.bf16.mxu0 %v1433_v20  ;;  %v1484_v60 = vld [vmem:[%s1831_s0 + $0xf4] ss:$20 sps:$4 sm:$0xff]   ;;  %v1486_v61 = vld [vmem:[%s1831_s0 + $0xfc] ss:$20 sps:$4 sm:$0xff]   ;;  %v1489_v63 = vld [vmem:[%s1831_s0 + $0xf8] ss:$20 sps:$4 sm:$0xff]  }
  0x16   :  { %1315 = vmatprep.subr.bf16.mxu1 %v1434_v21  ;;  %v1488_v62 = vld [vmem:[%s1831_s0 + $0xf0] ss:$20 sps:$4 sm:$0xff]   ;;  %v1495_v2 = vld [vmem:[%s1831_s0 + $0x118] ss:$20 sps:$4 sm:$0xff]   ;;  %v1496_v3 = vld [vmem:[%s1831_s0 + $0x120] ss:$20 sps:$4 sm:$0xff]  }
  0x17   :  { %v1491_v0 = vld [vmem:[%s1831_s0 + $0x11c] ss:$20 sps:$4 sm:$0xff]   ;;  %v1493_v1 = vld [vmem:[%s1831_s0 + $0x124] ss:$20 sps:$4 sm:$0xff]   ;;  %v1501_v8 = vld [vmem:[%s1831_s0 + $0x60] ss:$20 sps:$4 sm:$0xff]  }
  0x18   :  { %1252 = vmatpush3.bf16.msra.mxu0 %v1435_v22  ;;  %v1497_v4 = vld [vmem:[%s1831_s0 + $0x10] ss:$20 sps:$4 sm:$0xff]   ;;  %v1499_v6 = vld [vmem:[%s1831_s0 + $0x38] ss:$20 sps:$4 sm:$0xff]   ;;  %v1502_v9 = vld [vmem:[%s1831_s0 + $0x100] ss:$20 sps:$4 sm:$0xff]  }
  0x19   :  { %1316 = vmatpush3.bf16.msra.mxu1 %v1436_v23  ;;  %1253 = vmatprep.subr.bf16.mxu0 %v1437_v24  ;;  %v1498_v5 = vld [vmem:[%s1831_s0 + $0xb0] ss:$20 sps:$4 sm:$0xff]   ;;  %v1500_v7 = vld [vmem:[%s1831_s0 + $0xd8] ss:$20 sps:$4 sm:$0xff]   ;;  %v1503_v10 = vld [vmem:[%s1831_s0 + $0x88] ss:$20 sps:$4 sm:$0xff]  }
  0x1a   :  { %1317 = vmatprep.subr.bf16.mxu1 %v1438_v25  ;;  %v1504_v11 = vld [vmem:[%s1831_s0 + $0x128] ss:$20 sps:$4 sm:$0xff]  }
  0x1c   :  { %1254 = vmatpush3.bf16.msra.mxu0 %v1439_v26 }
  0x1d   :  { %1318 = vmatpush3.bf16.msra.mxu1 %v1440_v27  ;;  %1255 = vmatprep.subr.bf16.mxu0 %v1441_v28 }
  0x1e   :  { %1319 = vmatprep.subr.bf16.mxu1 %v1442_v29 }
  0x20   :  { %1256 = vmatpush3.bf16.msra.mxu0 %v1443_v30 }
  0x21   :  { %1320 = vmatpush3.bf16.msra.mxu1 %v1444_v31  ;;  %1381 = vmatprep.subr.bf16.mxu0 %v1451_v36 }
  0x22   :  { %1405 = vmatprep.subr.bf16.mxu1 %v1451_v36 }
  0x23   :  { %645 = vmatmul.mubr.bf16.vlgmr.msra.gmra.mxu0 %v1445_v32 }
  0x24   :  { %742 = vmatmul.mubr.bf16.vlgmr.msra.gmra.mxu1 %v1448_v34  ;;  %1382 = vmatpush3.bf16.msra.mxu0 %v1451_v36 }
  0x25   :  { %1409 = vmatpush3.bf16.msra.mxu1 %v1451_v36  ;;  %652 = vmatprep.mubr.bf16.mxu0 %v1452_v37 }
  0x26   :  { %749 = vmatprep.mubr.bf16.mxu1 %v1454_v38  ;;  %1383 = vmatprep.subr.bf16.mxu0 %v1464_v42 }
  0x27   :  { %1406 = vmatprep.subr.bf16.mxu1 %v1464_v42 }
  0x28   :  { %1384 = vmatpush3.bf16.msra.mxu0 %v1464_v42 }
  0x29   :  { %1410 = vmatpush3.bf16.msra.mxu1 %v1464_v42  ;;  %1385 = vmatprep.subr.bf16.mxu0 %v1477_v46 }
  0x2a   :  { %1407 = vmatprep.subr.bf16.mxu1 %v1477_v46 }
  0x2b   :  { %653 = vmatmul.mubr.bf16.gmra.mxu0 %v1456_v39 }
  0x2c   :  { %750 = vmatmul.mubr.bf16.gmra.mxu1 %v1457_v40  ;;  %660 = vmatprep.mubr.bf16.mxu0 %v1458_v41 }
  0x2d   :  { %757 = vmatprep.mubr.bf16.mxu1 %v1460_v43  ;;  %1386 = vmatpush3.bf16.msra.mxu0 %v1477_v46 }
  0x2e   :  { %1411 = vmatpush3.bf16.msra.mxu1 %v1477_v46  ;;  %1387 = vmatprep.subr.bf16.mxu0 %v1490_v49 }
  0x2f   :  { %1408 = vmatprep.subr.bf16.mxu1 %v1490_v49 }
  0x31   :  { %1388 = vmatpush3.bf16.msra.mxu0 %v1490_v49 }
  0x32   :  { %1412 = vmatpush3.bf16.msra.mxu1 %v1490_v49 }
  0x33   :  { %661 = vmatmul.mubr.bf16.gmra.mxu0 %v1462_v44 }
  0x34   :  { %758 = vmatmul.mubr.bf16.gmra.mxu1 %v1463_v45  ;;  %668 = vmatprep.mubr.bf16.mxu0 %v1465_v47 }
  0x35   :  { %765 = vmatprep.mubr.bf16.mxu1 %v1467_v48 }
  0x3b   :  { %669 = vmatmul.mubr.bf16.gmra.mxu0 %v1469_v50 }
  0x3c   :  { %766 = vmatmul.mubr.bf16.gmra.mxu1 %v1470_v51  ;;  %676 = vmatprep.mubr.bf16.mxu0 %v1471_v52 }
  0x3d   :  { %773 = vmatprep.mubr.bf16.mxu1 %v1473_v53 }
  0x43   :  { %677 = vmatmul.mubr.bf16.gmra.mxu0 %v1475_v54 }
  0x44   :  { %774 = vmatmul.mubr.bf16.gmra.mxu1 %v1476_v55  ;;  %684 = vmatprep.mubr.bf16.mxu0 %v1478_v56 }
  0x45   :  { %781 = vmatprep.mubr.bf16.mxu1 %v1480_v57 }
  0x4b   :  { %685 = vmatmul.mubr.bf16.gmra.mxu0 %v1482_v58 }
  0x4c   :  { %782 = vmatmul.mubr.bf16.gmra.mxu1 %v1483_v59  ;;  %692 = vmatprep.mubr.bf16.mxu0 %v1484_v60 }
  0x4d   :  { %789 = vmatprep.mubr.bf16.mxu1 %v1486_v61 }
  0x53   :  { %693 = vmatmul.mubr.bf16.gmra.mxu0 %v1488_v62 }
  0x54   :  { %790 = vmatmul.mubr.bf16.gmra.mxu1 %v1489_v63  ;;  %700 = vmatprep.mubr.bf16.mxu0 %v1491_v0 }
  0x55   :  { %797 = vmatprep.mubr.bf16.mxu1 %v1493_v1 }
  0x5b   :  { %701 = vmatmul.mubr.bf16.gmra.mxu0 %v1495_v2 }
  0x5c   :  { %798 = vmatmul.mubr.bf16.gmra.mxu1 %v1496_v3  ;;  %1389 = vmatprep.mubr.msk.bf16.mxu0 %vm587_vm0, %v1497_v4 }
  0x5d   :  { %1397 = vmatprep.mubr.msk.bf16.mxu1 %vm587_vm0, %v1498_v5 }
  0x63   :  { %1390 = vmatmul.mubr.msk.bf16.vlgmr.msra.gmra.mxu0 %vm587_vm0, %v1499_v6 }
  0x64   :  { %1398 = vmatmul.mubr.msk.bf16.vlgmr.msra.gmra.mxu1 %vm587_vm0, %v1500_v7  ;;  %1393 = vmatprep.mubr.msk.bf16.mxu0 %vm587_vm0, %v1501_v8 }
  0x65   :  { %1401 = vmatprep.mubr.msk.bf16.mxu1 %vm587_vm0, %v1502_v9 }
  0x6b   :  { %1394 = vmatmul.mubr.msk.bf16.gmra.mxu0 %vm587_vm0, %v1503_v10 }
  0x6c   :  { %1402 = vmatmul.mubr.msk.bf16.gmra.mxu1 %vm587_vm0, %v1504_v11 }
  0xe3   :  { %v1257_v12 = vpop.f32.mrf.mxu0 }
  0xe4   :  { %v1321_v13 = vpop.f32.mrf.mxu1 }
  0xe5   :  { %v1258_v14 = vpop.f32.mrf.mxu0 }
  0xe6   :  { %v1259_v15 = vadd.f32 %v1258_v14, %v1257_v12  ;;  %v1322_v16 = vpop.f32.mrf.mxu1 }
  0xe7   :  { %v1323_v17 = vadd.f32 %v1322_v16, %v1321_v13  ;;  %v1260_v18 = vpop.f32.mrf.mxu0 }
  0xe8   :  { %v1324_v19 = vpop.f32.mrf.mxu1 }
  0xe9   :  { %v1261_v20 = vpop.f32.mrf.mxu0  ;;  %v1761_v21 = vadd.f32 %v1323_v17, %v1259_v15 }
  0xea   :  { %v1325_v22 = vpop.f32.mrf.mxu1  ;;  %v1262_v7 = vadd.f32 %v1261_v20, %v1260_v18 }
  0xeb   :  { %1834 = vst [vmem:[#allocation3_spill] sm:$0xff] %v1761_v21  ;;  %v1263_v23 = vpop.f32.mrf.mxu0  ;;  %v1326_v8 = vadd.f32 %v1325_v22, %v1324_v19 }
  0xec   :  { %v1327_v24 = vpop.f32.mrf.mxu1 }
  0xed   :  { %v1264_v25 = vpop.f32.mrf.mxu0  ;;  %v747_v18 = vadd.f32 %v1326_v8, %v1262_v7 }
  0xee   :  { %v1328_v26 = vpop.f32.mrf.mxu1  ;;  %v1265_v10 = vadd.f32 %v1264_v25, %v1263_v23 }
  0xef   :  { %v1266_v27 = vpop.f32.mrf.mxu0  ;;  %v1329_v11 = vadd.f32 %v1328_v26, %v1327_v24 }
  0xf0   :  { %v1330_v28 = vpop.f32.mrf.mxu1 }
  0xf1   :  { %v1267_v29 = vpop.f32.mrf.mxu0 }
  0xf2   :  { %v1331_v30 = vpop.f32.mrf.mxu1  ;;  %v1268_v12 = vadd.f32 %v1267_v29, %v1266_v27 }
  0xf3   :  { %v1269_v31 = vpop.f32.mrf.mxu0  ;;  %v1332_v13 = vadd.f32 %v1331_v30, %v1330_v28 }
  0xf4   :  { %v1333_v32 = vpop.f32.mrf.mxu1 }
  0xf5   :  { %v1270_v33 = vpop.f32.mrf.mxu0 }
  0xf6   :  { %v1334_v34 = vpop.f32.mrf.mxu1  ;;  %v1271_v16 = vadd.f32 %v1270_v33, %v1269_v31 }
  0xf7   :  { %v1272_v35 = vpop.f32.mrf.mxu0  ;;  %v1335_v17 = vadd.f32 %v1334_v34, %v1333_v32 }
  0xf8   :  { %v1763_v36 = vpop.f32.mrf.mxu1 }
  0xf9   :  { %1835 = vst [vmem:[#allocation4_spill] sm:$0xff] %v1763_v36  ;;  %v1273_v37 = vpop.f32.mrf.mxu0  ;;  %v760_v29 = vadd.f32 %v1335_v17, %v1271_v16 }
  0xfa   :  { %v1765_v38 = vpop.f32.mrf.mxu1  ;;  %v1775_v24 = vadd.f32 %v1273_v37, %v1272_v35  ;;  %v1782_v35 = vld [vmem:[%s1832_s2] ss:$0 sm:$0xff] }
  0xfb   :  { %1836 = vst [vmem:[#allocation5_spill] sm:$0xff] %v1765_v38  ;;  %v1275_v39 = vpop.f32.mrf.mxu0 }
  0xfc   :  { %v1339_v40 = vpop.f32.mrf.mxu1 }
  0xfd   :  { %v1276_v41 = vpop.f32.mrf.mxu0 }
  0xfe   :  { %v1340_v42 = vpop.f32.mrf.mxu1  ;;  %v1277_v20 = vadd.f32 %v1276_v41, %v1275_v39 }
  0xff   :  { %v1278_v43 = vpop.f32.mrf.mxu0  ;;  %v1341_v19 = vadd.f32 %v1340_v42, %v1339_v40 }
 0x100   :  { %v1342_v44 = vpop.f32.mrf.mxu1  ;;  %v1841_v40 = vld [vmem:[#allocation4_spill] sm:$0xff] }
 0x101   :  { %v1279_v45 = vpop.f32.mrf.mxu0 }
 0x102   :  { %v1343_v46 = vpop.f32.mrf.mxu1  ;;  %v1280_v26 = vadd.f32 %v1279_v45, %v1278_v43  ;;  %v1842_v41 = vld [vmem:[#allocation5_spill] sm:$0xff]  ;;  %v768_v45 = vadd.f32 %v1341_v19, %v1277_v20 }
 0x103   :  { %v1281_v47 = vpop.f32.mrf.mxu0  ;;  %v1344_v27 = vadd.f32 %v1343_v46, %v1342_v44  ;;  %v1338_v42 = vadd.f32 %v1842_v41, %v1841_v40 }
 0x104   :  { %v1345_v48 = vpop.f32.mrf.mxu1 }
 0x105   :  { %v1282_v49 = vpop.f32.mrf.mxu0 }
 0x106   :  { %v1346_v50 = vpop.f32.mrf.mxu1  ;;  %v1283_v22 = vadd.f32 %v1282_v49, %v1281_v47 }
 0x107   :  { %v1284_v51 = vpop.f32.mrf.mxu0  ;;  %v1347_v23 = vadd.f32 %v1346_v50, %v1345_v48  ;;  %v771_v50 = vadd.f32 %v1344_v27, %v1280_v26 }
 0x108   :  { %v1348_v52 = vpop.f32.mrf.mxu1 }
 0x109   :  { %v1285_v53 = vpop.f32.mrf.mxu0  ;;  %v776_v44 = vadd.f32 %v1347_v23, %v1283_v22 }
 0x10a   :  { %v1349_v54 = vpop.f32.mrf.mxu1  ;;  %v1286_v30 = vadd.f32 %v1285_v53, %v1284_v51 }
 0x10b   :  { %v1287_v55 = vpop.f32.mrf.mxu0 }
 0x10c   :  { %v1351_v56 = vpop.f32.mrf.mxu1 }
 0x10d   :  { %v1288_v57 = vpop.f32.mrf.mxu0 }
 0x10e   :  { %v1352_v58 = vpop.f32.mrf.mxu1  ;;  %v1289_v38 = vadd.f32 %v1288_v57, %v1287_v55  ;;  %v1350_v55 = vadd.f32 %v1349_v54, %v1348_v52 }
 0x10f   :  { %v1290_v59 = vpop.f32.mrf.mxu0 }
 0x110   :  { %v1354_v60 = vpop.f32.mrf.mxu1 }
 0x111   :  { %v1291_v61 = vpop.f32.mrf.mxu0 }
 0x112   :  { %v1355_v62 = vpop.f32.mrf.mxu1  ;;  %v1292_v31 = vadd.f32 %v1291_v61, %v1290_v59 }
 0x113   :  { %v1293_v63 = vpop.f32.mrf.mxu0  ;;  %v1356_v32 = vadd.f32 %v1355_v62, %v1354_v60 }
 0x114   :  { %v1357_v0 = vpop.f32.mrf.mxu1 }
 0x115   :  { %v1294_v1 = vpop.f32.mrf.mxu0  ;;  %v787_v59 = vadd.f32 %v1356_v32, %v1292_v31 }
 0x116   :  { %v1358_v2 = vpop.f32.mrf.mxu1 }
 0x117   :  { %v1767_v3 = vpop.f32.mrf.mxu0  ;;  %v1359_v57 = vadd.f32 %v1358_v2, %v1357_v0 }
 0x118   :  { %1837 = vst [vmem:[#allocation6_spill] sm:$0xff] %v1767_v3  ;;  %v1769_v4 = vpop.f32.mrf.mxu1  ;;  %v1353_v3 = vadd.f32 %v1352_v58, %v1351_v56  ;;  %v1295_v56 = vadd.f32 %v1294_v1, %v1293_v63  ;;  %v779_v63 = vadd.f32 %v1350_v55, %v1286_v30 }
 0x119   :  { %1838 = vst [vmem:[#allocation7_spill] sm:$0xff] %v1769_v4  ;;  %v1771_v5 = vpop.f32.mrf.mxu0 }
 0x11a   :  { %1839 = vst [vmem:[#allocation8_spill] sm:$0xff] %v1771_v5  ;;  %v1773_v6 = vpop.f32.mrf.mxu1  ;;  %v752_v5 = vadd.f32 %v1329_v11, %v1265_v10  ;;  %v784_v34 = vadd.f32 %v1353_v3, %v1289_v38  ;;  %v1843_v38 = vld [vmem:[#allocation3_spill] sm:$0xff]  ;;  %v792_v0 = vadd.f32 %v1359_v57, %v1295_v56 }
 0x11b   :  { %1840 = vst [vmem:[#allocation9_spill] sm:$0xff] %v1773_v6  ;;  %v1299_v9 = vpop.f32.mrf.mxu0  ;;  %v755_v6 = vadd.f32 %v1332_v13, %v1268_v12 }
 0x11c   :  { %v1363_v14 = vpop.f32.mrf.mxu1 }
 0x11d   :  { %v1300_v15 = vpop.f32.mrf.mxu0 }
 0x11e   :  { %v1364_v21 = vpop.f32.mrf.mxu1  ;;  %v1301_v46 = vadd.f32 %v1300_v15, %v1299_v9 }
 0x11f   :  { %v1302_v36 = vpop.f32.mrf.mxu0  ;;  %v1365_v47 = vadd.f32 %v1364_v21, %v1363_v14  ;;  %v1844_v1 = vld [vmem:[#allocation6_spill] sm:$0xff] }
 0x120   :  { %v1366_v4 = vpop.f32.mrf.mxu1 }
 0x121   :  { %v1303_v25 = vpop.f32.mrf.mxu0  ;;  %v1845_v2 = vld [vmem:[#allocation8_spill] sm:$0xff] }
 0x122   :  { %v1367_v28 = vpop.f32.mrf.mxu1  ;;  %v1304_v51 = vadd.f32 %v1303_v25, %v1302_v36  ;;  %v1298_v3 = vadd.f32 %v1845_v2, %v1844_v1  ;;  %v1847_v21 = vld [vmem:[#allocation9_spill] sm:$0xff] }
 0x123   :  { %v1391_v33 = vpop.f32.mrf.mxu0  ;;  %v1368_v52 = vadd.f32 %v1367_v28, %v1366_v4 }
 0x124   :  { %v849_v58 = vadd.f32 %v1391_v33, %v752_v5  ;;  %v1399_v39 = vpop.f32.mrf.mxu1  ;;  %v1846_v5 = vld [vmem:[#allocation7_spill] sm:$0xff] }
 0x125   :  { %v881_v37 = vadd.f32 %v1399_v39, %v784_v34  ;;  %v840_v43 = vpop.f32.mrf.mxu0  ;;  %v1362_v7 = vadd.f32 %v1847_v21, %v1846_v5  ;;  %v803_v17 = vadd.f32 %v1368_v52, %v1304_v51 }
 0x126   :  { %v841_v48 = vadd.f32 %v840_v43, %v1843_v38  ;;  %v872_v49 = vpop.f32.mrf.mxu1  ;;  %v963_v60 = vadd.f32 %v1782_v35, %v849_v58 }
 0x127   :  { %v873_v53 = vadd.f32 %v872_v49, %v776_v44  ;;  %v1392_v54 = vpop.f32.mrf.mxu0  ;;  %v971_v8 = vadd.f32 %v1782_v35, %v881_v37 }
 0x128   :  { %v852_v61 = vadd.f32 %v1392_v54, %v755_v6  ;;  %v1400_v62 = vpop.f32.mrf.mxu1  ;;  %v961_v4 = vadd.f32 %v1782_v35, %v841_v48  ;;  %v800_v6 = vadd.f32 %v1365_v47, %v1301_v46  ;;  %v979_v20 = vmax.f32 %v963_v60, 0.0 }
 0x129   :  { %v884_v9 = vadd.f32 %v1400_v62, %v787_v59  ;;  %v843_v36 = vpop.f32.mrf.mxu0  ;;  %v969_v13 = vadd.f32 %v1782_v35, %v873_v53  ;;  %v987_v26 = vmax.f32 %v971_v8, 0.0  ;;  %v795_v48 = vadd.f32 %v1362_v7, %v1298_v3 }
 0x12a   :  { %v964_v10 = vadd.f32 %v1782_v35, %v852_v61  ;;  %v844_v11 = vadd.f32 %v843_v36, %v747_v18  ;;  %v875_v12 = vpop.f32.mrf.mxu1  ;;  %v977_v31 = vmax.f32 %v961_v4, 0.0 }
 0x12b   :  { %v972_v14 = vadd.f32 %v1782_v35, %v884_v9  ;;  %v876_v15 = vadd.f32 %v875_v12, %v779_v63  ;;  %v1395_v16 = vpop.f32.mrf.mxu0  ;;  %v985_v56 = vmax.f32 %v969_v13, 0.0 }
 0x12c   :  { %v980_v19 = vmax.f32 %v964_v10, 0.0  ;;  %v962_v22 = vadd.f32 %v1782_v35, %v844_v11  ;;  %v865_v23 = vadd.f32 %v1395_v16, %v768_v45  ;;  %v1403_v25 = vpop.f32.mrf.mxu1  ;;  %v763_v45 = vadd.f32 %v1338_v42, %v1775_v24 }
 0x12d   :  { %v988_v27 = vmax.f32 %v972_v14, 0.0  ;;  %v970_v28 = vadd.f32 %v1782_v35, %v876_v15  ;;  %v897_v18 = vadd.f32 %v1403_v25, %v800_v6  ;;  %v856_v30 = vpop.f32.mrf.mxu0 }
 0x12e   :  { %v1202_v32 = vpack.c.bf16 %v980_v19, %v979_v20  ;;  %v978_v33 = vmax.f32 %v962_v22, 0.0  ;;  %v857_v34 = vadd.f32 %v856_v30, %v760_v29  ;;  %v888_v55 = vpop.f32.mrf.mxu1  ;;  %v967_v37 = vadd.f32 %v1782_v35, %v865_v23 }
 0x12f   :  { %v1222_v57 = vpack.c.bf16 %v988_v27, %v987_v26  ;;  %v986_v58 = vmax.f32 %v970_v28, 0.0  ;;  %v889_v39 = vadd.f32 %v888_v55, %v792_v0  ;;  %v1396_v40 = vpop.f32.mrf.mxu0  ;;  %v975_v46 = vadd.f32 %v1782_v35, %v897_v18 }
 0x130   :  { %1234 = vst [vmem:[%s1833_s3 + $0x8] sm:$0xff] %v1202_v32   ;;  %v1197_v41 = vpack.c.bf16 %v978_v33, %v977_v31  ;;  %v868_v43 = vadd.f32 %v1396_v40, %v771_v50  ;;  %v1404_v44 = vpop.f32.mrf.mxu1  ;;  %v965_v49 = vadd.f32 %v1782_v35, %v857_v34  ;;  %v983_v54 = vmax.f32 %v967_v37, 0.0 }
 0x131   :  { %1238 = vst [vmem:[%s1833_s3 + $0x28] sm:$0xff] %v1222_v57   ;;  %v1217_v29 = vpack.c.bf16 %v986_v58, %v985_v56  ;;  %v900_v47 = vadd.f32 %v1404_v44, %v803_v17  ;;  %v859_v38 = vpop.f32.mrf.mxu0  ;;  %v973_v42 = vadd.f32 %v1782_v35, %v889_v39  ;;  %v991_v61 = vmax.f32 %v975_v46, 0.0 }
 0x132   :  { %1198 = vst [vmem:[%s1833_s3] sm:$0xff] %v1197_v41   ;;  %v968_v50 = vadd.f32 %v1782_v35, %v868_v43  ;;  %v860_v51 = vadd.f32 %v859_v38, %v763_v45  ;;  %v891_v24 = vpop.f32.mrf.mxu1  ;;  %v981_v0 = vmax.f32 %v965_v49, 0.0 }
 0x133   :  { %1237 = vst [vmem:[%s1833_s3 + $0x20] sm:$0xff] %v1217_v29   ;;  %v976_v52 = vadd.f32 %v1782_v35, %v900_v47  ;;  %v892_v53 = vadd.f32 %v891_v24, %v795_v48  ;;  %v989_v3 = vmax.f32 %v973_v42, 0.0 }
 0x134   :  { %v984_v59 = vmax.f32 %v968_v50, 0.0  ;;  %v966_v60 = vadd.f32 %v1782_v35, %v860_v51 }
 0x135   :  { %v992_v62 = vmax.f32 %v976_v52, 0.0  ;;  %v974_v63 = vadd.f32 %v1782_v35, %v892_v53 }
 0x136   :  { %v1212_v1 = vpack.c.bf16 %v984_v59, %v983_v54  ;;  %v982_v2 = vmax.f32 %v966_v60, 0.0 }
 0x137   :  { %v1232_v5 = vpack.c.bf16 %v992_v62, %v991_v61  ;;  %v990_v21 = vmax.f32 %v974_v63, 0.0 }
 0x138   :  { %1236 = vst [vmem:[%s1833_s3 + $0x18] sm:$0xff] %v1212_v1   ;;  %v1207_v7 = vpack.c.bf16 %v982_v2, %v981_v0 }
 0x139   :  { %1240 = vst [vmem:[%s1833_s3 + $0x38] sm:$0xff] %v1232_v5   ;;  %v1227_v8 = vpack.c.bf16 %v990_v21, %v989_v3 }
 0x13a   :  { %1235 = vst [vmem:[%s1833_s3 + $0x10] sm:$0xff] %v1207_v7  }
 0x13b   :  { %1239 = vst [vmem:[%s1833_s3 + $0x30] sm:$0xff] %v1227_v8  }

// kernel: vgg_base_forward.25
= control target key start
LH: loop header
LB: loop body
LE: loop exit
PB: predicated region body
PF: predicated region fallthrough
CT: control target
= control target key end

     0   :  { %s92_s0 = inlined_call_operand.vmem [shape: bf16[8,512], index: 0, kind: input, shape index: {}]   ;;  %s93_s1 = inlined_call_operand.vmem [shape: bf16[8,512], index: 1, kind: input, shape index: {}]   ;;  %s94_s2 = inlined_call_operand.vmem [shape: bf16[8,512], index: 2, kind: input, shape index: {}]   ;;  %s95_s3 = inlined_call_operand.vmem [shape: bf16[8,512], index: 3, kind: input, shape index: {}]   ;;  %s96_s4 = inlined_call_operand.vmem [shape: bf16[8,512], index: 4, kind: output, shape index: {}]  }
   0x1   :  { %v17_v0 = vld [vmem:[%s92_s0] sm:$0xff]  ;;  %v18_v4 = vld [vmem:[%s92_s0 + $0x8] sm:$0xff] }
   0x2   :  { %v19_v1 = vld [vmem:[%s93_s1] sm:$0xff]  ;;  %v20_v5 = vld [vmem:[%s93_s1 + $0x8] sm:$0xff] }
   0x3   :  { %v23_v2 = vld [vmem:[%s94_s2] sm:$0xff]  ;;  %v21_v3 = vmax.bf16 %v19_v1, %v17_v0  ;;  %v22_v7 = vmax.bf16 %v20_v5, %v18_v4  ;;  %v24_v8 = vld [vmem:[%s94_s2 + $0x8] sm:$0xff] }
   0x4   :  { %v27_v6 = vld [vmem:[%s95_s3] sm:$0xff]  ;;  %v28_v10 = vld [vmem:[%s95_s3 + $0x8] sm:$0xff] }
   0x5   :  { %v25_v9 = vmax.bf16 %v23_v2, %v21_v3  ;;  %v26_v11 = vmax.bf16 %v24_v8, %v22_v7 }
   0x7   :  { %v29_v12 = vmax.bf16 %v27_v6, %v25_v9  ;;  %v30_v13 = vmax.bf16 %v28_v10, %v26_v11 }
   0x9   :  { %31 = vst [vmem:[%s96_s4] sm:$0xff] %v29_v12  ;;  %32 = vst [vmem:[%s96_s4 + $0x8] sm:$0xff] %v30_v13 }

// kernel: vgg_base_forward.24
= control target key start
LH: loop header
LB: loop body
LE: loop exit
PB: predicated region body
PF: predicated region fallthrough
CT: control target
= control target key end

     0   :  { %s3050_s1 = inlined_call_operand.vmem [shape: bf16[1152,128], index: 1, kind: input, shape index: {}]   ;;  %s3051_s0 = inlined_call_operand.vmem [shape: bf16[128,1152], index: 0, kind: input, shape index: {}]   ;;  %s3052_s2 = inlined_call_operand.vmem [shape: f32[1,128], index: 2, kind: input, shape index: {}]   ;;  %s3053_s3 = inlined_call_operand.vmem [shape: bf16[128,128], index: 3, kind: output, shape index: {}]  }
   0x1   :  { %v2278_v0 = vld [vmem:[%s3050_s1 + $0x78] sm:$0xff]   ;;  %v2282_v4 = vld [vmem:[%s3050_s1 + $0x70] sm:$0xff]   ;;  %v2286_v8 = vld [vmem:[%s3050_s1 + $0x68] sm:$0xff]  }
   0x2   :  { %v2279_v1 = vld [vmem:[%s3050_s1 + $0xf8] sm:$0xff]   ;;  %1958 = vmatprep.subr.bf16.mxu0 %v2278_v0  ;;  %v2283_v5 = vld [vmem:[%s3050_s1 + $0xf0] sm:$0xff]   ;;  %v2287_v9 = vld [vmem:[%s3050_s1 + $0xe8] sm:$0xff]  }
   0x3   :  { %v2280_v2 = vld [vmem:[%s3050_s1 + $0x38] sm:$0xff]   ;;  %2022 = vmatprep.subr.bf16.mxu1 %v2279_v1  ;;  %v2284_v6 = vld [vmem:[%s3050_s1 + $0x30] sm:$0xff]   ;;  %v2288_v10 = vld [vmem:[%s3050_s1 + $0x28] sm:$0xff]  }
   0x4   :  { %v2281_v3 = vld [vmem:[%s3050_s1 + $0xb8] sm:$0xff]   ;;  %1959 = vmatpush3.bf16.msra.mxu0 %v2280_v2  ;;  %v2285_v7 = vld [vmem:[%s3050_s1 + $0xb0] sm:$0xff]   ;;  %v2289_v11 = vld [vmem:[%s3050_s1 + $0xa8] sm:$0xff]  }
   0x5   :  { %2023 = vmatpush3.bf16.msra.mxu1 %v2281_v3  ;;  %1960 = vmatprep.subr.bf16.mxu0 %v2282_v4  ;;  %v2290_v12 = vld [vmem:[%s3050_s1 + $0x60] sm:$0xff]   ;;  %v2294_v16 = vld [vmem:[%s3050_s1 + $0x58] sm:$0xff]   ;;  %v2298_v20 = vld [vmem:[%s3050_s1 + $0x50] sm:$0xff]  }
   0x6   :  { %2024 = vmatprep.subr.bf16.mxu1 %v2283_v5  ;;  %v2291_v13 = vld [vmem:[%s3050_s1 + $0xe0] sm:$0xff]   ;;  %v2295_v17 = vld [vmem:[%s3050_s1 + $0xd8] sm:$0xff]   ;;  %v2299_v21 = vld [vmem:[%s3050_s1 + $0xd0] sm:$0xff]  }
   0x7   :  { %v2292_v14 = vld [vmem:[%s3050_s1 + $0x20] sm:$0xff]   ;;  %v2296_v18 = vld [vmem:[%s3050_s1 + $0x18] sm:$0xff]   ;;  %v2300_v22 = vld [vmem:[%s3050_s1 + $0x10] sm:$0xff]  }
   0x8   :  { %1961 = vmatpush3.bf16.msra.mxu0 %v2284_v6  ;;  %v2293_v15 = vld [vmem:[%s3050_s1 + $0xa0] sm:$0xff]   ;;  %v2297_v19 = vld [vmem:[%s3050_s1 + $0x98] sm:$0xff]   ;;  %v2301_v23 = vld [vmem:[%s3050_s1 + $0x90] sm:$0xff]  }
   0x9   :  { %2025 = vmatpush3.bf16.msra.mxu1 %v2285_v7  ;;  %1962 = vmatprep.subr.bf16.mxu0 %v2286_v8  ;;  %v2302_v24 = vld [vmem:[%s3050_s1 + $0x48] sm:$0xff]   ;;  %v2306_v28 = vld [vmem:[%s3050_s1 + $0x40] sm:$0xff]   ;;  %v2316_v36 = vld [vmem:[%s3050_s1 + $0x178] sm:$0xff]  }
   0xa   :  { %2026 = vmatprep.subr.bf16.mxu1 %v2287_v9  ;;  %v2303_v25 = vld [vmem:[%s3050_s1 + $0xc8] sm:$0xff]   ;;  %v2307_v29 = vld [vmem:[%s3050_s1 + $0xc0] sm:$0xff]   ;;  %v2317_v37 = vld [vmem:[%s3050_s1 + $0x1f8] sm:$0xff]  }
   0xb   :  { %v2304_v26 = vld [vmem:[%s3050_s1 + $0x8] sm:$0xff]   ;;  %v2308_v30 = vld [vmem:[%s3050_s1] sm:$0xff]   ;;  %v2318_v38 = vld [vmem:[%s3050_s1 + $0x138] sm:$0xff]  }
   0xc   :  { %1963 = vmatpush3.bf16.msra.mxu0 %v2288_v10  ;;  %v2305_v27 = vld [vmem:[%s3050_s1 + $0x88] sm:$0xff]   ;;  %v2309_v31 = vld [vmem:[%s3050_s1 + $0x80] sm:$0xff]   ;;  %v2319_v39 = vld [vmem:[%s3050_s1 + $0x1b8] sm:$0xff]  }
   0xd   :  { %2027 = vmatpush3.bf16.msra.mxu1 %v2289_v11  ;;  %1964 = vmatprep.subr.bf16.mxu0 %v2290_v12  ;;  %v2310_v32 = vld [vmem:[%s3051_s0] ss:$36 sps:$4 sm:$0xff]   ;;  %v2313_v34 = vld [vmem:[%s3051_s0 + $0x8] ss:$36 sps:$4 sm:$0xff]   ;;  %v2322_v41 = vld [vmem:[%s3051_s0 + $0x54] ss:$36 sps:$4 sm:$0xff]  }
   0xe   :  { %2028 = vmatprep.subr.bf16.mxu1 %v2291_v13  ;;  %v2312_v33 = vld [vmem:[%s3051_s0 + $0x4] ss:$36 sps:$4 sm:$0xff]   ;;  %v2315_v35 = vld [vmem:[%s3051_s0 + $0xc] ss:$36 sps:$4 sm:$0xff]   ;;  %v2330_v48 = vld [vmem:[%s3051_s0 + $0x94] ss:$36 sps:$4 sm:$0xff]  }
   0xf   :  { %1107 = vmatprep.mubr.bf16.mxu0 %v2312_v33  ;;  %1204 = vmatprep.mubr.bf16.mxu1 %v2315_v35  ;;  %v2320_v40 = vld [vmem:[%s3051_s0 + $0x4c] ss:$36 sps:$4 sm:$0xff]   ;;  %v2332_v49 = vld [vmem:[%s3051_s0 + $0x9c] ss:$36 sps:$4 sm:$0xff]   ;;  %v2342_v57 = vld [vmem:[%s3051_s0 + $0xe4] ss:$36 sps:$4 sm:$0xff]  }
  0x10   :  { %1965 = vmatpush3.bf16.msra.mxu0 %v2292_v14  ;;  %v2324_v42 = vld [vmem:[%s3051_s0 + $0x48] ss:$36 sps:$4 sm:$0xff]   ;;  %v2325_v43 = vld [vmem:[%s3051_s0 + $0x50] ss:$36 sps:$4 sm:$0xff]   ;;  %v2335_v51 = vld [vmem:[%s3051_s0 + $0x98] ss:$36 sps:$4 sm:$0xff]  }
  0x11   :  { %2029 = vmatpush3.bf16.msra.mxu1 %v2293_v15  ;;  %1966 = vmatprep.subr.bf16.mxu0 %v2294_v16  ;;  %v2326_v44 = vld [vmem:[%s3050_s1 + $0x170] sm:$0xff]   ;;  %v2336_v52 = vld [vmem:[%s3050_s1 + $0x168] sm:$0xff]   ;;  %v2340_v56 = vld [vmem:[%s3051_s0 + $0xdc] ss:$36 sps:$4 sm:$0xff]  }
  0x12   :  { %2030 = vmatprep.subr.bf16.mxu1 %v2295_v17  ;;  %v2327_v45 = vld [vmem:[%s3050_s1 + $0x1f0] sm:$0xff]   ;;  %v2337_v53 = vld [vmem:[%s3050_s1 + $0x1e8] sm:$0xff]   ;;  %v2344_v58 = vld [vmem:[%s3051_s0 + $0xd8] ss:$36 sps:$4 sm:$0xff]  }
  0x13   :  { %v2328_v46 = vld [vmem:[%s3050_s1 + $0x130] sm:$0xff]   ;;  %v2338_v54 = vld [vmem:[%s3050_s1 + $0x128] sm:$0xff]   ;;  %v2345_v59 = vld [vmem:[%s3051_s0 + $0xe0] ss:$36 sps:$4 sm:$0xff]  }
  0x14   :  { %1967 = vmatpush3.bf16.msra.mxu0 %v2296_v18  ;;  %v2329_v47 = vld [vmem:[%s3050_s1 + $0x1b0] sm:$0xff]   ;;  %v2339_v55 = vld [vmem:[%s3050_s1 + $0x1a8] sm:$0xff]   ;;  %v2346_v60 = vld [vmem:[%s3050_s1 + $0x160] sm:$0xff]  }
  0x15   :  { %2031 = vmatpush3.bf16.msra.mxu1 %v2297_v19  ;;  %1968 = vmatprep.subr.bf16.mxu0 %v2298_v20  ;;  %v2334_v50 = vld [vmem:[%s3051_s0 + $0x90] ss:$36 sps:$4 sm:$0xff]   ;;  %v2347_v61 = vld [vmem:[%s3050_s1 + $0x1e0] sm:$0xff]   ;;  %v2356_v3 = vld [vmem:[%s3050_s1 + $0x158] sm:$0xff]  }
  0x16   :  { %2032 = vmatprep.subr.bf16.mxu1 %v2299_v21  ;;  %v2348_v62 = vld [vmem:[%s3050_s1 + $0x120] sm:$0xff]   ;;  %v2352_v1 = vld [vmem:[%s3051_s0 + $0x12c] ss:$36 sps:$4 sm:$0xff]   ;;  %v2357_v5 = vld [vmem:[%s3050_s1 + $0x1d8] sm:$0xff]  }
  0x17   :  { %v2349_v63 = vld [vmem:[%s3050_s1 + $0x1a0] sm:$0xff]   ;;  %v2355_v4 = vld [vmem:[%s3051_s0 + $0x128] ss:$36 sps:$4 sm:$0xff]   ;;  %v2358_v6 = vld [vmem:[%s3050_s1 + $0x118] sm:$0xff]  }
  0x18   :  { %1969 = vmatpush3.bf16.msra.mxu0 %v2300_v22  ;;  %v2350_v0 = vld [vmem:[%s3051_s0 + $0x124] ss:$36 sps:$4 sm:$0xff]   ;;  %v2359_v7 = vld [vmem:[%s3050_s1 + $0x198] sm:$0xff]   ;;  %v2360_v8 = vld [vmem:[%s3051_s0 + $0x16c] ss:$36 sps:$4 sm:$0xff]  }
  0x19   :  { %2033 = vmatpush3.bf16.msra.mxu1 %v2301_v23  ;;  %1970 = vmatprep.subr.bf16.mxu0 %v2302_v24  ;;  %v2354_v2 = vld [vmem:[%s3051_s0 + $0x120] ss:$36 sps:$4 sm:$0xff]   ;;  %v2362_v9 = vld [vmem:[%s3051_s0 + $0x174] ss:$36 sps:$4 sm:$0xff]   ;;  %v2364_v12 = vld [vmem:[%s3051_s0 + $0x168] ss:$36 sps:$4 sm:$0xff]  }
  0x1a   :  { %2034 = vmatprep.subr.bf16.mxu1 %v2303_v25  ;;  %v2366_v10 = vld [vmem:[%s3050_s1 + $0x150] sm:$0xff]   ;;  %v2372_v17 = vld [vmem:[%s3051_s0 + $0x1bc] ss:$36 sps:$4 sm:$0xff]   ;;  %v2376_v18 = vld [vmem:[%s3050_s1 + $0x148] sm:$0xff]  }
  0x1b   :  { %v2367_v11 = vld [vmem:[%s3050_s1 + $0x1d0] sm:$0xff]   ;;  %v2377_v19 = vld [vmem:[%s3050_s1 + $0x1c8] sm:$0xff]   ;;  %v2375_v23 = vld [vmem:[%s3051_s0 + $0x1b8] ss:$36 sps:$4 sm:$0xff]  }
  0x1c   :  { %1971 = vmatpush3.bf16.msra.mxu0 %v2304_v26  ;;  %v2368_v13 = vld [vmem:[%s3050_s1 + $0x110] sm:$0xff]   ;;  %v2378_v20 = vld [vmem:[%s3050_s1 + $0x108] sm:$0xff]   ;;  %v2380_v24 = vld [vmem:[%s3051_s0 + $0x1fc] ss:$36 sps:$4 sm:$0xff]  }
  0x1d   :  { %2035 = vmatpush3.bf16.msra.mxu1 %v2305_v27  ;;  %1972 = vmatprep.subr.bf16.mxu0 %v2306_v28  ;;  %v2369_v14 = vld [vmem:[%s3050_s1 + $0x190] sm:$0xff]   ;;  %v2379_v21 = vld [vmem:[%s3050_s1 + $0x188] sm:$0xff]   ;;  %v2386_v26 = vld [vmem:[%s3050_s1 + $0x140] sm:$0xff]  }
  0x1e   :  { %2036 = vmatprep.subr.bf16.mxu1 %v2307_v29  ;;  %v2365_v15 = vld [vmem:[%s3051_s0 + $0x170] ss:$36 sps:$4 sm:$0xff]   ;;  %v2382_v25 = vld [vmem:[%s3051_s0 + $0x204] ss:$36 sps:$4 sm:$0xff]  }
  0x1f   :  { %v2370_v16 = vld [vmem:[%s3051_s0 + $0x1b4] ss:$36 sps:$4 sm:$0xff]   ;;  %v2387_v27 = vld [vmem:[%s3050_s1 + $0x1c0] sm:$0xff]  }
  0x20   :  { %1973 = vmatpush3.bf16.msra.mxu0 %v2308_v30  ;;  %v2374_v22 = vld [vmem:[%s3051_s0 + $0x1b0] ss:$36 sps:$4 sm:$0xff]   ;;  %v2388_v28 = vld [vmem:[%s3050_s1 + $0x100] sm:$0xff]   ;;  %v2384_v30 = vld [vmem:[%s3051_s0 + $0x1f8] ss:$36 sps:$4 sm:$0xff]  }
  0x21   :  { %2037 = vmatpush3.bf16.msra.mxu1 %v2309_v31  ;;  %2086 = vmatprep.subr.bf16.mxu0 %v2316_v36  ;;  %v2389_v29 = vld [vmem:[%s3050_s1 + $0x180] sm:$0xff]   ;;  %v2392_v33 = vld [vmem:[%s3051_s0 + $0x14] ss:$36 sps:$4 sm:$0xff]  }
  0x22   :  { %2150 = vmatprep.subr.bf16.mxu1 %v2317_v37  ;;  %v2385_v31 = vld [vmem:[%s3051_s0 + $0x200] ss:$36 sps:$4 sm:$0xff]   ;;  %v2390_v35 = vld [vmem:[%s3051_s0 + $0x10] ss:$36 sps:$4 sm:$0xff]   ;;  %v2393_v36 = vld [vmem:[%s3051_s0 + $0x18] ss:$36 sps:$4 sm:$0xff]  }
  0x23   :  { %1108 = vmatmul.mubr.bf16.vlgmr.msra.gmra.mxu0 %v2310_v32  ;;  %v2396_v32 = vld [vmem:[%s3050_s1 + $0x238] sm:$0xff]  }
  0x24   :  { %1205 = vmatmul.mubr.bf16.vlgmr.msra.gmra.mxu1 %v2313_v34  ;;  %2087 = vmatpush3.bf16.msra.mxu0 %v2318_v38  ;;  %v2395_v34 = vld [vmem:[%s3051_s0 + $0x1c] ss:$36 sps:$4 sm:$0xff]   ;;  %v2399_v38 = vld [vmem:[%s3051_s0 + $0x64] ss:$36 sps:$4 sm:$0xff]  }
  0x25   :  { %2151 = vmatpush3.bf16.msra.mxu1 %v2319_v39  ;;  %1115 = vmatprep.mubr.bf16.mxu0 %v2320_v40  ;;  %v2397_v37 = vld [vmem:[%s3051_s0 + $0x5c] ss:$36 sps:$4 sm:$0xff]   ;;  %v2403_v39 = vld [vmem:[%s3050_s1 + $0x230] sm:$0xff]   ;;  %v2410_v40 = vld [vmem:[%s3050_s1 + $0x228] sm:$0xff]  }
  0x26   :  { %1212 = vmatprep.mubr.bf16.mxu1 %v2322_v41  ;;  %2088 = vmatprep.subr.bf16.mxu0 %v2326_v44  ;;  %v2401_v41 = vld [vmem:[%s3051_s0 + $0x58] ss:$36 sps:$4 sm:$0xff]   ;;  %v2406_v44 = vld [vmem:[%s3051_s0 + $0xac] ss:$36 sps:$4 sm:$0xff]  }
  0x27   :  { %2152 = vmatprep.subr.bf16.mxu1 %v2327_v45  ;;  %v2417_v45 = vld [vmem:[%s3050_s1 + $0x220] sm:$0xff]  }
  0x28   :  { %2089 = vmatpush3.bf16.msra.mxu0 %v2328_v46  ;;  %v2424_v46 = vld [vmem:[%s3050_s1 + $0x218] sm:$0xff]  }
  0x29   :  { %2153 = vmatpush3.bf16.msra.mxu1 %v2329_v47  ;;  %2090 = vmatprep.subr.bf16.mxu0 %v2336_v52  ;;  %v2408_v47 = vld [vmem:[%s3051_s0 + $0xa0] ss:$36 sps:$4 sm:$0xff]   ;;  %v2415_v52 = vld [vmem:[%s3051_s0 + $0xe8] ss:$36 sps:$4 sm:$0xff]  }
  0x2a   :  { %2154 = vmatprep.subr.bf16.mxu1 %v2337_v53  ;;  %v2438_v53 = vld [vmem:[%s3050_s1 + $0x208] sm:$0xff]  }
  0x2b   :  { %1116 = vmatmul.mubr.bf16.gmra.mxu0 %v2324_v42  ;;  %v2402_v42 = vld [vmem:[%s3051_s0 + $0x60] ss:$36 sps:$4 sm:$0xff]  }
  0x2c   :  { %1213 = vmatmul.mubr.bf16.gmra.mxu1 %v2325_v43  ;;  %1123 = vmatprep.mubr.bf16.mxu0 %v2330_v48  ;;  %v2404_v43 = vld [vmem:[%s3051_s0 + $0xa4] ss:$36 sps:$4 sm:$0xff]  }
  0x2d   :  { %1220 = vmatprep.mubr.bf16.mxu1 %v2332_v49  ;;  %2091 = vmatpush3.bf16.msra.mxu0 %v2338_v54  ;;  %v2409_v48 = vld [vmem:[%s3051_s0 + $0xa8] ss:$36 sps:$4 sm:$0xff]   ;;  %v2416_v54 = vld [vmem:[%s3051_s0 + $0xf0] ss:$36 sps:$4 sm:$0xff]  }
  0x2e   :  { %2155 = vmatpush3.bf16.msra.mxu1 %v2339_v55  ;;  %2092 = vmatprep.subr.bf16.mxu0 %v2346_v60  ;;  %v2411_v49 = vld [vmem:[%s3051_s0 + $0xec] ss:$36 sps:$4 sm:$0xff]   ;;  %v2418_v55 = vld [vmem:[%s3051_s0 + $0x134] ss:$36 sps:$4 sm:$0xff]   ;;  %v2425_v60 = vld [vmem:[%s3051_s0 + $0x17c] ss:$36 sps:$4 sm:$0xff]  }
  0x2f   :  { %2156 = vmatprep.subr.bf16.mxu1 %v2347_v61  ;;  %v2427_v61 = vld [vmem:[%s3051_s0 + $0x184] ss:$36 sps:$4 sm:$0xff]  }
  0x31   :  { %2093 = vmatpush3.bf16.msra.mxu0 %v2348_v62  ;;  %v2429_v62 = vld [vmem:[%s3051_s0 + $0x178] ss:$36 sps:$4 sm:$0xff]  }
  0x32   :  { %2157 = vmatpush3.bf16.msra.mxu1 %v2349_v63  ;;  %2094 = vmatprep.subr.bf16.mxu0 %v2356_v3  ;;  %v2430_v63 = vld [vmem:[%s3051_s0 + $0x180] ss:$36 sps:$4 sm:$0xff]   ;;  %v2437_v3 = vld [vmem:[%s3051_s0 + $0x1c8] ss:$36 sps:$4 sm:$0xff]  }
  0x33   :  { %1124 = vmatmul.mubr.bf16.gmra.mxu0 %v2334_v50  ;;  %2158 = vmatprep.subr.bf16.mxu1 %v2357_v5  ;;  %v2413_v50 = vld [vmem:[%s3051_s0 + $0xf4] ss:$36 sps:$4 sm:$0xff]  }
  0x34   :  { %1221 = vmatmul.mubr.bf16.gmra.mxu1 %v2335_v51  ;;  %1131 = vmatprep.mubr.bf16.mxu0 %v2340_v56  ;;  %v2431_v51 = vld [vmem:[%s3050_s1 + $0x210] sm:$0xff]   ;;  %v2420_v56 = vld [vmem:[%s3051_s0 + $0x13c] ss:$36 sps:$4 sm:$0xff]  }
  0x35   :  { %1228 = vmatprep.mubr.bf16.mxu1 %v2342_v57  ;;  %2095 = vmatpush3.bf16.msra.mxu0 %v2358_v6  ;;  %v2445_v57 = vld [vmem:[%s3050_s1 + $0x200] sm:$0xff]   ;;  %v2441_v5 = vld [vmem:[%s3051_s0 + $0x214] ss:$36 sps:$4 sm:$0xff]   ;;  %v2443_v6 = vld [vmem:[%s3051_s0 + $0x208] ss:$36 sps:$4 sm:$0xff]  }
  0x36   :  { %2159 = vmatpush3.bf16.msra.mxu1 %v2359_v7  ;;  %2096 = vmatprep.subr.bf16.mxu0 %v2366_v10  ;;  %v2444_v7 = vld [vmem:[%s3051_s0 + $0x210] ss:$36 sps:$4 sm:$0xff]   ;;  %v2448_v10 = vld [vmem:[%s3051_s0 + $0x68] ss:$36 sps:$4 sm:$0xff]  }
  0x37   :  { %2160 = vmatprep.subr.bf16.mxu1 %v2367_v11  ;;  %v2449_v11 = vld [vmem:[%s3051_s0 + $0x188] ss:$36 sps:$4 sm:$0xff]  }
  0x39   :  { %2097 = vmatpush3.bf16.msra.mxu0 %v2368_v13  ;;  %v2451_v13 = vld [vmem:[%s3051_s0 + $0x1d0] ss:$36 sps:$4 sm:$0xff]  }
  0x3a   :  { %2161 = vmatpush3.bf16.msra.mxu1 %v2369_v14  ;;  %2098 = vmatprep.subr.bf16.mxu0 %v2376_v18  ;;  %v2452_v14 = vld [vmem:[%s3051_s0 + $0xf8] ss:$36 sps:$4 sm:$0xff]  }
  0x3b   :  { %1132 = vmatmul.mubr.bf16.gmra.mxu0 %v2344_v58  ;;  %2162 = vmatprep.subr.bf16.mxu1 %v2377_v19  ;;  %v2422_v58 = vld [vmem:[%s3051_s0 + $0x130] ss:$36 sps:$4 sm:$0xff]  }
  0x3c   :  { %1229 = vmatmul.mubr.bf16.gmra.mxu1 %v2345_v59  ;;  %1139 = vmatprep.mubr.bf16.mxu0 %v2350_v0  ;;  %v2423_v59 = vld [vmem:[%s3051_s0 + $0x138] ss:$36 sps:$4 sm:$0xff]   ;;  %v2432_v0 = vld [vmem:[%s3051_s0 + $0x1c4] ss:$36 sps:$4 sm:$0xff]  }
  0x3d   :  { %1236 = vmatprep.mubr.bf16.mxu1 %v2352_v1  ;;  %2099 = vmatpush3.bf16.msra.mxu0 %v2378_v20  ;;  %v2434_v1 = vld [vmem:[%s3051_s0 + $0x1cc] ss:$36 sps:$4 sm:$0xff]  }
  0x3e   :  { %2163 = vmatpush3.bf16.msra.mxu1 %v2379_v21  ;;  %2100 = vmatprep.subr.bf16.mxu0 %v2386_v26 }
  0x3f   :  { %2164 = vmatprep.subr.bf16.mxu1 %v2387_v27 }
  0x41   :  { %2101 = vmatpush3.bf16.msra.mxu0 %v2388_v28 }
  0x42   :  { %2165 = vmatpush3.bf16.msra.mxu1 %v2389_v29  ;;  %2230 = vmatprep.subr.bf16.mxu0 %v2396_v32 }
  0x43   :  { %1140 = vmatmul.mubr.bf16.gmra.mxu0 %v2354_v2  ;;  %2262 = vmatprep.subr.bf16.mxu1 %v2396_v32  ;;  %v2436_v2 = vld [vmem:[%s3051_s0 + $0x1c0] ss:$36 sps:$4 sm:$0xff]  }
  0x44   :  { %1237 = vmatmul.mubr.bf16.gmra.mxu1 %v2355_v4  ;;  %1147 = vmatprep.mubr.bf16.mxu0 %v2360_v8  ;;  %v2439_v4 = vld [vmem:[%s3051_s0 + $0x20c] ss:$36 sps:$4 sm:$0xff]   ;;  %v2446_v8 = vld [vmem:[%s3051_s0 + $0x20] ss:$36 sps:$4 sm:$0xff]  }
  0x45   :  { %1244 = vmatprep.mubr.bf16.mxu1 %v2362_v9  ;;  %v2447_v9 = vld [vmem:[%s3051_s0 + $0x140] ss:$36 sps:$4 sm:$0xff]  }
  0x4b   :  { %1148 = vmatmul.mubr.bf16.gmra.mxu0 %v2364_v12  ;;  %v2450_v12 = vld [vmem:[%s3051_s0 + $0xb0] ss:$36 sps:$4 sm:$0xff]  }
  0x4c   :  { %1245 = vmatmul.mubr.bf16.gmra.mxu1 %v2365_v15  ;;  %1155 = vmatprep.mubr.bf16.mxu0 %v2370_v16  ;;  %v2453_v15 = vld [vmem:[%s3051_s0 + $0x218] ss:$36 sps:$4 sm:$0xff]  }
  0x4d   :  { %1252 = vmatprep.mubr.bf16.mxu1 %v2372_v17 }
  0x53   :  { %1156 = vmatmul.mubr.bf16.gmra.mxu0 %v2374_v22 }
  0x54   :  { %1253 = vmatmul.mubr.bf16.gmra.mxu1 %v2375_v23  ;;  %1163 = vmatprep.mubr.bf16.mxu0 %v2380_v24 }
  0x55   :  { %1260 = vmatprep.mubr.bf16.mxu1 %v2382_v25 }
  0x5b   :  { %1164 = vmatmul.mubr.bf16.gmra.mxu0 %v2384_v30 }
  0x5c   :  { %1261 = vmatmul.mubr.bf16.gmra.mxu1 %v2385_v31  ;;  %1301 = vmatprep.mubr.bf16.mxu0 %v2392_v33 }
  0x5d   :  { %1398 = vmatprep.mubr.bf16.mxu1 %v2395_v34 }
  0x63   :  { %1302 = vmatmul.mubr.bf16.vlgmr.msra.gmra.mxu0 %v2390_v35 }
  0x64   :  { %1399 = vmatmul.mubr.bf16.vlgmr.msra.gmra.mxu1 %v2393_v36  ;;  %2231 = vmatpush3.bf16.msra.mxu0 %v2396_v32 }
  0x65   :  { %2270 = vmatpush3.bf16.msra.mxu1 %v2396_v32  ;;  %1309 = vmatprep.mubr.bf16.mxu0 %v2397_v37 }
  0x66   :  { %1406 = vmatprep.mubr.bf16.mxu1 %v2399_v38  ;;  %2232 = vmatprep.subr.bf16.mxu0 %v2403_v39 }
  0x67   :  { %2263 = vmatprep.subr.bf16.mxu1 %v2403_v39 }
  0x68   :  { %2233 = vmatpush3.bf16.msra.mxu0 %v2403_v39 }
  0x69   :  { %2271 = vmatpush3.bf16.msra.mxu1 %v2403_v39  ;;  %2234 = vmatprep.subr.bf16.mxu0 %v2410_v40 }
  0x6a   :  { %2264 = vmatprep.subr.bf16.mxu1 %v2410_v40 }
  0x6b   :  { %1310 = vmatmul.mubr.bf16.gmra.mxu0 %v2401_v41 }
  0x6c   :  { %1407 = vmatmul.mubr.bf16.gmra.mxu1 %v2402_v42  ;;  %1317 = vmatprep.mubr.bf16.mxu0 %v2404_v43 }
  0x6d   :  { %1414 = vmatprep.mubr.bf16.mxu1 %v2406_v44  ;;  %2235 = vmatpush3.bf16.msra.mxu0 %v2410_v40 }
  0x6e   :  { %2272 = vmatpush3.bf16.msra.mxu1 %v2410_v40  ;;  %2236 = vmatprep.subr.bf16.mxu0 %v2417_v45 }
  0x6f   :  { %2265 = vmatprep.subr.bf16.mxu1 %v2417_v45 }
  0x71   :  { %2237 = vmatpush3.bf16.msra.mxu0 %v2417_v45 }
  0x72   :  { %2273 = vmatpush3.bf16.msra.mxu1 %v2417_v45  ;;  %2238 = vmatprep.subr.bf16.mxu0 %v2424_v46 }
  0x73   :  { %1318 = vmatmul.mubr.bf16.gmra.mxu0 %v2408_v47  ;;  %2266 = vmatprep.subr.bf16.mxu1 %v2424_v46 }
  0x74   :  { %1415 = vmatmul.mubr.bf16.gmra.mxu1 %v2409_v48  ;;  %1325 = vmatprep.mubr.bf16.mxu0 %v2411_v49 }
  0x75   :  { %1422 = vmatprep.mubr.bf16.mxu1 %v2413_v50  ;;  %2239 = vmatpush3.bf16.msra.mxu0 %v2424_v46 }
  0x76   :  { %2274 = vmatpush3.bf16.msra.mxu1 %v2424_v46  ;;  %2240 = vmatprep.subr.bf16.mxu0 %v2431_v51 }
  0x77   :  { %2267 = vmatprep.subr.bf16.mxu1 %v2431_v51 }
  0x79   :  { %2241 = vmatpush3.bf16.msra.mxu0 %v2431_v51 }
  0x7a   :  { %2275 = vmatpush3.bf16.msra.mxu1 %v2431_v51  ;;  %2242 = vmatprep.subr.bf16.mxu0 %v2438_v53 }
  0x7b   :  { %1326 = vmatmul.mubr.bf16.gmra.mxu0 %v2415_v52  ;;  %2268 = vmatprep.subr.bf16.mxu1 %v2438_v53 }
  0x7c   :  { %1423 = vmatmul.mubr.bf16.gmra.mxu1 %v2416_v54  ;;  %1333 = vmatprep.mubr.bf16.mxu0 %v2418_v55 }
  0x7d   :  { %1430 = vmatprep.mubr.bf16.mxu1 %v2420_v56  ;;  %2243 = vmatpush3.bf16.msra.mxu0 %v2438_v53 }
  0x7e   :  { %2276 = vmatpush3.bf16.msra.mxu1 %v2438_v53  ;;  %2244 = vmatprep.subr.bf16.mxu0 %v2445_v57 }
  0x7f   :  { %2269 = vmatprep.subr.bf16.mxu1 %v2445_v57 }
  0x81   :  { %2245 = vmatpush3.bf16.msra.mxu0 %v2445_v57 }
  0x82   :  { %2277 = vmatpush3.bf16.msra.mxu1 %v2445_v57 }
  0x83   :  { %1334 = vmatmul.mubr.bf16.gmra.mxu0 %v2422_v58 }
  0x84   :  { %1431 = vmatmul.mubr.bf16.gmra.mxu1 %v2423_v59  ;;  %1341 = vmatprep.mubr.bf16.mxu0 %v2425_v60 }
  0x85   :  { %1438 = vmatprep.mubr.bf16.mxu1 %v2427_v61 }
  0x8b   :  { %1342 = vmatmul.mubr.bf16.gmra.mxu0 %v2429_v62 }
  0x8c   :  { %1439 = vmatmul.mubr.bf16.gmra.mxu1 %v2430_v63  ;;  %1349 = vmatprep.mubr.bf16.mxu0 %v2432_v0 }
  0x8d   :  { %1446 = vmatprep.mubr.bf16.mxu1 %v2434_v1 }
  0x93   :  { %1350 = vmatmul.mubr.bf16.gmra.mxu0 %v2436_v2 }
  0x94   :  { %1447 = vmatmul.mubr.bf16.gmra.mxu1 %v2437_v3  ;;  %1357 = vmatprep.mubr.bf16.mxu0 %v2439_v4 }
  0x95   :  { %1454 = vmatprep.mubr.bf16.mxu1 %v2441_v5 }
  0x9b   :  { %1358 = vmatmul.mubr.bf16.gmra.mxu0 %v2443_v6 }
  0x9c   :  { %1455 = vmatmul.mubr.bf16.gmra.mxu1 %v2444_v7  ;;  %2246 = vmatprep.mubr.bf16.mxu0 %v2446_v8 }
  0x9d   :  { %2254 = vmatprep.mubr.bf16.mxu1 %v2447_v9 }
  0xa3   :  { %2247 = vmatmul.mubr.bf16.vlgmr.msra.gmra.mxu0 %v2448_v10 }
  0xa4   :  { %2255 = vmatmul.mubr.bf16.vlgmr.msra.gmra.mxu1 %v2449_v11  ;;  %2250 = vmatprep.mubr.bf16.mxu0 %v2450_v12 }
  0xa5   :  { %2258 = vmatprep.mubr.bf16.mxu1 %v2451_v13 }
  0xab   :  { %2251 = vmatmul.mubr.bf16.gmra.mxu0 %v2452_v14 }
  0xac   :  { %2259 = vmatmul.mubr.bf16.gmra.mxu1 %v2453_v15 }
  0xe3   :  { %v1974_v16 = vpop.f32.mrf.mxu0 }
  0xe4   :  { %v2038_v17 = vpop.f32.mrf.mxu1 }
  0xe5   :  { %v1975_v18 = vpop.f32.mrf.mxu0 }
  0xe6   :  { %v1976_v19 = vadd.f32 %v1975_v18, %v1974_v16  ;;  %v2039_v20 = vpop.f32.mrf.mxu1 }
  0xe7   :  { %v2040_v21 = vadd.f32 %v2039_v20, %v2038_v17  ;;  %v1977_v22 = vpop.f32.mrf.mxu0 }
  0xe8   :  { %v2041_v23 = vpop.f32.mrf.mxu1 }
  0xe9   :  { %v2906_v24 = vadd.f32 %v2040_v21, %v1976_v19  ;;  %v1978_v25 = vpop.f32.mrf.mxu0 }
  0xea   :  { %v1979_v26 = vadd.f32 %v1978_v25, %v1977_v22  ;;  %v2042_v27 = vpop.f32.mrf.mxu1 }
  0xeb   :  { %v2043_v28 = vadd.f32 %v2042_v27, %v2041_v23  ;;  %v1980_v29 = vpop.f32.mrf.mxu0 }
  0xec   :  { %v2044_v30 = vpop.f32.mrf.mxu1 }
  0xed   :  { %v2908_v31 = vadd.f32 %v2043_v28, %v1979_v26  ;;  %v1981_v32 = vpop.f32.mrf.mxu0 }
  0xee   :  { %v1982_v33 = vadd.f32 %v1981_v32, %v1980_v29  ;;  %v2045_v34 = vpop.f32.mrf.mxu1 }
  0xef   :  { %v2046_v35 = vadd.f32 %v2045_v34, %v2044_v30  ;;  %v1983_v36 = vpop.f32.mrf.mxu0 }
  0xf0   :  { %v2047_v37 = vpop.f32.mrf.mxu1 }
  0xf1   :  { %v2910_v38 = vadd.f32 %v2046_v35, %v1982_v33  ;;  %v1984_v39 = vpop.f32.mrf.mxu0 }
  0xf2   :  { %v1985_v40 = vadd.f32 %v1984_v39, %v1983_v36  ;;  %v2048_v41 = vpop.f32.mrf.mxu1 }
  0xf3   :  { %v2049_v42 = vadd.f32 %v2048_v41, %v2047_v37  ;;  %v1986_v43 = vpop.f32.mrf.mxu0 }
  0xf4   :  { %v2050_v44 = vpop.f32.mrf.mxu1 }
  0xf5   :  { %v2912_v45 = vadd.f32 %v2049_v42, %v1985_v40  ;;  %v1987_v46 = vpop.f32.mrf.mxu0 }
  0xf6   :  { %v1988_v47 = vadd.f32 %v1987_v46, %v1986_v43  ;;  %v2051_v48 = vpop.f32.mrf.mxu1 }
  0xf7   :  { %v2052_v49 = vadd.f32 %v2051_v48, %v2050_v44  ;;  %v1989_v50 = vpop.f32.mrf.mxu0 }
  0xf8   :  { %v2053_v51 = vpop.f32.mrf.mxu1 }
  0xf9   :  { %v2914_v52 = vadd.f32 %v2052_v49, %v1988_v47  ;;  %v1990_v53 = vpop.f32.mrf.mxu0 }
  0xfa   :  { %v1991_v54 = vadd.f32 %v1990_v53, %v1989_v50  ;;  %v2054_v55 = vpop.f32.mrf.mxu1 }
  0xfb   :  { %v2055_v56 = vadd.f32 %v2054_v55, %v2053_v51  ;;  %v1992_v57 = vpop.f32.mrf.mxu0 }
  0xfc   :  { %v2056_v58 = vpop.f32.mrf.mxu1 }
  0xfd   :  { %v2916_v59 = vadd.f32 %v2055_v56, %v1991_v54  ;;  %v1993_v60 = vpop.f32.mrf.mxu0 }
  0xfe   :  { %v1994_v61 = vadd.f32 %v1993_v60, %v1992_v57  ;;  %v2057_v62 = vpop.f32.mrf.mxu1 }
  0xff   :  { %v2058_v63 = vadd.f32 %v2057_v62, %v2056_v58  ;;  %v1995_v0 = vpop.f32.mrf.mxu0 }
 0x100   :  { %v2059_v1 = vpop.f32.mrf.mxu1 }
 0x101   :  { %v2918_v2 = vadd.f32 %v2058_v63, %v1994_v61  ;;  %v1996_v3 = vpop.f32.mrf.mxu0 }
 0x102   :  { %v1997_v4 = vadd.f32 %v1996_v3, %v1995_v0  ;;  %v2060_v5 = vpop.f32.mrf.mxu1 }
 0x103   :  { %v2061_v6 = vadd.f32 %v2060_v5, %v2059_v1  ;;  %v1998_v7 = vpop.f32.mrf.mxu0 }
 0x104   :  { %v2062_v8 = vpop.f32.mrf.mxu1 }
 0x105   :  { %v2920_v9 = vadd.f32 %v2061_v6, %v1997_v4  ;;  %v1999_v10 = vpop.f32.mrf.mxu0 }
 0x106   :  { %v2000_v11 = vadd.f32 %v1999_v10, %v1998_v7  ;;  %v2063_v12 = vpop.f32.mrf.mxu1 }
 0x107   :  { %v2064_v13 = vadd.f32 %v2063_v12, %v2062_v8  ;;  %v2001_v14 = vpop.f32.mrf.mxu0 }
 0x108   :  { %v2065_v15 = vpop.f32.mrf.mxu1 }
 0x109   :  { %v2922_v16 = vadd.f32 %v2064_v13, %v2000_v11  ;;  %v2002_v17 = vpop.f32.mrf.mxu0 }
 0x10a   :  { %v2003_v18 = vadd.f32 %v2002_v17, %v2001_v14  ;;  %v2066_v19 = vpop.f32.mrf.mxu1 }
 0x10b   :  { %v2067_v20 = vadd.f32 %v2066_v19, %v2065_v15  ;;  %v2004_v21 = vpop.f32.mrf.mxu0 }
 0x10c   :  { %v2068_v22 = vpop.f32.mrf.mxu1 }
 0x10d   :  { %v2924_v23 = vadd.f32 %v2067_v20, %v2003_v18  ;;  %v2005_v25 = vpop.f32.mrf.mxu0 }
 0x10e   :  { %v2006_v26 = vadd.f32 %v2005_v25, %v2004_v21  ;;  %v2069_v27 = vpop.f32.mrf.mxu1 }
 0x10f   :  { %3054 = vst [vmem:[#allocation3_spill] sm:$0xff] %v2924_v23  ;;  %v2070_v28 = vadd.f32 %v2069_v27, %v2068_v22  ;;  %v2007_v29 = vpop.f32.mrf.mxu0 }
 0x110   :  { %v2071_v30 = vpop.f32.mrf.mxu1 }
 0x111   :  { %v2926_v32 = vadd.f32 %v2070_v28, %v2006_v26  ;;  %v2008_v33 = vpop.f32.mrf.mxu0 }
 0x112   :  { %v2009_v34 = vadd.f32 %v2008_v33, %v2007_v29  ;;  %v2072_v35 = vpop.f32.mrf.mxu1 }
 0x113   :  { %v2073_v36 = vadd.f32 %v2072_v35, %v2071_v30  ;;  %v2010_v37 = vpop.f32.mrf.mxu0 }
 0x114   :  { %v2074_v39 = vpop.f32.mrf.mxu1 }
 0x115   :  { %v2928_v40 = vadd.f32 %v2073_v36, %v2009_v34  ;;  %v2011_v41 = vpop.f32.mrf.mxu0 }
 0x116   :  { %v2012_v42 = vadd.f32 %v2011_v41, %v2010_v37  ;;  %v2075_v43 = vpop.f32.mrf.mxu1 }
 0x117   :  { %3055 = vst [vmem:[#allocation4_spill] sm:$0xff] %v2928_v40  ;;  %v2076_v44 = vadd.f32 %v2075_v43, %v2074_v39  ;;  %v2013_v46 = vpop.f32.mrf.mxu0 }
 0x118   :  { %v2077_v47 = vpop.f32.mrf.mxu1 }
 0x119   :  { %v2930_v48 = vadd.f32 %v2076_v44, %v2012_v42  ;;  %v2014_v49 = vpop.f32.mrf.mxu0 }
 0x11a   :  { %v2015_v50 = vadd.f32 %v2014_v49, %v2013_v46  ;;  %v2078_v51 = vpop.f32.mrf.mxu1 }
 0x11b   :  { %3056 = vst [vmem:[#allocation5_spill] sm:$0xff] %v2930_v48  ;;  %v2079_v53 = vadd.f32 %v2078_v51, %v2077_v47  ;;  %v2016_v54 = vpop.f32.mrf.mxu0 }
 0x11c   :  { %v2080_v55 = vpop.f32.mrf.mxu1 }
 0x11d   :  { %v2932_v56 = vadd.f32 %v2079_v53, %v2015_v50  ;;  %v2017_v57 = vpop.f32.mrf.mxu0 }
 0x11e   :  { %v2018_v58 = vadd.f32 %v2017_v57, %v2016_v54  ;;  %v2081_v60 = vpop.f32.mrf.mxu1 }
 0x11f   :  { %3057 = vst [vmem:[#allocation6_spill] sm:$0xff] %v2932_v56  ;;  %v2082_v61 = vadd.f32 %v2081_v60, %v2080_v55  ;;  %v2019_v62 = vpop.f32.mrf.mxu0 }
 0x120   :  { %v2083_v63 = vpop.f32.mrf.mxu1 }
 0x121   :  { %v2934_v0 = vadd.f32 %v2082_v61, %v2018_v58  ;;  %v2020_v1 = vpop.f32.mrf.mxu0 }
 0x122   :  { %v2021_v3 = vadd.f32 %v2020_v1, %v2019_v62  ;;  %v2084_v4 = vpop.f32.mrf.mxu1 }
 0x123   :  { %3058 = vst [vmem:[#allocation7_spill] sm:$0xff] %v2934_v0  ;;  %v2085_v5 = vadd.f32 %v2084_v4, %v2083_v63  ;;  %v2102_v6 = vpop.f32.mrf.mxu0 }
 0x124   :  { %v2166_v7 = vpop.f32.mrf.mxu1 }
 0x125   :  { %v2936_v8 = vadd.f32 %v2085_v5, %v2021_v3  ;;  %v2103_v10 = vpop.f32.mrf.mxu0 }
 0x126   :  { %v2104_v11 = vadd.f32 %v2103_v10, %v2102_v6  ;;  %v2167_v12 = vpop.f32.mrf.mxu1 }
 0x127   :  { %3059 = vst [vmem:[#allocation8_spill] sm:$0xff] %v2936_v8  ;;  %v2105_v13 = vpop.f32.mrf.mxu0  ;;  %v2168_v15 = vadd.f32 %v2167_v12, %v2166_v7 }
 0x128   :  { %v1304_v14 = vadd.f32 %v2104_v11, %v2906_v24  ;;  %v2169_v17 = vpop.f32.mrf.mxu1 }
 0x129   :  { %v2106_v18 = vpop.f32.mrf.mxu0 }
 0x12a   :  { %v2170_v19 = vpop.f32.mrf.mxu1  ;;  %v2939_v20 = vadd.f32 %v2168_v15, %v1304_v14  ;;  %v2107_v14 = vadd.f32 %v2106_v18, %v2105_v13 }
 0x12b   :  { %v2108_v21 = vpop.f32.mrf.mxu0  ;;  %v2171_v40 = vadd.f32 %v2170_v19, %v2169_v17 }
 0x12c   :  { %3060 = vst [vmem:[#allocation9_spill] sm:$0xff] %v2939_v20  ;;  %v2172_v22 = vpop.f32.mrf.mxu1 }
 0x12d   :  { %v2109_v25 = vpop.f32.mrf.mxu0 }
 0x12e   :  { %v2173_v26 = vpop.f32.mrf.mxu1  ;;  %v2110_v20 = vadd.f32 %v2109_v25, %v2108_v21 }
 0x12f   :  { %v2111_v27 = vpop.f32.mrf.mxu0 }
 0x130   :  { %v2175_v28 = vpop.f32.mrf.mxu1 }
 0x131   :  { %v2112_v29 = vpop.f32.mrf.mxu0 }
 0x132   :  { %v2176_v30 = vpop.f32.mrf.mxu1  ;;  %v2113_v0 = vadd.f32 %v2112_v29, %v2111_v27  ;;  %v2174_v27 = vadd.f32 %v2173_v26, %v2172_v22 }
 0x133   :  { %v2114_v33 = vpop.f32.mrf.mxu0 }
 0x134   :  { %v2178_v34 = vpop.f32.mrf.mxu1  ;;  %v1315_v13 = vadd.f32 %v2113_v0, %v2912_v45 }
 0x135   :  { %v2115_v35 = vpop.f32.mrf.mxu0 }
 0x136   :  { %v2179_v36 = vpop.f32.mrf.mxu1 }
 0x137   :  { %v2117_v37 = vpop.f32.mrf.mxu0 }
 0x138   :  { %v2941_v24 = vpop.f32.mrf.mxu1 }
 0x139   :  { %v2118_v39 = vpop.f32.mrf.mxu0 }
 0x13a   :  { %v2943_v41 = vpop.f32.mrf.mxu1  ;;  %v2119_v29 = vadd.f32 %v2118_v39, %v2117_v37 }
 0x13b   :  { %v2120_v42 = vpop.f32.mrf.mxu0 }
 0x13c   :  { %v2184_v43 = vpop.f32.mrf.mxu1 }
 0x13d   :  { %v2121_v44 = vpop.f32.mrf.mxu0 }
 0x13e   :  { %v2185_v46 = vpop.f32.mrf.mxu1 }
 0x13f   :  { %v2123_v47 = vpop.f32.mrf.mxu0 }
 0x140   :  { %v2945_v49 = vpop.f32.mrf.mxu1 }
 0x141   :  { %3061 = vst [vmem:[#allocation10_spill] sm:$0xff] %v2945_v49  ;;  %v2124_v50 = vpop.f32.mrf.mxu0  ;;  %v2122_v49 = vadd.f32 %v2121_v44, %v2120_v42  ;;  %v2177_v42 = vadd.f32 %v2176_v30, %v2175_v28  ;;  %v2180_v44 = vadd.f32 %v2179_v36, %v2178_v34  ;;  %v2981_v28 = vadd.f32 %v2943_v41, %v2941_v24 }
 0x142   :  { %v2947_v51 = vpop.f32.mrf.mxu1  ;;  %v2125_v17 = vadd.f32 %v2124_v50, %v2123_v47 }
 0x143   :  { %3062 = vst [vmem:[#allocation11_spill] sm:$0xff] %v2947_v51  ;;  %v2126_v53 = vpop.f32.mrf.mxu0  ;;  %v1307_v51 = vadd.f32 %v2107_v14, %v2908_v31  ;;  %v1412_v37 = vadd.f32 %v2177_v42, %v1315_v13  ;;  %v2998_v14 = vld [vmem:[%s3052_s2] ss:$0 sm:$0xff] }
 0x144   :  { %v2949_v54 = vpop.f32.mrf.mxu1  ;;  %v1331_v36 = vadd.f32 %v2125_v17, %v2920_v9 }
 0x145   :  { %v2127_v55 = vpop.f32.mrf.mxu0 }
 0x146   :  { %v2191_v57 = vpop.f32.mrf.mxu1  ;;  %v2128_v21 = vadd.f32 %v2127_v55, %v2126_v53 }
 0x147   :  { %v2129_v58 = vpop.f32.mrf.mxu0  ;;  %v2192_v39 = vadd.f32 %v2191_v57, %v2949_v54 }
 0x148   :  { %v2951_v60 = vpop.f32.mrf.mxu1  ;;  %v3071_v24 = vld [vmem:[#allocation10_spill] sm:$0xff] }
 0x149   :  { %3063 = vst [vmem:[#allocation12_spill] sm:$0xff] %v2951_v60  ;;  %v2130_v61 = vpop.f32.mrf.mxu0 }
 0x14a   :  { %v2953_v62 = vpop.f32.mrf.mxu1  ;;  %v2131_v19 = vadd.f32 %v2130_v61, %v2129_v58  ;;  %v3072_v41 = vld [vmem:[#allocation11_spill] sm:$0xff] }
 0x14b   :  { %3064 = vst [vmem:[#allocation13_spill] sm:$0xff] %v2953_v62  ;;  %v2132_v63 = vpop.f32.mrf.mxu0  ;;  %v2116_v62 = vadd.f32 %v2115_v35, %v2114_v33  ;;  %v1328_v33 = vadd.f32 %v2122_v49, %v2918_v2  ;;  %v2970_v35 = vadd.f32 %v2171_v40, %v1307_v51  ;;  %v2977_v40 = vadd.f32 %v2119_v29, %v2916_v59  ;;  %v3069_v49 = vld [vmem:[#allocation4_spill] sm:$0xff]  ;;  %v3070_v51 = vld [vmem:[#allocation5_spill] sm:$0xff] }
 0x14c   :  { %v2196_v1 = vpop.f32.mrf.mxu1  ;;  %v2189_v61 = vadd.f32 %v3072_v41, %v3071_v24 }
 0x14d   :  { %v2133_v3 = vpop.f32.mrf.mxu0  ;;  %v1320_v18 = vadd.f32 %v2116_v62, %v2914_v52 }
 0x14e   :  { %v2197_v4 = vpop.f32.mrf.mxu1  ;;  %v1428_v42 = vadd.f32 %v2189_v61, %v1331_v36 }
 0x14f   :  { %v2135_v5 = vpop.f32.mrf.mxu0  ;;  %v2974_v2 = vadd.f32 %v2180_v44, %v1320_v18  ;;  %v2198_v30 = vadd.f32 %v2197_v4, %v2196_v1  ;;  %v3078_v18 = vld [vmem:[#allocation7_spill] sm:$0xff]  ;;  %v3080_v44 = vld [vmem:[#allocation8_spill] sm:$0xff] }
 0x150   :  { %v2955_v6 = vpop.f32.mrf.mxu1  ;;  %v3073_v62 = vld [vmem:[#allocation12_spill] sm:$0xff] }
 0x151   :  { %3065 = vst [vmem:[#allocation14_spill] sm:$0xff] %v2955_v6  ;;  %v2136_v7 = vpop.f32.mrf.mxu0 }
 0x152   :  { %v2957_v10 = vpop.f32.mrf.mxu1  ;;  %v2137_v45 = vadd.f32 %v2136_v7, %v2135_v5  ;;  %v3074_v1 = vld [vmem:[#allocation13_spill] sm:$0xff] }
 0x153   :  { %3066 = vst [vmem:[#allocation15_spill] sm:$0xff] %v2957_v10  ;;  %v2138_v11 = vpop.f32.mrf.mxu0  ;;  %v2134_v10 = vadd.f32 %v2133_v3, %v2132_v63  ;;  %v2186_v3 = vadd.f32 %v2185_v46, %v2184_v43  ;;  %v2195_v4 = vadd.f32 %v3074_v1, %v3073_v62 }
 0x154   :  { %v2959_v12 = vpop.f32.mrf.mxu1  ;;  %v1347_v50 = vadd.f32 %v2137_v45, %v3069_v49 }
 0x155   :  { %3067 = vst [vmem:[#allocation16_spill] sm:$0xff] %v2959_v12  ;;  %v2139_v15 = vpop.f32.mrf.mxu0  ;;  %v1312_v12 = vadd.f32 %v2110_v20, %v2910_v38  ;;  %v1344_v38 = vadd.f32 %v2134_v10, %v2926_v32  ;;  %v1336_v20 = vadd.f32 %v2128_v21, %v2922_v16  ;;  %v1425_v32 = vadd.f32 %v2186_v3, %v1328_v33  ;;  %v3068_v16 = vld [vmem:[#allocation3_spill] sm:$0xff] }
 0x156   :  { %v2203_v56 = vpop.f32.mrf.mxu1  ;;  %v2140_v0 = vadd.f32 %v2139_v15, %v2138_v11  ;;  %v1339_v43 = vadd.f32 %v2131_v19, %v3068_v16 }
 0x157   :  { %v2141_v8 = vpop.f32.mrf.mxu0  ;;  %v1409_v26 = vadd.f32 %v2174_v27, %v1312_v12  ;;  %v1441_v58 = vadd.f32 %v2198_v30, %v1344_v38  ;;  %v1433_v54 = vadd.f32 %v2192_v39, %v1336_v20  ;;  %v3079_v27 = vld [vmem:[#allocation9_spill] sm:$0xff]  ;;  %v3081_v20 = vld [vmem:[#allocation6_spill] sm:$0xff] }
 0x158   :  { %v2961_v60 = vpop.f32.mrf.mxu1  ;;  %v1352_v59 = vadd.f32 %v2140_v0, %v3070_v51  ;;  %v3075_v57 = vld [vmem:[#allocation14_spill] sm:$0xff] }
 0x159   :  { %v2142_v48 = vpop.f32.mrf.mxu0 }
 0x15a   :  { %v2964_v6 = vpop.f32.mrf.mxu1  ;;  %v3076_v7 = vld [vmem:[#allocation15_spill] sm:$0xff]  ;;  %v2143_v12 = vadd.f32 %v2142_v48, %v2141_v8 }
 0x15b   :  { %v2144_v23 = vpop.f32.mrf.mxu0  ;;  %v2207_v8 = vadd.f32 %v2964_v6, %v2961_v60 }
 0x15c   :  { %v2208_v25 = vpop.f32.mrf.mxu1  ;;  %v3077_v10 = vld [vmem:[#allocation16_spill] sm:$0xff] }
 0x15d   :  { %v2145_v31 = vpop.f32.mrf.mxu0  ;;  %v2204_v11 = vadd.f32 %v2203_v56, %v3077_v10 }
 0x15e   :  { %v2209_v63 = vpop.f32.mrf.mxu1  ;;  %v2146_v46 = vadd.f32 %v2145_v31, %v2144_v23  ;;  %v2201_v23 = vadd.f32 %v3076_v7, %v3075_v57  ;;  %v1436_v31 = vadd.f32 %v2195_v4, %v1339_v43 }
 0x15f   :  { %v2147_v52 = vpop.f32.mrf.mxu0  ;;  %v1449_v48 = vadd.f32 %v2204_v11, %v1352_v59  ;;  %v2210_v38 = vadd.f32 %v2209_v63, %v2208_v25 }
 0x160   :  { %v2211_v22 = vpop.f32.mrf.mxu1  ;;  %v1360_v21 = vadd.f32 %v2146_v46, %v3078_v18  ;;  %v1444_v56 = vadd.f32 %v2201_v23, %v1347_v50 }
 0x161   :  { %v2148_v34 = vpop.f32.mrf.mxu0 }
 0x162   :  { %v2212_v47 = vpop.f32.mrf.mxu1  ;;  %v2149_v53 = vadd.f32 %v2148_v34, %v2147_v52  ;;  %v1457_v60 = vadd.f32 %v2210_v38, %v1360_v21 }
 0x163   :  { %v2248_v55 = vpop.f32.mrf.mxu0  ;;  %v2213_v30 = vadd.f32 %v2212_v47, %v2211_v22 }
 0x164   :  { %v1506_v9 = vadd.f32 %v2248_v55, %v1409_v26  ;;  %v2256_v5 = vpop.f32.mrf.mxu1  ;;  %v1363_v17 = vadd.f32 %v2149_v53, %v3080_v44  ;;  %v1355_v26 = vadd.f32 %v2143_v12, %v3081_v20 }
 0x165   :  { %v1538_v15 = vadd.f32 %v2256_v5, %v1441_v58  ;;  %v1497_v13 = vpop.f32.mrf.mxu0 }
 0x166   :  { %v1498_v29 = vadd.f32 %v1497_v13, %v3079_v27  ;;  %v1529_v33 = vpop.f32.mrf.mxu1  ;;  %v1620_v45 = vadd.f32 %v2998_v14, %v1506_v9  ;;  %v1460_v50 = vadd.f32 %v2213_v30, %v1363_v17  ;;  %v1452_v27 = vadd.f32 %v2207_v8, %v1355_v26 }
 0x167   :  { %v1530_v19 = vadd.f32 %v1529_v33, %v1433_v54  ;;  %v2249_v3 = vpop.f32.mrf.mxu0  ;;  %v1628_v34 = vadd.f32 %v2998_v14, %v1538_v15  ;;  %v1420_v15 = vadd.f32 %v2981_v28, %v2977_v40 }
 0x168   :  { %v1509_v0 = vadd.f32 %v2249_v3, %v1412_v37  ;;  %v2257_v52 = vpop.f32.mrf.mxu1  ;;  %v1618_v16 = vadd.f32 %v2998_v14, %v1498_v29  ;;  %v1636_v22 = vmax.f32 %v1620_v45, 0.0 }
 0x169   :  { %v1541_v36 = vadd.f32 %v2257_v52, %v1444_v56  ;;  %v1500_v39 = vpop.f32.mrf.mxu0  ;;  %v1626_v6 = vadd.f32 %v2998_v14, %v1530_v19  ;;  %v1644_v55 = vmax.f32 %v1628_v34, 0.0 }
 0x16a   :  { %v1621_v43 = vadd.f32 %v2998_v14, %v1509_v0  ;;  %v1501_v46 = vadd.f32 %v1500_v39, %v2970_v35  ;;  %v1532_v49 = vpop.f32.mrf.mxu1  ;;  %v1634_v61 = vmax.f32 %v1618_v16, 0.0 }
 0x16b   :  { %v1629_v25 = vadd.f32 %v2998_v14, %v1541_v36  ;;  %v1533_v63 = vadd.f32 %v1532_v49, %v1436_v31  ;;  %v2252_v37 = vpop.f32.mrf.mxu0  ;;  %v1642_v5 = vmax.f32 %v1626_v6, 0.0 }
 0x16c   :  { %v1637_v47 = vmax.f32 %v1621_v43, 0.0  ;;  %v1619_v51 = vadd.f32 %v2998_v14, %v1501_v46  ;;  %v1522_v59 = vadd.f32 %v2252_v37, %v1425_v32  ;;  %v2260_v53 = vpop.f32.mrf.mxu1 }
 0x16d   :  { %v1645_v58 = vmax.f32 %v1629_v25, 0.0  ;;  %v1627_v24 = vadd.f32 %v2998_v14, %v1533_v63  ;;  %v1554_v35 = vadd.f32 %v2260_v53, %v1457_v60  ;;  %v1513_v41 = vpop.f32.mrf.mxu0 }
 0x16e   :  { %v1919_v62 = vpack.c.bf16 %v1637_v47, %v1636_v22  ;;  %v1635_v1 = vmax.f32 %v1619_v51, 0.0  ;;  %v1514_v4 = vadd.f32 %v1513_v41, %v2974_v2  ;;  %v1545_v9 = vpop.f32.mrf.mxu1  ;;  %v1624_v10 = vadd.f32 %v2998_v14, %v1522_v59 }
 0x16f   :  { %v1939_v54 = vpack.c.bf16 %v1645_v58, %v1644_v55  ;;  %v1643_v57 = vmax.f32 %v1627_v24, 0.0  ;;  %v1546_v7 = vadd.f32 %v1545_v9, %v1449_v48  ;;  %v2253_v23 = vpop.f32.mrf.mxu0  ;;  %v1632_v13 = vadd.f32 %v2998_v14, %v1554_v35 }
 0x170   :  { %1951 = vst [vmem:[%s3053_s3 + $0x8] sm:$0xff] %v1919_v62   ;;  %v1914_v32 = vpack.c.bf16 %v1635_v1, %v1634_v61  ;;  %v1525_v11 = vadd.f32 %v2253_v23, %v1428_v42  ;;  %v2261_v12 = vpop.f32.mrf.mxu1  ;;  %v1622_v29 = vadd.f32 %v2998_v14, %v1514_v4  ;;  %v1640_v17 = vmax.f32 %v1624_v10, 0.0 }
 0x171   :  { %1955 = vst [vmem:[%s3053_s3 + $0x28] sm:$0xff] %v1939_v54   ;;  %v1934_v2 = vpack.c.bf16 %v1643_v57, %v1642_v5  ;;  %v1557_v18 = vadd.f32 %v2261_v12, %v1460_v50  ;;  %v1516_v21 = vpop.f32.mrf.mxu0  ;;  %v1630_v28 = vadd.f32 %v2998_v14, %v1546_v7  ;;  %v1648_v56 = vmax.f32 %v1632_v13, 0.0 }
 0x172   :  { %1915 = vst [vmem:[%s3053_s3] sm:$0xff] %v1914_v32   ;;  %v1625_v33 = vadd.f32 %v2998_v14, %v1525_v11  ;;  %v1517_v31 = vadd.f32 %v1516_v21, %v1420_v15  ;;  %v1548_v40 = vpop.f32.mrf.mxu1  ;;  %v1638_v38 = vmax.f32 %v1622_v29, 0.0 }
 0x173   :  { %1954 = vst [vmem:[%s3053_s3 + $0x20] sm:$0xff] %v1934_v2   ;;  %v1633_v42 = vadd.f32 %v2998_v14, %v1557_v18  ;;  %v1549_v44 = vadd.f32 %v1548_v40, %v1452_v27  ;;  %v1646_v52 = vmax.f32 %v1630_v28, 0.0 }
 0x174   :  { %v1641_v19 = vmax.f32 %v1625_v33, 0.0  ;;  %v1623_v3 = vadd.f32 %v2998_v14, %v1517_v31 }
 0x175   :  { %v1649_v48 = vmax.f32 %v1633_v42, 0.0  ;;  %v1631_v8 = vadd.f32 %v2998_v14, %v1549_v44 }
 0x176   :  { %v1929_v45 = vpack.c.bf16 %v1641_v19, %v1640_v17  ;;  %v1639_v0 = vmax.f32 %v1623_v3, 0.0 }
 0x177   :  { %v1949_v20 = vpack.c.bf16 %v1649_v48, %v1648_v56  ;;  %v1647_v26 = vmax.f32 %v1631_v8, 0.0 }
 0x178   :  { %1953 = vst [vmem:[%s3053_s3 + $0x18] sm:$0xff] %v1929_v45   ;;  %v1924_v30 = vpack.c.bf16 %v1639_v0, %v1638_v38 }
 0x179   :  { %1957 = vst [vmem:[%s3053_s3 + $0x38] sm:$0xff] %v1949_v20   ;;  %v1944_v34 = vpack.c.bf16 %v1647_v26, %v1646_v52 }
 0x17a   :  { %1952 = vst [vmem:[%s3053_s3 + $0x10] sm:$0xff] %v1924_v30  }
 0x17b   :  { %1956 = vst [vmem:[%s3053_s3 + $0x30] sm:$0xff] %v1944_v34  }

// kernel: vgg_base_forward.26
= control target key start
LH: loop header
LB: loop body
LE: loop exit
PB: predicated region body
PF: predicated region fallthrough
CT: control target
= control target key end

     0   :  { %s2314_s1 = inlined_call_operand.vmem [shape: bf16[1152,256], index: 1, kind: input, shape index: {}]   ;;  %s2315_s0 = inlined_call_operand.vmem [shape: bf16[32,1152], index: 0, kind: input, shape index: {}]   ;;  %s2316_s2 = inlined_call_operand.vmem [shape: f32[1,256], index: 2, kind: input, shape index: {}]   ;;  %s2317_s3 = inlined_call_operand.vmem [shape: bf16[32,256], index: 3, kind: output, shape index: {}]  }
   0x1   :  { %v1550_v0 = vld [vmem:[%s2314_s1 + $0x74] ss:$8 sps:$4 sm:$0xff]   ;;  %v1554_v2 = vld [vmem:[%s2314_s1 + $0x70] ss:$8 sps:$4 sm:$0xff]   ;;  %v1556_v4 = vld [vmem:[%s2314_s1 + $0x64] ss:$8 sps:$4 sm:$0xff]  }
   0x2   :  { %v1552_v1 = vld [vmem:[%s2314_s1 + $0x174] ss:$8 sps:$4 sm:$0xff]   ;;  %1011 = vmatprep.subr.bf16.mxu0 %v1550_v0  ;;  %v1555_v3 = vld [vmem:[%s2314_s1 + $0x170] ss:$8 sps:$4 sm:$0xff]   ;;  %v1558_v5 = vld [vmem:[%s2314_s1 + $0x164] ss:$8 sps:$4 sm:$0xff]  }
   0x3   :  { %1064 = vmatprep.subr.bf16.mxu1 %v1552_v1  ;;  %1012 = vmatpush1.bf16.msra.mxu0 %v1554_v2  ;;  %v1560_v6 = vld [vmem:[%s2314_s1 + $0x60] ss:$8 sps:$4 sm:$0xff]   ;;  %v1562_v8 = vld [vmem:[%s2314_s1 + $0x54] ss:$8 sps:$4 sm:$0xff]   ;;  %v1566_v10 = vld [vmem:[%s2314_s1 + $0x50] ss:$8 sps:$4 sm:$0xff]  }
   0x4   :  { %1065 = vmatpush1.bf16.msra.mxu1 %v1555_v3  ;;  %1013 = vmatprep.subr.bf16.mxu0 %v1556_v4  ;;  %v1561_v7 = vld [vmem:[%s2314_s1 + $0x160] ss:$8 sps:$4 sm:$0xff]   ;;  %v1564_v9 = vld [vmem:[%s2314_s1 + $0x154] ss:$8 sps:$4 sm:$0xff]   ;;  %v1567_v11 = vld [vmem:[%s2314_s1 + $0x150] ss:$8 sps:$4 sm:$0xff]  }
   0x5   :  { %1066 = vmatprep.subr.bf16.mxu1 %v1558_v5  ;;  %v1568_v12 = vld [vmem:[%s2314_s1 + $0x44] ss:$8 sps:$4 sm:$0xff]   ;;  %v1572_v14 = vld [vmem:[%s2314_s1 + $0x40] ss:$8 sps:$4 sm:$0xff]   ;;  %v1574_v16 = vld [vmem:[%s2314_s1 + $0x34] ss:$8 sps:$4 sm:$0xff]  }
   0x6   :  { %v1570_v13 = vld [vmem:[%s2314_s1 + $0x144] ss:$8 sps:$4 sm:$0xff]   ;;  %v1573_v15 = vld [vmem:[%s2314_s1 + $0x140] ss:$8 sps:$4 sm:$0xff]   ;;  %v1576_v17 = vld [vmem:[%s2314_s1 + $0x134] ss:$8 sps:$4 sm:$0xff]  }
   0x7   :  { %1014 = vmatpush1.bf16.msra.mxu0 %v1560_v6  ;;  %v1578_v18 = vld [vmem:[%s2314_s1 + $0x30] ss:$8 sps:$4 sm:$0xff]   ;;  %v1580_v20 = vld [vmem:[%s2314_s1 + $0x24] ss:$8 sps:$4 sm:$0xff]   ;;  %v1584_v22 = vld [vmem:[%s2314_s1 + $0x20] ss:$8 sps:$4 sm:$0xff]  }
   0x8   :  { %1067 = vmatpush1.bf16.msra.mxu1 %v1561_v7  ;;  %1015 = vmatprep.subr.bf16.mxu0 %v1562_v8  ;;  %v1579_v19 = vld [vmem:[%s2314_s1 + $0x130] ss:$8 sps:$4 sm:$0xff]   ;;  %v1582_v21 = vld [vmem:[%s2314_s1 + $0x124] ss:$8 sps:$4 sm:$0xff]   ;;  %v1585_v23 = vld [vmem:[%s2314_s1 + $0x120] ss:$8 sps:$4 sm:$0xff]  }
   0x9   :  { %1068 = vmatprep.subr.bf16.mxu1 %v1564_v9  ;;  %v1586_v24 = vld [vmem:[%s2314_s1 + $0x14] ss:$8 sps:$4 sm:$0xff]   ;;  %v1590_v26 = vld [vmem:[%s2314_s1 + $0x10] ss:$8 sps:$4 sm:$0xff]   ;;  %v1592_v28 = vld [vmem:[%s2314_s1 + $0x4] ss:$8 sps:$4 sm:$0xff]  }
   0xa   :  { %v1588_v25 = vld [vmem:[%s2314_s1 + $0x114] ss:$8 sps:$4 sm:$0xff]   ;;  %v1591_v27 = vld [vmem:[%s2314_s1 + $0x110] ss:$8 sps:$4 sm:$0xff]   ;;  %v1594_v29 = vld [vmem:[%s2314_s1 + $0x104] ss:$8 sps:$4 sm:$0xff]  }
   0xb   :  { %1016 = vmatpush1.bf16.msra.mxu0 %v1566_v10  ;;  %v1596_v30 = vld [vmem:[%s2314_s1] ss:$8 sps:$4 sm:$0xff]   ;;  %v1598_v32 = vld [vmem:[%s2314_s1 + $0xf4] ss:$8 sps:$4 sm:$0xff]   ;;  %v1602_v34 = vld [vmem:[%s2314_s1 + $0xf0] ss:$8 sps:$4 sm:$0xff]  }
   0xc   :  { %1069 = vmatpush1.bf16.msra.mxu1 %v1567_v11  ;;  %1017 = vmatprep.subr.bf16.mxu0 %v1568_v12  ;;  %v1597_v31 = vld [vmem:[%s2314_s1 + $0x100] ss:$8 sps:$4 sm:$0xff]   ;;  %v1600_v33 = vld [vmem:[%s2314_s1 + $0x1f4] ss:$8 sps:$4 sm:$0xff]   ;;  %v1603_v35 = vld [vmem:[%s2314_s1 + $0x1f0] ss:$8 sps:$4 sm:$0xff]  }
   0xd   :  { %1070 = vmatprep.subr.bf16.mxu1 %v1570_v13  ;;  %v1604_v36 = vld [vmem:[%s2314_s1 + $0xe4] ss:$8 sps:$4 sm:$0xff]   ;;  %v1608_v38 = vld [vmem:[%s2314_s1 + $0xe0] ss:$8 sps:$4 sm:$0xff]   ;;  %v1610_v40 = vld [vmem:[%s2314_s1 + $0xd4] ss:$8 sps:$4 sm:$0xff]  }
   0xe   :  { %v1606_v37 = vld [vmem:[%s2314_s1 + $0x1e4] ss:$8 sps:$4 sm:$0xff]   ;;  %v1609_v39 = vld [vmem:[%s2314_s1 + $0x1e0] ss:$8 sps:$4 sm:$0xff]   ;;  %v1612_v41 = vld [vmem:[%s2314_s1 + $0x1d4] ss:$8 sps:$4 sm:$0xff]  }
   0xf   :  { %1018 = vmatpush1.bf16.msra.mxu0 %v1572_v14  ;;  %v1614_v42 = vld [vmem:[%s2314_s1 + $0xd0] ss:$8 sps:$4 sm:$0xff]   ;;  %v1616_v44 = vld [vmem:[%s2314_s1 + $0xc4] ss:$8 sps:$4 sm:$0xff]   ;;  %v1620_v46 = vld [vmem:[%s2314_s1 + $0xc0] ss:$8 sps:$4 sm:$0xff]  }
  0x10   :  { %1071 = vmatpush1.bf16.msra.mxu1 %v1573_v15  ;;  %1019 = vmatprep.subr.bf16.mxu0 %v1574_v16  ;;  %v1615_v43 = vld [vmem:[%s2314_s1 + $0x1d0] ss:$8 sps:$4 sm:$0xff]   ;;  %v1618_v45 = vld [vmem:[%s2314_s1 + $0x1c4] ss:$8 sps:$4 sm:$0xff]   ;;  %v1621_v47 = vld [vmem:[%s2314_s1 + $0x1c0] ss:$8 sps:$4 sm:$0xff]  }
  0x11   :  { %1072 = vmatprep.subr.bf16.mxu1 %v1576_v17  ;;  %v1622_v48 = vld [vmem:[%s2314_s1 + $0xb4] ss:$8 sps:$4 sm:$0xff]   ;;  %v1648_v49 = vld [vmem:[%s2315_s0 + $0x4] ss:$36 sps:$4 sm:$0xff]   ;;  %v1651_v51 = vld [vmem:[%s2315_s0 + $0xc] ss:$36 sps:$4 sm:$0xff]  }
  0x12   :  { %v1624_v50 = vld [vmem:[%s2314_s1 + $0x1b4] ss:$8 sps:$4 sm:$0xff]   ;;  %1043 = vmatprep.mubr.bf16.mxu0 %v1648_v49  ;;  %v1626_v52 = vld [vmem:[%s2314_s1 + $0xb0] ss:$8 sps:$4 sm:$0xff]   ;;  %1096 = vmatprep.mubr.bf16.mxu1 %v1651_v51  ;;  %v1628_v54 = vld [vmem:[%s2314_s1 + $0xa4] ss:$8 sps:$4 sm:$0xff]  }
  0x13   :  { %1020 = vmatpush1.bf16.msra.mxu0 %v1578_v18  ;;  %v1627_v53 = vld [vmem:[%s2314_s1 + $0x1b0] ss:$8 sps:$4 sm:$0xff]   ;;  %v1630_v55 = vld [vmem:[%s2314_s1 + $0x1a4] ss:$8 sps:$4 sm:$0xff]   ;;  %v1632_v56 = vld [vmem:[%s2314_s1 + $0xa0] ss:$8 sps:$4 sm:$0xff]  }
  0x14   :  { %1073 = vmatpush1.bf16.msra.mxu1 %v1579_v19  ;;  %1021 = vmatprep.subr.bf16.mxu0 %v1580_v20  ;;  %v1633_v57 = vld [vmem:[%s2314_s1 + $0x1a0] ss:$8 sps:$4 sm:$0xff]   ;;  %v1634_v58 = vld [vmem:[%s2314_s1 + $0x94] ss:$8 sps:$4 sm:$0xff]   ;;  %v1638_v60 = vld [vmem:[%s2314_s1 + $0x90] ss:$8 sps:$4 sm:$0xff]  }
  0x15   :  { %1074 = vmatprep.subr.bf16.mxu1 %v1582_v21  ;;  %v1636_v59 = vld [vmem:[%s2314_s1 + $0x194] ss:$8 sps:$4 sm:$0xff]   ;;  %v1639_v61 = vld [vmem:[%s2314_s1 + $0x190] ss:$8 sps:$4 sm:$0xff]   ;;  %v1640_v62 = vld [vmem:[%s2314_s1 + $0x84] ss:$8 sps:$4 sm:$0xff]  }
  0x16   :  { %v1642_v63 = vld [vmem:[%s2314_s1 + $0x184] ss:$8 sps:$4 sm:$0xff]   ;;  %v1644_v0 = vld [vmem:[%s2314_s1 + $0x80] ss:$8 sps:$4 sm:$0xff]   ;;  %v1654_v2 = vld [vmem:[%s2314_s1 + $0x274] ss:$8 sps:$4 sm:$0xff]  }
  0x17   :  { %1022 = vmatpush1.bf16.msra.mxu0 %v1584_v22  ;;  %v1645_v1 = vld [vmem:[%s2314_s1 + $0x180] ss:$8 sps:$4 sm:$0xff]   ;;  %v1657_v3 = vld [vmem:[%s2314_s1 + $0x374] ss:$8 sps:$4 sm:$0xff]   ;;  %v1652_v6 = vld [vmem:[%s2314_s1 + $0x270] ss:$8 sps:$4 sm:$0xff]  }
  0x18   :  { %1075 = vmatpush1.bf16.msra.mxu1 %v1585_v23  ;;  %1023 = vmatprep.subr.bf16.mxu0 %v1586_v24  ;;  %v1646_v4 = vld [vmem:[%s2315_s0] ss:$36 sps:$4 sm:$0xff]   ;;  %v1649_v5 = vld [vmem:[%s2315_s0 + $0x8] ss:$36 sps:$4 sm:$0xff]   ;;  %v1655_v7 = vld [vmem:[%s2314_s1 + $0x370] ss:$8 sps:$4 sm:$0xff]  }
  0x19   :  { %1076 = vmatprep.subr.bf16.mxu1 %v1588_v25  ;;  %v1660_v8 = vld [vmem:[%s2314_s1 + $0x264] ss:$8 sps:$4 sm:$0xff]   ;;  %v1658_v10 = vld [vmem:[%s2314_s1 + $0x260] ss:$8 sps:$4 sm:$0xff]   ;;  %v1666_v12 = vld [vmem:[%s2314_s1 + $0x254] ss:$8 sps:$4 sm:$0xff]  }
  0x1a   :  { %v1663_v9 = vld [vmem:[%s2314_s1 + $0x364] ss:$8 sps:$4 sm:$0xff]   ;;  %v1661_v11 = vld [vmem:[%s2314_s1 + $0x360] ss:$8 sps:$4 sm:$0xff]   ;;  %v1669_v13 = vld [vmem:[%s2314_s1 + $0x354] ss:$8 sps:$4 sm:$0xff]  }
  0x1b   :  { %1024 = vmatpush1.bf16.msra.mxu0 %v1590_v26  ;;  %v1664_v14 = vld [vmem:[%s2314_s1 + $0x250] ss:$8 sps:$4 sm:$0xff]   ;;  %v1672_v16 = vld [vmem:[%s2314_s1 + $0x244] ss:$8 sps:$4 sm:$0xff]   ;;  %v1670_v18 = vld [vmem:[%s2314_s1 + $0x240] ss:$8 sps:$4 sm:$0xff]  }
  0x1c   :  { %1077 = vmatpush1.bf16.msra.mxu1 %v1591_v27  ;;  %1025 = vmatprep.subr.bf16.mxu0 %v1592_v28  ;;  %v1667_v15 = vld [vmem:[%s2314_s1 + $0x350] ss:$8 sps:$4 sm:$0xff]   ;;  %v1675_v17 = vld [vmem:[%s2314_s1 + $0x344] ss:$8 sps:$4 sm:$0xff]   ;;  %v1673_v19 = vld [vmem:[%s2314_s1 + $0x340] ss:$8 sps:$4 sm:$0xff]  }
  0x1d   :  { %1078 = vmatprep.subr.bf16.mxu1 %v1594_v29  ;;  %v1678_v20 = vld [vmem:[%s2314_s1 + $0x234] ss:$8 sps:$4 sm:$0xff]   ;;  %v1676_v22 = vld [vmem:[%s2314_s1 + $0x230] ss:$8 sps:$4 sm:$0xff]   ;;  %v1684_v24 = vld [vmem:[%s2314_s1 + $0x224] ss:$8 sps:$4 sm:$0xff]  }
  0x1e   :  { %v1681_v21 = vld [vmem:[%s2314_s1 + $0x334] ss:$8 sps:$4 sm:$0xff]   ;;  %v1679_v23 = vld [vmem:[%s2314_s1 + $0x330] ss:$8 sps:$4 sm:$0xff]   ;;  %v1687_v25 = vld [vmem:[%s2314_s1 + $0x324] ss:$8 sps:$4 sm:$0xff]  }
  0x1f   :  { %1026 = vmatpush1.bf16.msra.mxu0 %v1596_v30  ;;  %v1730_v26 = vld [vmem:[%s2315_s0 + $0x4c] ss:$36 sps:$4 sm:$0xff]   ;;  %v1732_v27 = vld [vmem:[%s2315_s0 + $0x54] ss:$36 sps:$4 sm:$0xff]   ;;  %v1682_v30 = vld [vmem:[%s2314_s1 + $0x220] ss:$8 sps:$4 sm:$0xff]  }
  0x20   :  { %1079 = vmatpush1.bf16.msra.mxu1 %v1597_v31  ;;  %1027 = vmatprep.subr.bf16.mxu0 %v1598_v32  ;;  %v1734_v28 = vld [vmem:[%s2315_s0 + $0x48] ss:$36 sps:$4 sm:$0xff]   ;;  %v1735_v29 = vld [vmem:[%s2315_s0 + $0x50] ss:$36 sps:$4 sm:$0xff]  }
  0x21   :  { %1080 = vmatprep.subr.bf16.mxu1 %v1600_v33  ;;  %v1685_v31 = vld [vmem:[%s2314_s1 + $0x320] ss:$8 sps:$4 sm:$0xff]   ;;  %v1690_v32 = vld [vmem:[%s2314_s1 + $0x214] ss:$8 sps:$4 sm:$0xff]  }
  0x22   :  { %v1693_v33 = vld [vmem:[%s2314_s1 + $0x314] ss:$8 sps:$4 sm:$0xff]   ;;  %v1709_v49 = vld [vmem:[%s2314_s1 + $0x3e0] ss:$8 sps:$4 sm:$0xff]  }
  0x23   :  { %1028 = vmatpush2.bf16.msra.mxu0 %v1602_v34  ;;  %v1688_v34 = vld [vmem:[%s2314_s1 + $0x210] ss:$8 sps:$4 sm:$0xff]   ;;  %v1717_v51 = vld [vmem:[%s2314_s1 + $0x3d4] ss:$8 sps:$4 sm:$0xff]  }
  0x24   :  { %1081 = vmatpush2.bf16.msra.mxu1 %v1603_v35  ;;  %1029 = vmatprep.subr.bf16.mxu0 %v1604_v36  ;;  %v1691_v35 = vld [vmem:[%s2314_s1 + $0x310] ss:$8 sps:$4 sm:$0xff]   ;;  %v1696_v36 = vld [vmem:[%s2314_s1 + $0x204] ss:$8 sps:$4 sm:$0xff]  }
  0x25   :  { %1082 = vmatprep.subr.bf16.mxu1 %v1606_v37  ;;  %v1699_v37 = vld [vmem:[%s2314_s1 + $0x304] ss:$8 sps:$4 sm:$0xff]  }
  0x27   :  { %1030 = vmatpush2.bf16.msra.mxu0 %v1608_v38  ;;  %v1694_v38 = vld [vmem:[%s2314_s1 + $0x200] ss:$8 sps:$4 sm:$0xff]  }
  0x28   :  { %1083 = vmatpush2.bf16.msra.mxu1 %v1609_v39  ;;  %1031 = vmatprep.subr.bf16.mxu0 %v1610_v40  ;;  %v1697_v39 = vld [vmem:[%s2314_s1 + $0x300] ss:$8 sps:$4 sm:$0xff]   ;;  %v1702_v40 = vld [vmem:[%s2314_s1 + $0x2f4] ss:$8 sps:$4 sm:$0xff]  }
  0x29   :  { %1084 = vmatprep.subr.bf16.mxu1 %v1612_v41  ;;  %v1756_v41 = vld [vmem:[%s2315_s0 + $0x14] ss:$36 sps:$4 sm:$0xff]  }
  0x2b   :  { %1032 = vmatpush2.bf16.msra.mxu0 %v1614_v42  ;;  %v1705_v42 = vld [vmem:[%s2314_s1 + $0x3f4] ss:$8 sps:$4 sm:$0xff]  }
  0x2c   :  { %1085 = vmatpush2.bf16.msra.mxu1 %v1615_v43  ;;  %1033 = vmatprep.subr.bf16.mxu0 %v1616_v44  ;;  %v1759_v43 = vld [vmem:[%s2315_s0 + $0x1c] ss:$36 sps:$4 sm:$0xff]   ;;  %v1700_v44 = vld [vmem:[%s2314_s1 + $0x2f0] ss:$8 sps:$4 sm:$0xff]  }
  0x2d   :  { %1086 = vmatprep.subr.bf16.mxu1 %v1618_v45  ;;  %v1703_v45 = vld [vmem:[%s2314_s1 + $0x3f0] ss:$8 sps:$4 sm:$0xff]  }
  0x2f   :  { %1034 = vmatpush2.bf16.msra.mxu0 %v1620_v46  ;;  %v1708_v46 = vld [vmem:[%s2314_s1 + $0x2e4] ss:$8 sps:$4 sm:$0xff]  }
  0x30   :  { %1087 = vmatpush2.bf16.msra.mxu1 %v1621_v47  ;;  %1035 = vmatprep.subr.bf16.mxu0 %v1622_v48  ;;  %v1711_v47 = vld [vmem:[%s2314_s1 + $0x3e4] ss:$8 sps:$4 sm:$0xff]   ;;  %v1706_v48 = vld [vmem:[%s2314_s1 + $0x2e0] ss:$8 sps:$4 sm:$0xff]  }
  0x31   :  { %1088 = vmatprep.subr.bf16.mxu1 %v1624_v50  ;;  %v1714_v50 = vld [vmem:[%s2314_s1 + $0x2d4] ss:$8 sps:$4 sm:$0xff]  }
  0x33   :  { %1036 = vmatpush2.bf16.msra.mxu0 %v1626_v52  ;;  %v1712_v52 = vld [vmem:[%s2314_s1 + $0x2d0] ss:$8 sps:$4 sm:$0xff]  }
  0x34   :  { %1089 = vmatpush2.bf16.msra.mxu1 %v1627_v53  ;;  %1037 = vmatprep.subr.bf16.mxu0 %v1628_v54  ;;  %v1715_v53 = vld [vmem:[%s2314_s1 + $0x3d0] ss:$8 sps:$4 sm:$0xff]   ;;  %v1720_v54 = vld [vmem:[%s2314_s1 + $0x2c4] ss:$8 sps:$4 sm:$0xff]  }
  0x35   :  { %1090 = vmatprep.subr.bf16.mxu1 %v1630_v55  ;;  %v1723_v55 = vld [vmem:[%s2314_s1 + $0x3c4] ss:$8 sps:$4 sm:$0xff]  }
  0x37   :  { %1038 = vmatpush2.bf16.msra.mxu0 %v1632_v56  ;;  %v1718_v56 = vld [vmem:[%s2314_s1 + $0x2c0] ss:$8 sps:$4 sm:$0xff]  }
  0x38   :  { %1091 = vmatpush2.bf16.msra.mxu1 %v1633_v57  ;;  %1039 = vmatprep.subr.bf16.mxu0 %v1634_v58  ;;  %v1721_v57 = vld [vmem:[%s2314_s1 + $0x3c0] ss:$8 sps:$4 sm:$0xff]   ;;  %v1726_v58 = vld [vmem:[%s2314_s1 + $0x2b4] ss:$8 sps:$4 sm:$0xff]  }
  0x39   :  { %1092 = vmatprep.subr.bf16.mxu1 %v1636_v59  ;;  %v1729_v59 = vld [vmem:[%s2314_s1 + $0x3b4] ss:$8 sps:$4 sm:$0xff]  }
  0x3b   :  { %1040 = vmatpush2.bf16.msra.mxu0 %v1638_v60  ;;  %v1724_v60 = vld [vmem:[%s2314_s1 + $0x2b0] ss:$8 sps:$4 sm:$0xff]  }
  0x3c   :  { %1093 = vmatpush2.bf16.msra.mxu1 %v1639_v61  ;;  %1041 = vmatprep.subr.bf16.mxu0 %v1640_v62  ;;  %v1727_v61 = vld [vmem:[%s2314_s1 + $0x3b0] ss:$8 sps:$4 sm:$0xff]   ;;  %v1738_v62 = vld [vmem:[%s2314_s1 + $0x2a4] ss:$8 sps:$4 sm:$0xff]  }
  0x3d   :  { %1094 = vmatprep.subr.bf16.mxu1 %v1642_v63  ;;  %v1741_v63 = vld [vmem:[%s2314_s1 + $0x3a4] ss:$8 sps:$4 sm:$0xff]  }
  0x3f   :  { %1042 = vmatpush2.bf16.msra.mxu0 %v1644_v0  ;;  %v1736_v0 = vld [vmem:[%s2314_s1 + $0x2a0] ss:$8 sps:$4 sm:$0xff]  }
  0x40   :  { %1095 = vmatpush2.bf16.msra.mxu1 %v1645_v1  ;;  %1117 = vmatprep.subr.bf16.mxu0 %v1654_v2  ;;  %v1739_v1 = vld [vmem:[%s2314_s1 + $0x3a0] ss:$8 sps:$4 sm:$0xff]   ;;  %v1744_v2 = vld [vmem:[%s2314_s1 + $0x294] ss:$8 sps:$4 sm:$0xff]  }
  0x41   :  { %1170 = vmatprep.subr.bf16.mxu1 %v1657_v3  ;;  %v1747_v3 = vld [vmem:[%s2314_s1 + $0x394] ss:$8 sps:$4 sm:$0xff]  }
  0x42   :  { %1044 = vmatmul.mubr.bf16.vlgmr.msra.gmra.mxu0 %v1646_v4  ;;  %v1742_v4 = vld [vmem:[%s2314_s1 + $0x290] ss:$8 sps:$4 sm:$0xff]  }
  0x43   :  { %1097 = vmatmul.mubr.bf16.vlgmr.msra.gmra.mxu1 %v1649_v5  ;;  %1118 = vmatpush1.bf16.msra.mxu0 %v1652_v6  ;;  %v1745_v5 = vld [vmem:[%s2314_s1 + $0x390] ss:$8 sps:$4 sm:$0xff]   ;;  %v1750_v6 = vld [vmem:[%s2314_s1 + $0x284] ss:$8 sps:$4 sm:$0xff]  }
  0x44   :  { %1171 = vmatpush1.bf16.msra.mxu1 %v1655_v7  ;;  %1119 = vmatprep.subr.bf16.mxu0 %v1660_v8  ;;  %v1753_v7 = vld [vmem:[%s2314_s1 + $0x384] ss:$8 sps:$4 sm:$0xff]   ;;  %v1748_v8 = vld [vmem:[%s2314_s1 + $0x280] ss:$8 sps:$4 sm:$0xff]  }
  0x45   :  { %1172 = vmatprep.subr.bf16.mxu1 %v1663_v9  ;;  %1053 = vmatprep.mubr.bf16.mxu0 %v1730_v26  ;;  %v1751_v9 = vld [vmem:[%s2314_s1 + $0x380] ss:$8 sps:$4 sm:$0xff]   ;;  %v1778_v26 = vld [vmem:[%s2314_s1 + $0x430] ss:$8 sps:$4 sm:$0xff]  }
  0x46   :  { %1106 = vmatprep.mubr.bf16.mxu1 %v1732_v27  ;;  %v1783_v27 = vld [vmem:[%s2314_s1 + $0x424] ss:$8 sps:$4 sm:$0xff]  }
  0x47   :  { %1120 = vmatpush1.bf16.msra.mxu0 %v1658_v10  ;;  %v1762_v10 = vld [vmem:[%s2314_s1 + $0x474] ss:$8 sps:$4 sm:$0xff]  }
  0x48   :  { %1173 = vmatpush1.bf16.msra.mxu1 %v1661_v11  ;;  %1121 = vmatprep.subr.bf16.mxu0 %v1666_v12  ;;  %v1754_v11 = vld [vmem:[%s2315_s0 + $0x10] ss:$36 sps:$4 sm:$0xff]   ;;  %v1757_v12 = vld [vmem:[%s2315_s0 + $0x18] ss:$36 sps:$4 sm:$0xff]  }
  0x49   :  { %1174 = vmatprep.subr.bf16.mxu1 %v1669_v13  ;;  %v1760_v13 = vld [vmem:[%s2314_s1 + $0x470] ss:$8 sps:$4 sm:$0xff]  }
  0x4a   :  { %1054 = vmatmul.mubr.bf16.gmra.mxu0 %v1734_v28  ;;  %v1781_v28 = vld [vmem:[%s2314_s1 + $0x420] ss:$8 sps:$4 sm:$0xff]  }
  0x4b   :  { %1122 = vmatpush1.bf16.msra.mxu0 %v1664_v14  ;;  %1107 = vmatmul.mubr.bf16.gmra.mxu1 %v1735_v29  ;;  %v1765_v14 = vld [vmem:[%s2314_s1 + $0x464] ss:$8 sps:$4 sm:$0xff]   ;;  %v1786_v29 = vld [vmem:[%s2314_s1 + $0x414] ss:$8 sps:$4 sm:$0xff]  }
  0x4c   :  { %1175 = vmatpush1.bf16.msra.mxu1 %v1667_v15  ;;  %1123 = vmatprep.subr.bf16.mxu0 %v1672_v16  ;;  %v1766_v15 = vld [vmem:[%s2315_s0 + $0x5c] ss:$36 sps:$4 sm:$0xff]   ;;  %v1772_v16 = vld [vmem:[%s2315_s0 + $0x64] ss:$36 sps:$4 sm:$0xff]  }
  0x4d   :  { %1176 = vmatprep.subr.bf16.mxu1 %v1675_v17  ;;  %1149 = vmatprep.mubr.bf16.mxu0 %v1756_v41  ;;  %v1763_v17 = vld [vmem:[%s2314_s1 + $0x460] ss:$8 sps:$4 sm:$0xff]  }
  0x4e   :  { %1202 = vmatprep.mubr.bf16.mxu1 %v1759_v43 }
  0x4f   :  { %1124 = vmatpush1.bf16.msra.mxu0 %v1670_v18  ;;  %v1771_v18 = vld [vmem:[%s2314_s1 + $0x454] ss:$8 sps:$4 sm:$0xff]  }
  0x50   :  { %1177 = vmatpush1.bf16.msra.mxu1 %v1673_v19  ;;  %1125 = vmatprep.subr.bf16.mxu0 %v1678_v20  ;;  %v1768_v19 = vld [vmem:[%s2315_s0 + $0x58] ss:$36 sps:$4 sm:$0xff]   ;;  %v1774_v20 = vld [vmem:[%s2315_s0 + $0x60] ss:$36 sps:$4 sm:$0xff]  }
  0x51   :  { %1178 = vmatprep.subr.bf16.mxu1 %v1681_v21  ;;  %v1769_v21 = vld [vmem:[%s2314_s1 + $0x450] ss:$8 sps:$4 sm:$0xff]  }
  0x53   :  { %1126 = vmatpush1.bf16.msra.mxu0 %v1676_v22  ;;  %v1777_v22 = vld [vmem:[%s2314_s1 + $0x444] ss:$8 sps:$4 sm:$0xff]  }
  0x54   :  { %1179 = vmatpush1.bf16.msra.mxu1 %v1679_v23  ;;  %1127 = vmatprep.subr.bf16.mxu0 %v1684_v24  ;;  %v1775_v23 = vld [vmem:[%s2314_s1 + $0x440] ss:$8 sps:$4 sm:$0xff]   ;;  %v1780_v24 = vld [vmem:[%s2314_s1 + $0x434] ss:$8 sps:$4 sm:$0xff]  }
  0x55   :  { %1180 = vmatprep.subr.bf16.mxu1 %v1687_v25  ;;  %v1792_v25 = vmov 0  }
  0x57   :  { %1128 = vmatpush1.bf16.msra.mxu0 %v1682_v30  ;;  %v1784_v30 = vld [vmem:[%s2314_s1 + $0x410] ss:$8 sps:$4 sm:$0xff]  }
  0x58   :  { %1181 = vmatpush1.bf16.msra.mxu1 %v1685_v31  ;;  %1129 = vmatprep.subr.bf16.mxu0 %v1690_v32  ;;  %v1789_v31 = vld [vmem:[%s2314_s1 + $0x404] ss:$8 sps:$4 sm:$0xff]   ;;  %v1787_v32 = vld [vmem:[%s2314_s1 + $0x400] ss:$8 sps:$4 sm:$0xff]  }
  0x59   :  { %1182 = vmatprep.subr.bf16.mxu1 %v1693_v33  ;;  %v1790_v33 = vld [vmem:[%s2315_s0 + $0x20] ss:$36 sps:$4 sm:$0xff]  }
  0x5b   :  { %1130 = vmatpush1.bf16.msra.mxu0 %v1688_v34  ;;  %v1791_v34 = vld [vmem:[%s2315_s0 + $0x68] ss:$36 sps:$4 sm:$0xff]  }
  0x5c   :  { %1183 = vmatpush1.bf16.msra.mxu1 %v1691_v35  ;;  %1131 = vmatprep.subr.bf16.mxu0 %v1696_v36 }
  0x5d   :  { %1184 = vmatprep.subr.bf16.mxu1 %v1699_v37 }
  0x5f   :  { %1132 = vmatpush1.bf16.msra.mxu0 %v1694_v38 }
  0x60   :  { %1185 = vmatpush1.bf16.msra.mxu1 %v1697_v39  ;;  %1133 = vmatprep.subr.bf16.mxu0 %v1702_v40 }
  0x61   :  { %1186 = vmatprep.subr.bf16.mxu1 %v1705_v42 }
  0x63   :  { %1134 = vmatpush2.bf16.msra.mxu0 %v1700_v44 }
  0x64   :  { %1187 = vmatpush2.bf16.msra.mxu1 %v1703_v45  ;;  %1135 = vmatprep.subr.bf16.mxu0 %v1708_v46 }
  0x65   :  { %1188 = vmatprep.subr.bf16.mxu1 %v1711_v47 }
  0x67   :  { %1136 = vmatpush2.bf16.msra.mxu0 %v1706_v48 }
  0x68   :  { %1189 = vmatpush2.bf16.msra.mxu1 %v1709_v49  ;;  %1137 = vmatprep.subr.bf16.mxu0 %v1714_v50 }
  0x69   :  { %1190 = vmatprep.subr.bf16.mxu1 %v1717_v51 }
  0x6b   :  { %1138 = vmatpush2.bf16.msra.mxu0 %v1712_v52 }
  0x6c   :  { %1191 = vmatpush2.bf16.msra.mxu1 %v1715_v53  ;;  %1139 = vmatprep.subr.bf16.mxu0 %v1720_v54 }
  0x6d   :  { %1192 = vmatprep.subr.bf16.mxu1 %v1723_v55 }
  0x6f   :  { %1140 = vmatpush2.bf16.msra.mxu0 %v1718_v56 }
  0x70   :  { %1193 = vmatpush2.bf16.msra.mxu1 %v1721_v57  ;;  %1141 = vmatprep.subr.bf16.mxu0 %v1726_v58 }
  0x71   :  { %1194 = vmatprep.subr.bf16.mxu1 %v1729_v59 }
  0x73   :  { %1142 = vmatpush2.bf16.msra.mxu0 %v1724_v60 }
  0x74   :  { %1195 = vmatpush2.bf16.msra.mxu1 %v1727_v61  ;;  %1143 = vmatprep.subr.bf16.mxu0 %v1738_v62  ;;  %v1305_v61 = vlaneseq }
  0x75   :  { %1196 = vmatprep.subr.bf16.mxu1 %v1741_v63 }
  0x77   :  { %1144 = vmatpush2.bf16.msra.mxu0 %v1736_v0  ;;  %v1306_v0 = vshrl.u32 %v1305_v61, 7 }
  0x78   :  { %1197 = vmatpush2.bf16.msra.mxu1 %v1739_v1  ;;  %1145 = vmatprep.subr.bf16.mxu0 %v1744_v2 }
  0x79   :  { %1198 = vmatprep.subr.bf16.mxu1 %v1747_v3 }
  0x7b   :  { %1146 = vmatpush2.bf16.msra.mxu0 %v1742_v4 }
  0x7c   :  { %1199 = vmatpush2.bf16.msra.mxu1 %v1745_v5  ;;  %1147 = vmatprep.subr.bf16.mxu0 %v1750_v6  ;;  %v1307_v6 = vsub.s32 0, %v1306_v0 }
  0x7d   :  { %1200 = vmatprep.subr.bf16.mxu1 %v1753_v7 }
  0x7f   :  { %1148 = vmatpush2.bf16.msra.mxu0 %v1748_v8 }
  0x80   :  { %1201 = vmatpush2.bf16.msra.mxu1 %v1751_v9  ;;  %1223 = vmatprep.subr.bf16.mxu0 %v1762_v10 }
  0x81   :  { %1533 = vmatprep.subr.bf16.mxu1 %v1762_v10  ;;  %v1303_v10 = vld [vmem:[%s2316_s2] sm:$0x3] }
  0x82   :  { %1150 = vmatmul.mubr.bf16.vlgmr.msra.gmra.mxu0 %v1754_v11  ;;  %v1311_v11 = vsub.s32 1, %v1306_v0 }
  0x83   :  { %1203 = vmatmul.mubr.bf16.vlgmr.msra.gmra.mxu1 %v1757_v12  ;;  %1224 = vmatpush1.bf16.msra.mxu0 %v1760_v13 }
  0x84   :  { %1541 = vmatpush1.bf16.msra.mxu1 %v1760_v13  ;;  %1225 = vmatprep.subr.bf16.mxu0 %v1765_v14 }
  0x85   :  { %1534 = vmatprep.subr.bf16.mxu1 %v1765_v14  ;;  %1159 = vmatprep.mubr.bf16.mxu0 %v1766_v15 }
  0x86   :  { %1212 = vmatprep.mubr.bf16.mxu1 %v1772_v16 }
  0x87   :  { %1226 = vmatpush1.bf16.msra.mxu0 %v1763_v17 }
  0x88   :  { %1542 = vmatpush1.bf16.msra.mxu1 %v1763_v17  ;;  %1227 = vmatprep.subr.bf16.mxu0 %v1771_v18 }
  0x89   :  { %1535 = vmatprep.subr.bf16.mxu1 %v1771_v18 }
  0x8a   :  { %1160 = vmatmul.mubr.bf16.gmra.mxu0 %v1768_v19  ;;  %v1308_v19 = vrot.slane %v1303_v10, %v1307_v6 }
  0x8b   :  { %1213 = vmatmul.mubr.bf16.gmra.mxu1 %v1774_v20  ;;  %1228 = vmatpush1.bf16.msra.mxu0 %v1769_v21 }
  0x8c   :  { %1543 = vmatpush1.bf16.msra.mxu1 %v1769_v21  ;;  %1229 = vmatprep.subr.bf16.mxu0 %v1777_v22 }
  0x8d   :  { %1536 = vmatprep.subr.bf16.mxu1 %v1777_v22  ;;  %1255 = vmatprep.mubr.bf16.mxu0 %v1792_v25 }
  0x8e   :  { %1265 = vmatprep.mubr.bf16.mxu1 %v1792_v25 }
  0x8f   :  { %1230 = vmatpush1.bf16.msra.mxu0 %v1775_v23 }
  0x90   :  { %1544 = vmatpush1.bf16.msra.mxu1 %v1775_v23  ;;  %1231 = vmatprep.subr.bf16.mxu0 %v1780_v24  ;;  %v1312_v23 = vrot.slane %v1303_v10, %v1311_v11 }
  0x91   :  { %1537 = vmatprep.subr.bf16.mxu1 %v1780_v24 }
  0x93   :  { %1232 = vmatpush1.bf16.msra.mxu0 %v1778_v26 }
  0x94   :  { %1545 = vmatpush1.bf16.msra.mxu1 %v1778_v26  ;;  %1233 = vmatprep.subr.bf16.mxu0 %v1783_v27 }
  0x95   :  { %1538 = vmatprep.subr.bf16.mxu1 %v1783_v27 }
  0x97   :  { %1234 = vmatpush1.bf16.msra.mxu0 %v1781_v28 }
  0x98   :  { %1546 = vmatpush1.bf16.msra.mxu1 %v1781_v28  ;;  %1235 = vmatprep.subr.bf16.mxu0 %v1786_v29 }
  0x99   :  { %1539 = vmatprep.subr.bf16.mxu1 %v1786_v29 }
  0x9b   :  { %1236 = vmatpush1.bf16.msra.mxu0 %v1784_v30 }
  0x9c   :  { %1547 = vmatpush1.bf16.msra.mxu1 %v1784_v30  ;;  %1237 = vmatprep.subr.bf16.mxu0 %v1789_v31 }
  0x9d   :  { %1540 = vmatprep.subr.bf16.mxu1 %v1789_v31 }
  0x9f   :  { %1238 = vmatpush1.bf16.msra.mxu0 %v1787_v32 }
  0xa0   :  { %1548 = vmatpush1.bf16.msra.mxu1 %v1787_v32 }
  0xa2   :  { %1256 = vmatmul.mubr.bf16.vlgmr.msra.gmra.mxu0 %v1790_v33 }
  0xa3   :  { %1266 = vmatmul.mubr.bf16.vlgmr.msra.gmra.mxu1 %v1791_v34 }
 0x102   :  { %v1045_v35 = vpop.f32.mrf.mxu0 }
 0x103   :  { %v1098_v36 = vpop.f32.mrf.mxu1 }
 0x104   :  { %v1047_v37 = vpop.f32.mrf.mxu0  ;;  %v1099_v1 = vadd.f32 %v1098_v36, %v1045_v35 }
 0x105   :  { %v1100_v38 = vpop.f32.mrf.mxu1 }
 0x106   :  { %v1049_v39 = vpop.f32.mrf.mxu0  ;;  %v1101_v3 = vadd.f32 %v1100_v38, %v1047_v37 }
 0x107   :  { %v1102_v40 = vpop.f32.mrf.mxu1 }
 0x108   :  { %v1051_v41 = vpop.f32.mrf.mxu0  ;;  %v1103_v14 = vadd.f32 %v1102_v40, %v1049_v39 }
 0x109   :  { %v1104_v42 = vpop.f32.mrf.mxu1 }
 0x10a   :  { %v1055_v43 = vpop.f32.mrf.mxu0  ;;  %v1105_v15 = vadd.f32 %v1104_v42, %v1051_v41 }
 0x10b   :  { %v1108_v44 = vpop.f32.mrf.mxu1 }
 0x10c   :  { %v1057_v45 = vpop.f32.mrf.mxu0  ;;  %v1109_v2 = vadd.f32 %v1108_v44, %v1055_v43 }
 0x10d   :  { %v1110_v46 = vpop.f32.mrf.mxu1 }
 0x10e   :  { %v1059_v47 = vpop.f32.mrf.mxu0  ;;  %v1111_v7 = vadd.f32 %v1110_v46, %v1057_v45 }
 0x10f   :  { %v1112_v48 = vpop.f32.mrf.mxu1 }
 0x110   :  { %v1061_v49 = vpop.f32.mrf.mxu0  ;;  %v1113_v16 = vadd.f32 %v1112_v48, %v1059_v47 }
 0x111   :  { %v1114_v50 = vpop.f32.mrf.mxu1 }
 0x112   :  { %v1115_v20 = vadd.f32 %v1114_v50, %v1061_v49 }
 0x142   :  { %v1151_v51 = vpop.f32.mrf.mxu0 }
 0x143   :  { %v1204_v52 = vpop.f32.mrf.mxu1  ;;  %v1152_v8 = vadd.f32 %v1151_v51, %v1099_v1 }
 0x144   :  { %v1153_v53 = vpop.f32.mrf.mxu0 }
 0x145   :  { %v1206_v54 = vpop.f32.mrf.mxu1  ;;  %v1154_v12 = vadd.f32 %v1153_v53, %v1101_v3  ;;  %v1205_v21 = vadd.f32 %v1204_v52, %v1152_v8 }
 0x146   :  { %v1155_v55 = vpop.f32.mrf.mxu0 }
 0x147   :  { %v1208_v56 = vpop.f32.mrf.mxu1  ;;  %v1207_v24 = vadd.f32 %v1206_v54, %v1154_v12  ;;  %v1156_v25 = vadd.f32 %v1155_v55, %v1103_v14 }
 0x148   :  { %v1157_v57 = vpop.f32.mrf.mxu0 }
 0x149   :  { %v1210_v58 = vpop.f32.mrf.mxu1  ;;  %v1158_v26 = vadd.f32 %v1157_v57, %v1105_v15  ;;  %v1209_v40 = vadd.f32 %v1208_v56, %v1156_v25 }
 0x14a   :  { %v1161_v59 = vpop.f32.mrf.mxu0 }
 0x14b   :  { %v1214_v60 = vpop.f32.mrf.mxu1  ;;  %v1162_v9 = vadd.f32 %v1161_v59, %v1109_v2  ;;  %v1211_v44 = vadd.f32 %v1210_v58, %v1158_v26 }
 0x14c   :  { %v1163_v62 = vpop.f32.mrf.mxu0 }
 0x14d   :  { %v1216_v63 = vpop.f32.mrf.mxu1  ;;  %v1164_v13 = vadd.f32 %v1163_v62, %v1111_v7  ;;  %v1215_v22 = vadd.f32 %v1214_v60, %v1162_v9 }
 0x14e   :  { %v1165_v4 = vpop.f32.mrf.mxu0 }
 0x14f   :  { %v1218_v5 = vpop.f32.mrf.mxu1  ;;  %v1166_v27 = vadd.f32 %v1165_v4, %v1113_v16  ;;  %v1217_v30 = vadd.f32 %v1216_v63, %v1164_v13 }
 0x150   :  { %v1167_v17 = vpop.f32.mrf.mxu0 }
 0x151   :  { %v1220_v18 = vpop.f32.mrf.mxu1  ;;  %v1168_v31 = vadd.f32 %v1167_v17, %v1115_v20  ;;  %v1219_v41 = vadd.f32 %v1218_v5, %v1166_v27 }
 0x153   :  { %v1221_v45 = vadd.f32 %v1220_v18, %v1168_v31 }
 0x162   :  { %v1257_v28 = vpop.f32.mrf.mxu0 }
 0x163   :  { %v1267_v29 = vpop.f32.mrf.mxu1  ;;  %v1258_v32 = vadd.f32 %v1257_v28, %v1205_v21 }
 0x164   :  { %v1268_v33 = vadd.f32 %v1267_v29, %v1215_v22  ;;  %v1259_v34 = vpop.f32.mrf.mxu0 }
 0x165   :  { %v1269_v35 = vpop.f32.mrf.mxu1  ;;  %v1315_v36 = vadd.f32 %v1308_v19, %v1258_v32  ;;  %v1260_v38 = vadd.f32 %v1259_v34, %v1207_v24 }
 0x166   :  { %v1319_v37 = vadd.f32 %v1308_v19, %v1268_v33  ;;  %v1270_v39 = vadd.f32 %v1269_v35, %v1217_v30  ;;  %v1261_v42 = vpop.f32.mrf.mxu0 }
 0x167   :  { %v1271_v43 = vpop.f32.mrf.mxu1  ;;  %v1316_v46 = vadd.f32 %v1312_v23, %v1260_v38  ;;  %v1323_v48 = vmax.f32 %v1315_v36, 0.0  ;;  %v1262_v50 = vadd.f32 %v1261_v42, %v1209_v40 }
 0x168   :  { %v1320_v47 = vadd.f32 %v1312_v23, %v1270_v39  ;;  %v1327_v49 = vmax.f32 %v1319_v37, 0.0  ;;  %v1272_v51 = vadd.f32 %v1271_v43, %v1219_v41  ;;  %v1263_v52 = vpop.f32.mrf.mxu0 }
 0x169   :  { %v1273_v53 = vpop.f32.mrf.mxu1  ;;  %v1324_v54 = vmax.f32 %v1316_v46, 0.0  ;;  %v1264_v57 = vadd.f32 %v1263_v52, %v1211_v44  ;;  %v1317_v60 = vadd.f32 %v1308_v19, %v1262_v50 }
 0x16a   :  { %v1328_v55 = vmax.f32 %v1320_v47, 0.0  ;;  %v1274_v59 = vadd.f32 %v1273_v53, %v1221_v45  ;;  %v1321_v61 = vadd.f32 %v1308_v19, %v1272_v51 }
 0x16b   :  { %v1529_v56 = vpack.c.bf16 %v1324_v54, %v1323_v48  ;;  %v1318_v63 = vadd.f32 %v1312_v23, %v1264_v57  ;;  %v1325_v58 = vmax.f32 %v1317_v60, 0.0 }
 0x16c   :  { %v1531_v62 = vpack.c.bf16 %v1328_v55, %v1327_v49  ;;  %v1322_v0 = vadd.f32 %v1312_v23, %v1274_v59  ;;  %v1329_v1 = vmax.f32 %v1321_v61, 0.0 }
 0x16d   :  { %1355 = vst [vmem:[%s2317_s3] sm:$0xff] %v1529_v56  ;;  %v1326_v2 = vmax.f32 %v1318_v63, 0.0 }
 0x16e   :  { %1357 = vst [vmem:[%s2317_s3 + $0x10] sm:$0xff] %v1531_v62  ;;  %v1330_v3 = vmax.f32 %v1322_v0, 0.0 }
 0x16f   :  { %v1530_v4 = vpack.c.bf16 %v1326_v2, %v1325_v58 }
 0x170   :  { %v1532_v5 = vpack.c.bf16 %v1330_v3, %v1329_v1 }
 0x171   :  { %1356 = vst [vmem:[%s2317_s3 + $0x8] sm:$0xff] %v1530_v4 }
 0x172   :  { %1358 = vst [vmem:[%s2317_s3 + $0x18] sm:$0xff] %v1532_v5 }

// kernel: vgg_base_forward.27
= control target key start
LH: loop header
LB: loop body
LE: loop exit
PB: predicated region body
PF: predicated region fallthrough
CT: control target
= control target key end

     0   :  { %s1067_s12 = smov 0   ;;  %s1069_s13 = smov 0   ;;  %s1189_s0 = inlined_call_operand.vmem [shape: bf16[32,2304], index: 0, kind: input, shape index: {}]   ;;  %s1190_s1 = inlined_call_operand.vmem [shape: bf16[2304,256], index: 1, kind: input, shape index: {}]   ;;  %s1191_s2 = inlined_call_operand.vmem [shape: f32[1,256], index: 2, kind: input, shape index: {}]   ;;  %s1192_s3 = inlined_call_operand.vmem [shape: bf16[32,256], index: 3, kind: output, shape index: {}]  }
   0x1   :  { %s1071_s14 = smov 0   ;;  %s1073_s15 = smov 0  }
   0x2   :  { %s1075_s16 = smov 0  }
   0x3 LB: > { %s25_s17 = sadd.s32 1, %s1040_s15  ;;  %p48_p1 = scmp.ne.s32.totalorder %s1032_s13, %s1028_s12  ;;  %s1044_s16 = sphi %s1075_s16, %s13_s16   ;;  %s1040_s15 = sphi %s1073_s15, %s1196_s15   ;;  %s1036_s14 = sphi %s1071_s14, %s1195_s14   ;;  %s1032_s13 = sphi %s1069_s13, %s1194_s13   ;;  %s1028_s12 = sphi %s1067_s12, %s1193_s12  }
   0x4   : > { %p26_p0 = scmp.ge.s32.totalorder %s25_s17, 9  ;;  %p49_p2 = scmp.eq.s32.totalorder %s1044_s16, 0 }
   0x5   : > { %s41_s19 = sadd.s32 1, %s1032_s13  ;;  %p818_p5 = scmp.ge.s32.totalorder %s1044_s16, 9 }
   0x6   : > { %s1198_s17 = smov (%p26_p0, %s25_s17), 0  ;;  %p50_p3 = por %p49_p2, %p48_p1 }
   0x7   : > { %s37_s18 = ssub.s32 %s1040_s15, %s1198_s17  ;;  %164 = sbr.rel (%p818_p5) target bundleno = 18 (0x12), region = 20 }
   0x8   : > { %p39_p4 = scmp.eq.s32.totalorder %s37_s18, 0 }
   0xa   : > { %s1102_s20 = scalar_select %p39_p4, %s1032_s13, %s41_s19  }
   0xc   : > { %167 = sbr.rel (!%p50_p3) target bundleno = 18 (0x12), region = 24  ;;  %s169_s21 = sand.u32 (%p50_p3), 1, %s1032_s13  }
   0xd   : > { %s873_s22 = sshll.u32 (%p50_p3), %s1040_s15, 3  ;;  %s819_s23 = sshll.u32 (%p50_p3), %s169_s21, 5 }
   0xe   : > { %s177_s26 = scalar_lea.vmem (%p50_p3), %s1189_s0, %s873_s22  ;;  %s171_s27 = scalar_lea.vmem (%p50_p3), [#allocation3], %s819_s23 }
   0xf   : > { %v212_v0 = vld [vmem:[%s177_s26] sm:$0xff] (%p50_p3)  ;;  %v214_v1 = vld [vmem:[%s177_s26 + $0x48] sm:$0xff] (%p50_p3)  ;;  %v216_v2 = vld [vmem:[%s177_s26 + $0x90] sm:$0xff] (%p50_p3) }
  0x10   : > { %213 = vst [vmem:[%s171_s27] sm:$0xff] (%p50_p3), %v212_v0  ;;  %215 = vst [vmem:[%s171_s27 + $0x8] sm:$0xff] (%p50_p3), %v214_v1  ;;  %v218_v3 = vld [vmem:[%s177_s26 + $0xd8] sm:$0xff] (%p50_p3) }
  0x11   : > { %217 = vst [vmem:[%s171_s27 + $0x10] sm:$0xff] %v216_v2  ;;  %219 = vst [vmem:[%s171_s27 + $0x18] sm:$0xff] %v218_v3 }
  0x12 PF: > { %p822_p6 = scmp.ge.s32.totalorder %s1044_s16, 1  ;;  %p239_p7 = scmp.lt.s32.totalorder %s1044_s16, 10 }
  0x14   : > { %p240_p8 = pnand %p822_p6, %p239_p7 }
  0x15   : > { %s246_s28 = sand.u32 (!%p240_p8), 1, %s1028_s12   ;;  %s824_s29 = sshll.u32 (!%p240_p8), %s1036_s14, 5 }
  0x16   : > { %243 = sbr.rel (%p240_p8) target bundleno = 320 (0x140), region = 66  ;;  %s823_s30 = sshll.u32 (!%p240_p8), %s246_s28, 5 }
  0x17   : > { %p292_p9 = scmp.lt.s32.totalorder (!%p240_p8), %s824_s29, 287  ;;  %s1119_s8 = scalar_lea.vmem (!%p240_p8), [#allocation3], %s823_s30 }
  0x18   : > { %p827_p10 = scmp.ne.s32.totalorder (!%p240_p8), %s1036_s14, 0 }
  0x1b   : > { %s1200_s29 = smov (!%p292_p9, %s824_s29), 287  ;;  %322 = sbr.rel (%p827_p10) target bundleno = 37 (0x25), region = 74 }
  0x1c   : > { %s874_s4 = sshll.u32 %s1200_s29, 3 }
  0x1d   : > { %s1117_s7 = scalar_lea.vmem %s1190_s1, %s874_s4 }
  0x20   : > { %v1046_v4 = vmov 0.0  }
  0x21   : > { %323 = vst [vmem:[#allocation2 + $0x30] sm:$0xff] %v1046_v4  ;;  %324 = vst [vmem:[#allocation2] sm:$0xff] %v1046_v4 }
  0x22   : > { %325 = vst [vmem:[#allocation2 + $0x18] sm:$0xff] %v1046_v4  ;;  %326 = vst [vmem:[#allocation2 + $0x10] sm:$0xff] %v1046_v4 }
  0x23   : > { %327 = vst [vmem:[#allocation2 + $0x8] sm:$0xff] %v1046_v4  ;;  %328 = vst [vmem:[#allocation2 + $0x20] sm:$0xff] %v1046_v4 }
  0x24   : > { %329 = vst [vmem:[#allocation2 + $0x28] sm:$0xff] %v1046_v4  ;;  %330 = vst [vmem:[#allocation2 + $0x38] sm:$0xff] %v1046_v4 }
  0x25 PF: > { %v952_v5 = vld [vmem:[%s1117_s7 + $0x74] ss:$8 sps:$4 sm:$0xff]   ;;  %v954_v6 = vld [vmem:[%s1117_s7 + $0x70] ss:$8 sps:$4 sm:$0xff]   ;;  %v955_v7 = vld [vmem:[%s1117_s7 + $0x64] ss:$8 sps:$4 sm:$0xff]  }
  0x26   : > { %555 = vmatprep.subr.bf16.mxu0 %v952_v5  ;;  %879 = vmatprep.subr.bf16.mxu1 %v952_v5  ;;  %v957_v8 = vld [vmem:[%s1117_s7 + $0x60] ss:$8 sps:$4 sm:$0xff]   ;;  %v958_v9 = vld [vmem:[%s1117_s7 + $0x54] ss:$8 sps:$4 sm:$0xff]   ;;  %v960_v10 = vld [vmem:[%s1117_s7 + $0x50] ss:$8 sps:$4 sm:$0xff]  }
  0x27   : > { %556 = vmatpush1.bf16.msra.mxu0 %v954_v6  ;;  %895 = vmatpush1.bf16.msra.mxu1 %v954_v6  ;;  %v961_v11 = vld [vmem:[%s1117_s7 + $0x44] ss:$8 sps:$4 sm:$0xff]   ;;  %v963_v12 = vld [vmem:[%s1117_s7 + $0x40] ss:$8 sps:$4 sm:$0xff]   ;;  %v964_v13 = vld [vmem:[%s1117_s7 + $0x34] ss:$8 sps:$4 sm:$0xff]  }
  0x28   : > { %557 = vmatprep.subr.bf16.mxu0 %v955_v7  ;;  %880 = vmatprep.subr.bf16.mxu1 %v955_v7  ;;  %v966_v14 = vld [vmem:[%s1117_s7 + $0x30] ss:$8 sps:$4 sm:$0xff]   ;;  %v967_v15 = vld [vmem:[%s1117_s7 + $0x24] ss:$8 sps:$4 sm:$0xff]   ;;  %v969_v16 = vld [vmem:[%s1117_s7 + $0x20] ss:$8 sps:$4 sm:$0xff]  }
  0x29   : > { %v970_v17 = vld [vmem:[%s1117_s7 + $0x14] ss:$8 sps:$4 sm:$0xff]   ;;  %v1002_v18 = vld [vmem:[%s1119_s8 + $0x4] ss:$8 sps:$4 sm:$0xff]   ;;  %v972_v19 = vld [vmem:[%s1117_s7 + $0x10] ss:$8 sps:$4 sm:$0xff]  }
  0x2a   : > { %v1005_v20 = vld [vmem:[%s1119_s8 + $0x14] ss:$8 sps:$4 sm:$0xff]   ;;  %v973_v21 = vld [vmem:[%s1117_s7 + $0x4] ss:$8 sps:$4 sm:$0xff]   ;;  %587 = vmatprep.mubr.bf16.mxu0 %v1002_v18  ;;  %v975_v22 = vld [vmem:[%s1117_s7] ss:$8 sps:$4 sm:$0xff]  }
  0x2b   : > { %558 = vmatpush1.bf16.msra.mxu0 %v957_v8  ;;  %896 = vmatpush1.bf16.msra.mxu1 %v957_v8  ;;  %v976_v23 = vld [vmem:[%s1117_s7 + $0xf4] ss:$8 sps:$4 sm:$0xff]   ;;  %v978_v24 = vld [vmem:[%s1117_s7 + $0xf0] ss:$8 sps:$4 sm:$0xff]   ;;  %v979_v25 = vld [vmem:[%s1117_s7 + $0xe4] ss:$8 sps:$4 sm:$0xff]  }
  0x2c   : > { %559 = vmatprep.subr.bf16.mxu0 %v958_v9  ;;  %881 = vmatprep.subr.bf16.mxu1 %v958_v9  ;;  %v981_v26 = vld [vmem:[%s1117_s7 + $0xe0] ss:$8 sps:$4 sm:$0xff]   ;;  %v982_v27 = vld [vmem:[%s1117_s7 + $0xd4] ss:$8 sps:$4 sm:$0xff]   ;;  %v984_v28 = vld [vmem:[%s1117_s7 + $0xd0] ss:$8 sps:$4 sm:$0xff]  }
  0x2d   : > { %597 = vmatprep.mubr.bf16.mxu1 %v1005_v20  ;;  %v985_v29 = vld [vmem:[%s1117_s7 + $0xc4] ss:$8 sps:$4 sm:$0xff]   ;;  %v987_v30 = vld [vmem:[%s1117_s7 + $0xc0] ss:$8 sps:$4 sm:$0xff]   ;;  %v988_v31 = vld [vmem:[%s1117_s7 + $0xb4] ss:$8 sps:$4 sm:$0xff]  }
  0x2e   : > { %v990_v32 = vld [vmem:[%s1117_s7 + $0xb0] ss:$8 sps:$4 sm:$0xff]   ;;  %v991_v33 = vld [vmem:[%s1117_s7 + $0xa4] ss:$8 sps:$4 sm:$0xff]   ;;  %v993_v34 = vld [vmem:[%s1117_s7 + $0xa0] ss:$8 sps:$4 sm:$0xff]  }
  0x2f   : > { %560 = vmatpush1.bf16.msra.mxu0 %v960_v10  ;;  %897 = vmatpush1.bf16.msra.mxu1 %v960_v10  ;;  %v994_v35 = vld [vmem:[%s1117_s7 + $0x94] ss:$8 sps:$4 sm:$0xff]   ;;  %v996_v36 = vld [vmem:[%s1117_s7 + $0x90] ss:$8 sps:$4 sm:$0xff]   ;;  %v997_v37 = vld [vmem:[%s1117_s7 + $0x84] ss:$8 sps:$4 sm:$0xff]  }
  0x30   : > { %561 = vmatprep.subr.bf16.mxu0 %v961_v11  ;;  %882 = vmatprep.subr.bf16.mxu1 %v961_v11  ;;  %v999_v38 = vld [vmem:[%s1117_s7 + $0x80] ss:$8 sps:$4 sm:$0xff]   ;;  %v1003_v40 = vld [vmem:[%s1119_s8 + $0x10] ss:$8 sps:$4 sm:$0xff]   ;;  %p864_p11 = scmp.ne.s32.totalorder %s1036_s14, 8 }
  0x31   : > { %v1000_v39 = vld [vmem:[%s1119_s8] ss:$8 sps:$4 sm:$0xff]   ;;  %v331_v41 = vld [vmem:[#allocation2 + $0x30] sm:$0xff]  ;;  %v333_v51 = vld [vmem:[#allocation2 + $0x18] sm:$0xff] }
  0x32   : > { %v335_v42 = vld [vmem:[#allocation2 + $0x8] sm:$0xff]  ;;  %v332_v45 = vld [vmem:[#allocation2] sm:$0xff]  ;;  %v334_v57 = vld [vmem:[#allocation2 + $0x10] sm:$0xff] }
  0x33   : > { %562 = vmatpush1.bf16.msra.mxu0 %v963_v12  ;;  %898 = vmatpush1.bf16.msra.mxu1 %v963_v12  ;;  %v336_v46 = vld [vmem:[#allocation2 + $0x20] sm:$0xff]  ;;  %v337_v52 = vld [vmem:[#allocation2 + $0x28] sm:$0xff]  ;;  %v338_v58 = vld [vmem:[#allocation2 + $0x38] sm:$0xff] }
  0x34   : > { %563 = vmatprep.subr.bf16.mxu0 %v964_v13  ;;  %883 = vmatprep.subr.bf16.mxu1 %v964_v13 }
  0x37   : > { %564 = vmatpush1.bf16.msra.mxu0 %v966_v14  ;;  %899 = vmatpush1.bf16.msra.mxu1 %v966_v14 }
  0x38   : > { %565 = vmatprep.subr.bf16.mxu0 %v967_v15  ;;  %884 = vmatprep.subr.bf16.mxu1 %v967_v15 }
  0x3b   : > { %566 = vmatpush1.bf16.msra.mxu0 %v969_v16  ;;  %900 = vmatpush1.bf16.msra.mxu1 %v969_v16 }
  0x3c   : > { %567 = vmatprep.subr.bf16.mxu0 %v970_v17  ;;  %885 = vmatprep.subr.bf16.mxu1 %v970_v17 }
  0x3f   : > { %568 = vmatpush1.bf16.msra.mxu0 %v972_v19  ;;  %901 = vmatpush1.bf16.msra.mxu1 %v972_v19 }
  0x40   : > { %569 = vmatprep.subr.bf16.mxu0 %v973_v21  ;;  %886 = vmatprep.subr.bf16.mxu1 %v973_v21 }
  0x43   : > { %570 = vmatpush1.bf16.msra.mxu0 %v975_v22  ;;  %902 = vmatpush1.bf16.msra.mxu1 %v975_v22 }
  0x44   : > { %571 = vmatprep.subr.bf16.mxu0 %v976_v23  ;;  %887 = vmatprep.subr.bf16.mxu1 %v976_v23 }
  0x47   : > { %572 = vmatpush2.bf16.msra.mxu0 %v978_v24  ;;  %903 = vmatpush2.bf16.msra.mxu1 %v978_v24 }
  0x48   : > { %573 = vmatprep.subr.bf16.mxu0 %v979_v25  ;;  %888 = vmatprep.subr.bf16.mxu1 %v979_v25 }
  0x4b   : > { %574 = vmatpush2.bf16.msra.mxu0 %v981_v26  ;;  %904 = vmatpush2.bf16.msra.mxu1 %v981_v26 }
  0x4c   : > { %575 = vmatprep.subr.bf16.mxu0 %v982_v27  ;;  %889 = vmatprep.subr.bf16.mxu1 %v982_v27 }
  0x4f   : > { %576 = vmatpush2.bf16.msra.mxu0 %v984_v28  ;;  %905 = vmatpush2.bf16.msra.mxu1 %v984_v28 }
  0x50   : > { %577 = vmatprep.subr.bf16.mxu0 %v985_v29  ;;  %890 = vmatprep.subr.bf16.mxu1 %v985_v29 }
  0x53   : > { %578 = vmatpush2.bf16.msra.mxu0 %v987_v30  ;;  %906 = vmatpush2.bf16.msra.mxu1 %v987_v30 }
  0x54   : > { %579 = vmatprep.subr.bf16.mxu0 %v988_v31  ;;  %891 = vmatprep.subr.bf16.mxu1 %v988_v31 }
  0x57   : > { %580 = vmatpush2.bf16.msra.mxu0 %v990_v32  ;;  %907 = vmatpush2.bf16.msra.mxu1 %v990_v32 }
  0x58   : > { %581 = vmatprep.subr.bf16.mxu0 %v991_v33  ;;  %892 = vmatprep.subr.bf16.mxu1 %v991_v33 }
  0x5b   : > { %582 = vmatpush2.bf16.msra.mxu0 %v993_v34  ;;  %908 = vmatpush2.bf16.msra.mxu1 %v993_v34 }
  0x5c   : > { %583 = vmatprep.subr.bf16.mxu0 %v994_v35  ;;  %893 = vmatprep.subr.bf16.mxu1 %v994_v35 }
  0x5f   : > { %584 = vmatpush2.bf16.msra.mxu0 %v996_v36  ;;  %909 = vmatpush2.bf16.msra.mxu1 %v996_v36 }
  0x60   : > { %585 = vmatprep.subr.bf16.mxu0 %v997_v37  ;;  %894 = vmatprep.subr.bf16.mxu1 %v997_v37 }
  0x63   : > { %586 = vmatpush2.bf16.msra.mxu0 %v999_v38  ;;  %910 = vmatpush2.bf16.msra.mxu1 %v999_v38 }
  0x66   : > { %588 = vmatmul.mubr.bf16.vlgmr.msra.gmra.mxu0 %v1000_v39  ;;  %598 = vmatmul.mubr.bf16.vlgmr.msra.gmra.mxu1 %v1003_v40 }
 0x126   : > { %v589_v43 = vpop.f32.mrf.mxu0  ;;  %v599_v44 = vpop.f32.mrf.mxu1 }
 0x127   : > { %v608_v47 = vadd.f32 %v589_v43, %v331_v41  ;;  %v612_v48 = vadd.f32 %v599_v44, %v335_v42 }
 0x128   : > { %v591_v49 = vpop.f32.mrf.mxu0  ;;  %v601_v50 = vpop.f32.mrf.mxu1 }
 0x129   : > { %616 = vst [vmem:[#allocation2 + $0x30] sm:$0xff] %v608_v47  ;;  %620 = vst [vmem:[#allocation2 + $0x8] sm:$0xff] %v612_v48  ;;  %v609_v53 = vadd.f32 %v591_v49, %v332_v45  ;;  %v613_v54 = vadd.f32 %v601_v50, %v336_v46 }
 0x12a   : > { %v593_v55 = vpop.f32.mrf.mxu0  ;;  %v603_v56 = vpop.f32.mrf.mxu1 }
 0x12b   : > { %617 = vst [vmem:[#allocation2] sm:$0xff] %v609_v53  ;;  %621 = vst [vmem:[#allocation2 + $0x20] sm:$0xff] %v613_v54  ;;  %v610_v59 = vadd.f32 %v593_v55, %v333_v51  ;;  %v614_v60 = vadd.f32 %v603_v56, %v337_v52  ;;  %627 = sbr.rel (%p864_p11) target bundleno = 320 (0x140), region = 78 }
 0x12c   : > { %v595_v61 = vpop.f32.mrf.mxu0  ;;  %v605_v62 = vpop.f32.mrf.mxu1 }
 0x12d   : > { %618 = vst [vmem:[#allocation2 + $0x18] sm:$0xff] %v610_v59  ;;  %622 = vst [vmem:[#allocation2 + $0x28] sm:$0xff] %v614_v60  ;;  %v611_v63 = vadd.f32 %v595_v61, %v334_v57  ;;  %v615_v0 = vadd.f32 %v605_v62, %v338_v58 }
 0x12f   : > { %619 = vst [vmem:[#allocation2 + $0x10] sm:$0xff] %v611_v63  ;;  %623 = vst [vmem:[#allocation2 + $0x38] sm:$0xff] %v615_v0 }
 0x130   : > { %v638_v1 = vlaneseq  ;;  %v636_v3 = vld [vmem:[%s1191_s2] sm:$0x3]  ;;  %v628_v4 = vld [vmem:[#allocation2 + $0x30] sm:$0xff]  ;;  %v632_v10 = vld [vmem:[#allocation2 + $0x8] sm:$0xff] }
 0x132   : > { %v639_v2 = vshrl.u32 %v638_v1, 7  ;;  %v629_v5 = vld [vmem:[#allocation2] sm:$0xff] }
 0x133   : > { %v633_v13 = vld [vmem:[#allocation2 + $0x20] sm:$0xff] }
 0x134   : > { %v640_v6 = vsub.s32 0, %v639_v2  ;;  %v644_v7 = vsub.s32 1, %v639_v2  ;;  %v630_v8 = vld [vmem:[#allocation2 + $0x18] sm:$0xff]  ;;  %v634_v14 = vld [vmem:[#allocation2 + $0x28] sm:$0xff] }
 0x136   : > { %v631_v9 = vld [vmem:[#allocation2 + $0x10] sm:$0xff]  ;;  %v641_v11 = vrot.slane %v636_v3, %v640_v6  ;;  %v645_v12 = vrot.slane %v636_v3, %v644_v7  ;;  %v635_v15 = vld [vmem:[#allocation2 + $0x38] sm:$0xff] }
 0x138   : > { %v648_v16 = vadd.f32 %v641_v11, %v628_v4  ;;  %v649_v17 = vadd.f32 %v645_v12, %v629_v5  ;;  %v650_v18 = vadd.f32 %v641_v11, %v630_v8  ;;  %v651_v19 = vadd.f32 %v645_v12, %v631_v9 }
 0x139   : > { %v652_v20 = vadd.f32 %v641_v11, %v632_v10  ;;  %v653_v21 = vadd.f32 %v645_v12, %v633_v13  ;;  %v654_v22 = vadd.f32 %v641_v11, %v634_v14  ;;  %v655_v23 = vadd.f32 %v645_v12, %v635_v15 }
 0x13a   : > { %v656_v24 = vmax.f32 %v648_v16, 0.0  ;;  %v657_v25 = vmax.f32 %v649_v17, 0.0  ;;  %v658_v26 = vmax.f32 %v650_v18, 0.0  ;;  %v659_v27 = vmax.f32 %v651_v19, 0.0 }
 0x13b   : > { %v660_v28 = vmax.f32 %v652_v20, 0.0  ;;  %v661_v29 = vmax.f32 %v653_v21, 0.0  ;;  %v662_v30 = vmax.f32 %v654_v22, 0.0  ;;  %v663_v31 = vmax.f32 %v655_v23, 0.0 }
 0x13c   : > { %v875_v32 = vpack.c.bf16 %v657_v25, %v656_v24  ;;  %v876_v33 = vpack.c.bf16 %v659_v27, %v658_v26 }
 0x13d   : > { %v877_v34 = vpack.c.bf16 %v661_v29, %v660_v28  ;;  %v878_v35 = vpack.c.bf16 %v663_v31, %v662_v30 }
 0x13e   : > { %688 = vst [vmem:[%s1192_s3] sm:$0xff] %v875_v32  ;;  %689 = vst [vmem:[%s1192_s3 + $0x8] sm:$0xff] %v876_v33 }
 0x13f   : > { %690 = vst [vmem:[%s1192_s3 + $0x10] sm:$0xff] %v877_v34  ;;  %691 = vst [vmem:[%s1192_s3 + $0x18] sm:$0xff] %v878_v35 }
 0x140 PF: > { %s13_s16 = sadd.s32 1, %s1044_s16   ;;  %s1193_s12 = smov %s1032_s13 }
 0x141   : > { %p10_p12 = scmp.ge.s32.totalorder %s13_s16, 11   ;;  %s1194_s13 = smov %s1102_s20 }
 0x142   : > { %s1195_s14 = smov %s1040_s15  ;;  %s1196_s15 = smov %s1198_s17 }
 0x143   :  { %12 = sbr.rel (!%p10_p12) target bundleno = 3 (0x3), region = 119 }

// kernel: vgg_base_forward.30
= control target key start
LH: loop header
LB: loop body
LE: loop exit
PB: predicated region body
PF: predicated region fallthrough
CT: control target
= control target key end

     0   :  { %s1071_s12 = smov 0   ;;  %s1073_s13 = smov 0   ;;  %s1285_s0 = inlined_call_operand.vmem [shape: bf16[8,2304], index: 0, kind: input, shape index: {}]   ;;  %s1286_s1 = inlined_call_operand.vmem [shape: bf16[2304,512], index: 1, kind: input, shape index: {}]   ;;  %s1287_s2 = inlined_call_operand.vmem [shape: f32[1,512], index: 2, kind: input, shape index: {}]   ;;  %s1288_s3 = inlined_call_operand.vmem [shape: bf16[8,512], index: 3, kind: output, shape index: {}]  }
   0x1   :  { %s1075_s14 = smov 0   ;;  %s1077_s15 = smov 0  }
   0x2   :  { %s1079_s16 = smov 0   ;;  %s1081_s17 = smov 0  }
   0x3   :  { %s1083_s18 = smov 0  }
   0x4 LB: > { %s25_s19 = sadd.s32 1, %s1040_s16  ;;  %s28_s20 = sadd.s32 1, %s1044_s17  ;;  %s1048_s18 = sphi %s1083_s18, %s13_s18   ;;  %s1044_s17 = sphi %s1081_s17, %s1294_s17   ;;  %s1040_s16 = sphi %s1079_s16, %s1293_s16   ;;  %s1036_s15 = sphi %s1077_s15, %s1292_s15   ;;  %s1032_s14 = sphi %s1075_s14, %s1291_s14   ;;  %s1028_s13 = sphi %s1073_s13, %s1290_s13   ;;  %s1024_s12 = sphi %s1071_s12, %s1289_s12  }
   0x5   : > { %p26_p0 = scmp.ge.s32.totalorder %s25_s19, 9  ;;  %p76_p1 = scmp.ne.s32.totalorder %s1028_s13, %s1024_s12 }
   0x6   : > { %p77_p2 = scmp.eq.s32.totalorder %s1048_s18, 0  ;;  %s69_s24 = sadd.s32 1, %s1028_s13 }
   0x7   : > { %s1296_s19 = smov (%p26_p0, %s25_s19), 0  ;;  %s1298_s20 = smov (!%p26_p0, %s28_s20), %s1044_s17 }
   0x8   : > { %p78_p3 = por %p77_p2, %p76_p1  ;;  %p30_p4 = scmp.ge.s32.totalorder %s1298_s20, 2 }
   0x9   : > { %s64_s21 = ssub.s32 %s1040_s16, %s1296_s19  ;;  %p833_p6 = scmp.ge.s32.totalorder %s1048_s18, 18 }
   0xa   : > { %s1300_s20 = smov (%p30_p4, %s1298_s20), 0 }
   0xb   : > { %s65_s22 = ssub.s32 %s1044_s17, %s1300_s20  ;;  %156 = sbr.rel (%p833_p6) target bundleno = 39 (0x27), region = 16 }
   0xc   : > { %s66_s23 = sor.u32 %s65_s22, %s64_s21 }
   0xd   : > { %p67_p5 = scmp.eq.s32.totalorder %s66_s23, 0 }
   0xf   : > { %s1122_s25 = scalar_select %p67_p5, %s1028_s13, %s69_s24  }
  0x10   : > { %172 = sbr.rel (!%p78_p3) target bundleno = 39 (0x27), region = 24  ;;  %s174_s26 = sand.u32 (%p78_p3), 1, %s1028_s13  }
  0x11   : > { %s836_s27 = sshll.u32 (%p78_p3), %s1044_s17, 1  ;;  %s834_s28 = sshll.u32 (%p78_p3), %s174_s26, 8 }
  0x12   : > { %s885_s29 = sshll.u32 (%p78_p3), %s1040_s16, 7  ;;  %s1136_s8 = scalar_lea.vmem (%p78_p3), [#allocation3], %s834_s28 }
  0x13   : > { %s180_s30 = sadd.s32 (%p78_p3), %s885_s29, %s836_s27 }
  0x14   : > { %s838_s4 = sshll.u32 (%p78_p3), %s180_s30, 2 }
  0x15   : > { %s1131_s7 = scalar_lea.vmem %s1286_s1, %s838_s4 }
  0x16   : > { %v273_v0 = vld [vmem:[%s1131_s7] sm:$0xff]  ;;  %v275_v1 = vld [vmem:[%s1131_s7 + $0x10] sm:$0xff] }
  0x17   : > { %v277_v2 = vld [vmem:[%s1131_s7 + $0x20] sm:$0xff]  ;;  %274 = vst [vmem:[%s1136_s8] sm:$0xff] %v273_v0  ;;  %276 = vst [vmem:[%s1136_s8 + $0x8] sm:$0xff] %v275_v1  ;;  %v279_v3 = vld [vmem:[%s1131_s7 + $0x30] sm:$0xff] }
  0x18   : > { %278 = vst [vmem:[%s1136_s8 + $0x10] sm:$0xff] %v277_v2  ;;  %v281_v4 = vld [vmem:[%s1131_s7 + $0x40] sm:$0xff]  ;;  %v283_v5 = vld [vmem:[%s1131_s7 + $0x50] sm:$0xff]  ;;  %280 = vst [vmem:[%s1136_s8 + $0x18] sm:$0xff] %v279_v3 }
  0x19   : > { %282 = vst [vmem:[%s1136_s8 + $0x20] sm:$0xff] %v281_v4  ;;  %284 = vst [vmem:[%s1136_s8 + $0x28] sm:$0xff] %v283_v5  ;;  %v285_v6 = vld [vmem:[%s1131_s7 + $0x60] sm:$0xff]  ;;  %v287_v7 = vld [vmem:[%s1131_s7 + $0x70] sm:$0xff] }
  0x1a   : > { %v289_v8 = vld [vmem:[%s1131_s7 + $0x80] sm:$0xff]  ;;  %286 = vst [vmem:[%s1136_s8 + $0x30] sm:$0xff] %v285_v6  ;;  %288 = vst [vmem:[%s1136_s8 + $0x38] sm:$0xff] %v287_v7  ;;  %v291_v9 = vld [vmem:[%s1131_s7 + $0x90] sm:$0xff] }
  0x1b   : > { %290 = vst [vmem:[%s1136_s8 + $0x40] sm:$0xff] %v289_v8  ;;  %v293_v10 = vld [vmem:[%s1131_s7 + $0xa0] sm:$0xff]  ;;  %v295_v11 = vld [vmem:[%s1131_s7 + $0xb0] sm:$0xff]  ;;  %292 = vst [vmem:[%s1136_s8 + $0x48] sm:$0xff] %v291_v9 }
  0x1c   : > { %294 = vst [vmem:[%s1136_s8 + $0x50] sm:$0xff] %v293_v10  ;;  %296 = vst [vmem:[%s1136_s8 + $0x58] sm:$0xff] %v295_v11  ;;  %v297_v12 = vld [vmem:[%s1131_s7 + $0xc0] sm:$0xff]  ;;  %v299_v13 = vld [vmem:[%s1131_s7 + $0xd0] sm:$0xff] }
  0x1d   : > { %v301_v14 = vld [vmem:[%s1131_s7 + $0xe0] sm:$0xff]  ;;  %298 = vst [vmem:[%s1136_s8 + $0x60] sm:$0xff] %v297_v12  ;;  %300 = vst [vmem:[%s1136_s8 + $0x68] sm:$0xff] %v299_v13  ;;  %v303_v15 = vld [vmem:[%s1131_s7 + $0xf0] sm:$0xff] }
  0x1e   : > { %302 = vst [vmem:[%s1136_s8 + $0x70] sm:$0xff] %v301_v14  ;;  %v305_v16 = vld [vmem:[%s1131_s7 + $0x100] sm:$0xff]  ;;  %v307_v17 = vld [vmem:[%s1131_s7 + $0x110] sm:$0xff]  ;;  %304 = vst [vmem:[%s1136_s8 + $0x78] sm:$0xff] %v303_v15 }
  0x1f   : > { %306 = vst [vmem:[%s1136_s8 + $0x80] sm:$0xff] %v305_v16  ;;  %308 = vst [vmem:[%s1136_s8 + $0x88] sm:$0xff] %v307_v17  ;;  %v309_v18 = vld [vmem:[%s1131_s7 + $0x120] sm:$0xff]  ;;  %v311_v19 = vld [vmem:[%s1131_s7 + $0x130] sm:$0xff] }
  0x20   : > { %v313_v20 = vld [vmem:[%s1131_s7 + $0x140] sm:$0xff]  ;;  %310 = vst [vmem:[%s1136_s8 + $0x90] sm:$0xff] %v309_v18  ;;  %312 = vst [vmem:[%s1136_s8 + $0x98] sm:$0xff] %v311_v19  ;;  %v315_v21 = vld [vmem:[%s1131_s7 + $0x150] sm:$0xff] }
  0x21   : > { %314 = vst [vmem:[%s1136_s8 + $0xa0] sm:$0xff] %v313_v20  ;;  %v317_v22 = vld [vmem:[%s1131_s7 + $0x160] sm:$0xff]  ;;  %v319_v23 = vld [vmem:[%s1131_s7 + $0x170] sm:$0xff]  ;;  %316 = vst [vmem:[%s1136_s8 + $0xa8] sm:$0xff] %v315_v21 }
  0x22   : > { %318 = vst [vmem:[%s1136_s8 + $0xb0] sm:$0xff] %v317_v22  ;;  %320 = vst [vmem:[%s1136_s8 + $0xb8] sm:$0xff] %v319_v23  ;;  %v321_v24 = vld [vmem:[%s1131_s7 + $0x180] sm:$0xff]  ;;  %v323_v25 = vld [vmem:[%s1131_s7 + $0x190] sm:$0xff] }
  0x23   : > { %v325_v26 = vld [vmem:[%s1131_s7 + $0x1a0] sm:$0xff]  ;;  %322 = vst [vmem:[%s1136_s8 + $0xc0] sm:$0xff] %v321_v24  ;;  %324 = vst [vmem:[%s1136_s8 + $0xc8] sm:$0xff] %v323_v25  ;;  %v327_v27 = vld [vmem:[%s1131_s7 + $0x1b0] sm:$0xff] }
  0x24   : > { %326 = vst [vmem:[%s1136_s8 + $0xd0] sm:$0xff] %v325_v26  ;;  %v329_v28 = vld [vmem:[%s1131_s7 + $0x1c0] sm:$0xff]  ;;  %v331_v29 = vld [vmem:[%s1131_s7 + $0x1d0] sm:$0xff]  ;;  %328 = vst [vmem:[%s1136_s8 + $0xd8] sm:$0xff] %v327_v27 }
  0x25   : > { %330 = vst [vmem:[%s1136_s8 + $0xe0] sm:$0xff] %v329_v28  ;;  %332 = vst [vmem:[%s1136_s8 + $0xe8] sm:$0xff] %v331_v29  ;;  %v333_v30 = vld [vmem:[%s1131_s7 + $0x1e0] sm:$0xff]  ;;  %v335_v31 = vld [vmem:[%s1131_s7 + $0x1f0] sm:$0xff] }
  0x26   : > { %334 = vst [vmem:[%s1136_s8 + $0xf0] sm:$0xff] %v333_v30  ;;  %336 = vst [vmem:[%s1136_s8 + $0xf8] sm:$0xff] %v335_v31 }
  0x27 PF: > { %p839_p7 = scmp.ge.s32.totalorder %s1048_s18, 1  ;;  %p349_p8 = scmp.lt.s32.totalorder %s1048_s18, 19 }
  0x29   : > { %p350_p9 = pnand %p839_p7, %p349_p8 }
  0x2a   : > { %s356_s9 = sand.u32 (!%p350_p9), 1, %s1024_s12   ;;  %s841_s10 = sshll.u32 (!%p350_p9), %s1032_s14, 1 }
  0x2b   : > { %353 = sbr.rel (%p350_p9) target bundleno = 337 (0x151), region = 66  ;;  %s840_s11 = sshll.u32 (!%p350_p9), %s356_s9, 8 }
  0x2c   : > { %p399_p10 = scmp.lt.s32.totalorder (!%p350_p9), %s841_s10, 17  ;;  %s843_s21 = sshll.u32 (!%p350_p9), %s1036_s15, 1 }
  0x2d   : > { %p409_p11 = scmp.lt.s32.totalorder (!%p350_p9), %s843_s21, 3  ;;  %s1221_s5 = scalar_lea.vmem (!%p350_p9), [#allocation3], %s840_s11 }
  0x2e   : > { %p846_p12 = scmp.ne.s32.totalorder (!%p350_p9), %s1032_s14, 0 }
  0x30   : > { %s1302_s10 = smov (!%p399_p10, %s841_s10), 17  ;;  %s1304_s21 = smov (!%p409_p11, %s843_s21), 3 }
  0x31   : > { %s842_s22 = sshll.u32 %s1302_s10, 2  ;;  %s411_s12 = scalar_lea.vmem %s1287_s2, %s1304_s21 }
  0x32   : > { %s1207_s26 = scalar_lea.vmem %s1285_s0, %s842_s22  ;;  %s845_s29 = sshll.u32 %s1304_s21, 2 }
  0x33   : > { %s1219_s15 = scalar_lea.vmem %s1288_s3, %s845_s29  ;;  %426 = sbr.rel (%p846_p12) target bundleno = 58 (0x3a), region = 74 }
  0x38   : > { %v1050_v32 = vmov 0.0  }
  0x39   : > { %427 = vst [vmem:[#allocation2] sm:$0xff] %v1050_v32  ;;  %428 = vst [vmem:[#allocation2 + $0x8] sm:$0xff] %v1050_v32 }
  0x3a PF: > { %v944_v33 = vld [vmem:[%s1221_s5 + $0x74] ss:$8 sps:$4 sm:$0xff]   ;;  %v946_v34 = vld [vmem:[%s1221_s5 + $0x70] ss:$8 sps:$4 sm:$0xff]   ;;  %v947_v35 = vld [vmem:[%s1221_s5 + $0x64] ss:$8 sps:$4 sm:$0xff]  }
  0x3b   : > { %631 = vmatprep.subr.bf16.mxu0 %v944_v33  ;;  %v949_v36 = vld [vmem:[%s1221_s5 + $0x60] ss:$8 sps:$4 sm:$0xff]   ;;  %v950_v37 = vld [vmem:[%s1221_s5 + $0x54] ss:$8 sps:$4 sm:$0xff]   ;;  %v952_v38 = vld [vmem:[%s1221_s5 + $0x50] ss:$8 sps:$4 sm:$0xff]  }
  0x3c   : > { %632 = vmatpush1.bf16.msra.mxu0 %v946_v34  ;;  %v953_v39 = vld [vmem:[%s1221_s5 + $0x44] ss:$8 sps:$4 sm:$0xff]   ;;  %v955_v40 = vld [vmem:[%s1221_s5 + $0x40] ss:$8 sps:$4 sm:$0xff]   ;;  %v956_v41 = vld [vmem:[%s1221_s5 + $0x34] ss:$8 sps:$4 sm:$0xff]  }
  0x3d   : > { %633 = vmatprep.subr.bf16.mxu0 %v947_v35  ;;  %v958_v42 = vld [vmem:[%s1221_s5 + $0x30] ss:$8 sps:$4 sm:$0xff]   ;;  %v959_v43 = vld [vmem:[%s1221_s5 + $0x24] ss:$8 sps:$4 sm:$0xff]   ;;  %v961_v44 = vld [vmem:[%s1221_s5 + $0x20] ss:$8 sps:$4 sm:$0xff]  }
  0x3e   : > { %v962_v45 = vld [vmem:[%s1221_s5 + $0x14] ss:$8 sps:$4 sm:$0xff]   ;;  %v964_v48 = vld [vmem:[%s1221_s5 + $0x10] ss:$8 sps:$4 sm:$0xff]   ;;  %v965_v49 = vld [vmem:[%s1221_s5 + $0x4] ss:$8 sps:$4 sm:$0xff]  }
  0x3f   : > { %v431_v46 = vld [vmem:[%s1207_s26] sm:$0xff]  ;;  %v967_v50 = vld [vmem:[%s1221_s5] ss:$8 sps:$4 sm:$0xff]   ;;  %v971_v53 = vld [vmem:[%s1221_s5 + $0xe4] ss:$8 sps:$4 sm:$0xff]   ;;  %p881_p13 = scmp.ne.s32.totalorder %s1032_s14, 8 }
  0x40   : > { %634 = vmatpush1.bf16.msra.mxu0 %v949_v36  ;;  %v848_v47 = vcombine.high %v431_v46, %v431_v46  ;;  %v968_v51 = vld [vmem:[%s1221_s5 + $0xf4] ss:$8 sps:$4 sm:$0xff]   ;;  %v970_v52 = vld [vmem:[%s1221_s5 + $0xf0] ss:$8 sps:$4 sm:$0xff]   ;;  %v973_v54 = vld [vmem:[%s1221_s5 + $0xe0] ss:$8 sps:$4 sm:$0xff]   ;;  %v847_v3 = vcombine.low %v431_v46, %v431_v46 }
  0x41   : > { %635 = vmatprep.subr.bf16.mxu0 %v950_v37  ;;  %v974_v55 = vld [vmem:[%s1221_s5 + $0xd4] ss:$8 sps:$4 sm:$0xff]   ;;  %v976_v56 = vld [vmem:[%s1221_s5 + $0xd0] ss:$8 sps:$4 sm:$0xff]   ;;  %v977_v57 = vld [vmem:[%s1221_s5 + $0xc4] ss:$8 sps:$4 sm:$0xff]  }
  0x42   : > { %663 = vmatprep.mubr.bf16.mxu0 %v848_v47  ;;  %v979_v58 = vld [vmem:[%s1221_s5 + $0xc0] ss:$8 sps:$4 sm:$0xff]   ;;  %v980_v59 = vld [vmem:[%s1221_s5 + $0xb4] ss:$8 sps:$4 sm:$0xff]   ;;  %v982_v60 = vld [vmem:[%s1221_s5 + $0xb0] ss:$8 sps:$4 sm:$0xff]  }
  0x43   : > { %v983_v61 = vld [vmem:[%s1221_s5 + $0xa4] ss:$8 sps:$4 sm:$0xff]   ;;  %v985_v62 = vld [vmem:[%s1221_s5 + $0xa0] ss:$8 sps:$4 sm:$0xff]   ;;  %v986_v63 = vld [vmem:[%s1221_s5 + $0x94] ss:$8 sps:$4 sm:$0xff]  }
  0x44   : > { %636 = vmatpush1.bf16.msra.mxu0 %v952_v38  ;;  %v988_v0 = vld [vmem:[%s1221_s5 + $0x90] ss:$8 sps:$4 sm:$0xff]   ;;  %v989_v1 = vld [vmem:[%s1221_s5 + $0x84] ss:$8 sps:$4 sm:$0xff]   ;;  %v991_v2 = vld [vmem:[%s1221_s5 + $0x80] ss:$8 sps:$4 sm:$0xff]  }
  0x45   : > { %637 = vmatprep.subr.bf16.mxu0 %v953_v39  ;;  %v429_v4 = vld [vmem:[#allocation2] sm:$0xff]  ;;  %v430_v6 = vld [vmem:[#allocation2 + $0x8] sm:$0xff] }
  0x48   : > { %638 = vmatpush1.bf16.msra.mxu0 %v955_v40 }
  0x49   : > { %639 = vmatprep.subr.bf16.mxu0 %v956_v41 }
  0x4c   : > { %640 = vmatpush1.bf16.msra.mxu0 %v958_v42 }
  0x4d   : > { %641 = vmatprep.subr.bf16.mxu0 %v959_v43 }
  0x50   : > { %642 = vmatpush1.bf16.msra.mxu0 %v961_v44 }
  0x51   : > { %643 = vmatprep.subr.bf16.mxu0 %v962_v45 }
  0x54   : > { %644 = vmatpush1.bf16.msra.mxu0 %v964_v48 }
  0x55   : > { %645 = vmatprep.subr.bf16.mxu0 %v965_v49 }
  0x58   : > { %646 = vmatpush1.bf16.msra.mxu0 %v967_v50 }
  0x59   : > { %647 = vmatprep.subr.bf16.mxu0 %v968_v51 }
  0x5c   : > { %648 = vmatpush2.bf16.msra.mxu0 %v970_v52 }
  0x5d   : > { %649 = vmatprep.subr.bf16.mxu0 %v971_v53 }
  0x60   : > { %650 = vmatpush2.bf16.msra.mxu0 %v973_v54 }
  0x61   : > { %651 = vmatprep.subr.bf16.mxu0 %v974_v55 }
  0x64   : > { %652 = vmatpush2.bf16.msra.mxu0 %v976_v56 }
  0x65   : > { %653 = vmatprep.subr.bf16.mxu0 %v977_v57 }
  0x68   : > { %654 = vmatpush2.bf16.msra.mxu0 %v979_v58 }
  0x69   : > { %655 = vmatprep.subr.bf16.mxu0 %v980_v59 }
  0x6c   : > { %656 = vmatpush2.bf16.msra.mxu0 %v982_v60 }
  0x6d   : > { %657 = vmatprep.subr.bf16.mxu0 %v983_v61 }
  0x70   : > { %658 = vmatpush2.bf16.msra.mxu0 %v985_v62 }
  0x71   : > { %659 = vmatprep.subr.bf16.mxu0 %v986_v63 }
  0x74   : > { %660 = vmatpush2.bf16.msra.mxu0 %v988_v0 }
  0x75   : > { %661 = vmatprep.subr.bf16.mxu0 %v989_v1 }
  0x78   : > { %662 = vmatpush2.bf16.msra.mxu0 %v991_v2 }
  0x7b   : > { %664 = vmatmul.mubr.bf16.vlgmr.msra.gmra.mxu0 %v847_v3 }
 0x13b   : > { %v665_v5 = vpop.f32.mrf.mxu0 }
 0x13c   : > { %v672_v7 = vadd.f32 %v665_v5, %v429_v4 }
 0x13d   : > { %v667_v8 = vpop.f32.mrf.mxu0  ;;  %679 = sbr.rel (%p881_p13) target bundleno = 337 (0x151), region = 78 }
 0x13e   : > { %674 = vst [vmem:[#allocation2] sm:$0xff] %v672_v7  ;;  %v673_v9 = vadd.f32 %v667_v8, %v430_v6 }
 0x13f   : > { %v669_v10 = vpop.f32.mrf.mxu0 }
 0x140   : > { %675 = vst [vmem:[#allocation2 + $0x8] sm:$0xff] %v673_v9 }
 0x141   : > { %v670_v11 = vpop.f32.mrf.mxu0 }
 0x142   : > { %v684_v12 = vlaneseq  ;;  %v682_v14 = vld [vmem:[%s411_s12] sm:$0x3] }
 0x144   : > { %v685_v13 = vshrl.u32 %v684_v12, 7 }
 0x145   : > { %v680_v17 = vld [vmem:[#allocation2] sm:$0xff] }
 0x146   : > { %v686_v15 = vsub.s32 0, %v685_v13  ;;  %v690_v16 = vsub.s32 1, %v685_v13 }
 0x147   : > { %v681_v18 = vld [vmem:[#allocation2 + $0x8] sm:$0xff] }
 0x148   : > { %v687_v19 = vrot.slane %v682_v14, %v686_v15  ;;  %v691_v20 = vrot.slane %v682_v14, %v690_v16 }
 0x14a   : > { %v694_v21 = vadd.f32 %v687_v19, %v680_v17  ;;  %v695_v22 = vadd.f32 %v691_v20, %v681_v18 }
 0x14c   : > { %v696_v23 = vmax.f32 %v694_v21, 0.0  ;;  %v697_v24 = vmax.f32 %v695_v22, 0.0 }
 0x14e   : > { %v886_v25 = vpack.c.bf16 %v697_v24, %v696_v23 }
 0x150   : > { %706 = vst [vmem:[%s1219_s15] sm:$0xff] %v886_v25 }
 0x151 PF: > { %s13_s18 = sadd.s32 1, %s1048_s18   ;;  %s1289_s12 = smov %s1028_s13 }
 0x152   : > { %p10_p0 = scmp.ge.s32.totalorder %s13_s18, 20   ;;  %s1290_s13 = smov %s1122_s25 }
 0x153   : > { %s1291_s14 = smov %s1040_s16  ;;  %s1292_s15 = smov %s1044_s17 }
 0x154   : > { %s1293_s16 = smov %s1296_s19  ;;  %s1294_s17 = smov %s1300_s20 }
 0x155   :  { %12 = sbr.rel (!%p10_p0) target bundleno = 4 (0x4), region = 119 }

// kernel: vgg_base_forward.31
= control target key start
LH: loop header
LB: loop body
LE: loop exit
PB: predicated region body
PF: predicated region fallthrough
CT: control target
= control target key end

     0   :  { %s1524_s12 = smov 0   ;;  %s1526_s13 = smov 0   ;;  %s1835_s0 = inlined_call_operand.vmem [shape: bf16[8,4608], index: 0, kind: input, shape index: {}]   ;;  %s1836_s1 = inlined_call_operand.vmem [shape: bf16[4608,512], index: 1, kind: input, shape index: {}]   ;;  %s1837_s2 = inlined_call_operand.vmem [shape: f32[1,512], index: 2, kind: input, shape index: {}]   ;;  %s1838_s3 = inlined_call_operand.vmem [shape: bf16[8,512], index: 3, kind: output, shape index: {}]  }
   0x1   :  { %s1528_s14 = smov 0   ;;  %s1530_s15 = smov 0  }
   0x2   :  { %s1532_s16 = smov 0   ;;  %s1534_s17 = smov 0  }
   0x3   :  { %s1536_s18 = smov 0  }
   0x4 LB: > { %s25_s19 = sadd.s32 1, %s1493_s16  ;;  %s28_s20 = sadd.s32 1, %s1497_s17  ;;  %s1501_s18 = sphi %s1536_s18, %s13_s18   ;;  %s1497_s17 = sphi %s1534_s17, %s1844_s17   ;;  %s1493_s16 = sphi %s1532_s16, %s1843_s16   ;;  %s1489_s15 = sphi %s1530_s15, %s1842_s15   ;;  %s1485_s14 = sphi %s1528_s14, %s1841_s14   ;;  %s1481_s13 = sphi %s1526_s13, %s1840_s13   ;;  %s1477_s12 = sphi %s1524_s12, %s1839_s12  }
   0x5   : > { %p26_p0 = scmp.ge.s32.totalorder %s25_s19, 9  ;;  %p76_p1 = scmp.ne.s32.totalorder %s1481_s13, %s1477_s12 }
   0x6   : > { %p77_p2 = scmp.eq.s32.totalorder %s1501_s18, 0  ;;  %s69_s24 = sadd.s32 1, %s1481_s13 }
   0x7   : > { %s1846_s19 = smov (%p26_p0, %s25_s19), 0  ;;  %s1848_s20 = smov (!%p26_p0, %s28_s20), %s1497_s17 }
   0x8   : > { %p78_p3 = por %p77_p2, %p76_p1  ;;  %p30_p4 = scmp.ge.s32.totalorder %s1848_s20, 2 }
   0x9   : > { %s64_s21 = ssub.s32 %s1493_s16, %s1846_s19  ;;  %p1202_p6 = scmp.ge.s32.totalorder %s1501_s18, 18 }
   0xa   : > { %s1850_s20 = smov (%p30_p4, %s1848_s20), 0 }
   0xb   : > { %s65_s22 = ssub.s32 %s1497_s17, %s1850_s20  ;;  %156 = sbr.rel (%p1202_p6) target bundleno = 55 (0x37), region = 16 }
   0xc   : > { %s66_s23 = sor.u32 %s65_s22, %s64_s21 }
   0xd   : > { %p67_p5 = scmp.eq.s32.totalorder %s66_s23, 0 }
   0xf   : > { %s1575_s25 = scalar_select %p67_p5, %s1481_s13, %s69_s24  }
  0x10   : > { %172 = sbr.rel (!%p78_p3) target bundleno = 55 (0x37), region = 24  ;;  %s174_s26 = sand.u32 (%p78_p3), 1, %s1481_s13  }
  0x11   : > { %s1205_s27 = sshll.u32 (%p78_p3), %s1497_s17, 1  ;;  %s1203_s28 = sshll.u32 (%p78_p3), %s174_s26, 9 }
  0x12   : > { %s1288_s29 = sshll.u32 (%p78_p3), %s1493_s16, 8  ;;  %s1589_s8 = scalar_lea.vmem (%p78_p3), [#allocation3], %s1203_s28 }
  0x13   : > { %s180_s30 = sadd.s32 (%p78_p3), %s1288_s29, %s1205_s27 }
  0x14   : > { %s1207_s4 = sshll.u32 (%p78_p3), %s180_s30, 2 }
  0x15   : > { %s1584_s7 = scalar_lea.vmem %s1836_s1, %s1207_s4 }
  0x16   : > { %v337_v0 = vld [vmem:[%s1584_s7] sm:$0xff]  ;;  %v339_v1 = vld [vmem:[%s1584_s7 + $0x10] sm:$0xff] }
  0x17   : > { %v341_v2 = vld [vmem:[%s1584_s7 + $0x20] sm:$0xff]  ;;  %338 = vst [vmem:[%s1589_s8] sm:$0xff] %v337_v0  ;;  %340 = vst [vmem:[%s1589_s8 + $0x8] sm:$0xff] %v339_v1  ;;  %v343_v3 = vld [vmem:[%s1584_s7 + $0x30] sm:$0xff] }
  0x18   : > { %342 = vst [vmem:[%s1589_s8 + $0x10] sm:$0xff] %v341_v2  ;;  %v345_v4 = vld [vmem:[%s1584_s7 + $0x40] sm:$0xff]  ;;  %v347_v5 = vld [vmem:[%s1584_s7 + $0x50] sm:$0xff]  ;;  %344 = vst [vmem:[%s1589_s8 + $0x18] sm:$0xff] %v343_v3 }
  0x19   : > { %346 = vst [vmem:[%s1589_s8 + $0x20] sm:$0xff] %v345_v4  ;;  %348 = vst [vmem:[%s1589_s8 + $0x28] sm:$0xff] %v347_v5  ;;  %v349_v6 = vld [vmem:[%s1584_s7 + $0x60] sm:$0xff]  ;;  %v351_v7 = vld [vmem:[%s1584_s7 + $0x70] sm:$0xff] }
  0x1a   : > { %v353_v8 = vld [vmem:[%s1584_s7 + $0x80] sm:$0xff]  ;;  %350 = vst [vmem:[%s1589_s8 + $0x30] sm:$0xff] %v349_v6  ;;  %352 = vst [vmem:[%s1589_s8 + $0x38] sm:$0xff] %v351_v7  ;;  %v355_v9 = vld [vmem:[%s1584_s7 + $0x90] sm:$0xff] }
  0x1b   : > { %354 = vst [vmem:[%s1589_s8 + $0x40] sm:$0xff] %v353_v8  ;;  %v357_v10 = vld [vmem:[%s1584_s7 + $0xa0] sm:$0xff]  ;;  %v359_v11 = vld [vmem:[%s1584_s7 + $0xb0] sm:$0xff]  ;;  %356 = vst [vmem:[%s1589_s8 + $0x48] sm:$0xff] %v355_v9 }
  0x1c   : > { %358 = vst [vmem:[%s1589_s8 + $0x50] sm:$0xff] %v357_v10  ;;  %360 = vst [vmem:[%s1589_s8 + $0x58] sm:$0xff] %v359_v11  ;;  %v361_v12 = vld [vmem:[%s1584_s7 + $0xc0] sm:$0xff]  ;;  %v363_v13 = vld [vmem:[%s1584_s7 + $0xd0] sm:$0xff] }
  0x1d   : > { %v365_v14 = vld [vmem:[%s1584_s7 + $0xe0] sm:$0xff]  ;;  %362 = vst [vmem:[%s1589_s8 + $0x60] sm:$0xff] %v361_v12  ;;  %364 = vst [vmem:[%s1589_s8 + $0x68] sm:$0xff] %v363_v13  ;;  %v367_v15 = vld [vmem:[%s1584_s7 + $0xf0] sm:$0xff] }
  0x1e   : > { %366 = vst [vmem:[%s1589_s8 + $0x70] sm:$0xff] %v365_v14  ;;  %v369_v16 = vld [vmem:[%s1584_s7 + $0x100] sm:$0xff]  ;;  %v371_v17 = vld [vmem:[%s1584_s7 + $0x110] sm:$0xff]  ;;  %368 = vst [vmem:[%s1589_s8 + $0x78] sm:$0xff] %v367_v15 }
  0x1f   : > { %370 = vst [vmem:[%s1589_s8 + $0x80] sm:$0xff] %v369_v16  ;;  %372 = vst [vmem:[%s1589_s8 + $0x88] sm:$0xff] %v371_v17  ;;  %v373_v18 = vld [vmem:[%s1584_s7 + $0x120] sm:$0xff]  ;;  %v375_v19 = vld [vmem:[%s1584_s7 + $0x130] sm:$0xff] }
  0x20   : > { %v377_v20 = vld [vmem:[%s1584_s7 + $0x140] sm:$0xff]  ;;  %374 = vst [vmem:[%s1589_s8 + $0x90] sm:$0xff] %v373_v18  ;;  %376 = vst [vmem:[%s1589_s8 + $0x98] sm:$0xff] %v375_v19  ;;  %v379_v21 = vld [vmem:[%s1584_s7 + $0x150] sm:$0xff] }
  0x21   : > { %378 = vst [vmem:[%s1589_s8 + $0xa0] sm:$0xff] %v377_v20  ;;  %v381_v22 = vld [vmem:[%s1584_s7 + $0x160] sm:$0xff]  ;;  %v383_v23 = vld [vmem:[%s1584_s7 + $0x170] sm:$0xff]  ;;  %380 = vst [vmem:[%s1589_s8 + $0xa8] sm:$0xff] %v379_v21 }
  0x22   : > { %382 = vst [vmem:[%s1589_s8 + $0xb0] sm:$0xff] %v381_v22  ;;  %384 = vst [vmem:[%s1589_s8 + $0xb8] sm:$0xff] %v383_v23  ;;  %v385_v24 = vld [vmem:[%s1584_s7 + $0x180] sm:$0xff]  ;;  %v387_v25 = vld [vmem:[%s1584_s7 + $0x190] sm:$0xff] }
  0x23   : > { %v389_v26 = vld [vmem:[%s1584_s7 + $0x1a0] sm:$0xff]  ;;  %386 = vst [vmem:[%s1589_s8 + $0xc0] sm:$0xff] %v385_v24  ;;  %388 = vst [vmem:[%s1589_s8 + $0xc8] sm:$0xff] %v387_v25  ;;  %v391_v27 = vld [vmem:[%s1584_s7 + $0x1b0] sm:$0xff] }
  0x24   : > { %390 = vst [vmem:[%s1589_s8 + $0xd0] sm:$0xff] %v389_v26  ;;  %v393_v28 = vld [vmem:[%s1584_s7 + $0x1c0] sm:$0xff]  ;;  %v395_v29 = vld [vmem:[%s1584_s7 + $0x1d0] sm:$0xff]  ;;  %392 = vst [vmem:[%s1589_s8 + $0xd8] sm:$0xff] %v391_v27 }
  0x25   : > { %394 = vst [vmem:[%s1589_s8 + $0xe0] sm:$0xff] %v393_v28  ;;  %396 = vst [vmem:[%s1589_s8 + $0xe8] sm:$0xff] %v395_v29  ;;  %v397_v30 = vld [vmem:[%s1584_s7 + $0x1e0] sm:$0xff]  ;;  %v399_v31 = vld [vmem:[%s1584_s7 + $0x1f0] sm:$0xff] }
  0x26   : > { %v401_v32 = vld [vmem:[%s1584_s7 + $0x200] sm:$0xff]  ;;  %398 = vst [vmem:[%s1589_s8 + $0xf0] sm:$0xff] %v397_v30  ;;  %400 = vst [vmem:[%s1589_s8 + $0xf8] sm:$0xff] %v399_v31  ;;  %v403_v33 = vld [vmem:[%s1584_s7 + $0x210] sm:$0xff] }
  0x27   : > { %402 = vst [vmem:[%s1589_s8 + $0x100] sm:$0xff] %v401_v32  ;;  %v405_v34 = vld [vmem:[%s1584_s7 + $0x220] sm:$0xff]  ;;  %v407_v35 = vld [vmem:[%s1584_s7 + $0x230] sm:$0xff]  ;;  %404 = vst [vmem:[%s1589_s8 + $0x108] sm:$0xff] %v403_v33 }
  0x28   : > { %406 = vst [vmem:[%s1589_s8 + $0x110] sm:$0xff] %v405_v34  ;;  %408 = vst [vmem:[%s1589_s8 + $0x118] sm:$0xff] %v407_v35  ;;  %v409_v36 = vld [vmem:[%s1584_s7 + $0x240] sm:$0xff]  ;;  %v411_v37 = vld [vmem:[%s1584_s7 + $0x250] sm:$0xff] }
  0x29   : > { %v413_v38 = vld [vmem:[%s1584_s7 + $0x260] sm:$0xff]  ;;  %410 = vst [vmem:[%s1589_s8 + $0x120] sm:$0xff] %v409_v36  ;;  %412 = vst [vmem:[%s1589_s8 + $0x128] sm:$0xff] %v411_v37  ;;  %v415_v39 = vld [vmem:[%s1584_s7 + $0x270] sm:$0xff] }
  0x2a   : > { %414 = vst [vmem:[%s1589_s8 + $0x130] sm:$0xff] %v413_v38  ;;  %v417_v40 = vld [vmem:[%s1584_s7 + $0x280] sm:$0xff]  ;;  %v419_v41 = vld [vmem:[%s1584_s7 + $0x290] sm:$0xff]  ;;  %416 = vst [vmem:[%s1589_s8 + $0x138] sm:$0xff] %v415_v39 }
  0x2b   : > { %418 = vst [vmem:[%s1589_s8 + $0x140] sm:$0xff] %v417_v40  ;;  %420 = vst [vmem:[%s1589_s8 + $0x148] sm:$0xff] %v419_v41  ;;  %v421_v42 = vld [vmem:[%s1584_s7 + $0x2a0] sm:$0xff]  ;;  %v423_v43 = vld [vmem:[%s1584_s7 + $0x2b0] sm:$0xff] }
  0x2c   : > { %v425_v44 = vld [vmem:[%s1584_s7 + $0x2c0] sm:$0xff]  ;;  %422 = vst [vmem:[%s1589_s8 + $0x150] sm:$0xff] %v421_v42  ;;  %424 = vst [vmem:[%s1589_s8 + $0x158] sm:$0xff] %v423_v43  ;;  %v427_v45 = vld [vmem:[%s1584_s7 + $0x2d0] sm:$0xff] }
  0x2d   : > { %426 = vst [vmem:[%s1589_s8 + $0x160] sm:$0xff] %v425_v44  ;;  %v429_v46 = vld [vmem:[%s1584_s7 + $0x2e0] sm:$0xff]  ;;  %v431_v47 = vld [vmem:[%s1584_s7 + $0x2f0] sm:$0xff]  ;;  %428 = vst [vmem:[%s1589_s8 + $0x168] sm:$0xff] %v427_v45 }
  0x2e   : > { %430 = vst [vmem:[%s1589_s8 + $0x170] sm:$0xff] %v429_v46  ;;  %432 = vst [vmem:[%s1589_s8 + $0x178] sm:$0xff] %v431_v47  ;;  %v433_v48 = vld [vmem:[%s1584_s7 + $0x300] sm:$0xff]  ;;  %v435_v49 = vld [vmem:[%s1584_s7 + $0x310] sm:$0xff] }
  0x2f   : > { %v437_v50 = vld [vmem:[%s1584_s7 + $0x320] sm:$0xff]  ;;  %434 = vst [vmem:[%s1589_s8 + $0x180] sm:$0xff] %v433_v48  ;;  %436 = vst [vmem:[%s1589_s8 + $0x188] sm:$0xff] %v435_v49  ;;  %v439_v51 = vld [vmem:[%s1584_s7 + $0x330] sm:$0xff] }
  0x30   : > { %438 = vst [vmem:[%s1589_s8 + $0x190] sm:$0xff] %v437_v50  ;;  %v441_v52 = vld [vmem:[%s1584_s7 + $0x340] sm:$0xff]  ;;  %v443_v53 = vld [vmem:[%s1584_s7 + $0x350] sm:$0xff]  ;;  %440 = vst [vmem:[%s1589_s8 + $0x198] sm:$0xff] %v439_v51 }
  0x31   : > { %442 = vst [vmem:[%s1589_s8 + $0x1a0] sm:$0xff] %v441_v52  ;;  %444 = vst [vmem:[%s1589_s8 + $0x1a8] sm:$0xff] %v443_v53  ;;  %v445_v54 = vld [vmem:[%s1584_s7 + $0x360] sm:$0xff]  ;;  %v447_v55 = vld [vmem:[%s1584_s7 + $0x370] sm:$0xff] }
  0x32   : > { %v449_v56 = vld [vmem:[%s1584_s7 + $0x380] sm:$0xff]  ;;  %446 = vst [vmem:[%s1589_s8 + $0x1b0] sm:$0xff] %v445_v54  ;;  %448 = vst [vmem:[%s1589_s8 + $0x1b8] sm:$0xff] %v447_v55  ;;  %v451_v57 = vld [vmem:[%s1584_s7 + $0x390] sm:$0xff] }
  0x33   : > { %450 = vst [vmem:[%s1589_s8 + $0x1c0] sm:$0xff] %v449_v56  ;;  %v453_v58 = vld [vmem:[%s1584_s7 + $0x3a0] sm:$0xff]  ;;  %v455_v59 = vld [vmem:[%s1584_s7 + $0x3b0] sm:$0xff]  ;;  %452 = vst [vmem:[%s1589_s8 + $0x1c8] sm:$0xff] %v451_v57 }
  0x34   : > { %454 = vst [vmem:[%s1589_s8 + $0x1d0] sm:$0xff] %v453_v58  ;;  %456 = vst [vmem:[%s1589_s8 + $0x1d8] sm:$0xff] %v455_v59  ;;  %v457_v60 = vld [vmem:[%s1584_s7 + $0x3c0] sm:$0xff]  ;;  %v459_v61 = vld [vmem:[%s1584_s7 + $0x3d0] sm:$0xff] }
  0x35   : > { %v461_v62 = vld [vmem:[%s1584_s7 + $0x3e0] sm:$0xff]  ;;  %458 = vst [vmem:[%s1589_s8 + $0x1e0] sm:$0xff] %v457_v60  ;;  %460 = vst [vmem:[%s1589_s8 + $0x1e8] sm:$0xff] %v459_v61  ;;  %v463_v63 = vld [vmem:[%s1584_s7 + $0x3f0] sm:$0xff] }
  0x36   : > { %462 = vst [vmem:[%s1589_s8 + $0x1f0] sm:$0xff] %v461_v62  ;;  %464 = vst [vmem:[%s1589_s8 + $0x1f8] sm:$0xff] %v463_v63 }
  0x37 PF: > { %p1208_p7 = scmp.ge.s32.totalorder %s1501_s18, 1  ;;  %p477_p8 = scmp.lt.s32.totalorder %s1501_s18, 19 }
  0x39   : > { %p478_p9 = pnand %p1208_p7, %p477_p8 }
  0x3a   : > { %s484_s9 = sand.u32 (!%p478_p9), 1, %s1477_s12   ;;  %s1210_s10 = sshll.u32 (!%p478_p9), %s1485_s14, 2 }
  0x3b   : > { %481 = sbr.rel (%p478_p9) target bundleno = 355 (0x163), region = 66  ;;  %s1209_s11 = sshll.u32 (!%p478_p9), %s484_s9, 9 }
  0x3c   : > { %p527_p10 = scmp.lt.s32.totalorder (!%p478_p9), %s1210_s10, 35  ;;  %s1212_s21 = sshll.u32 (!%p478_p9), %s1489_s15, 1 }
  0x3d   : > { %p537_p11 = scmp.lt.s32.totalorder (!%p478_p9), %s1212_s21, 3  ;;  %s1738_s5 = scalar_lea.vmem (!%p478_p9), [#allocation3], %s1209_s11 }
  0x3e   : > { %p1215_p12 = scmp.ne.s32.totalorder (!%p478_p9), %s1485_s14, 0 }
  0x40   : > { %s1852_s10 = smov (!%p527_p10, %s1210_s10), 35  ;;  %s1854_s21 = smov (!%p537_p11, %s1212_s21), 3 }
  0x41   : > { %s1211_s22 = sshll.u32 %s1852_s10, 2  ;;  %s539_s12 = scalar_lea.vmem %s1837_s2, %s1854_s21 }
  0x42   : > { %s1724_s26 = scalar_lea.vmem %s1835_s0, %s1211_s22  ;;  %s1214_s29 = sshll.u32 %s1854_s21, 2 }
  0x43   : > { %s1736_s15 = scalar_lea.vmem %s1838_s3, %s1214_s29  ;;  %554 = sbr.rel (%p1215_p12) target bundleno = 74 (0x4a), region = 74 }
  0x48   : > { %v1503_v0 = vmov 0.0  }
  0x49   : > { %555 = vst [vmem:[#allocation2] sm:$0xff] %v1503_v0  ;;  %556 = vst [vmem:[#allocation2 + $0x8] sm:$0xff] %v1503_v0 }
  0x4a PF: > { %v1347_v1 = vld [vmem:[%s1738_s5 + $0x74] ss:$8 sps:$4 sm:$0xff]   ;;  %v1351_v3 = vld [vmem:[%s1738_s5 + $0x70] ss:$8 sps:$4 sm:$0xff]   ;;  %v1353_v5 = vld [vmem:[%s1738_s5 + $0x64] ss:$8 sps:$4 sm:$0xff]  }
  0x4b   : > { %v1349_v2 = vld [vmem:[%s1738_s5 + $0x174] ss:$8 sps:$4 sm:$0xff]   ;;  %959 = vmatprep.subr.bf16.mxu0 %v1347_v1  ;;  %v1352_v4 = vld [vmem:[%s1738_s5 + $0x170] ss:$8 sps:$4 sm:$0xff]   ;;  %v1355_v6 = vld [vmem:[%s1738_s5 + $0x164] ss:$8 sps:$4 sm:$0xff]  }
  0x4c   : > { %1000 = vmatprep.subr.bf16.mxu1 %v1349_v2  ;;  %960 = vmatpush1.bf16.msra.mxu0 %v1351_v3  ;;  %v1357_v7 = vld [vmem:[%s1738_s5 + $0x60] ss:$8 sps:$4 sm:$0xff]   ;;  %v1359_v9 = vld [vmem:[%s1738_s5 + $0x54] ss:$8 sps:$4 sm:$0xff]   ;;  %v1363_v11 = vld [vmem:[%s1738_s5 + $0x50] ss:$8 sps:$4 sm:$0xff]  }
  0x4d   : > { %1001 = vmatpush1.bf16.msra.mxu1 %v1352_v4  ;;  %961 = vmatprep.subr.bf16.mxu0 %v1353_v5  ;;  %v1358_v8 = vld [vmem:[%s1738_s5 + $0x160] ss:$8 sps:$4 sm:$0xff]   ;;  %v1361_v10 = vld [vmem:[%s1738_s5 + $0x154] ss:$8 sps:$4 sm:$0xff]   ;;  %v1364_v12 = vld [vmem:[%s1738_s5 + $0x150] ss:$8 sps:$4 sm:$0xff]  }
  0x4e   : > { %1002 = vmatprep.subr.bf16.mxu1 %v1355_v6  ;;  %v1365_v13 = vld [vmem:[%s1738_s5 + $0x44] ss:$8 sps:$4 sm:$0xff]   ;;  %v1369_v15 = vld [vmem:[%s1738_s5 + $0x40] ss:$8 sps:$4 sm:$0xff]   ;;  %v1371_v17 = vld [vmem:[%s1738_s5 + $0x34] ss:$8 sps:$4 sm:$0xff]  }
  0x4f   : > { %v1367_v14 = vld [vmem:[%s1738_s5 + $0x144] ss:$8 sps:$4 sm:$0xff]   ;;  %v1370_v16 = vld [vmem:[%s1738_s5 + $0x140] ss:$8 sps:$4 sm:$0xff]   ;;  %v1373_v18 = vld [vmem:[%s1738_s5 + $0x134] ss:$8 sps:$4 sm:$0xff]  }
  0x50   : > { %962 = vmatpush1.bf16.msra.mxu0 %v1357_v7  ;;  %v1375_v19 = vld [vmem:[%s1738_s5 + $0x30] ss:$8 sps:$4 sm:$0xff]   ;;  %v1377_v21 = vld [vmem:[%s1738_s5 + $0x24] ss:$8 sps:$4 sm:$0xff]   ;;  %v1381_v23 = vld [vmem:[%s1738_s5 + $0x20] ss:$8 sps:$4 sm:$0xff]  }
  0x51   : > { %1003 = vmatpush1.bf16.msra.mxu1 %v1358_v8  ;;  %963 = vmatprep.subr.bf16.mxu0 %v1359_v9  ;;  %v1376_v20 = vld [vmem:[%s1738_s5 + $0x130] ss:$8 sps:$4 sm:$0xff]   ;;  %v1379_v22 = vld [vmem:[%s1738_s5 + $0x124] ss:$8 sps:$4 sm:$0xff]   ;;  %v1382_v24 = vld [vmem:[%s1738_s5 + $0x120] ss:$8 sps:$4 sm:$0xff]  }
  0x52   : > { %1004 = vmatprep.subr.bf16.mxu1 %v1361_v10  ;;  %v1383_v25 = vld [vmem:[%s1738_s5 + $0x14] ss:$8 sps:$4 sm:$0xff]   ;;  %v1387_v27 = vld [vmem:[%s1738_s5 + $0x10] ss:$8 sps:$4 sm:$0xff]   ;;  %v1389_v29 = vld [vmem:[%s1738_s5 + $0x4] ss:$8 sps:$4 sm:$0xff]  }
  0x53   : > { %v1385_v26 = vld [vmem:[%s1738_s5 + $0x114] ss:$8 sps:$4 sm:$0xff]   ;;  %v1388_v28 = vld [vmem:[%s1738_s5 + $0x110] ss:$8 sps:$4 sm:$0xff]   ;;  %v1391_v30 = vld [vmem:[%s1738_s5 + $0x104] ss:$8 sps:$4 sm:$0xff]  }
  0x54   : > { %964 = vmatpush1.bf16.msra.mxu0 %v1363_v11  ;;  %v1393_v31 = vld [vmem:[%s1738_s5] ss:$8 sps:$4 sm:$0xff]   ;;  %v1395_v33 = vld [vmem:[%s1738_s5 + $0xf4] ss:$8 sps:$4 sm:$0xff]   ;;  %v1399_v35 = vld [vmem:[%s1738_s5 + $0xf0] ss:$8 sps:$4 sm:$0xff]  }
  0x55   : > { %1005 = vmatpush1.bf16.msra.mxu1 %v1364_v12  ;;  %965 = vmatprep.subr.bf16.mxu0 %v1365_v13  ;;  %v1394_v32 = vld [vmem:[%s1738_s5 + $0x100] ss:$8 sps:$4 sm:$0xff]   ;;  %v1397_v34 = vld [vmem:[%s1738_s5 + $0x1f4] ss:$8 sps:$4 sm:$0xff]   ;;  %v1400_v36 = vld [vmem:[%s1738_s5 + $0x1f0] ss:$8 sps:$4 sm:$0xff]  }
  0x56   : > { %1006 = vmatprep.subr.bf16.mxu1 %v1367_v14  ;;  %v1401_v37 = vld [vmem:[%s1738_s5 + $0xe4] ss:$8 sps:$4 sm:$0xff]   ;;  %v1405_v39 = vld [vmem:[%s1738_s5 + $0xe0] ss:$8 sps:$4 sm:$0xff]   ;;  %v1407_v41 = vld [vmem:[%s1738_s5 + $0xd4] ss:$8 sps:$4 sm:$0xff]  }
  0x57   : > { %v1403_v38 = vld [vmem:[%s1738_s5 + $0x1e4] ss:$8 sps:$4 sm:$0xff]   ;;  %v1406_v40 = vld [vmem:[%s1738_s5 + $0x1e0] ss:$8 sps:$4 sm:$0xff]   ;;  %v1409_v42 = vld [vmem:[%s1738_s5 + $0x1d4] ss:$8 sps:$4 sm:$0xff]  }
  0x58   : > { %966 = vmatpush1.bf16.msra.mxu0 %v1369_v15  ;;  %v1411_v43 = vld [vmem:[%s1738_s5 + $0xd0] ss:$8 sps:$4 sm:$0xff]   ;;  %v1413_v45 = vld [vmem:[%s1738_s5 + $0xc4] ss:$8 sps:$4 sm:$0xff]   ;;  %v1417_v50 = vld [vmem:[%s1738_s5 + $0xc0] ss:$8 sps:$4 sm:$0xff]  }
  0x59   : > { %1007 = vmatpush1.bf16.msra.mxu1 %v1370_v16  ;;  %967 = vmatprep.subr.bf16.mxu0 %v1371_v17  ;;  %v1412_v44 = vld [vmem:[%s1738_s5 + $0x1d0] ss:$8 sps:$4 sm:$0xff]   ;;  %v1415_v46 = vld [vmem:[%s1738_s5 + $0x1c4] ss:$8 sps:$4 sm:$0xff]   ;;  %v1418_v51 = vld [vmem:[%s1738_s5 + $0x1c0] ss:$8 sps:$4 sm:$0xff]  }
  0x5a   : > { %1008 = vmatprep.subr.bf16.mxu1 %v1373_v18  ;;  %v559_v47 = vld [vmem:[%s1724_s26] sm:$0xff]  ;;  %v560_v49 = vld [vmem:[%s1724_s26 + $0x8] sm:$0xff]  ;;  %v1425_v57 = vld [vmem:[%s1738_s5 + $0xa4] ss:$8 sps:$4 sm:$0xff]   ;;  %p1284_p13 = scmp.ne.s32.totalorder %s1485_s14, 8 }
  0x5b   : > { %v1217_v48 = vcombine.high %v559_v47, %v559_v47  ;;  %v1219_v52 = vcombine.high %v560_v49, %v560_v49  ;;  %v1419_v53 = vld [vmem:[%s1738_s5 + $0xb4] ss:$8 sps:$4 sm:$0xff]   ;;  %v1423_v55 = vld [vmem:[%s1738_s5 + $0xb0] ss:$8 sps:$4 sm:$0xff]   ;;  %v1427_v58 = vld [vmem:[%s1738_s5 + $0x1a4] ss:$8 sps:$4 sm:$0xff]   ;;  %v1216_v5 = vcombine.low %v559_v47, %v559_v47  ;;  %v1218_v6 = vcombine.low %v560_v49, %v560_v49 }
  0x5c   : > { %968 = vmatpush1.bf16.msra.mxu0 %v1375_v19  ;;  %v1421_v54 = vld [vmem:[%s1738_s5 + $0x1b4] ss:$8 sps:$4 sm:$0xff]   ;;  %v1424_v56 = vld [vmem:[%s1738_s5 + $0x1b0] ss:$8 sps:$4 sm:$0xff]   ;;  %v1429_v59 = vld [vmem:[%s1738_s5 + $0xa0] ss:$8 sps:$4 sm:$0xff]  }
  0x5d   : > { %1009 = vmatpush1.bf16.msra.mxu1 %v1376_v20  ;;  %969 = vmatprep.subr.bf16.mxu0 %v1377_v21  ;;  %v1430_v60 = vld [vmem:[%s1738_s5 + $0x1a0] ss:$8 sps:$4 sm:$0xff]   ;;  %v1431_v61 = vld [vmem:[%s1738_s5 + $0x94] ss:$8 sps:$4 sm:$0xff]   ;;  %v1435_v63 = vld [vmem:[%s1738_s5 + $0x90] ss:$8 sps:$4 sm:$0xff]  }
  0x5e   : > { %1010 = vmatprep.subr.bf16.mxu1 %v1379_v22  ;;  %991 = vmatprep.mubr.bf16.mxu0 %v1217_v48  ;;  %v1433_v62 = vld [vmem:[%s1738_s5 + $0x194] ss:$8 sps:$4 sm:$0xff]   ;;  %v1436_v0 = vld [vmem:[%s1738_s5 + $0x190] ss:$8 sps:$4 sm:$0xff]   ;;  %v1437_v1 = vld [vmem:[%s1738_s5 + $0x84] ss:$8 sps:$4 sm:$0xff]  }
  0x5f   : > { %1032 = vmatprep.mubr.bf16.mxu1 %v1219_v52  ;;  %v1439_v2 = vld [vmem:[%s1738_s5 + $0x184] ss:$8 sps:$4 sm:$0xff]   ;;  %v1441_v3 = vld [vmem:[%s1738_s5 + $0x80] ss:$8 sps:$4 sm:$0xff]   ;;  %v557_v8 = vld [vmem:[#allocation2] sm:$0xff] }
  0x60   : > { %970 = vmatpush1.bf16.msra.mxu0 %v1381_v23  ;;  %v1442_v4 = vld [vmem:[%s1738_s5 + $0x180] ss:$8 sps:$4 sm:$0xff]   ;;  %v558_v12 = vld [vmem:[#allocation2 + $0x8] sm:$0xff] }
  0x61   : > { %1011 = vmatpush1.bf16.msra.mxu1 %v1382_v24  ;;  %971 = vmatprep.subr.bf16.mxu0 %v1383_v25 }
  0x62   : > { %1012 = vmatprep.subr.bf16.mxu1 %v1385_v26 }
  0x64   : > { %972 = vmatpush1.bf16.msra.mxu0 %v1387_v27 }
  0x65   : > { %1013 = vmatpush1.bf16.msra.mxu1 %v1388_v28  ;;  %973 = vmatprep.subr.bf16.mxu0 %v1389_v29 }
  0x66   : > { %1014 = vmatprep.subr.bf16.mxu1 %v1391_v30 }
  0x68   : > { %974 = vmatpush1.bf16.msra.mxu0 %v1393_v31 }
  0x69   : > { %1015 = vmatpush1.bf16.msra.mxu1 %v1394_v32  ;;  %975 = vmatprep.subr.bf16.mxu0 %v1395_v33 }
  0x6a   : > { %1016 = vmatprep.subr.bf16.mxu1 %v1397_v34 }
  0x6c   : > { %976 = vmatpush2.bf16.msra.mxu0 %v1399_v35 }
  0x6d   : > { %1017 = vmatpush2.bf16.msra.mxu1 %v1400_v36  ;;  %977 = vmatprep.subr.bf16.mxu0 %v1401_v37 }
  0x6e   : > { %1018 = vmatprep.subr.bf16.mxu1 %v1403_v38 }
  0x70   : > { %978 = vmatpush2.bf16.msra.mxu0 %v1405_v39 }
  0x71   : > { %1019 = vmatpush2.bf16.msra.mxu1 %v1406_v40  ;;  %979 = vmatprep.subr.bf16.mxu0 %v1407_v41 }
  0x72   : > { %1020 = vmatprep.subr.bf16.mxu1 %v1409_v42 }
  0x74   : > { %980 = vmatpush2.bf16.msra.mxu0 %v1411_v43 }
  0x75   : > { %1021 = vmatpush2.bf16.msra.mxu1 %v1412_v44  ;;  %981 = vmatprep.subr.bf16.mxu0 %v1413_v45 }
  0x76   : > { %1022 = vmatprep.subr.bf16.mxu1 %v1415_v46 }
  0x78   : > { %982 = vmatpush2.bf16.msra.mxu0 %v1417_v50 }
  0x79   : > { %1023 = vmatpush2.bf16.msra.mxu1 %v1418_v51  ;;  %983 = vmatprep.subr.bf16.mxu0 %v1419_v53 }
  0x7a   : > { %1024 = vmatprep.subr.bf16.mxu1 %v1421_v54 }
  0x7c   : > { %984 = vmatpush2.bf16.msra.mxu0 %v1423_v55 }
  0x7d   : > { %1025 = vmatpush2.bf16.msra.mxu1 %v1424_v56  ;;  %985 = vmatprep.subr.bf16.mxu0 %v1425_v57 }
  0x7e   : > { %1026 = vmatprep.subr.bf16.mxu1 %v1427_v58 }
  0x80   : > { %986 = vmatpush2.bf16.msra.mxu0 %v1429_v59 }
  0x81   : > { %1027 = vmatpush2.bf16.msra.mxu1 %v1430_v60  ;;  %987 = vmatprep.subr.bf16.mxu0 %v1431_v61 }
  0x82   : > { %1028 = vmatprep.subr.bf16.mxu1 %v1433_v62 }
  0x84   : > { %988 = vmatpush2.bf16.msra.mxu0 %v1435_v63 }
  0x85   : > { %1029 = vmatpush2.bf16.msra.mxu1 %v1436_v0  ;;  %989 = vmatprep.subr.bf16.mxu0 %v1437_v1 }
  0x86   : > { %1030 = vmatprep.subr.bf16.mxu1 %v1439_v2 }
  0x88   : > { %990 = vmatpush2.bf16.msra.mxu0 %v1441_v3 }
  0x89   : > { %1031 = vmatpush2.bf16.msra.mxu1 %v1442_v4 }
  0x8b   : > { %992 = vmatmul.mubr.bf16.vlgmr.msra.gmra.mxu0 %v1216_v5 }
  0x8c   : > { %1033 = vmatmul.mubr.bf16.vlgmr.msra.gmra.mxu1 %v1218_v6 }
 0x14b   : > { %v993_v7 = vpop.f32.mrf.mxu0 }
 0x14c   : > { %v1034_v9 = vpop.f32.mrf.mxu1 }
 0x14d   : > { %v1035_v10 = vadd.f32 %v1034_v9, %v993_v7  ;;  %v995_v11 = vpop.f32.mrf.mxu0 }
 0x14e   : > { %v1036_v13 = vpop.f32.mrf.mxu1 }
 0x14f   : > { %v1041_v14 = vadd.f32 %v1035_v10, %v557_v8  ;;  %v1037_v15 = vadd.f32 %v1036_v13, %v995_v11  ;;  %v997_v16 = vpop.f32.mrf.mxu0  ;;  %1048 = sbr.rel (%p1284_p13) target bundleno = 355 (0x163), region = 78 }
 0x150   : > { %v1038_v17 = vpop.f32.mrf.mxu1 }
 0x151   : > { %1043 = vst [vmem:[#allocation2] sm:$0xff] %v1041_v14  ;;  %v1042_v18 = vadd.f32 %v1037_v15, %v558_v12  ;;  %v998_v19 = vpop.f32.mrf.mxu0 }
 0x152   : > { %v1039_v20 = vpop.f32.mrf.mxu1 }
 0x153   : > { %1044 = vst [vmem:[#allocation2 + $0x8] sm:$0xff] %v1042_v18 }
 0x154   : > { %v1053_v21 = vlaneseq  ;;  %v1051_v23 = vld [vmem:[%s539_s12] sm:$0x3] }
 0x156   : > { %v1054_v22 = vshrl.u32 %v1053_v21, 7 }
 0x158   : > { %v1055_v24 = vsub.s32 0, %v1054_v22  ;;  %v1059_v25 = vsub.s32 1, %v1054_v22  ;;  %v1049_v26 = vld [vmem:[#allocation2] sm:$0xff] }
 0x15a   : > { %v1050_v27 = vld [vmem:[#allocation2 + $0x8] sm:$0xff]  ;;  %v1056_v28 = vrot.slane %v1051_v23, %v1055_v24  ;;  %v1060_v29 = vrot.slane %v1051_v23, %v1059_v25 }
 0x15c   : > { %v1063_v30 = vadd.f32 %v1056_v28, %v1049_v26  ;;  %v1064_v31 = vadd.f32 %v1060_v29, %v1050_v27 }
 0x15e   : > { %v1065_v32 = vmax.f32 %v1063_v30, 0.0  ;;  %v1066_v33 = vmax.f32 %v1064_v31, 0.0 }
 0x160   : > { %v1289_v34 = vpack.c.bf16 %v1066_v33, %v1065_v32 }
 0x162   : > { %1075 = vst [vmem:[%s1736_s15] sm:$0xff] %v1289_v34 }
 0x163 PF: > { %s13_s18 = sadd.s32 1, %s1501_s18   ;;  %s1839_s12 = smov %s1481_s13 }
 0x164   : > { %p10_p0 = scmp.ge.s32.totalorder %s13_s18, 20   ;;  %s1840_s13 = smov %s1575_s25 }
 0x165   : > { %s1841_s14 = smov %s1493_s16  ;;  %s1842_s15 = smov %s1497_s17 }
 0x166   : > { %s1843_s16 = smov %s1846_s19  ;;  %s1844_s17 = smov %s1850_s20 }
 0x167   :  { %12 = sbr.rel (!%p10_p0) target bundleno = 4 (0x4), region = 119 }

// kernel: vgg_base_forward.37
= control target key start
LH: loop header
LB: loop body
LE: loop exit
PB: predicated region body
PF: predicated region fallthrough
CT: control target
= control target key end

     0   :  { %s182_s0 = inlined_call_operand.vmem [shape: bf16[8,512], index: 0, kind: input, shape index: {}, may-alias: {0,1,2,3,5,6,7,8}]   ;;  %s183_s1 = inlined_call_operand.vmem [shape: bf16[8,512], index: 1, kind: input, shape index: {}, may-alias: {0,1,2,3,5,6,7,8}]   ;;  %s184_s2 = inlined_call_operand.vmem [shape: bf16[8,512], index: 2, kind: input, shape index: {}, may-alias: {0,1,2,3,5,6,7,8}]   ;;  %s185_s3 = inlined_call_operand.vmem [shape: bf16[8,512], index: 3, kind: input, shape index: {}, may-alias: {0,1,2,3,5,6,7,8}]   ;;  %s186_s4 = inlined_call_operand.vmem [shape: bf16[8,512], index: 4, kind: input, shape index: {}]   ;;  %s187_s5 = inlined_call_operand.vmem [shape: bf16[8,512], index: 5, kind: input, shape index: {}, may-alias: {0,1,2,3,5,6,7,8}]   ;;  %s188_s6 = inlined_call_operand.vmem [shape: bf16[8,512], index: 6, kind: input, shape index: {}, may-alias: {0,1,2,3,5,6,7,8}]   ;;  %s189_s7 = inlined_call_operand.vmem [shape: bf16[8,512], index: 7, kind: input, shape index: {}, may-alias: {0,1,2,3,5,6,7,8}]   ;;  %s190_s8 = inlined_call_operand.vmem [shape: bf16[8,512], index: 8, kind: input, shape index: {}, may-alias: {0,1,2,3,5,6,7,8}]   ;;  %s191_s9 = inlined_call_operand.vmem [shape: bf16[8,512], index: 9, kind: output, shape index: {}]  }
   0x1   :  { %v32_v0 = vld [vmem:[%s182_s0] sm:$0xff]  ;;  %v33_v6 = vld [vmem:[%s182_s0 + $0x8] sm:$0xff] }
   0x2   :  { %v34_v1 = vld [vmem:[%s183_s1] sm:$0xff]  ;;  %v35_v7 = vld [vmem:[%s183_s1 + $0x8] sm:$0xff] }
   0x3   :  { %v38_v2 = vld [vmem:[%s184_s2] sm:$0xff]  ;;  %v36_v3 = vmax.bf16 %v34_v1, %v32_v0  ;;  %v39_v8 = vld [vmem:[%s184_s2 + $0x8] sm:$0xff]  ;;  %v37_v10 = vmax.bf16 %v35_v7, %v33_v6 }
   0x4   :  { %v42_v4 = vld [vmem:[%s185_s3] sm:$0xff]  ;;  %v43_v12 = vld [vmem:[%s185_s3 + $0x8] sm:$0xff] }
   0x5   :  { %v40_v5 = vmax.bf16 %v38_v2, %v36_v3  ;;  %v46_v9 = vld [vmem:[%s186_s4] sm:$0xff]  ;;  %v41_v14 = vmax.bf16 %v39_v8, %v37_v10  ;;  %v47_v16 = vld [vmem:[%s186_s4 + $0x8] sm:$0xff] }
   0x6   :  { %v50_v13 = vld [vmem:[%s187_s5] sm:$0xff]  ;;  %v51_v20 = vld [vmem:[%s187_s5 + $0x8] sm:$0xff] }
   0x7   :  { %v44_v11 = vmax.bf16 %v42_v4, %v40_v5  ;;  %v54_v17 = vld [vmem:[%s188_s6] sm:$0xff]  ;;  %v45_v18 = vmax.bf16 %v43_v12, %v41_v14  ;;  %v55_v24 = vld [vmem:[%s188_s6 + $0x8] sm:$0xff] }
   0x8   :  { %v58_v21 = vld [vmem:[%s189_s7] sm:$0xff]  ;;  %v59_v28 = vld [vmem:[%s189_s7 + $0x8] sm:$0xff] }
   0x9   :  { %v48_v15 = vmax.bf16 %v46_v9, %v44_v11  ;;  %v49_v22 = vmax.bf16 %v47_v16, %v45_v18  ;;  %v62_v25 = vld [vmem:[%s190_s8] sm:$0xff]  ;;  %v63_v31 = vld [vmem:[%s190_s8 + $0x8] sm:$0xff] }
   0xb   :  { %v52_v19 = vmax.bf16 %v50_v13, %v48_v15  ;;  %v53_v26 = vmax.bf16 %v51_v20, %v49_v22 }
   0xd   :  { %v56_v23 = vmax.bf16 %v54_v17, %v52_v19  ;;  %v57_v29 = vmax.bf16 %v55_v24, %v53_v26 }
   0xf   :  { %v60_v27 = vmax.bf16 %v58_v21, %v56_v23  ;;  %v61_v32 = vmax.bf16 %v59_v28, %v57_v29 }
  0x11   :  { %v64_v30 = vmax.bf16 %v62_v25, %v60_v27  ;;  %v65_v33 = vmax.bf16 %v63_v31, %v61_v32 }
  0x13   :  { %66 = vst [vmem:[%s191_s9] sm:$0xff] %v64_v30  ;;  %67 = vst [vmem:[%s191_s9 + $0x8] sm:$0xff] %v65_v33 }

// kernel: vgg_base_forward.38
= control target key start
LH: loop header
LB: loop body
LE: loop exit
PB: predicated region body
PF: predicated region fallthrough
CT: control target
= control target key end

     0   :  { %s1524_s12 = smov 0   ;;  %s1526_s13 = smov 0   ;;  %s1835_s0 = inlined_call_operand.vmem [shape: bf16[8,4608], index: 0, kind: input, shape index: {}]   ;;  %s1836_s1 = inlined_call_operand.vmem [shape: bf16[4608,1024], index: 1, kind: input, shape index: {}]   ;;  %s1837_s2 = inlined_call_operand.vmem [shape: f32[1,1024], index: 2, kind: input, shape index: {}]   ;;  %s1838_s3 = inlined_call_operand.vmem [shape: bf16[8,1024], index: 3, kind: output, shape index: {}]  }
   0x1   :  { %s1528_s14 = smov 0   ;;  %s1530_s15 = smov 0  }
   0x2   :  { %s1532_s16 = smov 0   ;;  %s1534_s17 = smov 0  }
   0x3   :  { %s1536_s18 = smov 0  }
   0x4 LB: > { %s25_s19 = sadd.s32 1, %s1493_s16  ;;  %s28_s20 = sadd.s32 1, %s1497_s17  ;;  %s1501_s18 = sphi %s1536_s18, %s13_s18   ;;  %s1497_s17 = sphi %s1534_s17, %s1844_s17   ;;  %s1493_s16 = sphi %s1532_s16, %s1843_s16   ;;  %s1489_s15 = sphi %s1530_s15, %s1842_s15   ;;  %s1485_s14 = sphi %s1528_s14, %s1841_s14   ;;  %s1481_s13 = sphi %s1526_s13, %s1840_s13   ;;  %s1477_s12 = sphi %s1524_s12, %s1839_s12  }
   0x5   : > { %p26_p0 = scmp.ge.s32.totalorder %s25_s19, 9  ;;  %p76_p1 = scmp.ne.s32.totalorder %s1481_s13, %s1477_s12 }
   0x6   : > { %p77_p2 = scmp.eq.s32.totalorder %s1501_s18, 0  ;;  %s69_s24 = sadd.s32 1, %s1481_s13 }
   0x7   : > { %s1846_s19 = smov (%p26_p0, %s25_s19), 0  ;;  %s1848_s20 = smov (!%p26_p0, %s28_s20), %s1497_s17 }
   0x8   : > { %p78_p3 = por %p77_p2, %p76_p1  ;;  %p30_p4 = scmp.ge.s32.totalorder %s1848_s20, 4 }
   0x9   : > { %s64_s21 = ssub.s32 %s1493_s16, %s1846_s19  ;;  %p1202_p6 = scmp.ge.s32.totalorder %s1501_s18, 36 }
   0xa   : > { %s1850_s20 = smov (%p30_p4, %s1848_s20), 0 }
   0xb   : > { %s65_s22 = ssub.s32 %s1497_s17, %s1850_s20  ;;  %156 = sbr.rel (%p1202_p6) target bundleno = 87 (0x57), region = 16 }
   0xc   : > { %s66_s23 = sor.u32 %s65_s22, %s64_s21 }
   0xd   : > { %p67_p5 = scmp.eq.s32.totalorder %s66_s23, 0 }
   0xf   : > { %s1575_s25 = scalar_select %p67_p5, %s1481_s13, %s69_s24  }
  0x10   : > { %172 = sbr.rel (!%p78_p3) target bundleno = 87 (0x57), region = 24  ;;  %s174_s26 = sand.u32 (%p78_p3), 1, %s1481_s13  }
  0x11   : > { %s1205_s27 = sshll.u32 (%p78_p3), %s1497_s17, 1  ;;  %s1203_s28 = sshll.u32 (%p78_p3), %s174_s26, 9 }
  0x12   : > { %s1288_s29 = sshll.u32 (%p78_p3), %s1493_s16, 9  ;;  %s1589_s8 = scalar_lea.vmem (%p78_p3), [#allocation3], %s1203_s28 }
  0x13   : > { %s180_s30 = sadd.s32 (%p78_p3), %s1288_s29, %s1205_s27 }
  0x14   : > { %s1207_s4 = sshll.u32 (%p78_p3), %s180_s30, 2 }
  0x15   : > { %s1584_s7 = scalar_lea.vmem %s1836_s1, %s1207_s4 }
  0x16   : > { %v337_v0 = vld [vmem:[%s1584_s7] sm:$0xff] }
  0x17   : > { %v339_v1 = vld [vmem:[%s1584_s7 + $0x20] sm:$0xff]  ;;  %338 = vst [vmem:[%s1589_s8] sm:$0xff] %v337_v0 }
  0x18   : > { %v341_v2 = vld [vmem:[%s1584_s7 + $0x40] sm:$0xff]  ;;  %340 = vst [vmem:[%s1589_s8 + $0x8] sm:$0xff] %v339_v1 }
  0x19   : > { %342 = vst [vmem:[%s1589_s8 + $0x10] sm:$0xff] %v341_v2  ;;  %v343_v3 = vld [vmem:[%s1584_s7 + $0x60] sm:$0xff] }
  0x1a   : > { %v345_v4 = vld [vmem:[%s1584_s7 + $0x80] sm:$0xff]  ;;  %344 = vst [vmem:[%s1589_s8 + $0x18] sm:$0xff] %v343_v3 }
  0x1b   : > { %v347_v5 = vld [vmem:[%s1584_s7 + $0xa0] sm:$0xff]  ;;  %346 = vst [vmem:[%s1589_s8 + $0x20] sm:$0xff] %v345_v4 }
  0x1c   : > { %348 = vst [vmem:[%s1589_s8 + $0x28] sm:$0xff] %v347_v5  ;;  %v349_v6 = vld [vmem:[%s1584_s7 + $0xc0] sm:$0xff] }
  0x1d   : > { %v351_v7 = vld [vmem:[%s1584_s7 + $0xe0] sm:$0xff]  ;;  %350 = vst [vmem:[%s1589_s8 + $0x30] sm:$0xff] %v349_v6 }
  0x1e   : > { %v353_v8 = vld [vmem:[%s1584_s7 + $0x100] sm:$0xff]  ;;  %352 = vst [vmem:[%s1589_s8 + $0x38] sm:$0xff] %v351_v7 }
  0x1f   : > { %354 = vst [vmem:[%s1589_s8 + $0x40] sm:$0xff] %v353_v8  ;;  %v355_v9 = vld [vmem:[%s1584_s7 + $0x120] sm:$0xff] }
  0x20   : > { %v357_v10 = vld [vmem:[%s1584_s7 + $0x140] sm:$0xff]  ;;  %356 = vst [vmem:[%s1589_s8 + $0x48] sm:$0xff] %v355_v9 }
  0x21   : > { %v359_v11 = vld [vmem:[%s1584_s7 + $0x160] sm:$0xff]  ;;  %358 = vst [vmem:[%s1589_s8 + $0x50] sm:$0xff] %v357_v10 }
  0x22   : > { %360 = vst [vmem:[%s1589_s8 + $0x58] sm:$0xff] %v359_v11  ;;  %v361_v12 = vld [vmem:[%s1584_s7 + $0x180] sm:$0xff] }
  0x23   : > { %v363_v13 = vld [vmem:[%s1584_s7 + $0x1a0] sm:$0xff]  ;;  %362 = vst [vmem:[%s1589_s8 + $0x60] sm:$0xff] %v361_v12 }
  0x24   : > { %v365_v14 = vld [vmem:[%s1584_s7 + $0x1c0] sm:$0xff]  ;;  %364 = vst [vmem:[%s1589_s8 + $0x68] sm:$0xff] %v363_v13 }
  0x25   : > { %366 = vst [vmem:[%s1589_s8 + $0x70] sm:$0xff] %v365_v14  ;;  %v367_v15 = vld [vmem:[%s1584_s7 + $0x1e0] sm:$0xff] }
  0x26   : > { %v369_v16 = vld [vmem:[%s1584_s7 + $0x200] sm:$0xff]  ;;  %368 = vst [vmem:[%s1589_s8 + $0x78] sm:$0xff] %v367_v15 }
  0x27   : > { %v371_v17 = vld [vmem:[%s1584_s7 + $0x220] sm:$0xff]  ;;  %370 = vst [vmem:[%s1589_s8 + $0x80] sm:$0xff] %v369_v16 }
  0x28   : > { %372 = vst [vmem:[%s1589_s8 + $0x88] sm:$0xff] %v371_v17  ;;  %v373_v18 = vld [vmem:[%s1584_s7 + $0x240] sm:$0xff] }
  0x29   : > { %v375_v19 = vld [vmem:[%s1584_s7 + $0x260] sm:$0xff]  ;;  %374 = vst [vmem:[%s1589_s8 + $0x90] sm:$0xff] %v373_v18 }
  0x2a   : > { %v377_v20 = vld [vmem:[%s1584_s7 + $0x280] sm:$0xff]  ;;  %376 = vst [vmem:[%s1589_s8 + $0x98] sm:$0xff] %v375_v19 }
  0x2b   : > { %378 = vst [vmem:[%s1589_s8 + $0xa0] sm:$0xff] %v377_v20  ;;  %v379_v21 = vld [vmem:[%s1584_s7 + $0x2a0] sm:$0xff] }
  0x2c   : > { %v381_v22 = vld [vmem:[%s1584_s7 + $0x2c0] sm:$0xff]  ;;  %380 = vst [vmem:[%s1589_s8 + $0xa8] sm:$0xff] %v379_v21 }
  0x2d   : > { %v383_v23 = vld [vmem:[%s1584_s7 + $0x2e0] sm:$0xff]  ;;  %382 = vst [vmem:[%s1589_s8 + $0xb0] sm:$0xff] %v381_v22 }
  0x2e   : > { %384 = vst [vmem:[%s1589_s8 + $0xb8] sm:$0xff] %v383_v23  ;;  %v385_v24 = vld [vmem:[%s1584_s7 + $0x300] sm:$0xff] }
  0x2f   : > { %v387_v25 = vld [vmem:[%s1584_s7 + $0x320] sm:$0xff]  ;;  %386 = vst [vmem:[%s1589_s8 + $0xc0] sm:$0xff] %v385_v24 }
  0x30   : > { %v389_v26 = vld [vmem:[%s1584_s7 + $0x340] sm:$0xff]  ;;  %388 = vst [vmem:[%s1589_s8 + $0xc8] sm:$0xff] %v387_v25 }
  0x31   : > { %390 = vst [vmem:[%s1589_s8 + $0xd0] sm:$0xff] %v389_v26  ;;  %v391_v27 = vld [vmem:[%s1584_s7 + $0x360] sm:$0xff] }
  0x32   : > { %v393_v28 = vld [vmem:[%s1584_s7 + $0x380] sm:$0xff]  ;;  %392 = vst [vmem:[%s1589_s8 + $0xd8] sm:$0xff] %v391_v27 }
  0x33   : > { %v395_v29 = vld [vmem:[%s1584_s7 + $0x3a0] sm:$0xff]  ;;  %394 = vst [vmem:[%s1589_s8 + $0xe0] sm:$0xff] %v393_v28 }
  0x34   : > { %396 = vst [vmem:[%s1589_s8 + $0xe8] sm:$0xff] %v395_v29  ;;  %v397_v30 = vld [vmem:[%s1584_s7 + $0x3c0] sm:$0xff] }
  0x35   : > { %v399_v31 = vld [vmem:[%s1584_s7 + $0x3e0] sm:$0xff]  ;;  %398 = vst [vmem:[%s1589_s8 + $0xf0] sm:$0xff] %v397_v30 }
  0x36   : > { %v401_v32 = vld [vmem:[%s1584_s7 + $0x400] sm:$0xff]  ;;  %400 = vst [vmem:[%s1589_s8 + $0xf8] sm:$0xff] %v399_v31 }
  0x37   : > { %402 = vst [vmem:[%s1589_s8 + $0x100] sm:$0xff] %v401_v32  ;;  %v403_v33 = vld [vmem:[%s1584_s7 + $0x420] sm:$0xff] }
  0x38   : > { %v405_v34 = vld [vmem:[%s1584_s7 + $0x440] sm:$0xff]  ;;  %404 = vst [vmem:[%s1589_s8 + $0x108] sm:$0xff] %v403_v33 }
  0x39   : > { %v407_v35 = vld [vmem:[%s1584_s7 + $0x460] sm:$0xff]  ;;  %406 = vst [vmem:[%s1589_s8 + $0x110] sm:$0xff] %v405_v34 }
  0x3a   : > { %408 = vst [vmem:[%s1589_s8 + $0x118] sm:$0xff] %v407_v35  ;;  %v409_v36 = vld [vmem:[%s1584_s7 + $0x480] sm:$0xff] }
  0x3b   : > { %v411_v37 = vld [vmem:[%s1584_s7 + $0x4a0] sm:$0xff]  ;;  %410 = vst [vmem:[%s1589_s8 + $0x120] sm:$0xff] %v409_v36 }
  0x3c   : > { %v413_v38 = vld [vmem:[%s1584_s7 + $0x4c0] sm:$0xff]  ;;  %412 = vst [vmem:[%s1589_s8 + $0x128] sm:$0xff] %v411_v37 }
  0x3d   : > { %414 = vst [vmem:[%s1589_s8 + $0x130] sm:$0xff] %v413_v38  ;;  %v415_v39 = vld [vmem:[%s1584_s7 + $0x4e0] sm:$0xff] }
  0x3e   : > { %v417_v40 = vld [vmem:[%s1584_s7 + $0x500] sm:$0xff]  ;;  %416 = vst [vmem:[%s1589_s8 + $0x138] sm:$0xff] %v415_v39 }
  0x3f   : > { %v419_v41 = vld [vmem:[%s1584_s7 + $0x520] sm:$0xff]  ;;  %418 = vst [vmem:[%s1589_s8 + $0x140] sm:$0xff] %v417_v40 }
  0x40   : > { %420 = vst [vmem:[%s1589_s8 + $0x148] sm:$0xff] %v419_v41  ;;  %v421_v42 = vld [vmem:[%s1584_s7 + $0x540] sm:$0xff] }
  0x41   : > { %v423_v43 = vld [vmem:[%s1584_s7 + $0x560] sm:$0xff]  ;;  %422 = vst [vmem:[%s1589_s8 + $0x150] sm:$0xff] %v421_v42 }
  0x42   : > { %v425_v44 = vld [vmem:[%s1584_s7 + $0x580] sm:$0xff]  ;;  %424 = vst [vmem:[%s1589_s8 + $0x158] sm:$0xff] %v423_v43 }
  0x43   : > { %426 = vst [vmem:[%s1589_s8 + $0x160] sm:$0xff] %v425_v44  ;;  %v427_v45 = vld [vmem:[%s1584_s7 + $0x5a0] sm:$0xff] }
  0x44   : > { %v429_v46 = vld [vmem:[%s1584_s7 + $0x5c0] sm:$0xff]  ;;  %428 = vst [vmem:[%s1589_s8 + $0x168] sm:$0xff] %v427_v45 }
  0x45   : > { %v431_v47 = vld [vmem:[%s1584_s7 + $0x5e0] sm:$0xff]  ;;  %430 = vst [vmem:[%s1589_s8 + $0x170] sm:$0xff] %v429_v46 }
  0x46   : > { %432 = vst [vmem:[%s1589_s8 + $0x178] sm:$0xff] %v431_v47  ;;  %v433_v48 = vld [vmem:[%s1584_s7 + $0x600] sm:$0xff] }
  0x47   : > { %v435_v49 = vld [vmem:[%s1584_s7 + $0x620] sm:$0xff]  ;;  %434 = vst [vmem:[%s1589_s8 + $0x180] sm:$0xff] %v433_v48 }
  0x48   : > { %v437_v50 = vld [vmem:[%s1584_s7 + $0x640] sm:$0xff]  ;;  %436 = vst [vmem:[%s1589_s8 + $0x188] sm:$0xff] %v435_v49 }
  0x49   : > { %438 = vst [vmem:[%s1589_s8 + $0x190] sm:$0xff] %v437_v50  ;;  %v439_v51 = vld [vmem:[%s1584_s7 + $0x660] sm:$0xff] }
  0x4a   : > { %v441_v52 = vld [vmem:[%s1584_s7 + $0x680] sm:$0xff]  ;;  %440 = vst [vmem:[%s1589_s8 + $0x198] sm:$0xff] %v439_v51 }
  0x4b   : > { %v443_v53 = vld [vmem:[%s1584_s7 + $0x6a0] sm:$0xff]  ;;  %442 = vst [vmem:[%s1589_s8 + $0x1a0] sm:$0xff] %v441_v52 }
  0x4c   : > { %444 = vst [vmem:[%s1589_s8 + $0x1a8] sm:$0xff] %v443_v53  ;;  %v445_v54 = vld [vmem:[%s1584_s7 + $0x6c0] sm:$0xff] }
  0x4d   : > { %v447_v55 = vld [vmem:[%s1584_s7 + $0x6e0] sm:$0xff]  ;;  %446 = vst [vmem:[%s1589_s8 + $0x1b0] sm:$0xff] %v445_v54 }
  0x4e   : > { %v449_v56 = vld [vmem:[%s1584_s7 + $0x700] sm:$0xff]  ;;  %448 = vst [vmem:[%s1589_s8 + $0x1b8] sm:$0xff] %v447_v55 }
  0x4f   : > { %450 = vst [vmem:[%s1589_s8 + $0x1c0] sm:$0xff] %v449_v56  ;;  %v451_v57 = vld [vmem:[%s1584_s7 + $0x720] sm:$0xff] }
  0x50   : > { %v453_v58 = vld [vmem:[%s1584_s7 + $0x740] sm:$0xff]  ;;  %452 = vst [vmem:[%s1589_s8 + $0x1c8] sm:$0xff] %v451_v57 }
  0x51   : > { %v455_v59 = vld [vmem:[%s1584_s7 + $0x760] sm:$0xff]  ;;  %454 = vst [vmem:[%s1589_s8 + $0x1d0] sm:$0xff] %v453_v58 }
  0x52   : > { %456 = vst [vmem:[%s1589_s8 + $0x1d8] sm:$0xff] %v455_v59  ;;  %v457_v60 = vld [vmem:[%s1584_s7 + $0x780] sm:$0xff] }
  0x53   : > { %v459_v61 = vld [vmem:[%s1584_s7 + $0x7a0] sm:$0xff]  ;;  %458 = vst [vmem:[%s1589_s8 + $0x1e0] sm:$0xff] %v457_v60 }
  0x54   : > { %v461_v62 = vld [vmem:[%s1584_s7 + $0x7c0] sm:$0xff]  ;;  %460 = vst [vmem:[%s1589_s8 + $0x1e8] sm:$0xff] %v459_v61 }
  0x55   : > { %462 = vst [vmem:[%s1589_s8 + $0x1f0] sm:$0xff] %v461_v62  ;;  %v463_v63 = vld [vmem:[%s1584_s7 + $0x7e0] sm:$0xff] }
  0x56   : > { %464 = vst [vmem:[%s1589_s8 + $0x1f8] sm:$0xff] %v463_v63 }
  0x57 PF: > { %p1208_p7 = scmp.ge.s32.totalorder %s1501_s18, 1  ;;  %p477_p8 = scmp.lt.s32.totalorder %s1501_s18, 37 }
  0x59   : > { %p478_p9 = pnand %p1208_p7, %p477_p8 }
  0x5a   : > { %s484_s9 = sand.u32 (!%p478_p9), 1, %s1477_s12   ;;  %s1210_s10 = sshll.u32 (!%p478_p9), %s1485_s14, 2 }
  0x5b   : > { %481 = sbr.rel (%p478_p9) target bundleno = 387 (0x183), region = 66  ;;  %s1209_s11 = sshll.u32 (!%p478_p9), %s484_s9, 9 }
  0x5c   : > { %p527_p10 = scmp.lt.s32.totalorder (!%p478_p9), %s1210_s10, 35  ;;  %s1212_s21 = sshll.u32 (!%p478_p9), %s1489_s15, 1 }
  0x5d   : > { %p537_p11 = scmp.lt.s32.totalorder (!%p478_p9), %s1212_s21, 7  ;;  %s1738_s5 = scalar_lea.vmem (!%p478_p9), [#allocation3], %s1209_s11 }
  0x5e   : > { %p1215_p12 = scmp.ne.s32.totalorder (!%p478_p9), %s1485_s14, 0 }
  0x60   : > { %s1852_s10 = smov (!%p527_p10, %s1210_s10), 35  ;;  %s1854_s21 = smov (!%p537_p11, %s1212_s21), 7 }
  0x61   : > { %s1211_s22 = sshll.u32 %s1852_s10, 2  ;;  %s539_s12 = scalar_lea.vmem %s1837_s2, %s1854_s21 }
  0x62   : > { %s1724_s26 = scalar_lea.vmem %s1835_s0, %s1211_s22  ;;  %s1214_s29 = sshll.u32 %s1854_s21, 2 }
  0x63   : > { %s1736_s15 = scalar_lea.vmem %s1838_s3, %s1214_s29  ;;  %554 = sbr.rel (%p1215_p12) target bundleno = 106 (0x6a), region = 74 }
  0x68   : > { %v1503_v0 = vmov 0.0  }
  0x69   : > { %555 = vst [vmem:[#allocation2] sm:$0xff] %v1503_v0  ;;  %556 = vst [vmem:[#allocation2 + $0x8] sm:$0xff] %v1503_v0 }
  0x6a PF: > { %v1347_v1 = vld [vmem:[%s1738_s5 + $0x74] ss:$8 sps:$4 sm:$0xff]   ;;  %v1351_v3 = vld [vmem:[%s1738_s5 + $0x70] ss:$8 sps:$4 sm:$0xff]   ;;  %v1353_v5 = vld [vmem:[%s1738_s5 + $0x64] ss:$8 sps:$4 sm:$0xff]  }
  0x6b   : > { %v1349_v2 = vld [vmem:[%s1738_s5 + $0x174] ss:$8 sps:$4 sm:$0xff]   ;;  %959 = vmatprep.subr.bf16.mxu0 %v1347_v1  ;;  %v1352_v4 = vld [vmem:[%s1738_s5 + $0x170] ss:$8 sps:$4 sm:$0xff]   ;;  %v1355_v6 = vld [vmem:[%s1738_s5 + $0x164] ss:$8 sps:$4 sm:$0xff]  }
  0x6c   : > { %1000 = vmatprep.subr.bf16.mxu1 %v1349_v2  ;;  %960 = vmatpush1.bf16.msra.mxu0 %v1351_v3  ;;  %v1357_v7 = vld [vmem:[%s1738_s5 + $0x60] ss:$8 sps:$4 sm:$0xff]   ;;  %v1359_v9 = vld [vmem:[%s1738_s5 + $0x54] ss:$8 sps:$4 sm:$0xff]   ;;  %v1363_v11 = vld [vmem:[%s1738_s5 + $0x50] ss:$8 sps:$4 sm:$0xff]  }
  0x6d   : > { %1001 = vmatpush1.bf16.msra.mxu1 %v1352_v4  ;;  %961 = vmatprep.subr.bf16.mxu0 %v1353_v5  ;;  %v1358_v8 = vld [vmem:[%s1738_s5 + $0x160] ss:$8 sps:$4 sm:$0xff]   ;;  %v1361_v10 = vld [vmem:[%s1738_s5 + $0x154] ss:$8 sps:$4 sm:$0xff]   ;;  %v1364_v12 = vld [vmem:[%s1738_s5 + $0x150] ss:$8 sps:$4 sm:$0xff]  }
  0x6e   : > { %1002 = vmatprep.subr.bf16.mxu1 %v1355_v6  ;;  %v1365_v13 = vld [vmem:[%s1738_s5 + $0x44] ss:$8 sps:$4 sm:$0xff]   ;;  %v1369_v15 = vld [vmem:[%s1738_s5 + $0x40] ss:$8 sps:$4 sm:$0xff]   ;;  %v1371_v17 = vld [vmem:[%s1738_s5 + $0x34] ss:$8 sps:$4 sm:$0xff]  }
  0x6f   : > { %v1367_v14 = vld [vmem:[%s1738_s5 + $0x144] ss:$8 sps:$4 sm:$0xff]   ;;  %v1370_v16 = vld [vmem:[%s1738_s5 + $0x140] ss:$8 sps:$4 sm:$0xff]   ;;  %v1373_v18 = vld [vmem:[%s1738_s5 + $0x134] ss:$8 sps:$4 sm:$0xff]  }
  0x70   : > { %962 = vmatpush1.bf16.msra.mxu0 %v1357_v7  ;;  %v1375_v19 = vld [vmem:[%s1738_s5 + $0x30] ss:$8 sps:$4 sm:$0xff]   ;;  %v1377_v21 = vld [vmem:[%s1738_s5 + $0x24] ss:$8 sps:$4 sm:$0xff]   ;;  %v1381_v23 = vld [vmem:[%s1738_s5 + $0x20] ss:$8 sps:$4 sm:$0xff]  }
  0x71   : > { %1003 = vmatpush1.bf16.msra.mxu1 %v1358_v8  ;;  %963 = vmatprep.subr.bf16.mxu0 %v1359_v9  ;;  %v1376_v20 = vld [vmem:[%s1738_s5 + $0x130] ss:$8 sps:$4 sm:$0xff]   ;;  %v1379_v22 = vld [vmem:[%s1738_s5 + $0x124] ss:$8 sps:$4 sm:$0xff]   ;;  %v1382_v24 = vld [vmem:[%s1738_s5 + $0x120] ss:$8 sps:$4 sm:$0xff]  }
  0x72   : > { %1004 = vmatprep.subr.bf16.mxu1 %v1361_v10  ;;  %v1383_v25 = vld [vmem:[%s1738_s5 + $0x14] ss:$8 sps:$4 sm:$0xff]   ;;  %v1387_v27 = vld [vmem:[%s1738_s5 + $0x10] ss:$8 sps:$4 sm:$0xff]   ;;  %v1389_v29 = vld [vmem:[%s1738_s5 + $0x4] ss:$8 sps:$4 sm:$0xff]  }
  0x73   : > { %v1385_v26 = vld [vmem:[%s1738_s5 + $0x114] ss:$8 sps:$4 sm:$0xff]   ;;  %v1388_v28 = vld [vmem:[%s1738_s5 + $0x110] ss:$8 sps:$4 sm:$0xff]   ;;  %v1391_v30 = vld [vmem:[%s1738_s5 + $0x104] ss:$8 sps:$4 sm:$0xff]  }
  0x74   : > { %964 = vmatpush1.bf16.msra.mxu0 %v1363_v11  ;;  %v1393_v31 = vld [vmem:[%s1738_s5] ss:$8 sps:$4 sm:$0xff]   ;;  %v1395_v33 = vld [vmem:[%s1738_s5 + $0xf4] ss:$8 sps:$4 sm:$0xff]   ;;  %v1399_v35 = vld [vmem:[%s1738_s5 + $0xf0] ss:$8 sps:$4 sm:$0xff]  }
  0x75   : > { %1005 = vmatpush1.bf16.msra.mxu1 %v1364_v12  ;;  %965 = vmatprep.subr.bf16.mxu0 %v1365_v13  ;;  %v1394_v32 = vld [vmem:[%s1738_s5 + $0x100] ss:$8 sps:$4 sm:$0xff]   ;;  %v1397_v34 = vld [vmem:[%s1738_s5 + $0x1f4] ss:$8 sps:$4 sm:$0xff]   ;;  %v1400_v36 = vld [vmem:[%s1738_s5 + $0x1f0] ss:$8 sps:$4 sm:$0xff]  }
  0x76   : > { %1006 = vmatprep.subr.bf16.mxu1 %v1367_v14  ;;  %v1401_v37 = vld [vmem:[%s1738_s5 + $0xe4] ss:$8 sps:$4 sm:$0xff]   ;;  %v1405_v39 = vld [vmem:[%s1738_s5 + $0xe0] ss:$8 sps:$4 sm:$0xff]   ;;  %v1407_v41 = vld [vmem:[%s1738_s5 + $0xd4] ss:$8 sps:$4 sm:$0xff]  }
  0x77   : > { %v1403_v38 = vld [vmem:[%s1738_s5 + $0x1e4] ss:$8 sps:$4 sm:$0xff]   ;;  %v1406_v40 = vld [vmem:[%s1738_s5 + $0x1e0] ss:$8 sps:$4 sm:$0xff]   ;;  %v1409_v42 = vld [vmem:[%s1738_s5 + $0x1d4] ss:$8 sps:$4 sm:$0xff]  }
  0x78   : > { %966 = vmatpush1.bf16.msra.mxu0 %v1369_v15  ;;  %v1411_v43 = vld [vmem:[%s1738_s5 + $0xd0] ss:$8 sps:$4 sm:$0xff]   ;;  %v1413_v45 = vld [vmem:[%s1738_s5 + $0xc4] ss:$8 sps:$4 sm:$0xff]   ;;  %v1417_v50 = vld [vmem:[%s1738_s5 + $0xc0] ss:$8 sps:$4 sm:$0xff]  }
  0x79   : > { %1007 = vmatpush1.bf16.msra.mxu1 %v1370_v16  ;;  %967 = vmatprep.subr.bf16.mxu0 %v1371_v17  ;;  %v1412_v44 = vld [vmem:[%s1738_s5 + $0x1d0] ss:$8 sps:$4 sm:$0xff]   ;;  %v1415_v46 = vld [vmem:[%s1738_s5 + $0x1c4] ss:$8 sps:$4 sm:$0xff]   ;;  %v1418_v51 = vld [vmem:[%s1738_s5 + $0x1c0] ss:$8 sps:$4 sm:$0xff]  }
  0x7a   : > { %1008 = vmatprep.subr.bf16.mxu1 %v1373_v18  ;;  %v559_v47 = vld [vmem:[%s1724_s26] sm:$0xff]  ;;  %v560_v49 = vld [vmem:[%s1724_s26 + $0x8] sm:$0xff]  ;;  %v1425_v57 = vld [vmem:[%s1738_s5 + $0xa4] ss:$8 sps:$4 sm:$0xff]   ;;  %p1284_p13 = scmp.ne.s32.totalorder %s1485_s14, 8 }
  0x7b   : > { %v1217_v48 = vcombine.high %v559_v47, %v559_v47  ;;  %v1219_v52 = vcombine.high %v560_v49, %v560_v49  ;;  %v1419_v53 = vld [vmem:[%s1738_s5 + $0xb4] ss:$8 sps:$4 sm:$0xff]   ;;  %v1423_v55 = vld [vmem:[%s1738_s5 + $0xb0] ss:$8 sps:$4 sm:$0xff]   ;;  %v1427_v58 = vld [vmem:[%s1738_s5 + $0x1a4] ss:$8 sps:$4 sm:$0xff]   ;;  %v1216_v5 = vcombine.low %v559_v47, %v559_v47  ;;  %v1218_v6 = vcombine.low %v560_v49, %v560_v49 }
  0x7c   : > { %968 = vmatpush1.bf16.msra.mxu0 %v1375_v19  ;;  %v1421_v54 = vld [vmem:[%s1738_s5 + $0x1b4] ss:$8 sps:$4 sm:$0xff]   ;;  %v1424_v56 = vld [vmem:[%s1738_s5 + $0x1b0] ss:$8 sps:$4 sm:$0xff]   ;;  %v1429_v59 = vld [vmem:[%s1738_s5 + $0xa0] ss:$8 sps:$4 sm:$0xff]  }
  0x7d   : > { %1009 = vmatpush1.bf16.msra.mxu1 %v1376_v20  ;;  %969 = vmatprep.subr.bf16.mxu0 %v1377_v21  ;;  %v1430_v60 = vld [vmem:[%s1738_s5 + $0x1a0] ss:$8 sps:$4 sm:$0xff]   ;;  %v1431_v61 = vld [vmem:[%s1738_s5 + $0x94] ss:$8 sps:$4 sm:$0xff]   ;;  %v1435_v63 = vld [vmem:[%s1738_s5 + $0x90] ss:$8 sps:$4 sm:$0xff]  }
  0x7e   : > { %1010 = vmatprep.subr.bf16.mxu1 %v1379_v22  ;;  %991 = vmatprep.mubr.bf16.mxu0 %v1217_v48  ;;  %v1433_v62 = vld [vmem:[%s1738_s5 + $0x194] ss:$8 sps:$4 sm:$0xff]   ;;  %v1436_v0 = vld [vmem:[%s1738_s5 + $0x190] ss:$8 sps:$4 sm:$0xff]   ;;  %v1437_v1 = vld [vmem:[%s1738_s5 + $0x84] ss:$8 sps:$4 sm:$0xff]  }
  0x7f   : > { %1032 = vmatprep.mubr.bf16.mxu1 %v1219_v52  ;;  %v1439_v2 = vld [vmem:[%s1738_s5 + $0x184] ss:$8 sps:$4 sm:$0xff]   ;;  %v1441_v3 = vld [vmem:[%s1738_s5 + $0x80] ss:$8 sps:$4 sm:$0xff]   ;;  %v557_v8 = vld [vmem:[#allocation2] sm:$0xff] }
  0x80   : > { %970 = vmatpush1.bf16.msra.mxu0 %v1381_v23  ;;  %v1442_v4 = vld [vmem:[%s1738_s5 + $0x180] ss:$8 sps:$4 sm:$0xff]   ;;  %v558_v12 = vld [vmem:[#allocation2 + $0x8] sm:$0xff] }
  0x81   : > { %1011 = vmatpush1.bf16.msra.mxu1 %v1382_v24  ;;  %971 = vmatprep.subr.bf16.mxu0 %v1383_v25 }
  0x82   : > { %1012 = vmatprep.subr.bf16.mxu1 %v1385_v26 }
  0x84   : > { %972 = vmatpush1.bf16.msra.mxu0 %v1387_v27 }
  0x85   : > { %1013 = vmatpush1.bf16.msra.mxu1 %v1388_v28  ;;  %973 = vmatprep.subr.bf16.mxu0 %v1389_v29 }
  0x86   : > { %1014 = vmatprep.subr.bf16.mxu1 %v1391_v30 }
  0x88   : > { %974 = vmatpush1.bf16.msra.mxu0 %v1393_v31 }
  0x89   : > { %1015 = vmatpush1.bf16.msra.mxu1 %v1394_v32  ;;  %975 = vmatprep.subr.bf16.mxu0 %v1395_v33 }
  0x8a   : > { %1016 = vmatprep.subr.bf16.mxu1 %v1397_v34 }
  0x8c   : > { %976 = vmatpush2.bf16.msra.mxu0 %v1399_v35 }
  0x8d   : > { %1017 = vmatpush2.bf16.msra.mxu1 %v1400_v36  ;;  %977 = vmatprep.subr.bf16.mxu0 %v1401_v37 }
  0x8e   : > { %1018 = vmatprep.subr.bf16.mxu1 %v1403_v38 }
  0x90   : > { %978 = vmatpush2.bf16.msra.mxu0 %v1405_v39 }
  0x91   : > { %1019 = vmatpush2.bf16.msra.mxu1 %v1406_v40  ;;  %979 = vmatprep.subr.bf16.mxu0 %v1407_v41 }
  0x92   : > { %1020 = vmatprep.subr.bf16.mxu1 %v1409_v42 }
  0x94   : > { %980 = vmatpush2.bf16.msra.mxu0 %v1411_v43 }
  0x95   : > { %1021 = vmatpush2.bf16.msra.mxu1 %v1412_v44  ;;  %981 = vmatprep.subr.bf16.mxu0 %v1413_v45 }
  0x96   : > { %1022 = vmatprep.subr.bf16.mxu1 %v1415_v46 }
  0x98   : > { %982 = vmatpush2.bf16.msra.mxu0 %v1417_v50 }
  0x99   : > { %1023 = vmatpush2.bf16.msra.mxu1 %v1418_v51  ;;  %983 = vmatprep.subr.bf16.mxu0 %v1419_v53 }
  0x9a   : > { %1024 = vmatprep.subr.bf16.mxu1 %v1421_v54 }
  0x9c   : > { %984 = vmatpush2.bf16.msra.mxu0 %v1423_v55 }
  0x9d   : > { %1025 = vmatpush2.bf16.msra.mxu1 %v1424_v56  ;;  %985 = vmatprep.subr.bf16.mxu0 %v1425_v57 }
  0x9e   : > { %1026 = vmatprep.subr.bf16.mxu1 %v1427_v58 }
  0xa0   : > { %986 = vmatpush2.bf16.msra.mxu0 %v1429_v59 }
  0xa1   : > { %1027 = vmatpush2.bf16.msra.mxu1 %v1430_v60  ;;  %987 = vmatprep.subr.bf16.mxu0 %v1431_v61 }
  0xa2   : > { %1028 = vmatprep.subr.bf16.mxu1 %v1433_v62 }
  0xa4   : > { %988 = vmatpush2.bf16.msra.mxu0 %v1435_v63 }
  0xa5   : > { %1029 = vmatpush2.bf16.msra.mxu1 %v1436_v0  ;;  %989 = vmatprep.subr.bf16.mxu0 %v1437_v1 }
  0xa6   : > { %1030 = vmatprep.subr.bf16.mxu1 %v1439_v2 }
  0xa8   : > { %990 = vmatpush2.bf16.msra.mxu0 %v1441_v3 }
  0xa9   : > { %1031 = vmatpush2.bf16.msra.mxu1 %v1442_v4 }
  0xab   : > { %992 = vmatmul.mubr.bf16.vlgmr.msra.gmra.mxu0 %v1216_v5 }
  0xac   : > { %1033 = vmatmul.mubr.bf16.vlgmr.msra.gmra.mxu1 %v1218_v6 }
 0x16b   : > { %v993_v7 = vpop.f32.mrf.mxu0 }
 0x16c   : > { %v1034_v9 = vpop.f32.mrf.mxu1 }
 0x16d   : > { %v1035_v10 = vadd.f32 %v1034_v9, %v993_v7  ;;  %v995_v11 = vpop.f32.mrf.mxu0 }
 0x16e   : > { %v1036_v13 = vpop.f32.mrf.mxu1 }
 0x16f   : > { %v1041_v14 = vadd.f32 %v1035_v10, %v557_v8  ;;  %v1037_v15 = vadd.f32 %v1036_v13, %v995_v11  ;;  %v997_v16 = vpop.f32.mrf.mxu0  ;;  %1048 = sbr.rel (%p1284_p13) target bundleno = 387 (0x183), region = 78 }
 0x170   : > { %v1038_v17 = vpop.f32.mrf.mxu1 }
 0x171   : > { %1043 = vst [vmem:[#allocation2] sm:$0xff] %v1041_v14  ;;  %v1042_v18 = vadd.f32 %v1037_v15, %v558_v12  ;;  %v998_v19 = vpop.f32.mrf.mxu0 }
 0x172   : > { %v1039_v20 = vpop.f32.mrf.mxu1 }
 0x173   : > { %1044 = vst [vmem:[#allocation2 + $0x8] sm:$0xff] %v1042_v18 }
 0x174   : > { %v1053_v21 = vlaneseq  ;;  %v1051_v23 = vld [vmem:[%s539_s12] sm:$0x3] }
 0x176   : > { %v1054_v22 = vshrl.u32 %v1053_v21, 7 }
 0x178   : > { %v1055_v24 = vsub.s32 0, %v1054_v22  ;;  %v1059_v25 = vsub.s32 1, %v1054_v22  ;;  %v1049_v26 = vld [vmem:[#allocation2] sm:$0xff] }
 0x17a   : > { %v1050_v27 = vld [vmem:[#allocation2 + $0x8] sm:$0xff]  ;;  %v1056_v28 = vrot.slane %v1051_v23, %v1055_v24  ;;  %v1060_v29 = vrot.slane %v1051_v23, %v1059_v25 }
 0x17c   : > { %v1063_v30 = vadd.f32 %v1056_v28, %v1049_v26  ;;  %v1064_v31 = vadd.f32 %v1060_v29, %v1050_v27 }
 0x17e   : > { %v1065_v32 = vmax.f32 %v1063_v30, 0.0  ;;  %v1066_v33 = vmax.f32 %v1064_v31, 0.0 }
 0x180   : > { %v1289_v34 = vpack.c.bf16 %v1066_v33, %v1065_v32 }
 0x182   : > { %1075 = vst [vmem:[%s1736_s15] sm:$0xff] %v1289_v34 }
 0x183 PF: > { %s13_s18 = sadd.s32 1, %s1501_s18   ;;  %s1839_s12 = smov %s1481_s13 }
 0x184   : > { %p10_p0 = scmp.ge.s32.totalorder %s13_s18, 38   ;;  %s1840_s13 = smov %s1575_s25 }
 0x185   : > { %s1841_s14 = smov %s1493_s16  ;;  %s1842_s15 = smov %s1497_s17 }
 0x186   : > { %s1843_s16 = smov %s1846_s19  ;;  %s1844_s17 = smov %s1850_s20 }
 0x187   :  { %12 = sbr.rel (!%p10_p0) target bundleno = 4 (0x4), region = 119 }

// kernel: vgg_base_forward.39
= control target key start
LH: loop header
LB: loop body
LE: loop exit
PB: predicated region body
PF: predicated region fallthrough
CT: control target
= control target key end

     0   :  { %s2390_s12 = smov 0   ;;  %s2392_s13 = smov 0   ;;  %s2884_s0 = inlined_call_operand.vmem [shape: bf16[8,1024], index: 0, kind: input, shape index: {}]   ;;  %s2885_s1 = inlined_call_operand.vmem [shape: bf16[1024,1024], index: 1, kind: input, shape index: {}]   ;;  %s2886_s2 = inlined_call_operand.vmem [shape: f32[1,1024], index: 2, kind: input, shape index: {}]   ;;  %s2887_s3 = inlined_call_operand.vmem [shape: bf16[8,1024], index: 3, kind: output, shape index: {}]  }
   0x1   :  { %s2394_s14 = smov 0   ;;  %s2396_s15 = smov 0  }
   0x2   :  { %s2398_s16 = smov 0  }
   0x3 LB: > { %s28_s17 = sadd.s32 1, %s2364_s15  ;;  %p76_p1 = scmp.ne.s32.totalorder %s2356_s13, %s2352_s12  ;;  %s2368_s16 = sphi %s2398_s16, %s13_s16   ;;  %s2364_s15 = sphi %s2396_s15, %s2891_s15   ;;  %s2360_s14 = sphi %s2394_s14, %s2890_s14   ;;  %s2356_s13 = sphi %s2392_s13, %s2889_s13   ;;  %s2352_s12 = sphi %s2390_s12, %s2888_s12  }
   0x4   : > { %p30_p0 = scmp.ge.s32.totalorder %s28_s17, 4  ;;  %p77_p2 = scmp.eq.s32.totalorder %s2368_s16, 0 }
   0x5   : > { %s69_s19 = sadd.s32 1, %s2356_s13  ;;  %p1940_p5 = scmp.ge.s32.totalorder %s2368_s16, 4 }
   0x6   : > { %s2893_s17 = smov (%p30_p0, %s28_s17), 0  ;;  %p78_p3 = por %p77_p2, %p76_p1 }
   0x7   : > { %s65_s18 = ssub.s32 %s2364_s15, %s2893_s17  ;;  %169 = sbr.rel (%p1940_p5) target bundleno = 144 (0x90), region = 20 }
   0x8   : > { %p67_p4 = scmp.eq.s32.totalorder %s65_s18, 0 }
   0xa   : > { %s2425_s20 = scalar_select %p67_p4, %s2356_s13, %s69_s19  }
   0xc   : > { %172 = sbr.rel (!%p78_p3) target bundleno = 144 (0x90), region = 24  ;;  %s174_s21 = sand.u32 (%p78_p3), 1, %s2356_s13  }
   0xd   : > { %s2088_s22 = sshll.u32 (%p78_p3), %s2364_s15, 3  ;;  %s1941_s23 = sshll.u32 (%p78_p3), %s174_s21, 10 }
   0xe   : > { %s2433_s26 = scalar_lea.vmem (%p78_p3), %s2885_s1, %s2088_s22  ;;  %s2438_s27 = scalar_lea.vmem (%p78_p3), [#allocation3], %s1941_s23 }
   0xf   : > { %v465_v0 = vld [vmem:[%s2433_s26] sm:$0xff] (%p78_p3) }
  0x10   : > { %v467_v1 = vld [vmem:[%s2433_s26 + $0x20] sm:$0xff] (%p78_p3)  ;;  %466 = vst [vmem:[%s2438_s27] sm:$0xff] (%p78_p3), %v465_v0 }
  0x11   : > { %v469_v2 = vld [vmem:[%s2433_s26 + $0x40] sm:$0xff]  ;;  %468 = vst [vmem:[%s2438_s27 + $0x8] sm:$0xff] %v467_v1 }
  0x12   : > { %470 = vst [vmem:[%s2438_s27 + $0x10] sm:$0xff] %v469_v2  ;;  %v471_v3 = vld [vmem:[%s2433_s26 + $0x60] sm:$0xff] }
  0x13   : > { %v473_v4 = vld [vmem:[%s2433_s26 + $0x80] sm:$0xff]  ;;  %472 = vst [vmem:[%s2438_s27 + $0x18] sm:$0xff] %v471_v3 }
  0x14   : > { %v475_v5 = vld [vmem:[%s2433_s26 + $0xa0] sm:$0xff]  ;;  %474 = vst [vmem:[%s2438_s27 + $0x20] sm:$0xff] %v473_v4 }
  0x15   : > { %476 = vst [vmem:[%s2438_s27 + $0x28] sm:$0xff] %v475_v5  ;;  %v477_v6 = vld [vmem:[%s2433_s26 + $0xc0] sm:$0xff] }
  0x16   : > { %v479_v7 = vld [vmem:[%s2433_s26 + $0xe0] sm:$0xff]  ;;  %478 = vst [vmem:[%s2438_s27 + $0x30] sm:$0xff] %v477_v6 }
  0x17   : > { %v481_v8 = vld [vmem:[%s2433_s26 + $0x100] sm:$0xff]  ;;  %480 = vst [vmem:[%s2438_s27 + $0x38] sm:$0xff] %v479_v7 }
  0x18   : > { %482 = vst [vmem:[%s2438_s27 + $0x40] sm:$0xff] %v481_v8  ;;  %v483_v9 = vld [vmem:[%s2433_s26 + $0x120] sm:$0xff] }
  0x19   : > { %v485_v10 = vld [vmem:[%s2433_s26 + $0x140] sm:$0xff]  ;;  %484 = vst [vmem:[%s2438_s27 + $0x48] sm:$0xff] %v483_v9 }
  0x1a   : > { %v487_v11 = vld [vmem:[%s2433_s26 + $0x160] sm:$0xff]  ;;  %486 = vst [vmem:[%s2438_s27 + $0x50] sm:$0xff] %v485_v10 }
  0x1b   : > { %488 = vst [vmem:[%s2438_s27 + $0x58] sm:$0xff] %v487_v11  ;;  %v489_v12 = vld [vmem:[%s2433_s26 + $0x180] sm:$0xff] }
  0x1c   : > { %v491_v13 = vld [vmem:[%s2433_s26 + $0x1a0] sm:$0xff]  ;;  %490 = vst [vmem:[%s2438_s27 + $0x60] sm:$0xff] %v489_v12 }
  0x1d   : > { %v493_v14 = vld [vmem:[%s2433_s26 + $0x1c0] sm:$0xff]  ;;  %492 = vst [vmem:[%s2438_s27 + $0x68] sm:$0xff] %v491_v13 }
  0x1e   : > { %494 = vst [vmem:[%s2438_s27 + $0x70] sm:$0xff] %v493_v14  ;;  %v495_v15 = vld [vmem:[%s2433_s26 + $0x1e0] sm:$0xff] }
  0x1f   : > { %v497_v16 = vld [vmem:[%s2433_s26 + $0x200] sm:$0xff]  ;;  %496 = vst [vmem:[%s2438_s27 + $0x78] sm:$0xff] %v495_v15 }
  0x20   : > { %v499_v17 = vld [vmem:[%s2433_s26 + $0x220] sm:$0xff]  ;;  %498 = vst [vmem:[%s2438_s27 + $0x80] sm:$0xff] %v497_v16 }
  0x21   : > { %500 = vst [vmem:[%s2438_s27 + $0x88] sm:$0xff] %v499_v17  ;;  %v501_v18 = vld [vmem:[%s2433_s26 + $0x240] sm:$0xff] }
  0x22   : > { %v503_v19 = vld [vmem:[%s2433_s26 + $0x260] sm:$0xff]  ;;  %502 = vst [vmem:[%s2438_s27 + $0x90] sm:$0xff] %v501_v18 }
  0x23   : > { %v505_v20 = vld [vmem:[%s2433_s26 + $0x280] sm:$0xff]  ;;  %504 = vst [vmem:[%s2438_s27 + $0x98] sm:$0xff] %v503_v19 }
  0x24   : > { %506 = vst [vmem:[%s2438_s27 + $0xa0] sm:$0xff] %v505_v20  ;;  %v507_v21 = vld [vmem:[%s2433_s26 + $0x2a0] sm:$0xff] }
  0x25   : > { %v509_v22 = vld [vmem:[%s2433_s26 + $0x2c0] sm:$0xff]  ;;  %508 = vst [vmem:[%s2438_s27 + $0xa8] sm:$0xff] %v507_v21 }
  0x26   : > { %v511_v23 = vld [vmem:[%s2433_s26 + $0x2e0] sm:$0xff]  ;;  %510 = vst [vmem:[%s2438_s27 + $0xb0] sm:$0xff] %v509_v22 }
  0x27   : > { %512 = vst [vmem:[%s2438_s27 + $0xb8] sm:$0xff] %v511_v23  ;;  %v513_v24 = vld [vmem:[%s2433_s26 + $0x300] sm:$0xff] }
  0x28   : > { %v515_v25 = vld [vmem:[%s2433_s26 + $0x320] sm:$0xff]  ;;  %514 = vst [vmem:[%s2438_s27 + $0xc0] sm:$0xff] %v513_v24 }
  0x29   : > { %v517_v26 = vld [vmem:[%s2433_s26 + $0x340] sm:$0xff]  ;;  %516 = vst [vmem:[%s2438_s27 + $0xc8] sm:$0xff] %v515_v25 }
  0x2a   : > { %518 = vst [vmem:[%s2438_s27 + $0xd0] sm:$0xff] %v517_v26  ;;  %v519_v27 = vld [vmem:[%s2433_s26 + $0x360] sm:$0xff] }
  0x2b   : > { %v521_v28 = vld [vmem:[%s2433_s26 + $0x380] sm:$0xff]  ;;  %520 = vst [vmem:[%s2438_s27 + $0xd8] sm:$0xff] %v519_v27 }
  0x2c   : > { %v523_v29 = vld [vmem:[%s2433_s26 + $0x3a0] sm:$0xff]  ;;  %522 = vst [vmem:[%s2438_s27 + $0xe0] sm:$0xff] %v521_v28 }
  0x2d   : > { %524 = vst [vmem:[%s2438_s27 + $0xe8] sm:$0xff] %v523_v29  ;;  %v525_v30 = vld [vmem:[%s2433_s26 + $0x3c0] sm:$0xff] }
  0x2e   : > { %v527_v31 = vld [vmem:[%s2433_s26 + $0x3e0] sm:$0xff]  ;;  %526 = vst [vmem:[%s2438_s27 + $0xf0] sm:$0xff] %v525_v30 }
  0x2f   : > { %v529_v32 = vld [vmem:[%s2433_s26 + $0x400] sm:$0xff]  ;;  %528 = vst [vmem:[%s2438_s27 + $0xf8] sm:$0xff] %v527_v31 }
  0x30   : > { %530 = vst [vmem:[%s2438_s27 + $0x100] sm:$0xff] %v529_v32  ;;  %v531_v33 = vld [vmem:[%s2433_s26 + $0x420] sm:$0xff] }
  0x31   : > { %v533_v34 = vld [vmem:[%s2433_s26 + $0x440] sm:$0xff]  ;;  %532 = vst [vmem:[%s2438_s27 + $0x108] sm:$0xff] %v531_v33 }
  0x32   : > { %v535_v35 = vld [vmem:[%s2433_s26 + $0x460] sm:$0xff]  ;;  %534 = vst [vmem:[%s2438_s27 + $0x110] sm:$0xff] %v533_v34 }
  0x33   : > { %536 = vst [vmem:[%s2438_s27 + $0x118] sm:$0xff] %v535_v35  ;;  %v537_v36 = vld [vmem:[%s2433_s26 + $0x480] sm:$0xff] }
  0x34   : > { %v539_v37 = vld [vmem:[%s2433_s26 + $0x4a0] sm:$0xff]  ;;  %538 = vst [vmem:[%s2438_s27 + $0x120] sm:$0xff] %v537_v36 }
  0x35   : > { %v541_v38 = vld [vmem:[%s2433_s26 + $0x4c0] sm:$0xff]  ;;  %540 = vst [vmem:[%s2438_s27 + $0x128] sm:$0xff] %v539_v37 }
  0x36   : > { %542 = vst [vmem:[%s2438_s27 + $0x130] sm:$0xff] %v541_v38  ;;  %v543_v39 = vld [vmem:[%s2433_s26 + $0x4e0] sm:$0xff] }
  0x37   : > { %v545_v40 = vld [vmem:[%s2433_s26 + $0x500] sm:$0xff]  ;;  %544 = vst [vmem:[%s2438_s27 + $0x138] sm:$0xff] %v543_v39 }
  0x38   : > { %v547_v41 = vld [vmem:[%s2433_s26 + $0x520] sm:$0xff]  ;;  %546 = vst [vmem:[%s2438_s27 + $0x140] sm:$0xff] %v545_v40 }
  0x39   : > { %548 = vst [vmem:[%s2438_s27 + $0x148] sm:$0xff] %v547_v41  ;;  %v549_v42 = vld [vmem:[%s2433_s26 + $0x540] sm:$0xff] }
  0x3a   : > { %v551_v43 = vld [vmem:[%s2433_s26 + $0x560] sm:$0xff]  ;;  %550 = vst [vmem:[%s2438_s27 + $0x150] sm:$0xff] %v549_v42 }
  0x3b   : > { %v553_v44 = vld [vmem:[%s2433_s26 + $0x580] sm:$0xff]  ;;  %552 = vst [vmem:[%s2438_s27 + $0x158] sm:$0xff] %v551_v43 }
  0x3c   : > { %554 = vst [vmem:[%s2438_s27 + $0x160] sm:$0xff] %v553_v44  ;;  %v555_v45 = vld [vmem:[%s2433_s26 + $0x5a0] sm:$0xff] }
  0x3d   : > { %v557_v46 = vld [vmem:[%s2433_s26 + $0x5c0] sm:$0xff]  ;;  %556 = vst [vmem:[%s2438_s27 + $0x168] sm:$0xff] %v555_v45 }
  0x3e   : > { %v559_v47 = vld [vmem:[%s2433_s26 + $0x5e0] sm:$0xff]  ;;  %558 = vst [vmem:[%s2438_s27 + $0x170] sm:$0xff] %v557_v46 }
  0x3f   : > { %560 = vst [vmem:[%s2438_s27 + $0x178] sm:$0xff] %v559_v47  ;;  %v561_v48 = vld [vmem:[%s2433_s26 + $0x600] sm:$0xff] }
  0x40   : > { %v563_v49 = vld [vmem:[%s2433_s26 + $0x620] sm:$0xff]  ;;  %562 = vst [vmem:[%s2438_s27 + $0x180] sm:$0xff] %v561_v48 }
  0x41   : > { %v565_v50 = vld [vmem:[%s2433_s26 + $0x640] sm:$0xff]  ;;  %564 = vst [vmem:[%s2438_s27 + $0x188] sm:$0xff] %v563_v49 }
  0x42   : > { %566 = vst [vmem:[%s2438_s27 + $0x190] sm:$0xff] %v565_v50  ;;  %v567_v51 = vld [vmem:[%s2433_s26 + $0x660] sm:$0xff] }
  0x43   : > { %v569_v52 = vld [vmem:[%s2433_s26 + $0x680] sm:$0xff]  ;;  %568 = vst [vmem:[%s2438_s27 + $0x198] sm:$0xff] %v567_v51 }
  0x44   : > { %v571_v53 = vld [vmem:[%s2433_s26 + $0x6a0] sm:$0xff]  ;;  %570 = vst [vmem:[%s2438_s27 + $0x1a0] sm:$0xff] %v569_v52 }
  0x45   : > { %572 = vst [vmem:[%s2438_s27 + $0x1a8] sm:$0xff] %v571_v53  ;;  %v573_v54 = vld [vmem:[%s2433_s26 + $0x6c0] sm:$0xff] }
  0x46   : > { %v575_v55 = vld [vmem:[%s2433_s26 + $0x6e0] sm:$0xff]  ;;  %574 = vst [vmem:[%s2438_s27 + $0x1b0] sm:$0xff] %v573_v54 }
  0x47   : > { %v577_v56 = vld [vmem:[%s2433_s26 + $0x700] sm:$0xff]  ;;  %576 = vst [vmem:[%s2438_s27 + $0x1b8] sm:$0xff] %v575_v55 }
  0x48   : > { %578 = vst [vmem:[%s2438_s27 + $0x1c0] sm:$0xff] %v577_v56  ;;  %v579_v57 = vld [vmem:[%s2433_s26 + $0x720] sm:$0xff] }
  0x49   : > { %v581_v58 = vld [vmem:[%s2433_s26 + $0x740] sm:$0xff]  ;;  %580 = vst [vmem:[%s2438_s27 + $0x1c8] sm:$0xff] %v579_v57 }
  0x4a   : > { %v583_v59 = vld [vmem:[%s2433_s26 + $0x760] sm:$0xff]  ;;  %582 = vst [vmem:[%s2438_s27 + $0x1d0] sm:$0xff] %v581_v58 }
  0x4b   : > { %584 = vst [vmem:[%s2438_s27 + $0x1d8] sm:$0xff] %v583_v59  ;;  %v585_v60 = vld [vmem:[%s2433_s26 + $0x780] sm:$0xff] }
  0x4c   : > { %v587_v61 = vld [vmem:[%s2433_s26 + $0x7a0] sm:$0xff]  ;;  %586 = vst [vmem:[%s2438_s27 + $0x1e0] sm:$0xff] %v585_v60 }
  0x4d   : > { %v589_v62 = vld [vmem:[%s2433_s26 + $0x7c0] sm:$0xff]  ;;  %588 = vst [vmem:[%s2438_s27 + $0x1e8] sm:$0xff] %v587_v61 }
  0x4e   : > { %590 = vst [vmem:[%s2438_s27 + $0x1f0] sm:$0xff] %v589_v62  ;;  %v591_v63 = vld [vmem:[%s2433_s26 + $0x7e0] sm:$0xff] }
  0x4f   : > { %v593_v0 = vld [vmem:[%s2433_s26 + $0x800] sm:$0xff]  ;;  %592 = vst [vmem:[%s2438_s27 + $0x1f8] sm:$0xff] %v591_v63 }
  0x50   : > { %v595_v1 = vld [vmem:[%s2433_s26 + $0x820] sm:$0xff]  ;;  %594 = vst [vmem:[%s2438_s27 + $0x200] sm:$0xff] %v593_v0 }
  0x51   : > { %596 = vst [vmem:[%s2438_s27 + $0x208] sm:$0xff] %v595_v1  ;;  %v597_v2 = vld [vmem:[%s2433_s26 + $0x840] sm:$0xff] }
  0x52   : > { %v599_v3 = vld [vmem:[%s2433_s26 + $0x860] sm:$0xff]  ;;  %598 = vst [vmem:[%s2438_s27 + $0x210] sm:$0xff] %v597_v2 }
  0x53   : > { %v601_v4 = vld [vmem:[%s2433_s26 + $0x880] sm:$0xff]  ;;  %600 = vst [vmem:[%s2438_s27 + $0x218] sm:$0xff] %v599_v3 }
  0x54   : > { %602 = vst [vmem:[%s2438_s27 + $0x220] sm:$0xff] %v601_v4  ;;  %v603_v5 = vld [vmem:[%s2433_s26 + $0x8a0] sm:$0xff] }
  0x55   : > { %v605_v6 = vld [vmem:[%s2433_s26 + $0x8c0] sm:$0xff]  ;;  %604 = vst [vmem:[%s2438_s27 + $0x228] sm:$0xff] %v603_v5 }
  0x56   : > { %v607_v7 = vld [vmem:[%s2433_s26 + $0x8e0] sm:$0xff]  ;;  %606 = vst [vmem:[%s2438_s27 + $0x230] sm:$0xff] %v605_v6 }
  0x57   : > { %608 = vst [vmem:[%s2438_s27 + $0x238] sm:$0xff] %v607_v7  ;;  %v609_v8 = vld [vmem:[%s2433_s26 + $0x900] sm:$0xff] }
  0x58   : > { %v611_v9 = vld [vmem:[%s2433_s26 + $0x920] sm:$0xff]  ;;  %610 = vst [vmem:[%s2438_s27 + $0x240] sm:$0xff] %v609_v8 }
  0x59   : > { %v613_v10 = vld [vmem:[%s2433_s26 + $0x940] sm:$0xff]  ;;  %612 = vst [vmem:[%s2438_s27 + $0x248] sm:$0xff] %v611_v9 }
  0x5a   : > { %614 = vst [vmem:[%s2438_s27 + $0x250] sm:$0xff] %v613_v10  ;;  %v615_v11 = vld [vmem:[%s2433_s26 + $0x960] sm:$0xff] }
  0x5b   : > { %v617_v12 = vld [vmem:[%s2433_s26 + $0x980] sm:$0xff]  ;;  %616 = vst [vmem:[%s2438_s27 + $0x258] sm:$0xff] %v615_v11 }
  0x5c   : > { %v619_v13 = vld [vmem:[%s2433_s26 + $0x9a0] sm:$0xff]  ;;  %618 = vst [vmem:[%s2438_s27 + $0x260] sm:$0xff] %v617_v12 }
  0x5d   : > { %620 = vst [vmem:[%s2438_s27 + $0x268] sm:$0xff] %v619_v13  ;;  %v621_v14 = vld [vmem:[%s2433_s26 + $0x9c0] sm:$0xff] }
  0x5e   : > { %v623_v15 = vld [vmem:[%s2433_s26 + $0x9e0] sm:$0xff]  ;;  %622 = vst [vmem:[%s2438_s27 + $0x270] sm:$0xff] %v621_v14 }
  0x5f   : > { %v625_v16 = vld [vmem:[%s2433_s26 + $0xa00] sm:$0xff]  ;;  %624 = vst [vmem:[%s2438_s27 + $0x278] sm:$0xff] %v623_v15 }
  0x60   : > { %626 = vst [vmem:[%s2438_s27 + $0x280] sm:$0xff] %v625_v16  ;;  %v627_v17 = vld [vmem:[%s2433_s26 + $0xa20] sm:$0xff] }
  0x61   : > { %v629_v18 = vld [vmem:[%s2433_s26 + $0xa40] sm:$0xff]  ;;  %628 = vst [vmem:[%s2438_s27 + $0x288] sm:$0xff] %v627_v17 }
  0x62   : > { %v631_v19 = vld [vmem:[%s2433_s26 + $0xa60] sm:$0xff]  ;;  %630 = vst [vmem:[%s2438_s27 + $0x290] sm:$0xff] %v629_v18 }
  0x63   : > { %632 = vst [vmem:[%s2438_s27 + $0x298] sm:$0xff] %v631_v19  ;;  %v633_v20 = vld [vmem:[%s2433_s26 + $0xa80] sm:$0xff] }
  0x64   : > { %v635_v21 = vld [vmem:[%s2433_s26 + $0xaa0] sm:$0xff]  ;;  %634 = vst [vmem:[%s2438_s27 + $0x2a0] sm:$0xff] %v633_v20 }
  0x65   : > { %v637_v22 = vld [vmem:[%s2433_s26 + $0xac0] sm:$0xff]  ;;  %636 = vst [vmem:[%s2438_s27 + $0x2a8] sm:$0xff] %v635_v21 }
  0x66   : > { %638 = vst [vmem:[%s2438_s27 + $0x2b0] sm:$0xff] %v637_v22  ;;  %v639_v23 = vld [vmem:[%s2433_s26 + $0xae0] sm:$0xff] }
  0x67   : > { %v641_v24 = vld [vmem:[%s2433_s26 + $0xb00] sm:$0xff]  ;;  %640 = vst [vmem:[%s2438_s27 + $0x2b8] sm:$0xff] %v639_v23 }
  0x68   : > { %v643_v25 = vld [vmem:[%s2433_s26 + $0xb20] sm:$0xff]  ;;  %642 = vst [vmem:[%s2438_s27 + $0x2c0] sm:$0xff] %v641_v24 }
  0x69   : > { %644 = vst [vmem:[%s2438_s27 + $0x2c8] sm:$0xff] %v643_v25  ;;  %v645_v26 = vld [vmem:[%s2433_s26 + $0xb40] sm:$0xff] }
  0x6a   : > { %v647_v27 = vld [vmem:[%s2433_s26 + $0xb60] sm:$0xff]  ;;  %646 = vst [vmem:[%s2438_s27 + $0x2d0] sm:$0xff] %v645_v26 }
  0x6b   : > { %v649_v28 = vld [vmem:[%s2433_s26 + $0xb80] sm:$0xff]  ;;  %648 = vst [vmem:[%s2438_s27 + $0x2d8] sm:$0xff] %v647_v27 }
  0x6c   : > { %650 = vst [vmem:[%s2438_s27 + $0x2e0] sm:$0xff] %v649_v28  ;;  %v651_v29 = vld [vmem:[%s2433_s26 + $0xba0] sm:$0xff] }
  0x6d   : > { %v653_v30 = vld [vmem:[%s2433_s26 + $0xbc0] sm:$0xff]  ;;  %652 = vst [vmem:[%s2438_s27 + $0x2e8] sm:$0xff] %v651_v29 }
  0x6e   : > { %v655_v31 = vld [vmem:[%s2433_s26 + $0xbe0] sm:$0xff]  ;;  %654 = vst [vmem:[%s2438_s27 + $0x2f0] sm:$0xff] %v653_v30 }
  0x6f   : > { %656 = vst [vmem:[%s2438_s27 + $0x2f8] sm:$0xff] %v655_v31  ;;  %v657_v32 = vld [vmem:[%s2433_s26 + $0xc00] sm:$0xff] }
  0x70   : > { %v659_v33 = vld [vmem:[%s2433_s26 + $0xc20] sm:$0xff]  ;;  %658 = vst [vmem:[%s2438_s27 + $0x300] sm:$0xff] %v657_v32 }
  0x71   : > { %v661_v34 = vld [vmem:[%s2433_s26 + $0xc40] sm:$0xff]  ;;  %660 = vst [vmem:[%s2438_s27 + $0x308] sm:$0xff] %v659_v33 }
  0x72   : > { %662 = vst [vmem:[%s2438_s27 + $0x310] sm:$0xff] %v661_v34  ;;  %v663_v35 = vld [vmem:[%s2433_s26 + $0xc60] sm:$0xff] }
  0x73   : > { %v665_v36 = vld [vmem:[%s2433_s26 + $0xc80] sm:$0xff]  ;;  %664 = vst [vmem:[%s2438_s27 + $0x318] sm:$0xff] %v663_v35 }
  0x74   : > { %v667_v37 = vld [vmem:[%s2433_s26 + $0xca0] sm:$0xff]  ;;  %666 = vst [vmem:[%s2438_s27 + $0x320] sm:$0xff] %v665_v36 }
  0x75   : > { %668 = vst [vmem:[%s2438_s27 + $0x328] sm:$0xff] %v667_v37  ;;  %v669_v38 = vld [vmem:[%s2433_s26 + $0xcc0] sm:$0xff] }
  0x76   : > { %v671_v39 = vld [vmem:[%s2433_s26 + $0xce0] sm:$0xff]  ;;  %670 = vst [vmem:[%s2438_s27 + $0x330] sm:$0xff] %v669_v38 }
  0x77   : > { %v673_v40 = vld [vmem:[%s2433_s26 + $0xd00] sm:$0xff]  ;;  %672 = vst [vmem:[%s2438_s27 + $0x338] sm:$0xff] %v671_v39 }
  0x78   : > { %674 = vst [vmem:[%s2438_s27 + $0x340] sm:$0xff] %v673_v40  ;;  %v675_v41 = vld [vmem:[%s2433_s26 + $0xd20] sm:$0xff] }
  0x79   : > { %v677_v42 = vld [vmem:[%s2433_s26 + $0xd40] sm:$0xff]  ;;  %676 = vst [vmem:[%s2438_s27 + $0x348] sm:$0xff] %v675_v41 }
  0x7a   : > { %v679_v43 = vld [vmem:[%s2433_s26 + $0xd60] sm:$0xff]  ;;  %678 = vst [vmem:[%s2438_s27 + $0x350] sm:$0xff] %v677_v42 }
  0x7b   : > { %680 = vst [vmem:[%s2438_s27 + $0x358] sm:$0xff] %v679_v43  ;;  %v681_v44 = vld [vmem:[%s2433_s26 + $0xd80] sm:$0xff] }
  0x7c   : > { %v683_v45 = vld [vmem:[%s2433_s26 + $0xda0] sm:$0xff]  ;;  %682 = vst [vmem:[%s2438_s27 + $0x360] sm:$0xff] %v681_v44 }
  0x7d   : > { %v685_v46 = vld [vmem:[%s2433_s26 + $0xdc0] sm:$0xff]  ;;  %684 = vst [vmem:[%s2438_s27 + $0x368] sm:$0xff] %v683_v45 }
  0x7e   : > { %686 = vst [vmem:[%s2438_s27 + $0x370] sm:$0xff] %v685_v46  ;;  %v687_v47 = vld [vmem:[%s2433_s26 + $0xde0] sm:$0xff] }
  0x7f   : > { %v689_v48 = vld [vmem:[%s2433_s26 + $0xe00] sm:$0xff]  ;;  %688 = vst [vmem:[%s2438_s27 + $0x378] sm:$0xff] %v687_v47 }
  0x80   : > { %v691_v49 = vld [vmem:[%s2433_s26 + $0xe20] sm:$0xff]  ;;  %690 = vst [vmem:[%s2438_s27 + $0x380] sm:$0xff] %v689_v48 }
  0x81   : > { %692 = vst [vmem:[%s2438_s27 + $0x388] sm:$0xff] %v691_v49  ;;  %v693_v50 = vld [vmem:[%s2433_s26 + $0xe40] sm:$0xff] }
  0x82   : > { %v695_v51 = vld [vmem:[%s2433_s26 + $0xe60] sm:$0xff]  ;;  %694 = vst [vmem:[%s2438_s27 + $0x390] sm:$0xff] %v693_v50 }
  0x83   : > { %v697_v52 = vld [vmem:[%s2433_s26 + $0xe80] sm:$0xff]  ;;  %696 = vst [vmem:[%s2438_s27 + $0x398] sm:$0xff] %v695_v51 }
  0x84   : > { %698 = vst [vmem:[%s2438_s27 + $0x3a0] sm:$0xff] %v697_v52  ;;  %v699_v53 = vld [vmem:[%s2433_s26 + $0xea0] sm:$0xff] }
  0x85   : > { %v701_v54 = vld [vmem:[%s2433_s26 + $0xec0] sm:$0xff]  ;;  %700 = vst [vmem:[%s2438_s27 + $0x3a8] sm:$0xff] %v699_v53 }
  0x86   : > { %v703_v55 = vld [vmem:[%s2433_s26 + $0xee0] sm:$0xff]  ;;  %702 = vst [vmem:[%s2438_s27 + $0x3b0] sm:$0xff] %v701_v54 }
  0x87   : > { %704 = vst [vmem:[%s2438_s27 + $0x3b8] sm:$0xff] %v703_v55  ;;  %v705_v56 = vld [vmem:[%s2433_s26 + $0xf00] sm:$0xff] }
  0x88   : > { %v707_v57 = vld [vmem:[%s2433_s26 + $0xf20] sm:$0xff]  ;;  %706 = vst [vmem:[%s2438_s27 + $0x3c0] sm:$0xff] %v705_v56 }
  0x89   : > { %v709_v58 = vld [vmem:[%s2433_s26 + $0xf40] sm:$0xff]  ;;  %708 = vst [vmem:[%s2438_s27 + $0x3c8] sm:$0xff] %v707_v57 }
  0x8a   : > { %710 = vst [vmem:[%s2438_s27 + $0x3d0] sm:$0xff] %v709_v58  ;;  %v711_v59 = vld [vmem:[%s2433_s26 + $0xf60] sm:$0xff] }
  0x8b   : > { %v713_v60 = vld [vmem:[%s2433_s26 + $0xf80] sm:$0xff]  ;;  %712 = vst [vmem:[%s2438_s27 + $0x3d8] sm:$0xff] %v711_v59 }
  0x8c   : > { %v715_v61 = vld [vmem:[%s2433_s26 + $0xfa0] sm:$0xff]  ;;  %714 = vst [vmem:[%s2438_s27 + $0x3e0] sm:$0xff] %v713_v60 }
  0x8d   : > { %716 = vst [vmem:[%s2438_s27 + $0x3e8] sm:$0xff] %v715_v61  ;;  %v717_v62 = vld [vmem:[%s2433_s26 + $0xfc0] sm:$0xff] }
  0x8e   : > { %v719_v63 = vld [vmem:[%s2433_s26 + $0xfe0] sm:$0xff]  ;;  %718 = vst [vmem:[%s2438_s27 + $0x3f0] sm:$0xff] %v717_v62 }
  0x8f   : > { %720 = vst [vmem:[%s2438_s27 + $0x3f8] sm:$0xff] %v719_v63 }
  0x90 PF: > { %p1944_p6 = scmp.ge.s32.totalorder %s2368_s16, 1  ;;  %p733_p7 = scmp.lt.s32.totalorder %s2368_s16, 5 }
  0x92   : > { %p734_p8 = pnand %p1944_p6, %p733_p7 }
  0x93   : > { %s740_s28 = sand.u32 (!%p734_p8), 1, %s2352_s12   ;;  %s1946_s12 = sshll.u32 (!%p734_p8), %s2360_s14, 1 }
  0x94   : > { %737 = sbr.rel (%p734_p8) target bundleno = 488 (0x1e8), region = 66  ;;  %s1945_s6 = sshll.u32 (!%p734_p8), %s740_s28, 10 }
  0x95   : > { %s2710_s7 = scalar_lea.vmem (!%p734_p8), [#allocation3], %s1945_s6  ;;  %p793_p9 = scmp.lt.s32.totalorder (!%p734_p8), %s1946_s12, 7 }
  0x99   : > { %v2699_v0 = vld [vmem:[%s2884_s0] sm:$0xff]  ;;  %v2704_v1 = vld [vmem:[%s2884_s0 + $0x8] sm:$0xff]  ;;  %v2130_v4 = vld [vmem:[%s2710_s7 + $0x74] ss:$8 sps:$4 sm:$0xff]   ;;  %s2895_s12 = smov (!%p793_p9, %s1946_s12), 7 }
  0x9a   : > { %v1950_v2 = vcombine.high %v2699_v0, %v2699_v0  ;;  %v1952_v3 = vcombine.high %v2704_v1, %v2704_v1  ;;  %v2132_v5 = vld [vmem:[%s2710_s7 + $0x174] ss:$8 sps:$4 sm:$0xff]   ;;  %1615 = vmatprep.subr.bf16.mxu0 %v2130_v4  ;;  %v2134_v6 = vld [vmem:[%s2710_s7 + $0x70] ss:$8 sps:$4 sm:$0xff]   ;;  %v2136_v8 = vld [vmem:[%s2710_s7 + $0x64] ss:$8 sps:$4 sm:$0xff]   ;;  %s795_s21 = scalar_lea.vmem %s2886_s2, %s2895_s12 }
  0x9b   : > { %v2135_v7 = vld [vmem:[%s2710_s7 + $0x170] ss:$8 sps:$4 sm:$0xff]   ;;  %1656 = vmatprep.subr.bf16.mxu1 %v2132_v5  ;;  %1616 = vmatpush1.bf16.msra.mxu0 %v2134_v6  ;;  %v2138_v9 = vld [vmem:[%s2710_s7 + $0x164] ss:$8 sps:$4 sm:$0xff]   ;;  %v2140_v10 = vld [vmem:[%s2710_s7 + $0x60] ss:$8 sps:$4 sm:$0xff]  }
  0x9c   : > { %1647 = vmatprep.mubr.bf16.mxu0 %v1950_v2  ;;  %1688 = vmatprep.mubr.bf16.mxu1 %v1952_v3  ;;  %v2141_v11 = vld [vmem:[%s2710_s7 + $0x160] ss:$8 sps:$4 sm:$0xff]   ;;  %v2142_v12 = vld [vmem:[%s2710_s7 + $0x54] ss:$8 sps:$4 sm:$0xff]   ;;  %v2146_v14 = vld [vmem:[%s2710_s7 + $0x50] ss:$8 sps:$4 sm:$0xff]  }
  0x9d   : > { %1657 = vmatpush1.bf16.msra.mxu1 %v2135_v7  ;;  %1617 = vmatprep.subr.bf16.mxu0 %v2136_v8  ;;  %v2144_v13 = vld [vmem:[%s2710_s7 + $0x154] ss:$8 sps:$4 sm:$0xff]   ;;  %v2147_v15 = vld [vmem:[%s2710_s7 + $0x150] ss:$8 sps:$4 sm:$0xff]   ;;  %v2148_v16 = vld [vmem:[%s2710_s7 + $0x44] ss:$8 sps:$4 sm:$0xff]  }
  0x9e   : > { %1658 = vmatprep.subr.bf16.mxu1 %v2138_v9  ;;  %v2150_v17 = vld [vmem:[%s2710_s7 + $0x144] ss:$8 sps:$4 sm:$0xff]   ;;  %v2152_v18 = vld [vmem:[%s2710_s7 + $0x40] ss:$8 sps:$4 sm:$0xff]   ;;  %v2154_v20 = vld [vmem:[%s2710_s7 + $0x34] ss:$8 sps:$4 sm:$0xff]  }
  0x9f   : > { %1618 = vmatpush1.bf16.msra.mxu0 %v2140_v10  ;;  %v2153_v19 = vld [vmem:[%s2710_s7 + $0x140] ss:$8 sps:$4 sm:$0xff]   ;;  %v2156_v21 = vld [vmem:[%s2710_s7 + $0x134] ss:$8 sps:$4 sm:$0xff]   ;;  %v2158_v22 = vld [vmem:[%s2710_s7 + $0x30] ss:$8 sps:$4 sm:$0xff]   ;;  %v1949_v10 = vcombine.low %v2699_v0, %v2699_v0 }
  0xa0   : > { %1619 = vmatprep.subr.bf16.mxu0 %v2142_v12  ;;  %v2159_v23 = vld [vmem:[%s2710_s7 + $0x130] ss:$8 sps:$4 sm:$0xff]   ;;  %v2160_v24 = vld [vmem:[%s2710_s7 + $0x24] ss:$8 sps:$4 sm:$0xff]   ;;  %v2164_v26 = vld [vmem:[%s2710_s7 + $0x20] ss:$8 sps:$4 sm:$0xff]  }
  0xa1   : > { %1659 = vmatpush1.bf16.msra.mxu1 %v2141_v11  ;;  %v2162_v25 = vld [vmem:[%s2710_s7 + $0x124] ss:$8 sps:$4 sm:$0xff]   ;;  %v2165_v27 = vld [vmem:[%s2710_s7 + $0x120] ss:$8 sps:$4 sm:$0xff]   ;;  %v2166_v28 = vld [vmem:[%s2710_s7 + $0x14] ss:$8 sps:$4 sm:$0xff]   ;;  %v1951_v11 = vcombine.low %v2704_v1, %v2704_v1 }
  0xa2   : > { %1660 = vmatprep.subr.bf16.mxu1 %v2144_v13  ;;  %v2168_v29 = vld [vmem:[%s2710_s7 + $0x114] ss:$8 sps:$4 sm:$0xff]   ;;  %v2170_v30 = vld [vmem:[%s2710_s7 + $0x10] ss:$8 sps:$4 sm:$0xff]   ;;  %v2172_v32 = vld [vmem:[%s2710_s7 + $0x4] ss:$8 sps:$4 sm:$0xff]  }
  0xa3   : > { %1620 = vmatpush1.bf16.msra.mxu0 %v2146_v14  ;;  %v2171_v31 = vld [vmem:[%s2710_s7 + $0x110] ss:$8 sps:$4 sm:$0xff]   ;;  %v2174_v33 = vld [vmem:[%s2710_s7 + $0x104] ss:$8 sps:$4 sm:$0xff]   ;;  %v2176_v34 = vld [vmem:[%s2710_s7] ss:$8 sps:$4 sm:$0xff]  }
  0xa4   : > { %1621 = vmatprep.subr.bf16.mxu0 %v2148_v16  ;;  %v2177_v35 = vld [vmem:[%s2710_s7 + $0x100] ss:$8 sps:$4 sm:$0xff]   ;;  %v2178_v36 = vld [vmem:[%s2710_s7 + $0xf4] ss:$8 sps:$4 sm:$0xff]   ;;  %v2182_v38 = vld [vmem:[%s2710_s7 + $0xf0] ss:$8 sps:$4 sm:$0xff]  }
  0xa5   : > { %1661 = vmatpush1.bf16.msra.mxu1 %v2147_v15  ;;  %v2180_v37 = vld [vmem:[%s2710_s7 + $0x1f4] ss:$8 sps:$4 sm:$0xff]   ;;  %v2183_v39 = vld [vmem:[%s2710_s7 + $0x1f0] ss:$8 sps:$4 sm:$0xff]   ;;  %v2184_v40 = vld [vmem:[%s2710_s7 + $0xe4] ss:$8 sps:$4 sm:$0xff]  }
  0xa6   : > { %1662 = vmatprep.subr.bf16.mxu1 %v2150_v17  ;;  %v2186_v41 = vld [vmem:[%s2710_s7 + $0x1e4] ss:$8 sps:$4 sm:$0xff]   ;;  %v2188_v42 = vld [vmem:[%s2710_s7 + $0xe0] ss:$8 sps:$4 sm:$0xff]   ;;  %v2190_v44 = vld [vmem:[%s2710_s7 + $0xd4] ss:$8 sps:$4 sm:$0xff]  }
  0xa7   : > { %1622 = vmatpush1.bf16.msra.mxu0 %v2152_v18  ;;  %v2189_v43 = vld [vmem:[%s2710_s7 + $0x1e0] ss:$8 sps:$4 sm:$0xff]   ;;  %v2192_v45 = vld [vmem:[%s2710_s7 + $0x1d4] ss:$8 sps:$4 sm:$0xff]   ;;  %v2194_v46 = vld [vmem:[%s2710_s7 + $0xd0] ss:$8 sps:$4 sm:$0xff]  }
  0xa8   : > { %1623 = vmatprep.subr.bf16.mxu0 %v2154_v20  ;;  %v2195_v47 = vld [vmem:[%s2710_s7 + $0x1d0] ss:$8 sps:$4 sm:$0xff]   ;;  %v2196_v48 = vld [vmem:[%s2710_s7 + $0xc4] ss:$8 sps:$4 sm:$0xff]   ;;  %v2200_v50 = vld [vmem:[%s2710_s7 + $0xc0] ss:$8 sps:$4 sm:$0xff]  }
  0xa9   : > { %1663 = vmatpush1.bf16.msra.mxu1 %v2153_v19  ;;  %v2198_v49 = vld [vmem:[%s2710_s7 + $0x1c4] ss:$8 sps:$4 sm:$0xff]   ;;  %v2201_v51 = vld [vmem:[%s2710_s7 + $0x1c0] ss:$8 sps:$4 sm:$0xff]   ;;  %v2202_v52 = vld [vmem:[%s2710_s7 + $0xb4] ss:$8 sps:$4 sm:$0xff]  }
  0xaa   : > { %1664 = vmatprep.subr.bf16.mxu1 %v2156_v21  ;;  %v2204_v53 = vld [vmem:[%s2710_s7 + $0x1b4] ss:$8 sps:$4 sm:$0xff]   ;;  %v2206_v54 = vld [vmem:[%s2710_s7 + $0xb0] ss:$8 sps:$4 sm:$0xff]   ;;  %v2208_v56 = vld [vmem:[%s2710_s7 + $0xa4] ss:$8 sps:$4 sm:$0xff]  }
  0xab   : > { %1624 = vmatpush1.bf16.msra.mxu0 %v2158_v22  ;;  %v2207_v55 = vld [vmem:[%s2710_s7 + $0x1b0] ss:$8 sps:$4 sm:$0xff]   ;;  %v2210_v57 = vld [vmem:[%s2710_s7 + $0x1a4] ss:$8 sps:$4 sm:$0xff]   ;;  %v2212_v58 = vld [vmem:[%s2710_s7 + $0xa0] ss:$8 sps:$4 sm:$0xff]  }
  0xac   : > { %1625 = vmatprep.subr.bf16.mxu0 %v2160_v24  ;;  %v2213_v59 = vld [vmem:[%s2710_s7 + $0x1a0] ss:$8 sps:$4 sm:$0xff]   ;;  %v2214_v60 = vld [vmem:[%s2710_s7 + $0x94] ss:$8 sps:$4 sm:$0xff]   ;;  %v2218_v62 = vld [vmem:[%s2710_s7 + $0x90] ss:$8 sps:$4 sm:$0xff]  }
  0xad   : > { %1665 = vmatpush1.bf16.msra.mxu1 %v2159_v23  ;;  %v2216_v61 = vld [vmem:[%s2710_s7 + $0x194] ss:$8 sps:$4 sm:$0xff]   ;;  %v2219_v63 = vld [vmem:[%s2710_s7 + $0x190] ss:$8 sps:$4 sm:$0xff]   ;;  %v2220_v2 = vld [vmem:[%s2710_s7 + $0x84] ss:$8 sps:$4 sm:$0xff]  }
  0xae   : > { %1666 = vmatprep.subr.bf16.mxu1 %v2162_v25  ;;  %v2222_v3 = vld [vmem:[%s2710_s7 + $0x184] ss:$8 sps:$4 sm:$0xff]   ;;  %v2224_v4 = vld [vmem:[%s2710_s7 + $0x80] ss:$8 sps:$4 sm:$0xff]   ;;  %v2232_v6 = vld [vmem:[%s2710_s7 + $0x274] ss:$8 sps:$4 sm:$0xff]  }
  0xaf   : > { %1626 = vmatpush1.bf16.msra.mxu0 %v2164_v26  ;;  %v2225_v5 = vld [vmem:[%s2710_s7 + $0x180] ss:$8 sps:$4 sm:$0xff]   ;;  %v2235_v7 = vld [vmem:[%s2710_s7 + $0x374] ss:$8 sps:$4 sm:$0xff]   ;;  %v2230_v12 = vld [vmem:[%s2710_s7 + $0x270] ss:$8 sps:$4 sm:$0xff]  }
  0xb0   : > { %1627 = vmatprep.subr.bf16.mxu0 %v2166_v28  ;;  %v2781_v8 = vld [vmem:[%s2884_s0 + $0x10] sm:$0xff]  ;;  %v2786_v9 = vld [vmem:[%s2884_s0 + $0x18] sm:$0xff]  ;;  %v2238_v14 = vld [vmem:[%s2710_s7 + $0x264] ss:$8 sps:$4 sm:$0xff]   ;;  %s1948_s14 = sshll.u32 %s2895_s12, 2 }
  0xb1   : > { %1667 = vmatpush1.bf16.msra.mxu1 %v2165_v27  ;;  %v2233_v13 = vld [vmem:[%s2710_s7 + $0x370] ss:$8 sps:$4 sm:$0xff]   ;;  %v2241_v15 = vld [vmem:[%s2710_s7 + $0x364] ss:$8 sps:$4 sm:$0xff]   ;;  %v1954_v16 = vcombine.high %v2781_v8, %v2781_v8  ;;  %v1956_v0 = vcombine.high %v2786_v9, %v2786_v9  ;;  %v2236_v1 = vld [vmem:[%s2710_s7 + $0x260] ss:$8 sps:$4 sm:$0xff]   ;;  %s805_s24 = scalar_lea.vmem %s2887_s3, %s1948_s14 }
  0xb2   : > { %1668 = vmatprep.subr.bf16.mxu1 %v2168_v29  ;;  %v2239_v17 = vld [vmem:[%s2710_s7 + $0x360] ss:$8 sps:$4 sm:$0xff]   ;;  %v2244_v18 = vld [vmem:[%s2710_s7 + $0x254] ss:$8 sps:$4 sm:$0xff]   ;;  %v2242_v20 = vld [vmem:[%s2710_s7 + $0x250] ss:$8 sps:$4 sm:$0xff]  }
  0xb3   : > { %1628 = vmatpush1.bf16.msra.mxu0 %v2170_v30  ;;  %v2247_v19 = vld [vmem:[%s2710_s7 + $0x354] ss:$8 sps:$4 sm:$0xff]   ;;  %v2245_v21 = vld [vmem:[%s2710_s7 + $0x350] ss:$8 sps:$4 sm:$0xff]   ;;  %v2250_v22 = vld [vmem:[%s2710_s7 + $0x244] ss:$8 sps:$4 sm:$0xff]  }
  0xb4   : > { %1629 = vmatprep.subr.bf16.mxu0 %v2172_v32  ;;  %v2253_v23 = vld [vmem:[%s2710_s7 + $0x344] ss:$8 sps:$4 sm:$0xff]   ;;  %v2248_v24 = vld [vmem:[%s2710_s7 + $0x240] ss:$8 sps:$4 sm:$0xff]   ;;  %v2256_v26 = vld [vmem:[%s2710_s7 + $0x234] ss:$8 sps:$4 sm:$0xff]  }
  0xb5   : > { %1669 = vmatpush1.bf16.msra.mxu1 %v2171_v31  ;;  %v2251_v25 = vld [vmem:[%s2710_s7 + $0x340] ss:$8 sps:$4 sm:$0xff]   ;;  %v2259_v27 = vld [vmem:[%s2710_s7 + $0x334] ss:$8 sps:$4 sm:$0xff]   ;;  %v2254_v28 = vld [vmem:[%s2710_s7 + $0x230] ss:$8 sps:$4 sm:$0xff]  }
  0xb6   : > { %1670 = vmatprep.subr.bf16.mxu1 %v2174_v33  ;;  %v2257_v29 = vld [vmem:[%s2710_s7 + $0x330] ss:$8 sps:$4 sm:$0xff]   ;;  %v2262_v30 = vld [vmem:[%s2710_s7 + $0x224] ss:$8 sps:$4 sm:$0xff]   ;;  %v2260_v32 = vld [vmem:[%s2710_s7 + $0x220] ss:$8 sps:$4 sm:$0xff]  }
  0xb7   : > { %1630 = vmatpush1.bf16.msra.mxu0 %v2176_v34  ;;  %v2265_v31 = vld [vmem:[%s2710_s7 + $0x324] ss:$8 sps:$4 sm:$0xff]   ;;  %v2263_v33 = vld [vmem:[%s2710_s7 + $0x320] ss:$8 sps:$4 sm:$0xff]   ;;  %v2268_v34 = vld [vmem:[%s2710_s7 + $0x214] ss:$8 sps:$4 sm:$0xff]  }
  0xb8   : > { %1631 = vmatprep.subr.bf16.mxu0 %v2178_v36  ;;  %v2266_v36 = vld [vmem:[%s2710_s7 + $0x210] ss:$8 sps:$4 sm:$0xff]  }
  0xb9   : > { %1671 = vmatpush1.bf16.msra.mxu1 %v2177_v35  ;;  %v2271_v35 = vld [vmem:[%s2710_s7 + $0x314] ss:$8 sps:$4 sm:$0xff]  }
  0xba   : > { %1672 = vmatprep.subr.bf16.mxu1 %v2180_v37  ;;  %v2269_v37 = vld [vmem:[%s2710_s7 + $0x310] ss:$8 sps:$4 sm:$0xff]  }
  0xbb   : > { %1632 = vmatpush2.bf16.msra.mxu0 %v2182_v38  ;;  %v2274_v38 = vld [vmem:[%s2710_s7 + $0x204] ss:$8 sps:$4 sm:$0xff]  }
  0xbc   : > { %1633 = vmatprep.subr.bf16.mxu0 %v2184_v40  ;;  %v2272_v40 = vld [vmem:[%s2710_s7 + $0x200] ss:$8 sps:$4 sm:$0xff]  }
  0xbd   : > { %1673 = vmatpush2.bf16.msra.mxu1 %v2183_v39  ;;  %v2277_v39 = vld [vmem:[%s2710_s7 + $0x304] ss:$8 sps:$4 sm:$0xff]  }
  0xbe   : > { %1674 = vmatprep.subr.bf16.mxu1 %v2186_v41  ;;  %v2275_v41 = vld [vmem:[%s2710_s7 + $0x300] ss:$8 sps:$4 sm:$0xff]  }
  0xbf   : > { %1634 = vmatpush2.bf16.msra.mxu0 %v2188_v42  ;;  %v2280_v42 = vld [vmem:[%s2710_s7 + $0x2f4] ss:$8 sps:$4 sm:$0xff]  }
  0xc0   : > { %1635 = vmatprep.subr.bf16.mxu0 %v2190_v44  ;;  %v2278_v44 = vld [vmem:[%s2710_s7 + $0x2f0] ss:$8 sps:$4 sm:$0xff]  }
  0xc1   : > { %1675 = vmatpush2.bf16.msra.mxu1 %v2189_v43  ;;  %v2283_v43 = vld [vmem:[%s2710_s7 + $0x3f4] ss:$8 sps:$4 sm:$0xff]  }
  0xc2   : > { %1676 = vmatprep.subr.bf16.mxu1 %v2192_v45  ;;  %v2281_v45 = vld [vmem:[%s2710_s7 + $0x3f0] ss:$8 sps:$4 sm:$0xff]  }
  0xc3   : > { %1636 = vmatpush2.bf16.msra.mxu0 %v2194_v46  ;;  %v2286_v46 = vld [vmem:[%s2710_s7 + $0x2e4] ss:$8 sps:$4 sm:$0xff]  }
  0xc4   : > { %1637 = vmatprep.subr.bf16.mxu0 %v2196_v48  ;;  %v2284_v48 = vld [vmem:[%s2710_s7 + $0x2e0] ss:$8 sps:$4 sm:$0xff]  }
  0xc5   : > { %1677 = vmatpush2.bf16.msra.mxu1 %v2195_v47  ;;  %v2289_v47 = vld [vmem:[%s2710_s7 + $0x3e4] ss:$8 sps:$4 sm:$0xff]  }
  0xc6   : > { %1678 = vmatprep.subr.bf16.mxu1 %v2198_v49  ;;  %v2287_v49 = vld [vmem:[%s2710_s7 + $0x3e0] ss:$8 sps:$4 sm:$0xff]  }
  0xc7   : > { %1638 = vmatpush2.bf16.msra.mxu0 %v2200_v50  ;;  %v2292_v50 = vld [vmem:[%s2710_s7 + $0x2d4] ss:$8 sps:$4 sm:$0xff]  }
  0xc8   : > { %1639 = vmatprep.subr.bf16.mxu0 %v2202_v52  ;;  %v2290_v52 = vld [vmem:[%s2710_s7 + $0x2d0] ss:$8 sps:$4 sm:$0xff]  }
  0xc9   : > { %1679 = vmatpush2.bf16.msra.mxu1 %v2201_v51  ;;  %v2295_v51 = vld [vmem:[%s2710_s7 + $0x3d4] ss:$8 sps:$4 sm:$0xff]  }
  0xca   : > { %1680 = vmatprep.subr.bf16.mxu1 %v2204_v53  ;;  %v2293_v53 = vld [vmem:[%s2710_s7 + $0x3d0] ss:$8 sps:$4 sm:$0xff]  }
  0xcb   : > { %1640 = vmatpush2.bf16.msra.mxu0 %v2206_v54  ;;  %v2298_v54 = vld [vmem:[%s2710_s7 + $0x2c4] ss:$8 sps:$4 sm:$0xff]  }
  0xcc   : > { %1641 = vmatprep.subr.bf16.mxu0 %v2208_v56  ;;  %v2296_v56 = vld [vmem:[%s2710_s7 + $0x2c0] ss:$8 sps:$4 sm:$0xff]  }
  0xcd   : > { %1681 = vmatpush2.bf16.msra.mxu1 %v2207_v55  ;;  %v2301_v55 = vld [vmem:[%s2710_s7 + $0x3c4] ss:$8 sps:$4 sm:$0xff]  }
  0xce   : > { %1682 = vmatprep.subr.bf16.mxu1 %v2210_v57  ;;  %v2299_v57 = vld [vmem:[%s2710_s7 + $0x3c0] ss:$8 sps:$4 sm:$0xff]  }
  0xcf   : > { %1642 = vmatpush2.bf16.msra.mxu0 %v2212_v58  ;;  %v2304_v58 = vld [vmem:[%s2710_s7 + $0x2b4] ss:$8 sps:$4 sm:$0xff]  }
  0xd0   : > { %1643 = vmatprep.subr.bf16.mxu0 %v2214_v60  ;;  %v2302_v60 = vld [vmem:[%s2710_s7 + $0x2b0] ss:$8 sps:$4 sm:$0xff]  }
  0xd1   : > { %1683 = vmatpush2.bf16.msra.mxu1 %v2213_v59  ;;  %v2307_v59 = vld [vmem:[%s2710_s7 + $0x3b4] ss:$8 sps:$4 sm:$0xff]  }
  0xd2   : > { %1684 = vmatprep.subr.bf16.mxu1 %v2216_v61  ;;  %v2305_v61 = vld [vmem:[%s2710_s7 + $0x3b0] ss:$8 sps:$4 sm:$0xff]  }
  0xd3   : > { %1644 = vmatpush2.bf16.msra.mxu0 %v2218_v62  ;;  %v2310_v62 = vld [vmem:[%s2710_s7 + $0x2a4] ss:$8 sps:$4 sm:$0xff]  }
  0xd4   : > { %1645 = vmatprep.subr.bf16.mxu0 %v2220_v2  ;;  %v2308_v2 = vld [vmem:[%s2710_s7 + $0x2a0] ss:$8 sps:$4 sm:$0xff]  }
  0xd5   : > { %1685 = vmatpush2.bf16.msra.mxu1 %v2219_v63  ;;  %v2313_v63 = vld [vmem:[%s2710_s7 + $0x3a4] ss:$8 sps:$4 sm:$0xff]  }
  0xd6   : > { %1686 = vmatprep.subr.bf16.mxu1 %v2222_v3  ;;  %v2311_v3 = vld [vmem:[%s2710_s7 + $0x3a0] ss:$8 sps:$4 sm:$0xff]  }
  0xd7   : > { %1646 = vmatpush2.bf16.msra.mxu0 %v2224_v4  ;;  %v2316_v4 = vld [vmem:[%s2710_s7 + $0x294] ss:$8 sps:$4 sm:$0xff]  }
  0xd8   : > { %1697 = vmatprep.subr.bf16.mxu0 %v2232_v6  ;;  %v2314_v6 = vld [vmem:[%s2710_s7 + $0x290] ss:$8 sps:$4 sm:$0xff]  }
  0xd9   : > { %1687 = vmatpush2.bf16.msra.mxu1 %v2225_v5  ;;  %v2319_v5 = vld [vmem:[%s2710_s7 + $0x394] ss:$8 sps:$4 sm:$0xff]  }
  0xda   : > { %1738 = vmatprep.subr.bf16.mxu1 %v2235_v7  ;;  %1648 = vmatmul.mubr.bf16.vlgmr.msra.gmra.mxu0 %v1949_v10  ;;  %v2317_v7 = vld [vmem:[%s2710_s7 + $0x390] ss:$8 sps:$4 sm:$0xff]   ;;  %v2322_v10 = vld [vmem:[%s2710_s7 + $0x284] ss:$8 sps:$4 sm:$0xff]  }
  0xdb   : > { %1698 = vmatpush1.bf16.msra.mxu0 %v2230_v12  ;;  %1729 = vmatprep.mubr.bf16.mxu0 %v1954_v16  ;;  %v2320_v12 = vld [vmem:[%s2710_s7 + $0x280] ss:$8 sps:$4 sm:$0xff]  }
  0xdc   : > { %1689 = vmatmul.mubr.bf16.vlgmr.msra.gmra.mxu1 %v1951_v11  ;;  %1699 = vmatprep.subr.bf16.mxu0 %v2238_v14  ;;  %v2325_v11 = vld [vmem:[%s2710_s7 + $0x384] ss:$8 sps:$4 sm:$0xff]   ;;  %v1953_v14 = vcombine.low %v2781_v8, %v2781_v8 }
  0xdd   : > { %1739 = vmatpush1.bf16.msra.mxu1 %v2233_v13  ;;  %1770 = vmatprep.mubr.bf16.mxu1 %v1956_v0  ;;  %v2323_v13 = vld [vmem:[%s2710_s7 + $0x380] ss:$8 sps:$4 sm:$0xff]  }
  0xde   : > { %1740 = vmatprep.subr.bf16.mxu1 %v2241_v15  ;;  %v1955_v15 = vcombine.low %v2786_v9, %v2786_v9 }
  0xdf   : > { %1700 = vmatpush1.bf16.msra.mxu0 %v2236_v1 }
  0xe0   : > { %1701 = vmatprep.subr.bf16.mxu0 %v2244_v18 }
  0xe1   : > { %1741 = vmatpush1.bf16.msra.mxu1 %v2239_v17 }
  0xe2   : > { %1742 = vmatprep.subr.bf16.mxu1 %v2247_v19 }
  0xe3   : > { %1702 = vmatpush1.bf16.msra.mxu0 %v2242_v20 }
  0xe4   : > { %1703 = vmatprep.subr.bf16.mxu0 %v2250_v22 }
  0xe5   : > { %1743 = vmatpush1.bf16.msra.mxu1 %v2245_v21 }
  0xe6   : > { %1744 = vmatprep.subr.bf16.mxu1 %v2253_v23  ;;  %v1790_v23 = vlaneseq }
  0xe7   : > { %1704 = vmatpush1.bf16.msra.mxu0 %v2248_v24  ;;  %v1788_v24 = vld [vmem:[%s795_s21] sm:$0x3] }
  0xe8   : > { %1705 = vmatprep.subr.bf16.mxu0 %v2256_v26  ;;  %v1791_v8 = vshrl.u32 %v1790_v23, 7 }
  0xe9   : > { %1745 = vmatpush1.bf16.msra.mxu1 %v2251_v25 }
  0xea   : > { %1746 = vmatprep.subr.bf16.mxu1 %v2259_v27  ;;  %v1792_v9 = vsub.s32 0, %v1791_v8  ;;  %v1796_v25 = vsub.s32 1, %v1791_v8 }
  0xeb   : > { %1706 = vmatpush1.bf16.msra.mxu0 %v2254_v28 }
  0xec   : > { %1707 = vmatprep.subr.bf16.mxu0 %v2262_v30  ;;  %v1793_v30 = vrot.slane %v1788_v24, %v1792_v9 }
  0xed   : > { %1747 = vmatpush1.bf16.msra.mxu1 %v2257_v29 }
  0xee   : > { %1748 = vmatprep.subr.bf16.mxu1 %v2265_v31 }
  0xef   : > { %1708 = vmatpush1.bf16.msra.mxu0 %v2260_v32 }
  0xf0   : > { %1709 = vmatprep.subr.bf16.mxu0 %v2268_v34 }
  0xf1   : > { %1749 = vmatpush1.bf16.msra.mxu1 %v2263_v33 }
  0xf2   : > { %1750 = vmatprep.subr.bf16.mxu1 %v2271_v35  ;;  %v1797_v35 = vrot.slane %v1788_v24, %v1796_v25 }
  0xf3   : > { %1710 = vmatpush1.bf16.msra.mxu0 %v2266_v36 }
  0xf4   : > { %1711 = vmatprep.subr.bf16.mxu0 %v2274_v38 }
  0xf5   : > { %1751 = vmatpush1.bf16.msra.mxu1 %v2269_v37 }
  0xf6   : > { %1752 = vmatprep.subr.bf16.mxu1 %v2277_v39 }
  0xf7   : > { %1712 = vmatpush1.bf16.msra.mxu0 %v2272_v40 }
  0xf8   : > { %1713 = vmatprep.subr.bf16.mxu0 %v2280_v42 }
  0xf9   : > { %1753 = vmatpush1.bf16.msra.mxu1 %v2275_v41 }
  0xfa   : > { %1754 = vmatprep.subr.bf16.mxu1 %v2283_v43 }
  0xfb   : > { %1714 = vmatpush2.bf16.msra.mxu0 %v2278_v44 }
  0xfc   : > { %1715 = vmatprep.subr.bf16.mxu0 %v2286_v46 }
  0xfd   : > { %1755 = vmatpush2.bf16.msra.mxu1 %v2281_v45 }
  0xfe   : > { %1756 = vmatprep.subr.bf16.mxu1 %v2289_v47 }
  0xff   : > { %1716 = vmatpush2.bf16.msra.mxu0 %v2284_v48 }
 0x100   : > { %1717 = vmatprep.subr.bf16.mxu0 %v2292_v50 }
 0x101   : > { %1757 = vmatpush2.bf16.msra.mxu1 %v2287_v49 }
 0x102   : > { %1758 = vmatprep.subr.bf16.mxu1 %v2295_v51 }
 0x103   : > { %1718 = vmatpush2.bf16.msra.mxu0 %v2290_v52 }
 0x104   : > { %1719 = vmatprep.subr.bf16.mxu0 %v2298_v54 }
 0x105   : > { %1759 = vmatpush2.bf16.msra.mxu1 %v2293_v53 }
 0x106   : > { %1760 = vmatprep.subr.bf16.mxu1 %v2301_v55 }
 0x107   : > { %1720 = vmatpush2.bf16.msra.mxu0 %v2296_v56 }
 0x108   : > { %1721 = vmatprep.subr.bf16.mxu0 %v2304_v58 }
 0x109   : > { %1761 = vmatpush2.bf16.msra.mxu1 %v2299_v57 }
 0x10a   : > { %1762 = vmatprep.subr.bf16.mxu1 %v2307_v59 }
 0x10b   : > { %1722 = vmatpush2.bf16.msra.mxu0 %v2302_v60 }
 0x10c   : > { %1723 = vmatprep.subr.bf16.mxu0 %v2310_v62 }
 0x10d   : > { %1763 = vmatpush2.bf16.msra.mxu1 %v2305_v61 }
 0x10e   : > { %1764 = vmatprep.subr.bf16.mxu1 %v2313_v63 }
 0x10f   : > { %1724 = vmatpush2.bf16.msra.mxu0 %v2308_v2 }
 0x110   : > { %1725 = vmatprep.subr.bf16.mxu0 %v2316_v4 }
 0x111   : > { %1765 = vmatpush2.bf16.msra.mxu1 %v2311_v3 }
 0x112   : > { %1766 = vmatprep.subr.bf16.mxu1 %v2319_v5 }
 0x113   : > { %1726 = vmatpush2.bf16.msra.mxu0 %v2314_v6 }
 0x114   : > { %1727 = vmatprep.subr.bf16.mxu0 %v2322_v10 }
 0x115   : > { %1767 = vmatpush2.bf16.msra.mxu1 %v2317_v7 }
 0x116   : > { %1768 = vmatprep.subr.bf16.mxu1 %v2325_v11 }
 0x117   : > { %1728 = vmatpush2.bf16.msra.mxu0 %v2320_v12 }
 0x119   : > { %1769 = vmatpush2.bf16.msra.mxu1 %v2323_v13 }
 0x11a   : > { %1730 = vmatmul.mubr.bf16.vlgmr.msra.gmra.mxu0 %v1953_v14 }
 0x11c   : > { %1771 = vmatmul.mubr.bf16.vlgmr.msra.gmra.mxu1 %v1955_v15 }
 0x19a   : > { %v1649_v16 = vpop.f32.mrf.mxu0 }
 0x19c   : > { %v1690_v0 = vpop.f32.mrf.mxu1  ;;  %v1651_v17 = vpop.f32.mrf.mxu0 }
 0x19d   : > { %v1691_v1 = vadd.f32 %v1690_v0, %v1649_v16 }
 0x19e   : > { %v1692_v18 = vpop.f32.mrf.mxu1  ;;  %v1653_v19 = vpop.f32.mrf.mxu0 }
 0x19f   : > { %v1693_v28 = vadd.f32 %v1692_v18, %v1651_v17 }
 0x1a0   : > { %v1694_v20 = vpop.f32.mrf.mxu1  ;;  %v1654_v21 = vpop.f32.mrf.mxu0 }
 0x1a2   : > { %v1695_v22 = vpop.f32.mrf.mxu1 }
 0x1da   : > { %v1731_v26 = vpop.f32.mrf.mxu0 }
 0x1db   : > { %v1732_v29 = vadd.f32 %v1731_v26, %v1691_v1 }
 0x1dc   : > { %v1772_v27 = vpop.f32.mrf.mxu1  ;;  %v1733_v31 = vpop.f32.mrf.mxu0 }
 0x1dd   : > { %v1773_v33 = vadd.f32 %v1772_v27, %v1732_v29  ;;  %v1734_v34 = vadd.f32 %v1733_v31, %v1693_v28 }
 0x1de   : > { %v1774_v32 = vpop.f32.mrf.mxu1  ;;  %v1735_v36 = vpop.f32.mrf.mxu0 }
 0x1df   : > { %v1800_v38 = vadd.f32 %v1793_v30, %v1773_v33  ;;  %v1775_v39 = vadd.f32 %v1774_v32, %v1734_v34 }
 0x1e0   : > { %v1776_v37 = vpop.f32.mrf.mxu1  ;;  %v1736_v40 = vpop.f32.mrf.mxu0 }
 0x1e1   : > { %v1801_v42 = vadd.f32 %v1797_v35, %v1775_v39  ;;  %v1802_v43 = vmax.f32 %v1800_v38, 0.0 }
 0x1e2   : > { %v1777_v41 = vpop.f32.mrf.mxu1 }
 0x1e3   : > { %v1803_v44 = vmax.f32 %v1801_v42, 0.0 }
 0x1e5   : > { %v2089_v45 = vpack.c.bf16 %v1803_v44, %v1802_v43 }
 0x1e7   : > { %1812 = vst [vmem:[%s805_s24] sm:$0xff] %v2089_v45 }
 0x1e8 PF: > { %s13_s16 = sadd.s32 1, %s2368_s16   ;;  %s2888_s12 = smov %s2356_s13 }
 0x1e9   : > { %p10_p10 = scmp.ge.s32.totalorder %s13_s16, 6   ;;  %s2889_s13 = smov %s2425_s20 }
 0x1ea   : > { %s2890_s14 = smov %s2364_s15  ;;  %s2891_s15 = smov %s2893_s17 }
 0x1eb   :  { %12 = sbr.rel (!%p10_p10) target bundleno = 3 (0x3), region = 119 }

</bundles_post_ra>
